<compile_context>
chip_gen: v6e
topology: v6e:2x2x1
jax: 0.10.0
libtpu: 0.0.40
codegen_flags: <defaults>
</compile_context>

<pallas_src>
import numpy as np
import jax
import jax.numpy as jnp
from jax.experimental import pallas as pl
from jax.experimental.pallas import tpu as pltpu

EPS = 1e-5
HIDDEN = 512
NUM_LAYERS = 3
FEAT = 800                    # 32 channels * 5 * 5 after maxpool
FEAT_MAIN = HIDDEN            # first 512 features live in the main packed slab
FEAT_REM = FEAT - HIDDEN      # remaining 288 features -> resident remainder weights
KP = 2 * HIDDEN               # 1024: packed [h_prev | x[:512] or h_below]
GATES = 4 * HIDDEN            # 2048 gate pre-activations (i, f, g, o)
GB = 2                        # gate blocks per layer
GW = GATES // GB              # 1024-wide gate block
FC_PAD = 256                  # 225 fc outputs padded to a lane-dense 256
NEG_BIG = -1e30
VMEM_LIMIT = 32 * 1024 * 1024


def _sigmoid(x):
    # sigmoid(x) = 0.5*tanh(0.5*x) + 0.5 -> stays on the EUP, no divide.
    return 0.5 * jnp.tanh(0.5 * x) + 0.5


def _const_spec(arr):
    nd = arr.ndim
    return pl.BlockSpec(arr.shape, lambda l, g, _nd=nd: (0,) * _nd)


# -----------------------------------------------------------------------------
# Fused kernel. grid = (layer, gate_block).
#   (l==0, g==0) prologue: conv1+relu+bn1 -> conv2+relu+bn2 -> maxpool -> flatten
#   every step        : one 1024-wide gate block (bf16 MXU, f32 accumulate)
#   g==1              : LSTM cell update (i, f, g, o), h/c writeback
#   (l==2, g==1)      : fc1 + softmax (padded to 256 lanes)
# -----------------------------------------------------------------------------
def fused_kernel(p1t_ref, w1_ref, b1_ref, g1_ref, bt1_ref,
                 w2t_ref, b2_ref, g2_ref, bt2_ref,
                 s2_ref, mp_ref, neg_ref, tile_ref, mask_ref,
                 h0_ref, c0_ref, w_ref, wrem_ref, b_ref, wfc_ref, bfc_ref,
                 h_out_ref, c_out_ref, out_ref,
                 xh_sc, gates_sc, rem_sc):
    l = pl.program_id(0)
    g = pl.program_id(1)

    # ----- conv prologue (runs once, overlapped with the LSTM weight DMA stream) ----
    @pl.when(jnp.logical_and(l == 0, g == 0))
    def _():
        # conv1 (1->32, 5x5): (32,25) @ (25,121), then ReLU, then BN (batch stats).
        z1 = jnp.dot(w1_ref[...], p1t_ref[...].astype(jnp.bfloat16),
                     preferred_element_type=jnp.float32) + b1_ref[...]
        z1 = jnp.maximum(z1, 0.0)
        m1 = jnp.mean(z1, axis=1, keepdims=True)
        v1 = jnp.mean((z1 - m1) ** 2, axis=1, keepdims=True)
        y1 = (z1 - m1) * jax.lax.rsqrt(v1 + EPS) * g1_ref[...] + bt1_ref[...]
        y1b = y1.astype(jnp.bfloat16)

        # conv2 (32->32, 3x3): 9 taps = 0/1 window-select matmul + (32,32) matmul,
        # accumulated into two independent partial sums.
        acc_a = jnp.zeros((32, 81), jnp.float32)
        acc_b = jnp.zeros((32, 81), jnp.float32)
        for t in range(9):
            shifted = jnp.dot(y1b, s2_ref[t],
                              preferred_element_type=jnp.float32).astype(jnp.bfloat16)
            term = jnp.dot(w2t_ref[t], shifted, preferred_element_type=jnp.float32)
            if t % 2 == 0:
                acc_a = acc_a + term
            else:
                acc_b = acc_b + term
        z2 = jnp.maximum(acc_a + acc_b + b2_ref[...], 0.0)
        m2 = jnp.mean(z2, axis=1, keepdims=True)
        v2 = jnp.mean((z2 - m2) ** 2, axis=1, keepdims=True)
        y2b = ((z2 - m2) * jax.lax.rsqrt(v2 + EPS) * g2_ref[...]
               + bt2_ref[...]).astype(jnp.bfloat16)

        # maxpool 3x3 / stride 2 / pad 1: (32,81) -> (32,25); invalid taps masked -1e30.
        pooled = jnp.full((32, 25), NEG_BIG, jnp.float32)
        for t in range(9):
            cand = jnp.dot(y2b, mp_ref[t], preferred_element_type=jnp.float32) + neg_ref[t]
            pooled = jnp.maximum(pooled, cand)

        # Exact flatten (32,25) -> (1,800) in torch.flatten order, no relayout:
        #   tiled[c,k] = pooled[c, k%25];  mask[c,k] = [k//25 == c];
        #   xrow = ones(1,32) @ (tiled * mask)   (one nonzero term per column).
        tiled = jnp.dot(pooled.astype(jnp.bfloat16), tile_ref[...],
                        preferred_element_type=jnp.float32)           # (32, 800)
        sel = (tiled * mask_ref[...]).astype(jnp.bfloat16)
        xrow = jnp.dot(jnp.ones((1, 32), jnp.bfloat16), sel,
                       preferred_element_type=jnp.float32)             # (1, 800)

        xh_sc[:, HIDDEN:KP] = xrow[:, :FEAT_MAIN]
        # Layer-0 contribution of the remaining 288 features, computed once.
        rem = jnp.dot(xrow[:, FEAT_MAIN:FEAT].astype(jnp.bfloat16), wrem_ref[...],
                      preferred_element_type=jnp.float32)               # (1, 2048)
        rem_sc[0] = rem[:, :GW]
        rem_sc[1] = rem[:, GW:GATES]

    # ----- assemble h_prev once per layer --------------------------------------------
    @pl.when(g == 0)
    def _():
        xh_sc[:, 0:HIDDEN] = h0_ref[0]

    # ----- one 1024-wide gate block: (1,1024) @ (1024,1024) bf16 -> f32 ---------------
    gates_sc[g] = (jnp.dot(xh_sc[...].astype(jnp.bfloat16), w_ref[0],
                           preferred_element_type=jnp.float32) + b_ref[0])

    @pl.when(l == 0)
    def _():
        gates_sc[g] = gates_sc[g] + rem_sc[g]        # features 512..799 (layer 0 only)

    # ----- cell update once both gate blocks (PyTorch order [i|f], [g|o]) are ready ---
    @pl.when(g == GB - 1)
    def _():
        g01 = gates_sc[0]
        g23 = gates_sc[1]
        i_g = _sigmoid(g01[:, :HIDDEN])
        f_g = _sigmoid(g01[:, HIDDEN:])
        g_g = jnp.tanh(g23[:, :HIDDEN])
        o_g = _sigmoid(g23[:, HIDDEN:])
        c_new = f_g * c0_ref[0] + i_g * g_g
        h_new = o_g * jnp.tanh(c_new)
        c_out_ref[0] = c_new
        h_out_ref[0] = h_new
        xh_sc[:, HIDDEN:KP] = h_new                  # becomes next layer's input

    # ----- last layer: fc1 + softmax (padded lanes carry -1e30 logits) ----------------
    @pl.when(jnp.logical_and(l == NUM_LAYERS - 1, g == GB - 1))
    def _():
        h_last = xh_sc[:, HIDDEN:KP]
        z = (jnp.dot(h_last.astype(jnp.bfloat16), wfc_ref[...],
                     preferred_element_type=jnp.float32) + bfc_ref[...])
        z = z - jnp.max(z, axis=1, keepdims=True)
        e = jnp.exp(z)
        out_ref[...] = e * pl.reciprocal(jnp.sum(e, axis=1, keepdims=True),
                                         approx=True)


def fused_forward(prep, p1t, h0, c0):
    consts = [p1t, prep["w1m"], prep["b1"], prep["g1"], prep["beta1"],
              prep["w2t"], prep["b2"], prep["g2"], prep["beta2"],
              prep["s2"], prep["mp"], prep["mpneg"],
              prep["flat_tile"], prep["flat_mask"]]
    w = prep["lstm_w"]
    wrem = prep["lstm_w_rem"]
    b = prep["lstm_b"]
    wfc = prep["fc_w"]
    bfc = prep["fc_b"]

    cost = pl.CostEstimate(
        flops=int(2 * (NUM_LAYERS * KP * GATES + FEAT_REM * GATES
                       + HIDDEN * FC_PAD + 5_000_000)),
        transcendentals=int(NUM_LAYERS * 5 * HIDDEN + FC_PAD),
        bytes_accessed=int(w.size * 2 + wrem.size * 2 + wfc.size * 2
                           + b.size * 4 + bfc.size * 4
                           + sum(int(a.size) * a.dtype.itemsize for a in consts)
                           + (6 * NUM_LAYERS * HIDDEN + FC_PAD) * 4),
    )

    grid_spec = pltpu.PrefetchScalarGridSpec(
        num_scalar_prefetch=0,
        grid=(NUM_LAYERS, GB),
        in_specs=[_const_spec(a) for a in consts] + [
            pl.BlockSpec((1, 1, HIDDEN), lambda l, g: (l, 0, 0)),   # h_agent
            pl.BlockSpec((1, 1, HIDDEN), lambda l, g: (l, 0, 0)),   # c_agent
            pl.BlockSpec((1, KP, GW), lambda l, g: (l, 0, g)),      # packed main W (bf16)
            _const_spec(wrem),                                      # layer-0 remainder W
            pl.BlockSpec((1, 1, GW), lambda l, g: (l, 0, g)),       # bih + bhh
            _const_spec(wfc),                                       # fc weight (bf16)
            _const_spec(bfc),                                       # fc bias (padded)
        ],
        out_specs=[
            pl.BlockSpec((1, 1, HIDDEN), lambda l, g: (l, 0, 0)),   # h
            pl.BlockSpec((1, 1, HIDDEN), lambda l, g: (l, 0, 0)),   # c
            pl.BlockSpec((1, FC_PAD), lambda l, g: (0, 0)),         # softmax (padded)
        ],
        scratch_shapes=[
            pltpu.VMEM((1, KP), jnp.float32),        # [h_prev | x-or-h_below] row
            pltpu.VMEM((GB, 1, GW), jnp.float32),    # gate-block pre-activations
            pltpu.VMEM((GB, 1, GW), jnp.float32),    # layer-0 remainder contribution
        ],
    )

    return pl.pallas_call(
        fused_kernel,
        grid_spec=grid_spec,
        out_shape=(
            jax.ShapeDtypeStruct((NUM_LAYERS, 1, HIDDEN), jnp.float32),
            jax.ShapeDtypeStruct((NUM_LAYERS, 1, HIDDEN), jnp.float32),
            jax.ShapeDtypeStruct((1, FC_PAD), jnp.float32),
        ),
        compiler_params=pltpu.CompilerParams(
            dimension_semantics=("arbitrary", "arbitrary"),
            vmem_limit_bytes=VMEM_LIMIT),
        cost_estimate=cost,
    )(*(consts + [h0, c0, w, wrem, b, wfc, bfc]))


# -----------------------------------------------------------------------------
# One-time parameter packing (outside forward): bf16 casts, transposes, bih+bhh,
# selection / flatten matrices, padded fc.
# -----------------------------------------------------------------------------
def init_params(key):
    ks = iter(jax.random.split(key, 24))
    p = {}
    p["w1"] = 0.2 * jax.random.normal(next(ks), (32, 1, 5, 5), jnp.float32)
    p["b1"] = 0.1 * jax.random.normal(next(ks), (32,), jnp.float32)
    p["g1"] = jnp.ones((32,), jnp.float32)
    p["beta1"] = jnp.zeros((32,), jnp.float32)
    p["w2"] = 0.08 * jax.random.normal(next(ks), (32, 32, 3, 3), jnp.float32)
    p["b2"] = 0.1 * jax.random.normal(next(ks), (32,), jnp.float32)
    p["g2"] = jnp.ones((32,), jnp.float32)
    p["beta2"] = jnp.zeros((32,), jnp.float32)
    in_dims = (FEAT, HIDDEN, HIDDEN)
    for l in range(NUM_LAYERS):
        p[f"wih{l}"] = 0.04 * jax.random.normal(next(ks), (4 * HIDDEN, in_dims[l]), jnp.float32)
        p[f"whh{l}"] = 0.04 * jax.random.normal(next(ks), (4 * HIDDEN, HIDDEN), jnp.float32)
        p[f"bih{l}"] = 0.04 * jax.random.normal(next(ks), (4 * HIDDEN,), jnp.float32)
        p[f"bhh{l}"] = 0.04 * jax.random.normal(next(ks), (4 * HIDDEN,), jnp.float32)
    p["fc_w"] = 0.05 * jax.random.normal(next(ks), (225, HIDDEN), jnp.float32)
    p["fc_b"] = jnp.zeros((225,), jnp.float32)
    return p


def prepare_params(p):
    bf16 = jnp.bfloat16
    prep = {}
    # conv1: (Cout, 25 taps), taps ordered kh*5+kw (matches im2col rows).
    prep["w1m"] = p["w1"].reshape(32, 25).astype(bf16)
    prep["b1"] = p["b1"].reshape(32, 1)
    prep["g1"] = p["g1"].reshape(32, 1)
    prep["beta1"] = p["beta1"].reshape(32, 1)
    # conv2: per-tap (Cout, Cin), taps ordered kh*3+kw.
    prep["w2t"] = jnp.transpose(p["w2"], (2, 3, 0, 1)).reshape(9, 32, 32).astype(bf16)
    prep["b2"] = p["b2"].reshape(32, 1)
    prep["g2"] = p["g2"].reshape(32, 1)
    prep["beta2"] = p["beta2"].reshape(32, 1)

    # conv1 im2col gather indices: (25 taps, 121 outputs) into the flat 15x15 board.
    idx = np.empty((25, 121), np.int32)
    for kh in range(5):
        for kw in range(5):
            t = kh * 5 + kw
            for oh in range(11):
                for ow in range(11):
                    idx[t, oh * 11 + ow] = (oh + kh) * 15 + (ow + kw)
    prep["im2col_idx"] = jnp.asarray(idx)

    # conv2 window-selection matrices S[t]: (121, 81); 0/1 exact in bf16.
    S = np.zeros((9, 121, 81), np.float32)
    for kh in range(3):
        for kw in range(3):
            t = kh * 3 + kw
            for oh in range(9):
                for ow in range(9):
                    S[t, (oh + kh) * 11 + (ow + kw), oh * 9 + ow] = 1.0
    prep["s2"] = jnp.asarray(S).astype(bf16)

    # maxpool(3, 2, 1) selection M[t]: (81, 25) + validity mask (9, 1, 25).
    M = np.zeros((9, 81, 25), np.float32)
    NEG = np.full((9, 1, 25), NEG_BIG, np.float32)
    for kh in range(3):
        for kw in range(3):
            t = kh * 3 + kw
            for ph in range(5):
                for pw in range(5):
                    ih, iw = 2 * ph - 1 + kh, 2 * pw - 1 + kw
                    if 0 <= ih < 9 and 0 <= iw < 9:
                        M[t, ih * 9 + iw, ph * 5 + pw] = 1.0
                        NEG[t, 0, ph * 5 + pw] = 0.0
    prep["mp"] = jnp.asarray(M).astype(bf16)
    prep["mpneg"] = jnp.asarray(NEG)

    # Exact flatten helpers: T[s,k] = [k%25 == s], mask[c,k] = [k//25 == c].
    ks_ = np.arange(FEAT)
    T = (ks_[None, :] % 25 == np.arange(25)[:, None]).astype(np.float32)    # (25, 800)
    Mm = (ks_[None, :] // 25 == np.arange(32)[:, None]).astype(np.float32)  # (32, 800)
    prep["flat_tile"] = jnp.asarray(T).astype(bf16)
    prep["flat_mask"] = jnp.asarray(Mm)

    # LSTM: main packed slab (3, 1024, 2048) bf16, rows = [whh^T | wih^T[:512]].
    # Layer-0 remainder rows (features 512..799) kept as a separate resident slab.
    Ws, Bs = [], []
    for l in range(NUM_LAYERS):
        wih_t = p[f"wih{l}"].T                      # (in_dim, 2048)
        whh_t = p[f"whh{l}"].T                      # (512, 2048)
        Ws.append(jnp.concatenate([whh_t, wih_t[:HIDDEN]], axis=0))  # (1024, 2048)
        Bs.append((p[f"bih{l}"] + p[f"bhh{l}"]).reshape(1, GATES))
    prep["lstm_w"] = jnp.stack(Ws).astype(bf16)                      # (3, 1024, 2048)
    prep["lstm_b"] = jnp.stack(Bs)                                   # (3, 1, 2048)
    prep["lstm_w_rem"] = p["wih0"].T[HIDDEN:FEAT].astype(bf16)       # (288, 2048)

    # fc1 padded to 256 output lanes; padded logits get -1e30 (vanish in softmax).
    wfc = jnp.zeros((HIDDEN, FC_PAD), jnp.float32).at[:, :225].set(p["fc_w"].T)
    bfc = jnp.full((1, FC_PAD), NEG_BIG, jnp.float32).at[0, :225].set(p["fc_b"])
    prep["fc_w"] = wfc.astype(bf16)
    prep["fc_b"] = bfc
    return prep


# -----------------------------------------------------------------------------
# Forward pass (jitted): the only non-Pallas op is the tiny static-index im2col
# gather of the 15x15 board (25x121 f32); everything else is one fused kernel.
# -----------------------------------------------------------------------------
@jax.jit
def forward(prep, x, h_agent=None, c_agent=None):
    x = jnp.asarray(x, jnp.float32).reshape(15 * 15)
    p1t = x[prep["im2col_idx"]]                     # (25, 121) transposed im2col patches

    if h_agent is None:
        h_agent = jnp.zeros((NUM_LAYERS, 1, HIDDEN), jnp.float32)
        c_agent = jnp.zeros((NUM_LAYERS, 1, HIDDEN), jnp.float32)

    h, c, probs_pad = fused_forward(prep, p1t, h_agent, c_agent)
    return probs_pad[:, :225], h, c


if __name__ == "__main__":
    key = jax.random.PRNGKey(0)
    pkey, xkey, hkey, ckey = jax.random.split(key, 4)
    params = init_params(pkey)
    prep = prepare_params(params)

    x = jax.random.normal(xkey, (15, 15), jnp.float32)
    h0 = 0.1 * jax.random.normal(hkey, (NUM_LAYERS, 1, HIDDEN), jnp.float32)
    c0 = 0.1 * jax.random.normal(ckey, (NUM_LAYERS, 1, HIDDEN), jnp.float32)

    out, h, c = forward(prep, x, h0, c0)
    out, h, c = jax.block_until_ready((out, h, c))

    assert out.shape == (1, 225), out.shape
    assert h.shape == (NUM_LAYERS, 1, HIDDEN) and c.shape == (NUM_LAYERS, 1, HIDDEN)
    assert abs(float(jnp.sum(out)) - 1.0) < 5e-3
    assert bool(jnp.all(jnp.isfinite(out)))
    assert bool(jnp.all(jnp.isfinite(h))) and bool(jnp.all(jnp.isfinite(c)))
    print("KERNEL_OK")
</pallas_src>

<mosaic_0001>
module attributes {stable_mosaic.version = 11 : i64} {
  func.func @fused_kernel(%arg0: i32, %arg1: i32, %arg2: memref<25x121xf32, #tpu.memory_space<vmem>>, %arg3: memref<32x25xbf16, #tpu.memory_space<vmem>>, %arg4: memref<32x1xf32, #tpu.memory_space<vmem>>, %arg5: memref<32x1xf32, #tpu.memory_space<vmem>>, %arg6: memref<32x1xf32, #tpu.memory_space<vmem>>, %arg7: memref<9x32x32xbf16, #tpu.memory_space<vmem>>, %arg8: memref<32x1xf32, #tpu.memory_space<vmem>>, %arg9: memref<32x1xf32, #tpu.memory_space<vmem>>, %arg10: memref<32x1xf32, #tpu.memory_space<vmem>>, %arg11: memref<9x121x81xbf16, #tpu.memory_space<vmem>>, %arg12: memref<9x81x25xbf16, #tpu.memory_space<vmem>>, %arg13: memref<9x1x25xf32, #tpu.memory_space<vmem>>, %arg14: memref<25x800xbf16, #tpu.memory_space<vmem>>, %arg15: memref<32x800xf32, #tpu.memory_space<vmem>>, %arg16: memref<1x1x512xf32, #tpu.memory_space<vmem>>, %arg17: memref<1x1x512xf32, #tpu.memory_space<vmem>>, %arg18: memref<1x1024x1024xbf16, #tpu.memory_space<vmem>>, %arg19: memref<288x2048xbf16, #tpu.memory_space<vmem>>, %arg20: memref<1x1x1024xf32, #tpu.memory_space<vmem>>, %arg21: memref<512x256xbf16, #tpu.memory_space<vmem>>, %arg22: memref<1x256xf32, #tpu.memory_space<vmem>>, %arg23: memref<1x1x512xf32, #tpu.memory_space<vmem>>, %arg24: memref<1x1x512xf32, #tpu.memory_space<vmem>>, %arg25: memref<1x256xf32, #tpu.memory_space<vmem>>, %arg26: memref<1x1024xf32, #tpu.memory_space<vmem>>, %arg27: memref<2x1x1024xf32, #tpu.memory_space<vmem>>, %arg28: memref<2x1x1024xf32, #tpu.memory_space<vmem>>) attributes {dimension_semantics = [#tpu.dimension_semantics<arbitrary>, #tpu.dimension_semantics<arbitrary>], iteration_bounds = array<i64: 3, 2>, scalar_prefetch = 0 : i64, scratch_operands = 3 : i64, tpu.core_type = #tpu.core_type<tc>, window_params = [{pipeline_mode = #tpu.pipeline_mode<synchronous>, transform_indices = @transform_0, window_bounds = array<i64: 25, 121>}, {pipeline_mode = #tpu.pipeline_mode<synchronous>, transform_indices = @transform_1, window_bounds = array<i64: 32, 25>}, {pipeline_mode = #tpu.pipeline_mode<synchronous>, transform_indices = @transform_2, window_bounds = array<i64: 32, 1>}, {pipeline_mode = #tpu.pipeline_mode<synchronous>, transform_indices = @transform_3, window_bounds = array<i64: 32, 1>}, {pipeline_mode = #tpu.pipeline_mode<synchronous>, transform_indices = @transform_4, window_bounds = array<i64: 32, 1>}, {pipeline_mode = #tpu.pipeline_mode<synchronous>, transform_indices = @transform_5, window_bounds = array<i64: 9, 32, 32>}, {pipeline_mode = #tpu.pipeline_mode<synchronous>, transform_indices = @transform_6, window_bounds = array<i64: 32, 1>}, {pipeline_mode = #tpu.pipeline_mode<synchronous>, transform_indices = @transform_7, window_bounds = array<i64: 32, 1>}, {pipeline_mode = #tpu.pipeline_mode<synchronous>, transform_indices = @transform_8, window_bounds = array<i64: 32, 1>}, {pipeline_mode = #tpu.pipeline_mode<synchronous>, transform_indices = @transform_9, window_bounds = array<i64: 9, 121, 81>}, {pipeline_mode = #tpu.pipeline_mode<synchronous>, transform_indices = @transform_10, window_bounds = array<i64: 9, 81, 25>}, {pipeline_mode = #tpu.pipeline_mode<synchronous>, transform_indices = @transform_11, window_bounds = array<i64: 9, 1, 25>}, {pipeline_mode = #tpu.pipeline_mode<synchronous>, transform_indices = @transform_12, window_bounds = array<i64: 25, 800>}, {pipeline_mode = #tpu.pipeline_mode<synchronous>, transform_indices = @transform_13, window_bounds = array<i64: 32, 800>}, {transform_indices = @transform_14, window_bounds = array<i64: 1, 1, 512>}, {transform_indices = @transform_15, window_bounds = array<i64: 1, 1, 512>}, {transform_indices = @transform_16, window_bounds = array<i64: 1, 1024, 1024>}, {pipeline_mode = #tpu.pipeline_mode<synchronous>, transform_indices = @transform_17, window_bounds = array<i64: 288, 2048>}, {transform_indices = @transform_18, window_bounds = array<i64: 1, 1, 1024>}, {pipeline_mode = #tpu.pipeline_mode<synchronous>, transform_indices = @transform_19, window_bounds = array<i64: 512, 256>}, {pipeline_mode = #tpu.pipeline_mode<synchronous>, transform_indices = @transform_20, window_bounds = array<i64: 1, 256>}, {transform_indices = @transform_21, window_bounds = array<i64: 1, 1, 512>}, {transform_indices = @transform_22, window_bounds = array<i64: 1, 1, 512>}, {pipeline_mode = #tpu.pipeline_mode<synchronous>, transform_indices = @transform_23, window_bounds = array<i64: 1, 256>}]} {
    %c0_i32 = arith.constant 0 : i32
    %0 = arith.cmpi eq, %arg0, %c0_i32 : i32
    %c0_i32_0 = arith.constant 0 : i32
    %1 = arith.cmpi eq, %arg1, %c0_i32_0 : i32
    %2 = arith.andi %0, %1 : i1
    %3 = arith.extui %2 : i1 to i32
    %c0_i32_1 = arith.constant 0 : i32
    %4 = arith.cmpi ne, %3, %c0_i32_1 : i32
    scf.if %4 {
      %c0_18 = arith.constant 0 : index
      %c0_19 = arith.constant 0 : index
      %31 = vector.load %arg3[%c0_18, %c0_19] : memref<32x25xbf16, #tpu.memory_space<vmem>>, vector<32x25xbf16>
      %c0_20 = arith.constant 0 : index
      %c0_21 = arith.constant 0 : index
      %32 = vector.load %arg2[%c0_20, %c0_21] : memref<25x121xf32, #tpu.memory_space<vmem>>, vector<25x121xf32>
      %33 = arith.truncf %32 : vector<25x121xf32> to vector<25x121xbf16>
      %cst_22 = arith.constant dense<0.000000e+00> : vector<32x121xf32>
      %34 = tpu.matmul %31, %33, %cst_22 {dimension_numbers = #tpu.dot_dimension_numbers<[1], [0], [0], [1], [0, 0, 1, 1], [], []>} : vector<32x25xbf16>, vector<25x121xbf16>, vector<32x121xf32> -> vector<32x121xf32>
      %c0_23 = arith.constant 0 : index
      %c0_24 = arith.constant 0 : index
      %35 = vector.load %arg4[%c0_23, %c0_24] : memref<32x1xf32, #tpu.memory_space<vmem>>, vector<32x1xf32>
      %36 = vector.broadcast %35 : vector<32x1xf32> to vector<32x121xf32>
      %37 = arith.addf %34, %36 : vector<32x121xf32>
      %cst_25 = arith.constant 0.000000e+00 : f32
      %38 = vector.broadcast %cst_25 : f32 to vector<32x121xf32>
      %39 = arith.maximumf %37, %38 : vector<32x121xf32>
      %cst_26 = arith.constant dense<0.000000e+00> : vector<32xf32>
      %40 = vector.multi_reduction <add>, %39, %cst_26 [1] : vector<32x121xf32> to vector<32xf32>
      %41 = vector.shape_cast %40 : vector<32xf32> to vector<32x1xf32>
      %cst_27 = arith.constant 1.210000e+02 : f32
      %42 = vector.broadcast %cst_27 : f32 to vector<32x1xf32>
      %43 = arith.divf %41, %42 : vector<32x1xf32>
      %44 = vector.broadcast %43 : vector<32x1xf32> to vector<32x121xf32>
      %45 = arith.subf %39, %44 : vector<32x121xf32>
      %46 = arith.mulf %45, %45 : vector<32x121xf32>
      %cst_28 = arith.constant dense<0.000000e+00> : vector<32xf32>
      %47 = vector.multi_reduction <add>, %46, %cst_28 [1] : vector<32x121xf32> to vector<32xf32>
      %48 = vector.shape_cast %47 : vector<32xf32> to vector<32x1xf32>
      %cst_29 = arith.constant 1.210000e+02 : f32
      %49 = vector.broadcast %cst_29 : f32 to vector<32x1xf32>
      %50 = arith.divf %48, %49 : vector<32x1xf32>
      %51 = vector.broadcast %43 : vector<32x1xf32> to vector<32x121xf32>
      %52 = arith.subf %39, %51 : vector<32x121xf32>
      %cst_30 = arith.constant 9.99999974E-6 : f32
      %53 = vector.broadcast %cst_30 : f32 to vector<32x1xf32>
      %54 = arith.addf %50, %53 : vector<32x1xf32>
      %55 = math.rsqrt %54 : vector<32x1xf32>
      %56 = vector.broadcast %55 : vector<32x1xf32> to vector<32x121xf32>
      %57 = arith.mulf %52, %56 : vector<32x121xf32>
      %c0_31 = arith.constant 0 : index
      %c0_32 = arith.constant 0 : index
      %58 = vector.load %arg5[%c0_31, %c0_32] : memref<32x1xf32, #tpu.memory_space<vmem>>, vector<32x1xf32>
      %59 = vector.broadcast %58 : vector<32x1xf32> to vector<32x121xf32>
      %60 = arith.mulf %57, %59 : vector<32x121xf32>
      %c0_33 = arith.constant 0 : index
      %c0_34 = arith.constant 0 : index
      %61 = vector.load %arg6[%c0_33, %c0_34] : memref<32x1xf32, #tpu.memory_space<vmem>>, vector<32x1xf32>
      %62 = vector.broadcast %61 : vector<32x1xf32> to vector<32x121xf32>
      %63 = arith.addf %60, %62 : vector<32x121xf32>
      %64 = arith.truncf %63 : vector<32x121xf32> to vector<32x121xbf16>
      %cst_35 = arith.constant 0.000000e+00 : f32
      %65 = vector.broadcast %cst_35 : f32 to vector<32x81xf32>
      %cst_36 = arith.constant 0.000000e+00 : f32
      %66 = vector.broadcast %cst_36 : f32 to vector<32x81xf32>
      %c0_37 = arith.constant 0 : index
      %c0_38 = arith.constant 0 : index
      %c0_39 = arith.constant 0 : index
      %67 = vector.load %arg11[%c0_37, %c0_38, %c0_39] : memref<9x121x81xbf16, #tpu.memory_space<vmem>>, vector<1x121x81xbf16>
      %68 = vector.shape_cast %67 : vector<1x121x81xbf16> to vector<121x81xbf16>
      %cst_40 = arith.constant dense<0.000000e+00> : vector<32x81xf32>
      %69 = tpu.matmul %64, %68, %cst_40 {dimension_numbers = #tpu.dot_dimension_numbers<[1], [0], [0], [1], [0, 0, 1, 1], [], []>} : vector<32x121xbf16>, vector<121x81xbf16>, vector<32x81xf32> -> vector<32x81xf32>
      %70 = arith.truncf %69 : vector<32x81xf32> to vector<32x81xbf16>
      %c0_41 = arith.constant 0 : index
      %c0_42 = arith.constant 0 : index
      %c0_43 = arith.constant 0 : index
      %71 = vector.load %arg7[%c0_41, %c0_42, %c0_43] : memref<9x32x32xbf16, #tpu.memory_space<vmem>>, vector<1x32x32xbf16>
      %72 = vector.shape_cast %71 : vector<1x32x32xbf16> to vector<32x32xbf16>
      %cst_44 = arith.constant dense<0.000000e+00> : vector<32x81xf32>
      %73 = tpu.matmul %72, %70, %cst_44 {dimension_numbers = #tpu.dot_dimension_numbers<[1], [0], [0], [1], [0, 0, 1, 1], [], []>} : vector<32x32xbf16>, vector<32x81xbf16>, vector<32x81xf32> -> vector<32x81xf32>
      %74 = arith.addf %65, %73 : vector<32x81xf32>
      %c1 = arith.constant 1 : index
      %c0_45 = arith.constant 0 : index
      %c0_46 = arith.constant 0 : index
      %75 = vector.load %arg11[%c1, %c0_45, %c0_46] : memref<9x121x81xbf16, #tpu.memory_space<vmem>>, vector<1x121x81xbf16>
      %76 = vector.shape_cast %75 : vector<1x121x81xbf16> to vector<121x81xbf16>
      %cst_47 = arith.constant dense<0.000000e+00> : vector<32x81xf32>
      %77 = tpu.matmul %64, %76, %cst_47 {dimension_numbers = #tpu.dot_dimension_numbers<[1], [0], [0], [1], [0, 0, 1, 1], [], []>} : vector<32x121xbf16>, vector<121x81xbf16>, vector<32x81xf32> -> vector<32x81xf32>
      %78 = arith.truncf %77 : vector<32x81xf32> to vector<32x81xbf16>
      %c1_48 = arith.constant 1 : index
      %c0_49 = arith.constant 0 : index
      %c0_50 = arith.constant 0 : index
      %79 = vector.load %arg7[%c1_48, %c0_49, %c0_50] : memref<9x32x32xbf16, #tpu.memory_space<vmem>>, vector<1x32x32xbf16>
      %80 = vector.shape_cast %79 : vector<1x32x32xbf16> to vector<32x32xbf16>
      %cst_51 = arith.constant dense<0.000000e+00> : vector<32x81xf32>
      %81 = tpu.matmul %80, %78, %cst_51 {dimension_numbers = #tpu.dot_dimension_numbers<[1], [0], [0], [1], [0, 0, 1, 1], [], []>} : vector<32x32xbf16>, vector<32x81xbf16>, vector<32x81xf32> -> vector<32x81xf32>
      %82 = arith.addf %66, %81 : vector<32x81xf32>
      %c2 = arith.constant 2 : index
      %c0_52 = arith.constant 0 : index
      %c0_53 = arith.constant 0 : index
      %83 = vector.load %arg11[%c2, %c0_52, %c0_53] : memref<9x121x81xbf16, #tpu.memory_space<vmem>>, vector<1x121x81xbf16>
      %84 = vector.shape_cast %83 : vector<1x121x81xbf16> to vector<121x81xbf16>
      %cst_54 = arith.constant dense<0.000000e+00> : vector<32x81xf32>
      %85 = tpu.matmul %64, %84, %cst_54 {dimension_numbers = #tpu.dot_dimension_numbers<[1], [0], [0], [1], [0, 0, 1, 1], [], []>} : vector<32x121xbf16>, vector<121x81xbf16>, vector<32x81xf32> -> vector<32x81xf32>
      %86 = arith.truncf %85 : vector<32x81xf32> to vector<32x81xbf16>
      %c2_55 = arith.constant 2 : index
      %c0_56 = arith.constant 0 : index
      %c0_57 = arith.constant 0 : index
      %87 = vector.load %arg7[%c2_55, %c0_56, %c0_57] : memref<9x32x32xbf16, #tpu.memory_space<vmem>>, vector<1x32x32xbf16>
      %88 = vector.shape_cast %87 : vector<1x32x32xbf16> to vector<32x32xbf16>
      %cst_58 = arith.constant dense<0.000000e+00> : vector<32x81xf32>
      %89 = tpu.matmul %88, %86, %cst_58 {dimension_numbers = #tpu.dot_dimension_numbers<[1], [0], [0], [1], [0, 0, 1, 1], [], []>} : vector<32x32xbf16>, vector<32x81xbf16>, vector<32x81xf32> -> vector<32x81xf32>
      %90 = arith.addf %74, %89 : vector<32x81xf32>
      %c3 = arith.constant 3 : index
      %c0_59 = arith.constant 0 : index
      %c0_60 = arith.constant 0 : index
      %91 = vector.load %arg11[%c3, %c0_59, %c0_60] : memref<9x121x81xbf16, #tpu.memory_space<vmem>>, vector<1x121x81xbf16>
      %92 = vector.shape_cast %91 : vector<1x121x81xbf16> to vector<121x81xbf16>
      %cst_61 = arith.constant dense<0.000000e+00> : vector<32x81xf32>
      %93 = tpu.matmul %64, %92, %cst_61 {dimension_numbers = #tpu.dot_dimension_numbers<[1], [0], [0], [1], [0, 0, 1, 1], [], []>} : vector<32x121xbf16>, vector<121x81xbf16>, vector<32x81xf32> -> vector<32x81xf32>
      %94 = arith.truncf %93 : vector<32x81xf32> to vector<32x81xbf16>
      %c3_62 = arith.constant 3 : index
      %c0_63 = arith.constant 0 : index
      %c0_64 = arith.constant 0 : index
      %95 = vector.load %arg7[%c3_62, %c0_63, %c0_64] : memref<9x32x32xbf16, #tpu.memory_space<vmem>>, vector<1x32x32xbf16>
      %96 = vector.shape_cast %95 : vector<1x32x32xbf16> to vector<32x32xbf16>
      %cst_65 = arith.constant dense<0.000000e+00> : vector<32x81xf32>
      %97 = tpu.matmul %96, %94, %cst_65 {dimension_numbers = #tpu.dot_dimension_numbers<[1], [0], [0], [1], [0, 0, 1, 1], [], []>} : vector<32x32xbf16>, vector<32x81xbf16>, vector<32x81xf32> -> vector<32x81xf32>
      %98 = arith.addf %82, %97 : vector<32x81xf32>
      %c4 = arith.constant 4 : index
      %c0_66 = arith.constant 0 : index
      %c0_67 = arith.constant 0 : index
      %99 = vector.load %arg11[%c4, %c0_66, %c0_67] : memref<9x121x81xbf16, #tpu.memory_space<vmem>>, vector<1x121x81xbf16>
      %100 = vector.shape_cast %99 : vector<1x121x81xbf16> to vector<121x81xbf16>
      %cst_68 = arith.constant dense<0.000000e+00> : vector<32x81xf32>
      %101 = tpu.matmul %64, %100, %cst_68 {dimension_numbers = #tpu.dot_dimension_numbers<[1], [0], [0], [1], [0, 0, 1, 1], [], []>} : vector<32x121xbf16>, vector<121x81xbf16>, vector<32x81xf32> -> vector<32x81xf32>
      %102 = arith.truncf %101 : vector<32x81xf32> to vector<32x81xbf16>
      %c4_69 = arith.constant 4 : index
      %c0_70 = arith.constant 0 : index
      %c0_71 = arith.constant 0 : index
      %103 = vector.load %arg7[%c4_69, %c0_70, %c0_71] : memref<9x32x32xbf16, #tpu.memory_space<vmem>>, vector<1x32x32xbf16>
      %104 = vector.shape_cast %103 : vector<1x32x32xbf16> to vector<32x32xbf16>
      %cst_72 = arith.constant dense<0.000000e+00> : vector<32x81xf32>
      %105 = tpu.matmul %104, %102, %cst_72 {dimension_numbers = #tpu.dot_dimension_numbers<[1], [0], [0], [1], [0, 0, 1, 1], [], []>} : vector<32x32xbf16>, vector<32x81xbf16>, vector<32x81xf32> -> vector<32x81xf32>
      %106 = arith.addf %90, %105 : vector<32x81xf32>
      %c5 = arith.constant 5 : index
      %c0_73 = arith.constant 0 : index
      %c0_74 = arith.constant 0 : index
      %107 = vector.load %arg11[%c5, %c0_73, %c0_74] : memref<9x121x81xbf16, #tpu.memory_space<vmem>>, vector<1x121x81xbf16>
      %108 = vector.shape_cast %107 : vector<1x121x81xbf16> to vector<121x81xbf16>
      %cst_75 = arith.constant dense<0.000000e+00> : vector<32x81xf32>
      %109 = tpu.matmul %64, %108, %cst_75 {dimension_numbers = #tpu.dot_dimension_numbers<[1], [0], [0], [1], [0, 0, 1, 1], [], []>} : vector<32x121xbf16>, vector<121x81xbf16>, vector<32x81xf32> -> vector<32x81xf32>
      %110 = arith.truncf %109 : vector<32x81xf32> to vector<32x81xbf16>
      %c5_76 = arith.constant 5 : index
      %c0_77 = arith.constant 0 : index
      %c0_78 = arith.constant 0 : index
      %111 = vector.load %arg7[%c5_76, %c0_77, %c0_78] : memref<9x32x32xbf16, #tpu.memory_space<vmem>>, vector<1x32x32xbf16>
      %112 = vector.shape_cast %111 : vector<1x32x32xbf16> to vector<32x32xbf16>
      %cst_79 = arith.constant dense<0.000000e+00> : vector<32x81xf32>
      %113 = tpu.matmul %112, %110, %cst_79 {dimension_numbers = #tpu.dot_dimension_numbers<[1], [0], [0], [1], [0, 0, 1, 1], [], []>} : vector<32x32xbf16>, vector<32x81xbf16>, vector<32x81xf32> -> vector<32x81xf32>
      %114 = arith.addf %98, %113 : vector<32x81xf32>
      %c6 = arith.constant 6 : index
      %c0_80 = arith.constant 0 : index
      %c0_81 = arith.constant 0 : index
      %115 = vector.load %arg11[%c6, %c0_80, %c0_81] : memref<9x121x81xbf16, #tpu.memory_space<vmem>>, vector<1x121x81xbf16>
      %116 = vector.shape_cast %115 : vector<1x121x81xbf16> to vector<121x81xbf16>
      %cst_82 = arith.constant dense<0.000000e+00> : vector<32x81xf32>
      %117 = tpu.matmul %64, %116, %cst_82 {dimension_numbers = #tpu.dot_dimension_numbers<[1], [0], [0], [1], [0, 0, 1, 1], [], []>} : vector<32x121xbf16>, vector<121x81xbf16>, vector<32x81xf32> -> vector<32x81xf32>
      %118 = arith.truncf %117 : vector<32x81xf32> to vector<32x81xbf16>
      %c6_83 = arith.constant 6 : index
      %c0_84 = arith.constant 0 : index
      %c0_85 = arith.constant 0 : index
      %119 = vector.load %arg7[%c6_83, %c0_84, %c0_85] : memref<9x32x32xbf16, #tpu.memory_space<vmem>>, vector<1x32x32xbf16>
      %120 = vector.shape_cast %119 : vector<1x32x32xbf16> to vector<32x32xbf16>
      %cst_86 = arith.constant dense<0.000000e+00> : vector<32x81xf32>
      %121 = tpu.matmul %120, %118, %cst_86 {dimension_numbers = #tpu.dot_dimension_numbers<[1], [0], [0], [1], [0, 0, 1, 1], [], []>} : vector<32x32xbf16>, vector<32x81xbf16>, vector<32x81xf32> -> vector<32x81xf32>
      %122 = arith.addf %106, %121 : vector<32x81xf32>
      %c7 = arith.constant 7 : index
      %c0_87 = arith.constant 0 : index
      %c0_88 = arith.constant 0 : index
      %123 = vector.load %arg11[%c7, %c0_87, %c0_88] : memref<9x121x81xbf16, #tpu.memory_space<vmem>>, vector<1x121x81xbf16>
      %124 = vector.shape_cast %123 : vector<1x121x81xbf16> to vector<121x81xbf16>
      %cst_89 = arith.constant dense<0.000000e+00> : vector<32x81xf32>
      %125 = tpu.matmul %64, %124, %cst_89 {dimension_numbers = #tpu.dot_dimension_numbers<[1], [0], [0], [1], [0, 0, 1, 1], [], []>} : vector<32x121xbf16>, vector<121x81xbf16>, vector<32x81xf32> -> vector<32x81xf32>
      %126 = arith.truncf %125 : vector<32x81xf32> to vector<32x81xbf16>
      %c7_90 = arith.constant 7 : index
      %c0_91 = arith.constant 0 : index
      %c0_92 = arith.constant 0 : index
      %127 = vector.load %arg7[%c7_90, %c0_91, %c0_92] : memref<9x32x32xbf16, #tpu.memory_space<vmem>>, vector<1x32x32xbf16>
      %128 = vector.shape_cast %127 : vector<1x32x32xbf16> to vector<32x32xbf16>
      %cst_93 = arith.constant dense<0.000000e+00> : vector<32x81xf32>
      %129 = tpu.matmul %128, %126, %cst_93 {dimension_numbers = #tpu.dot_dimension_numbers<[1], [0], [0], [1], [0, 0, 1, 1], [], []>} : vector<32x32xbf16>, vector<32x81xbf16>, vector<32x81xf32> -> vector<32x81xf32>
      %130 = arith.addf %114, %129 : vector<32x81xf32>
      %c8 = arith.constant 8 : index
      %c0_94 = arith.constant 0 : index
      %c0_95 = arith.constant 0 : index
      %131 = vector.load %arg11[%c8, %c0_94, %c0_95] : memref<9x121x81xbf16, #tpu.memory_space<vmem>>, vector<1x121x81xbf16>
      %132 = vector.shape_cast %131 : vector<1x121x81xbf16> to vector<121x81xbf16>
      %cst_96 = arith.constant dense<0.000000e+00> : vector<32x81xf32>
      %133 = tpu.matmul %64, %132, %cst_96 {dimension_numbers = #tpu.dot_dimension_numbers<[1], [0], [0], [1], [0, 0, 1, 1], [], []>} : vector<32x121xbf16>, vector<121x81xbf16>, vector<32x81xf32> -> vector<32x81xf32>
      %134 = arith.truncf %133 : vector<32x81xf32> to vector<32x81xbf16>
      %c8_97 = arith.constant 8 : index
      %c0_98 = arith.constant 0 : index
      %c0_99 = arith.constant 0 : index
      %135 = vector.load %arg7[%c8_97, %c0_98, %c0_99] : memref<9x32x32xbf16, #tpu.memory_space<vmem>>, vector<1x32x32xbf16>
      %136 = vector.shape_cast %135 : vector<1x32x32xbf16> to vector<32x32xbf16>
      %cst_100 = arith.constant dense<0.000000e+00> : vector<32x81xf32>
      %137 = tpu.matmul %136, %134, %cst_100 {dimension_numbers = #tpu.dot_dimension_numbers<[1], [0], [0], [1], [0, 0, 1, 1], [], []>} : vector<32x32xbf16>, vector<32x81xbf16>, vector<32x81xf32> -> vector<32x81xf32>
      %138 = arith.addf %122, %137 : vector<32x81xf32>
      %139 = arith.addf %138, %130 : vector<32x81xf32>
      %c0_101 = arith.constant 0 : index
      %c0_102 = arith.constant 0 : index
      %140 = vector.load %arg8[%c0_101, %c0_102] : memref<32x1xf32, #tpu.memory_space<vmem>>, vector<32x1xf32>
      %141 = vector.broadcast %140 : vector<32x1xf32> to vector<32x81xf32>
      %142 = arith.addf %139, %141 : vector<32x81xf32>
      %cst_103 = arith.constant 0.000000e+00 : f32
      %143 = vector.broadcast %cst_103 : f32 to vector<32x81xf32>
      %144 = arith.maximumf %142, %143 : vector<32x81xf32>
      %cst_104 = arith.constant dense<0.000000e+00> : vector<32xf32>
      %145 = vector.multi_reduction <add>, %144, %cst_104 [1] : vector<32x81xf32> to vector<32xf32>
      %146 = vector.shape_cast %145 : vector<32xf32> to vector<32x1xf32>
      %cst_105 = arith.constant 8.100000e+01 : f32
      %147 = vector.broadcast %cst_105 : f32 to vector<32x1xf32>
      %148 = arith.divf %146, %147 : vector<32x1xf32>
      %149 = vector.broadcast %148 : vector<32x1xf32> to vector<32x81xf32>
      %150 = arith.subf %144, %149 : vector<32x81xf32>
      %151 = arith.mulf %150, %150 : vector<32x81xf32>
      %cst_106 = arith.constant dense<0.000000e+00> : vector<32xf32>
      %152 = vector.multi_reduction <add>, %151, %cst_106 [1] : vector<32x81xf32> to vector<32xf32>
      %153 = vector.shape_cast %152 : vector<32xf32> to vector<32x1xf32>
      %cst_107 = arith.constant 8.100000e+01 : f32
      %154 = vector.broadcast %cst_107 : f32 to vector<32x1xf32>
      %155 = arith.divf %153, %154 : vector<32x1xf32>
      %156 = vector.broadcast %148 : vector<32x1xf32> to vector<32x81xf32>
      %157 = arith.subf %144, %156 : vector<32x81xf32>
      %cst_108 = arith.constant 9.99999974E-6 : f32
      %158 = vector.broadcast %cst_108 : f32 to vector<32x1xf32>
      %159 = arith.addf %155, %158 : vector<32x1xf32>
      %160 = math.rsqrt %159 : vector<32x1xf32>
      %161 = vector.broadcast %160 : vector<32x1xf32> to vector<32x81xf32>
      %162 = arith.mulf %157, %161 : vector<32x81xf32>
      %c0_109 = arith.constant 0 : index
      %c0_110 = arith.constant 0 : index
      %163 = vector.load %arg9[%c0_109, %c0_110] : memref<32x1xf32, #tpu.memory_space<vmem>>, vector<32x1xf32>
      %164 = vector.broadcast %163 : vector<32x1xf32> to vector<32x81xf32>
      %165 = arith.mulf %162, %164 : vector<32x81xf32>
      %c0_111 = arith.constant 0 : index
      %c0_112 = arith.constant 0 : index
      %166 = vector.load %arg10[%c0_111, %c0_112] : memref<32x1xf32, #tpu.memory_space<vmem>>, vector<32x1xf32>
      %167 = vector.broadcast %166 : vector<32x1xf32> to vector<32x81xf32>
      %168 = arith.addf %165, %167 : vector<32x81xf32>
      %169 = arith.truncf %168 : vector<32x81xf32> to vector<32x81xbf16>
      %cst_113 = arith.constant -1.000000e+30 : f32
      %170 = vector.broadcast %cst_113 : f32 to vector<32x25xf32>
      %c0_114 = arith.constant 0 : index
      %c0_115 = arith.constant 0 : index
      %c0_116 = arith.constant 0 : index
      %171 = vector.load %arg12[%c0_114, %c0_115, %c0_116] : memref<9x81x25xbf16, #tpu.memory_space<vmem>>, vector<1x81x25xbf16>
      %172 = vector.shape_cast %171 : vector<1x81x25xbf16> to vector<81x25xbf16>
      %cst_117 = arith.constant dense<0.000000e+00> : vector<32x25xf32>
      %173 = tpu.matmul %169, %172, %cst_117 {dimension_numbers = #tpu.dot_dimension_numbers<[1], [0], [0], [1], [0, 0, 1, 1], [], []>} : vector<32x81xbf16>, vector<81x25xbf16>, vector<32x25xf32> -> vector<32x25xf32>
      %c0_118 = arith.constant 0 : index
      %c0_119 = arith.constant 0 : index
      %c0_120 = arith.constant 0 : index
      %174 = vector.load %arg13[%c0_118, %c0_119, %c0_120] : memref<9x1x25xf32, #tpu.memory_space<vmem>>, vector<1x1x25xf32>
      %175 = vector.shape_cast %174 : vector<1x1x25xf32> to vector<1x25xf32>
      %176 = vector.broadcast %175 : vector<1x25xf32> to vector<32x25xf32>
      %177 = arith.addf %173, %176 : vector<32x25xf32>
      %178 = arith.maximumf %170, %177 : vector<32x25xf32>
      %c1_121 = arith.constant 1 : index
      %c0_122 = arith.constant 0 : index
      %c0_123 = arith.constant 0 : index
      %179 = vector.load %arg12[%c1_121, %c0_122, %c0_123] : memref<9x81x25xbf16, #tpu.memory_space<vmem>>, vector<1x81x25xbf16>
      %180 = vector.shape_cast %179 : vector<1x81x25xbf16> to vector<81x25xbf16>
      %cst_124 = arith.constant dense<0.000000e+00> : vector<32x25xf32>
      %181 = tpu.matmul %169, %180, %cst_124 {dimension_numbers = #tpu.dot_dimension_numbers<[1], [0], [0], [1], [0, 0, 1, 1], [], []>} : vector<32x81xbf16>, vector<81x25xbf16>, vector<32x25xf32> -> vector<32x25xf32>
      %c1_125 = arith.constant 1 : index
      %c0_126 = arith.constant 0 : index
      %c0_127 = arith.constant 0 : index
      %182 = vector.load %arg13[%c1_125, %c0_126, %c0_127] : memref<9x1x25xf32, #tpu.memory_space<vmem>>, vector<1x1x25xf32>
      %183 = vector.shape_cast %182 : vector<1x1x25xf32> to vector<1x25xf32>
      %184 = vector.broadcast %183 : vector<1x25xf32> to vector<32x25xf32>
      %185 = arith.addf %181, %184 : vector<32x25xf32>
      %186 = arith.maximumf %178, %185 : vector<32x25xf32>
      %c2_128 = arith.constant 2 : index
      %c0_129 = arith.constant 0 : index
      %c0_130 = arith.constant 0 : index
      %187 = vector.load %arg12[%c2_128, %c0_129, %c0_130] : memref<9x81x25xbf16, #tpu.memory_space<vmem>>, vector<1x81x25xbf16>
      %188 = vector.shape_cast %187 : vector<1x81x25xbf16> to vector<81x25xbf16>
      %cst_131 = arith.constant dense<0.000000e+00> : vector<32x25xf32>
      %189 = tpu.matmul %169, %188, %cst_131 {dimension_numbers = #tpu.dot_dimension_numbers<[1], [0], [0], [1], [0, 0, 1, 1], [], []>} : vector<32x81xbf16>, vector<81x25xbf16>, vector<32x25xf32> -> vector<32x25xf32>
      %c2_132 = arith.constant 2 : index
      %c0_133 = arith.constant 0 : index
      %c0_134 = arith.constant 0 : index
      %190 = vector.load %arg13[%c2_132, %c0_133, %c0_134] : memref<9x1x25xf32, #tpu.memory_space<vmem>>, vector<1x1x25xf32>
      %191 = vector.shape_cast %190 : vector<1x1x25xf32> to vector<1x25xf32>
      %192 = vector.broadcast %191 : vector<1x25xf32> to vector<32x25xf32>
      %193 = arith.addf %189, %192 : vector<32x25xf32>
      %194 = arith.maximumf %186, %193 : vector<32x25xf32>
      %c3_135 = arith.constant 3 : index
      %c0_136 = arith.constant 0 : index
      %c0_137 = arith.constant 0 : index
      %195 = vector.load %arg12[%c3_135, %c0_136, %c0_137] : memref<9x81x25xbf16, #tpu.memory_space<vmem>>, vector<1x81x25xbf16>
      %196 = vector.shape_cast %195 : vector<1x81x25xbf16> to vector<81x25xbf16>
      %cst_138 = arith.constant dense<0.000000e+00> : vector<32x25xf32>
      %197 = tpu.matmul %169, %196, %cst_138 {dimension_numbers = #tpu.dot_dimension_numbers<[1], [0], [0], [1], [0, 0, 1, 1], [], []>} : vector<32x81xbf16>, vector<81x25xbf16>, vector<32x25xf32> -> vector<32x25xf32>
      %c3_139 = arith.constant 3 : index
      %c0_140 = arith.constant 0 : index
      %c0_141 = arith.constant 0 : index
      %198 = vector.load %arg13[%c3_139, %c0_140, %c0_141] : memref<9x1x25xf32, #tpu.memory_space<vmem>>, vector<1x1x25xf32>
      %199 = vector.shape_cast %198 : vector<1x1x25xf32> to vector<1x25xf32>
      %200 = vector.broadcast %199 : vector<1x25xf32> to vector<32x25xf32>
      %201 = arith.addf %197, %200 : vector<32x25xf32>
      %202 = arith.maximumf %194, %201 : vector<32x25xf32>
      %c4_142 = arith.constant 4 : index
      %c0_143 = arith.constant 0 : index
      %c0_144 = arith.constant 0 : index
      %203 = vector.load %arg12[%c4_142, %c0_143, %c0_144] : memref<9x81x25xbf16, #tpu.memory_space<vmem>>, vector<1x81x25xbf16>
      %204 = vector.shape_cast %203 : vector<1x81x25xbf16> to vector<81x25xbf16>
      %cst_145 = arith.constant dense<0.000000e+00> : vector<32x25xf32>
      %205 = tpu.matmul %169, %204, %cst_145 {dimension_numbers = #tpu.dot_dimension_numbers<[1], [0], [0], [1], [0, 0, 1, 1], [], []>} : vector<32x81xbf16>, vector<81x25xbf16>, vector<32x25xf32> -> vector<32x25xf32>
      %c4_146 = arith.constant 4 : index
      %c0_147 = arith.constant 0 : index
      %c0_148 = arith.constant 0 : index
      %206 = vector.load %arg13[%c4_146, %c0_147, %c0_148] : memref<9x1x25xf32, #tpu.memory_space<vmem>>, vector<1x1x25xf32>
      %207 = vector.shape_cast %206 : vector<1x1x25xf32> to vector<1x25xf32>
      %208 = vector.broadcast %207 : vector<1x25xf32> to vector<32x25xf32>
      %209 = arith.addf %205, %208 : vector<32x25xf32>
      %210 = arith.maximumf %202, %209 : vector<32x25xf32>
      %c5_149 = arith.constant 5 : index
      %c0_150 = arith.constant 0 : index
      %c0_151 = arith.constant 0 : index
      %211 = vector.load %arg12[%c5_149, %c0_150, %c0_151] : memref<9x81x25xbf16, #tpu.memory_space<vmem>>, vector<1x81x25xbf16>
      %212 = vector.shape_cast %211 : vector<1x81x25xbf16> to vector<81x25xbf16>
      %cst_152 = arith.constant dense<0.000000e+00> : vector<32x25xf32>
      %213 = tpu.matmul %169, %212, %cst_152 {dimension_numbers = #tpu.dot_dimension_numbers<[1], [0], [0], [1], [0, 0, 1, 1], [], []>} : vector<32x81xbf16>, vector<81x25xbf16>, vector<32x25xf32> -> vector<32x25xf32>
      %c5_153 = arith.constant 5 : index
      %c0_154 = arith.constant 0 : index
      %c0_155 = arith.constant 0 : index
      %214 = vector.load %arg13[%c5_153, %c0_154, %c0_155] : memref<9x1x25xf32, #tpu.memory_space<vmem>>, vector<1x1x25xf32>
      %215 = vector.shape_cast %214 : vector<1x1x25xf32> to vector<1x25xf32>
      %216 = vector.broadcast %215 : vector<1x25xf32> to vector<32x25xf32>
      %217 = arith.addf %213, %216 : vector<32x25xf32>
      %218 = arith.maximumf %210, %217 : vector<32x25xf32>
      %c6_156 = arith.constant 6 : index
      %c0_157 = arith.constant 0 : index
      %c0_158 = arith.constant 0 : index
      %219 = vector.load %arg12[%c6_156, %c0_157, %c0_158] : memref<9x81x25xbf16, #tpu.memory_space<vmem>>, vector<1x81x25xbf16>
      %220 = vector.shape_cast %219 : vector<1x81x25xbf16> to vector<81x25xbf16>
      %cst_159 = arith.constant dense<0.000000e+00> : vector<32x25xf32>
      %221 = tpu.matmul %169, %220, %cst_159 {dimension_numbers = #tpu.dot_dimension_numbers<[1], [0], [0], [1], [0, 0, 1, 1], [], []>} : vector<32x81xbf16>, vector<81x25xbf16>, vector<32x25xf32> -> vector<32x25xf32>
      %c6_160 = arith.constant 6 : index
      %c0_161 = arith.constant 0 : index
      %c0_162 = arith.constant 0 : index
      %222 = vector.load %arg13[%c6_160, %c0_161, %c0_162] : memref<9x1x25xf32, #tpu.memory_space<vmem>>, vector<1x1x25xf32>
      %223 = vector.shape_cast %222 : vector<1x1x25xf32> to vector<1x25xf32>
      %224 = vector.broadcast %223 : vector<1x25xf32> to vector<32x25xf32>
      %225 = arith.addf %221, %224 : vector<32x25xf32>
      %226 = arith.maximumf %218, %225 : vector<32x25xf32>
      %c7_163 = arith.constant 7 : index
      %c0_164 = arith.constant 0 : index
      %c0_165 = arith.constant 0 : index
      %227 = vector.load %arg12[%c7_163, %c0_164, %c0_165] : memref<9x81x25xbf16, #tpu.memory_space<vmem>>, vector<1x81x25xbf16>
      %228 = vector.shape_cast %227 : vector<1x81x25xbf16> to vector<81x25xbf16>
      %cst_166 = arith.constant dense<0.000000e+00> : vector<32x25xf32>
      %229 = tpu.matmul %169, %228, %cst_166 {dimension_numbers = #tpu.dot_dimension_numbers<[1], [0], [0], [1], [0, 0, 1, 1], [], []>} : vector<32x81xbf16>, vector<81x25xbf16>, vector<32x25xf32> -> vector<32x25xf32>
      %c7_167 = arith.constant 7 : index
      %c0_168 = arith.constant 0 : index
      %c0_169 = arith.constant 0 : index
      %230 = vector.load %arg13[%c7_167, %c0_168, %c0_169] : memref<9x1x25xf32, #tpu.memory_space<vmem>>, vector<1x1x25xf32>
      %231 = vector.shape_cast %230 : vector<1x1x25xf32> to vector<1x25xf32>
      %232 = vector.broadcast %231 : vector<1x25xf32> to vector<32x25xf32>
      %233 = arith.addf %229, %232 : vector<32x25xf32>
      %234 = arith.maximumf %226, %233 : vector<32x25xf32>
      %c8_170 = arith.constant 8 : index
      %c0_171 = arith.constant 0 : index
      %c0_172 = arith.constant 0 : index
      %235 = vector.load %arg12[%c8_170, %c0_171, %c0_172] : memref<9x81x25xbf16, #tpu.memory_space<vmem>>, vector<1x81x25xbf16>
      %236 = vector.shape_cast %235 : vector<1x81x25xbf16> to vector<81x25xbf16>
      %cst_173 = arith.constant dense<0.000000e+00> : vector<32x25xf32>
      %237 = tpu.matmul %169, %236, %cst_173 {dimension_numbers = #tpu.dot_dimension_numbers<[1], [0], [0], [1], [0, 0, 1, 1], [], []>} : vector<32x81xbf16>, vector<81x25xbf16>, vector<32x25xf32> -> vector<32x25xf32>
      %c8_174 = arith.constant 8 : index
      %c0_175 = arith.constant 0 : index
      %c0_176 = arith.constant 0 : index
      %238 = vector.load %arg13[%c8_174, %c0_175, %c0_176] : memref<9x1x25xf32, #tpu.memory_space<vmem>>, vector<1x1x25xf32>
      %239 = vector.shape_cast %238 : vector<1x1x25xf32> to vector<1x25xf32>
      %240 = vector.broadcast %239 : vector<1x25xf32> to vector<32x25xf32>
      %241 = arith.addf %237, %240 : vector<32x25xf32>
      %242 = arith.maximumf %234, %241 : vector<32x25xf32>
      %243 = arith.truncf %242 : vector<32x25xf32> to vector<32x25xbf16>
      %c0_177 = arith.constant 0 : index
      %c0_178 = arith.constant 0 : index
      %244 = vector.load %arg14[%c0_177, %c0_178] : memref<25x800xbf16, #tpu.memory_space<vmem>>, vector<25x800xbf16>
      %cst_179 = arith.constant dense<0.000000e+00> : vector<32x800xf32>
      %245 = tpu.matmul %243, %244, %cst_179 {dimension_numbers = #tpu.dot_dimension_numbers<[1], [0], [0], [1], [0, 0, 1, 1], [], []>} : vector<32x25xbf16>, vector<25x800xbf16>, vector<32x800xf32> -> vector<32x800xf32>
      %c0_180 = arith.constant 0 : index
      %c0_181 = arith.constant 0 : index
      %246 = vector.load %arg15[%c0_180, %c0_181] : memref<32x800xf32, #tpu.memory_space<vmem>>, vector<32x800xf32>
      %247 = arith.mulf %245, %246 : vector<32x800xf32>
      %248 = arith.truncf %247 : vector<32x800xf32> to vector<32x800xbf16>
      %cst_182 = arith.constant 1.000000e+00 : bf16
      %249 = vector.broadcast %cst_182 : bf16 to vector<1x32xbf16>
      %cst_183 = arith.constant dense<0.000000e+00> : vector<1x800xf32>
      %250 = tpu.matmul %249, %248, %cst_183 {dimension_numbers = #tpu.dot_dimension_numbers<[1], [0], [0], [1], [0, 0, 1, 1], [], []>} : vector<1x32xbf16>, vector<32x800xbf16>, vector<1x800xf32> -> vector<1x800xf32>
      %251 = vector.extract_strided_slice %250 {offsets = [0, 0], sizes = [1, 512], strides = [1, 1]} : vector<1x800xf32> to vector<1x512xf32>
      %c0_184 = arith.constant 0 : index
      %c512 = arith.constant 512 : index
      %252 = vector.load %arg26[%c0_184, %c512] : memref<1x1024xf32, #tpu.memory_space<vmem>>, vector<1x512xf32>
      tpu.vector_store %arg26[%c0_184, %c512], %251 {strides = array<i32>} : memref<1x1024xf32, #tpu.memory_space<vmem>>, vector<1x512xf32>,
      %253 = vector.extract_strided_slice %250 {offsets = [0, 512], sizes = [1, 288], strides = [1, 1]} : vector<1x800xf32> to vector<1x288xf32>
      %254 = arith.truncf %253 : vector<1x288xf32> to vector<1x288xbf16>
      %c0_185 = arith.constant 0 : index
      %c0_186 = arith.constant 0 : index
      %255 = vector.load %arg19[%c0_185, %c0_186] : memref<288x2048xbf16, #tpu.memory_space<vmem>>, vector<288x2048xbf16>
      %cst_187 = arith.constant dense<0.000000e+00> : vector<1x2048xf32>
      %256 = tpu.matmul %254, %255, %cst_187 {dimension_numbers = #tpu.dot_dimension_numbers<[1], [0], [0], [1], [0, 0, 1, 1], [], []>} : vector<1x288xbf16>, vector<288x2048xbf16>, vector<1x2048xf32> -> vector<1x2048xf32>
      %257 = vector.extract_strided_slice %256 {offsets = [0, 0], sizes = [1, 1024], strides = [1, 1]} : vector<1x2048xf32> to vector<1x1024xf32>
      %c0_188 = arith.constant 0 : index
      %c0_189 = arith.constant 0 : index
      %c0_190 = arith.constant 0 : index
      %258 = vector.load %arg28[%c0_188, %c0_189, %c0_190] : memref<2x1x1024xf32, #tpu.memory_space<vmem>>, vector<1x1x1024xf32>
      %259 = vector.shape_cast %258 : vector<1x1x1024xf32> to vector<1x1024xf32>
      %260 = vector.shape_cast %257 : vector<1x1024xf32> to vector<1x1x1024xf32>
      tpu.vector_store %arg28[%c0_188, %c0_189, %c0_190], %260 {strides = array<i32>} : memref<2x1x1024xf32, #tpu.memory_space<vmem>>, vector<1x1x1024xf32>,
      %261 = vector.extract_strided_slice %256 {offsets = [0, 1024], sizes = [1, 1024], strides = [1, 1]} : vector<1x2048xf32> to vector<1x1024xf32>
      %c1_191 = arith.constant 1 : index
      %c0_192 = arith.constant 0 : index
      %c0_193 = arith.constant 0 : index
      %262 = vector.load %arg28[%c1_191, %c0_192, %c0_193] : memref<2x1x1024xf32, #tpu.memory_space<vmem>>, vector<1x1x1024xf32>
      %263 = vector.shape_cast %262 : vector<1x1x1024xf32> to vector<1x1024xf32>
      %264 = vector.shape_cast %261 : vector<1x1024xf32> to vector<1x1x1024xf32>
      tpu.vector_store %arg28[%c1_191, %c0_192, %c0_193], %264 {strides = array<i32>} : memref<2x1x1024xf32, #tpu.memory_space<vmem>>, vector<1x1x1024xf32>,
    } else {
    }
    %c0_i32_2 = arith.constant 0 : i32
    %5 = arith.cmpi eq, %arg1, %c0_i32_2 : i32
    %6 = arith.extui %5 : i1 to i32
    %c0_i32_3 = arith.constant 0 : i32
    %7 = arith.cmpi ne, %6, %c0_i32_3 : i32
    scf.if %7 {
      %c0_18 = arith.constant 0 : index
      %c0_19 = arith.constant 0 : index
      %c0_20 = arith.constant 0 : index
      %31 = vector.load %arg16[%c0_18, %c0_19, %c0_20] : memref<1x1x512xf32, #tpu.memory_space<vmem>>, vector<1x1x512xf32>
      %32 = vector.shape_cast %31 : vector<1x1x512xf32> to vector<1x512xf32>
      %c0_21 = arith.constant 0 : index
      %c0_22 = arith.constant 0 : index
      %33 = vector.load %arg26[%c0_21, %c0_22] : memref<1x1024xf32, #tpu.memory_space<vmem>>, vector<1x512xf32>
      tpu.vector_store %arg26[%c0_21, %c0_22], %32 {strides = array<i32>} : memref<1x1024xf32, #tpu.memory_space<vmem>>, vector<1x512xf32>,
    } else {
    }
    %c0 = arith.constant 0 : index
    %c0_4 = arith.constant 0 : index
    %8 = vector.load %arg26[%c0, %c0_4] : memref<1x1024xf32, #tpu.memory_space<vmem>>, vector<1x1024xf32>
    %9 = arith.truncf %8 : vector<1x1024xf32> to vector<1x1024xbf16>
    %c0_5 = arith.constant 0 : index
    %c0_6 = arith.constant 0 : index
    %c0_7 = arith.constant 0 : index
    %10 = vector.load %arg18[%c0_5, %c0_6, %c0_7] : memref<1x1024x1024xbf16, #tpu.memory_space<vmem>>, vector<1x1024x1024xbf16>
    %11 = vector.shape_cast %10 : vector<1x1024x1024xbf16> to vector<1024x1024xbf16>
    %cst = arith.constant dense<0.000000e+00> : vector<1x1024xf32>
    %12 = tpu.matmul %9, %11, %cst {dimension_numbers = #tpu.dot_dimension_numbers<[1], [0], [0], [1], [0, 0, 1, 1], [], []>} : vector<1x1024xbf16>, vector<1024x1024xbf16>, vector<1x1024xf32> -> vector<1x1024xf32>
    %c0_8 = arith.constant 0 : index
    %c0_9 = arith.constant 0 : index
    %c0_10 = arith.constant 0 : index
    %13 = vector.load %arg20[%c0_8, %c0_9, %c0_10] : memref<1x1x1024xf32, #tpu.memory_space<vmem>>, vector<1x1x1024xf32>
    %14 = vector.shape_cast %13 : vector<1x1x1024xf32> to vector<1x1024xf32>
    %15 = arith.addf %12, %14 : vector<1x1024xf32>
    %16 = arith.index_cast %arg1 : i32 to index
    %c0_11 = arith.constant 0 : index
    %c0_12 = arith.constant 0 : index
    %17 = vector.load %arg27[%16, %c0_11, %c0_12] : memref<2x1x1024xf32, #tpu.memory_space<vmem>>, vector<1x1x1024xf32>
    %18 = vector.shape_cast %17 : vector<1x1x1024xf32> to vector<1x1024xf32>
    %19 = vector.shape_cast %15 : vector<1x1024xf32> to vector<1x1x1024xf32>
    tpu.vector_store %arg27[%16, %c0_11, %c0_12], %19 {strides = array<i32>} : memref<2x1x1024xf32, #tpu.memory_space<vmem>>, vector<1x1x1024xf32>,
    %c0_i32_13 = arith.constant 0 : i32
    %20 = arith.cmpi eq, %arg0, %c0_i32_13 : i32
    %21 = arith.extui %20 : i1 to i32
    %c0_i32_14 = arith.constant 0 : i32
    %22 = arith.cmpi ne, %21, %c0_i32_14 : i32
    scf.if %22 {
      %31 = arith.index_cast %arg1 : i32 to index
      %c0_18 = arith.constant 0 : index
      %c0_19 = arith.constant 0 : index
      %32 = vector.load %arg27[%31, %c0_18, %c0_19] : memref<2x1x1024xf32, #tpu.memory_space<vmem>>, vector<1x1x1024xf32>
      %33 = vector.shape_cast %32 : vector<1x1x1024xf32> to vector<1x1024xf32>
      %34 = arith.index_cast %arg1 : i32 to index
      %c0_20 = arith.constant 0 : index
      %c0_21 = arith.constant 0 : index
      %35 = vector.load %arg28[%34, %c0_20, %c0_21] : memref<2x1x1024xf32, #tpu.memory_space<vmem>>, vector<1x1x1024xf32>
      %36 = vector.shape_cast %35 : vector<1x1x1024xf32> to vector<1x1024xf32>
      %37 = arith.addf %33, %36 : vector<1x1024xf32>
      %38 = arith.index_cast %arg1 : i32 to index
      %c0_22 = arith.constant 0 : index
      %c0_23 = arith.constant 0 : index
      %39 = vector.load %arg27[%38, %c0_22, %c0_23] : memref<2x1x1024xf32, #tpu.memory_space<vmem>>, vector<1x1x1024xf32>
      %40 = vector.shape_cast %39 : vector<1x1x1024xf32> to vector<1x1024xf32>
      %41 = vector.shape_cast %37 : vector<1x1024xf32> to vector<1x1x1024xf32>
      tpu.vector_store %arg27[%38, %c0_22, %c0_23], %41 {strides = array<i32>} : memref<2x1x1024xf32, #tpu.memory_space<vmem>>, vector<1x1x1024xf32>,
    } else {
    }
    %c1_i32 = arith.constant 1 : i32
    %23 = arith.cmpi eq, %arg1, %c1_i32 : i32
    %24 = arith.extui %23 : i1 to i32
    %c0_i32_15 = arith.constant 0 : i32
    %25 = arith.cmpi ne, %24, %c0_i32_15 : i32
    scf.if %25 {
      %c0_18 = arith.constant 0 : index
      %c0_19 = arith.constant 0 : index
      %c0_20 = arith.constant 0 : index
      %31 = vector.load %arg27[%c0_18, %c0_19, %c0_20] : memref<2x1x1024xf32, #tpu.memory_space<vmem>>, vector<1x1x1024xf32>
      %32 = vector.shape_cast %31 : vector<1x1x1024xf32> to vector<1x1024xf32>
      %c1 = arith.constant 1 : index
      %c0_21 = arith.constant 0 : index
      %c0_22 = arith.constant 0 : index
      %33 = vector.load %arg27[%c1, %c0_21, %c0_22] : memref<2x1x1024xf32, #tpu.memory_space<vmem>>, vector<1x1x1024xf32>
      %34 = vector.shape_cast %33 : vector<1x1x1024xf32> to vector<1x1024xf32>
      %35 = vector.extract_strided_slice %32 {offsets = [0, 0], sizes = [1, 512], strides = [1, 1]} : vector<1x1024xf32> to vector<1x512xf32>
      %cst_23 = arith.constant 5.000000e-01 : f32
      %36 = vector.broadcast %cst_23 : f32 to vector<1x512xf32>
      %37 = arith.mulf %36, %35 : vector<1x512xf32>
      %38 = math.tanh %37 : vector<1x512xf32>
      %cst_24 = arith.constant 5.000000e-01 : f32
      %39 = vector.broadcast %cst_24 : f32 to vector<1x512xf32>
      %40 = arith.mulf %39, %38 : vector<1x512xf32>
      %cst_25 = arith.constant 5.000000e-01 : f32
      %41 = vector.broadcast %cst_25 : f32 to vector<1x512xf32>
      %42 = arith.addf %40, %41 : vector<1x512xf32>
      %43 = vector.extract_strided_slice %32 {offsets = [0, 512], sizes = [1, 512], strides = [1, 1]} : vector<1x1024xf32> to vector<1x512xf32>
      %cst_26 = arith.constant 5.000000e-01 : f32
      %44 = vector.broadcast %cst_26 : f32 to vector<1x512xf32>
      %45 = arith.mulf %44, %43 : vector<1x512xf32>
      %46 = math.tanh %45 : vector<1x512xf32>
      %cst_27 = arith.constant 5.000000e-01 : f32
      %47 = vector.broadcast %cst_27 : f32 to vector<1x512xf32>
      %48 = arith.mulf %47, %46 : vector<1x512xf32>
      %cst_28 = arith.constant 5.000000e-01 : f32
      %49 = vector.broadcast %cst_28 : f32 to vector<1x512xf32>
      %50 = arith.addf %48, %49 : vector<1x512xf32>
      %51 = vector.extract_strided_slice %34 {offsets = [0, 0], sizes = [1, 512], strides = [1, 1]} : vector<1x1024xf32> to vector<1x512xf32>
      %52 = math.tanh %51 : vector<1x512xf32>
      %53 = vector.extract_strided_slice %34 {offsets = [0, 512], sizes = [1, 512], strides = [1, 1]} : vector<1x1024xf32> to vector<1x512xf32>
      %cst_29 = arith.constant 5.000000e-01 : f32
      %54 = vector.broadcast %cst_29 : f32 to vector<1x512xf32>
      %55 = arith.mulf %54, %53 : vector<1x512xf32>
      %56 = math.tanh %55 : vector<1x512xf32>
      %cst_30 = arith.constant 5.000000e-01 : f32
      %57 = vector.broadcast %cst_30 : f32 to vector<1x512xf32>
      %58 = arith.mulf %57, %56 : vector<1x512xf32>
      %cst_31 = arith.constant 5.000000e-01 : f32
      %59 = vector.broadcast %cst_31 : f32 to vector<1x512xf32>
      %60 = arith.addf %58, %59 : vector<1x512xf32>
      %c0_32 = arith.constant 0 : index
      %c0_33 = arith.constant 0 : index
      %c0_34 = arith.constant 0 : index
      %61 = vector.load %arg17[%c0_32, %c0_33, %c0_34] : memref<1x1x512xf32, #tpu.memory_space<vmem>>, vector<1x1x512xf32>
      %62 = vector.shape_cast %61 : vector<1x1x512xf32> to vector<1x512xf32>
      %63 = arith.mulf %50, %62 : vector<1x512xf32>
      %64 = arith.mulf %42, %52 : vector<1x512xf32>
      %65 = arith.addf %63, %64 : vector<1x512xf32>
      %66 = math.tanh %65 : vector<1x512xf32>
      %67 = arith.mulf %60, %66 : vector<1x512xf32>
      %c0_35 = arith.constant 0 : index
      %c0_36 = arith.constant 0 : index
      %c0_37 = arith.constant 0 : index
      %68 = vector.load %arg24[%c0_35, %c0_36, %c0_37] : memref<1x1x512xf32, #tpu.memory_space<vmem>>, vector<1x1x512xf32>
      %69 = vector.shape_cast %68 : vector<1x1x512xf32> to vector<1x512xf32>
      %70 = vector.shape_cast %65 : vector<1x512xf32> to vector<1x1x512xf32>
      tpu.vector_store %arg24[%c0_35, %c0_36, %c0_37], %70 {strides = array<i32>} : memref<1x1x512xf32, #tpu.memory_space<vmem>>, vector<1x1x512xf32>,
      %c0_38 = arith.constant 0 : index
      %c0_39 = arith.constant 0 : index
      %c0_40 = arith.constant 0 : index
      %71 = vector.load %arg23[%c0_38, %c0_39, %c0_40] : memref<1x1x512xf32, #tpu.memory_space<vmem>>, vector<1x1x512xf32>
      %72 = vector.shape_cast %71 : vector<1x1x512xf32> to vector<1x512xf32>
      %73 = vector.shape_cast %67 : vector<1x512xf32> to vector<1x1x512xf32>
      tpu.vector_store %arg23[%c0_38, %c0_39, %c0_40], %73 {strides = array<i32>} : memref<1x1x512xf32, #tpu.memory_space<vmem>>, vector<1x1x512xf32>,
      %c0_41 = arith.constant 0 : index
      %c512 = arith.constant 512 : index
      %74 = vector.load %arg26[%c0_41, %c512] : memref<1x1024xf32, #tpu.memory_space<vmem>>, vector<1x512xf32>
      tpu.vector_store %arg26[%c0_41, %c512], %67 {strides = array<i32>} : memref<1x1024xf32, #tpu.memory_space<vmem>>, vector<1x512xf32>,
    } else {
    }
    %c2_i32 = arith.constant 2 : i32
    %26 = arith.cmpi eq, %arg0, %c2_i32 : i32
    %c1_i32_16 = arith.constant 1 : i32
    %27 = arith.cmpi eq, %arg1, %c1_i32_16 : i32
    %28 = arith.andi %26, %27 : i1
    %29 = arith.extui %28 : i1 to i32
    %c0_i32_17 = arith.constant 0 : i32
    %30 = arith.cmpi ne, %29, %c0_i32_17 : i32
    scf.if %30 {
      %c0_18 = arith.constant 0 : index
      %c512 = arith.constant 512 : index
      %31 = vector.load %arg26[%c0_18, %c512] : memref<1x1024xf32, #tpu.memory_space<vmem>>, vector<1x512xf32>
      %32 = arith.truncf %31 : vector<1x512xf32> to vector<1x512xbf16>
      %c0_19 = arith.constant 0 : index
      %c0_20 = arith.constant 0 : index
      %33 = vector.load %arg21[%c0_19, %c0_20] : memref<512x256xbf16, #tpu.memory_space<vmem>>, vector<512x256xbf16>
      %cst_21 = arith.constant dense<0.000000e+00> : vector<1x256xf32>
      %34 = tpu.matmul %32, %33, %cst_21 {dimension_numbers = #tpu.dot_dimension_numbers<[1], [0], [0], [1], [0, 0, 1, 1], [], []>} : vector<1x512xbf16>, vector<512x256xbf16>, vector<1x256xf32> -> vector<1x256xf32>
      %c0_22 = arith.constant 0 : index
      %c0_23 = arith.constant 0 : index
      %35 = vector.load %arg22[%c0_22, %c0_23] : memref<1x256xf32, #tpu.memory_space<vmem>>, vector<1x256xf32>
      %36 = arith.addf %34, %35 : vector<1x256xf32>
      %cst_24 = arith.constant dense<0xFF800000> : vector<1xf32>
      %37 = vector.multi_reduction <maximumf>, %36, %cst_24 [1] : vector<1x256xf32> to vector<1xf32>
      %38 = vector.shape_cast %37 : vector<1xf32> to vector<1x1xf32>
      %39 = vector.broadcast %38 : vector<1x1xf32> to vector<1x256xf32>
      %40 = arith.subf %36, %39 : vector<1x256xf32>
      %41 = math.exp %40 : vector<1x256xf32>
      %cst_25 = arith.constant dense<0.000000e+00> : vector<1xf32>
      %42 = vector.multi_reduction <add>, %41, %cst_25 [1] : vector<1x256xf32> to vector<1xf32>
      %43 = vector.shape_cast %42 : vector<1xf32> to vector<1x1xf32>
      %44 = tpu.reciprocal %43 {approx = true} : vector<1x1xf32> -> vector<1x1xf32>
      %45 = vector.broadcast %44 : vector<1x1xf32> to vector<1x256xf32>
      %46 = arith.mulf %41, %45 : vector<1x256xf32>
      %c0_26 = arith.constant 0 : index
      %c0_27 = arith.constant 0 : index
      %47 = vector.load %arg25[%c0_26, %c0_27] : memref<1x256xf32, #tpu.memory_space<vmem>>, vector<1x256xf32>
      tpu.vector_store %arg25[%c0_26, %c0_27], %46 {strides = array<i32>} : memref<1x256xf32, #tpu.memory_space<vmem>>, vector<1x256xf32>,
    } else {
    }
    return
  }
  func.func @transform_0(%arg0: i32, %arg1: i32) -> (i32, i32) {
    %c0_i32 = arith.constant 0 : i32
    %c0_i32_0 = arith.constant 0 : i32
    %c0_i32_1 = arith.constant 0 : i32
    return %c0_i32, %c0_i32_0 : i32, i32
  }
  func.func @transform_1(%arg0: i32, %arg1: i32) -> (i32, i32) {
    %c0_i32 = arith.constant 0 : i32
    %c0_i32_0 = arith.constant 0 : i32
    %c0_i32_1 = arith.constant 0 : i32
    return %c0_i32, %c0_i32_0 : i32, i32
  }
  func.func @transform_2(%arg0: i32, %arg1: i32) -> (i32, i32) {
    %c0_i32 = arith.constant 0 : i32
    %c0_i32_0 = arith.constant 0 : i32
    %c0_i32_1 = arith.constant 0 : i32
    return %c0_i32, %c0_i32_0 : i32, i32
  }
  func.func @transform_3(%arg0: i32, %arg1: i32) -> (i32, i32) {
    %c0_i32 = arith.constant 0 : i32
    %c0_i32_0 = arith.constant 0 : i32
    %c0_i32_1 = arith.constant 0 : i32
    return %c0_i32, %c0_i32_0 : i32, i32
  }
  func.func @transform_4(%arg0: i32, %arg1: i32) -> (i32, i32) {
    %c0_i32 = arith.constant 0 : i32
    %c0_i32_0 = arith.constant 0 : i32
    %c0_i32_1 = arith.constant 0 : i32
    return %c0_i32, %c0_i32_0 : i32, i32
  }
  func.func @transform_5(%arg0: i32, %arg1: i32) -> (i32, i32, i32) {
    %c0_i32 = arith.constant 0 : i32
    %c0_i32_0 = arith.constant 0 : i32
    %c0_i32_1 = arith.constant 0 : i32
    %c0_i32_2 = arith.constant 0 : i32
    return %c0_i32, %c0_i32_0, %c0_i32_1 : i32, i32, i32
  }
  func.func @transform_6(%arg0: i32, %arg1: i32) -> (i32, i32) {
    %c0_i32 = arith.constant 0 : i32
    %c0_i32_0 = arith.constant 0 : i32
    %c0_i32_1 = arith.constant 0 : i32
    return %c0_i32, %c0_i32_0 : i32, i32
  }
  func.func @transform_7(%arg0: i32, %arg1: i32) -> (i32, i32) {
    %c0_i32 = arith.constant 0 : i32
    %c0_i32_0 = arith.constant 0 : i32
    %c0_i32_1 = arith.constant 0 : i32
    return %c0_i32, %c0_i32_0 : i32, i32
  }
  func.func @transform_8(%arg0: i32, %arg1: i32) -> (i32, i32) {
    %c0_i32 = arith.constant 0 : i32
    %c0_i32_0 = arith.constant 0 : i32
    %c0_i32_1 = arith.constant 0 : i32
    return %c0_i32, %c0_i32_0 : i32, i32
  }
  func.func @transform_9(%arg0: i32, %arg1: i32) -> (i32, i32, i32) {
    %c0_i32 = arith.constant 0 : i32
    %c0_i32_0 = arith.constant 0 : i32
    %c0_i32_1 = arith.constant 0 : i32
    %c0_i32_2 = arith.constant 0 : i32
    return %c0_i32, %c0_i32_0, %c0_i32_1 : i32, i32, i32
  }
  func.func @transform_10(%arg0: i32, %arg1: i32) -> (i32, i32, i32) {
    %c0_i32 = arith.constant 0 : i32
    %c0_i32_0 = arith.constant 0 : i32
    %c0_i32_1 = arith.constant 0 : i32
    %c0_i32_2 = arith.constant 0 : i32
    return %c0_i32, %c0_i32_0, %c0_i32_1 : i32, i32, i32
  }
  func.func @transform_11(%arg0: i32, %arg1: i32) -> (i32, i32, i32) {
    %c0_i32 = arith.constant 0 : i32
    %c0_i32_0 = arith.constant 0 : i32
    %c0_i32_1 = arith.constant 0 : i32
    %c0_i32_2 = arith.constant 0 : i32
    return %c0_i32, %c0_i32_0, %c0_i32_1 : i32, i32, i32
  }
  func.func @transform_12(%arg0: i32, %arg1: i32) -> (i32, i32) {
    %c0_i32 = arith.constant 0 : i32
    %c0_i32_0 = arith.constant 0 : i32
    %c0_i32_1 = arith.constant 0 : i32
    return %c0_i32, %c0_i32_0 : i32, i32
  }
  func.func @transform_13(%arg0: i32, %arg1: i32) -> (i32, i32) {
    %c0_i32 = arith.constant 0 : i32
    %c0_i32_0 = arith.constant 0 : i32
    %c0_i32_1 = arith.constant 0 : i32
    return %c0_i32, %c0_i32_0 : i32, i32
  }
  func.func @transform_14(%arg0: i32, %arg1: i32) -> (i32, i32, i32) {
    %c0_i32 = arith.constant 0 : i32
    %c0_i32_0 = arith.constant 0 : i32
    %c0_i32_1 = arith.constant 0 : i32
    return %arg0, %c0_i32, %c0_i32_0 : i32, i32, i32
  }
  func.func @transform_15(%arg0: i32, %arg1: i32) -> (i32, i32, i32) {
    %c0_i32 = arith.constant 0 : i32
    %c0_i32_0 = arith.constant 0 : i32
    %c0_i32_1 = arith.constant 0 : i32
    return %arg0, %c0_i32, %c0_i32_0 : i32, i32, i32
  }
  func.func @transform_16(%arg0: i32, %arg1: i32) -> (i32, i32, i32) {
    %c0_i32 = arith.constant 0 : i32
    %c0_i32_0 = arith.constant 0 : i32
    return %arg0, %c0_i32, %arg1 : i32, i32, i32
  }
  func.func @transform_17(%arg0: i32, %arg1: i32) -> (i32, i32) {
    %c0_i32 = arith.constant 0 : i32
    %c0_i32_0 = arith.constant 0 : i32
    %c0_i32_1 = arith.constant 0 : i32
    return %c0_i32, %c0_i32_0 : i32, i32
  }
  func.func @transform_18(%arg0: i32, %arg1: i32) -> (i32, i32, i32) {
    %c0_i32 = arith.constant 0 : i32
    %c0_i32_0 = arith.constant 0 : i32
    return %arg0, %c0_i32, %arg1 : i32, i32, i32
  }
  func.func @transform_19(%arg0: i32, %arg1: i32) -> (i32, i32) {
    %c0_i32 = arith.constant 0 : i32
    %c0_i32_0 = arith.constant 0 : i32
    %c0_i32_1 = arith.constant 0 : i32
    return %c0_i32, %c0_i32_0 : i32, i32
  }
  func.func @transform_20(%arg0: i32, %arg1: i32) -> (i32, i32) {
    %c0_i32 = arith.constant 0 : i32
    %c0_i32_0 = arith.constant 0 : i32
    %c0_i32_1 = arith.constant 0 : i32
    return %c0_i32, %c0_i32_0 : i32, i32
  }
  func.func @transform_21(%arg0: i32, %arg1: i32) -> (i32, i32, i32) {
    %c0_i32 = arith.constant 0 : i32
    %c0_i32_0 = arith.constant 0 : i32
    %c0_i32_1 = arith.constant 0 : i32
    return %arg0, %c0_i32, %c0_i32_0 : i32, i32, i32
  }
  func.func @transform_22(%arg0: i32, %arg1: i32) -> (i32, i32, i32) {
    %c0_i32 = arith.constant 0 : i32
    %c0_i32_0 = arith.constant 0 : i32
    %c0_i32_1 = arith.constant 0 : i32
    return %arg0, %c0_i32, %c0_i32_0 : i32, i32, i32
  }
  func.func @transform_23(%arg0: i32, %arg1: i32) -> (i32, i32) {
    %c0_i32 = arith.constant 0 : i32
    %c0_i32_0 = arith.constant 0 : i32
    %c0_i32_1 = arith.constant 0 : i32
    return %c0_i32, %c0_i32_0 : i32, i32
  }
}

</mosaic_0001>

<bundles_post_ra>
// kernel: forward.1
= control target key start
LH: loop header
LB: loop body
LE: loop exit
PB: predicated region body
PF: predicated region fallthrough
CT: control target
= control target key end

     0   :  { %s19530_s0 = inlined_call_operand.vmem [shape: f32[25,121], index: 0, kind: input, shape index: {}]   ;;  %s19531_s1 = inlined_call_operand.vmem [shape: bf16[32,25], index: 1, kind: input, shape index: {}]   ;;  %s19532_s2 = inlined_call_operand.vmem [shape: f32[32,1], index: 2, kind: input, shape index: {}]   ;;  %s19533_s3 = inlined_call_operand.vmem [shape: f32[32,1], index: 3, kind: input, shape index: {}]   ;;  %s19534_s4 = inlined_call_operand.vmem [shape: f32[32,1], index: 4, kind: input, shape index: {}]   ;;  %s19535_s5 = inlined_call_operand.vmem [shape: bf16[9,32,32], index: 5, kind: input, shape index: {}]   ;;  %s19536_s6 = inlined_call_operand.vmem [shape: f32[32,1], index: 6, kind: input, shape index: {}]   ;;  %s19537_s7 = inlined_call_operand.vmem [shape: f32[32,1], index: 7, kind: input, shape index: {}]   ;;  %s19538_s8 = inlined_call_operand.vmem [shape: f32[32,1], index: 8, kind: input, shape index: {}]   ;;  %s19539_s9 = inlined_call_operand.vmem [shape: bf16[9,121,81], index: 9, kind: input, shape index: {}]   ;;  %s19540_s10 = inlined_call_operand.vmem [shape: bf16[9,81,25], index: 10, kind: input, shape index: {}]   ;;  %s19541_s11 = inlined_call_operand.vmem [shape: f32[9,1,25], index: 11, kind: input, shape index: {}]   ;;  %s19542_s12 = inlined_call_operand.vmem [shape: bf16[25,800], index: 12, kind: input, shape index: {}]   ;;  %s19543_s13 = inlined_call_operand.vmem [shape: f32[32,800], index: 13, kind: input, shape index: {}]   ;;  %s19544_s14 = inlined_call_operand.vmem [shape: f32[3,1,512], index: 14, kind: input, shape index: {}]   ;;  %s19545_s15 = inlined_call_operand.vmem [shape: f32[3,1,512], index: 15, kind: input, shape index: {}]   ;;  %s19546_s16 = inlined_call_operand.vmem [shape: bf16[3,1024,2048], index: 16, kind: input, shape index: {}]   ;;  %s19547_s17 = inlined_call_operand.vmem [shape: bf16[288,2048], index: 17, kind: input, shape index: {}]   ;;  %s19548_s18 = inlined_call_operand.vmem [shape: f32[3,1,2048], index: 18, kind: input, shape index: {}]   ;;  %s19549_s19 = inlined_call_operand.vmem [shape: bf16[512,256], index: 19, kind: input, shape index: {}]   ;;  %s19550_s20 = inlined_call_operand.vmem [shape: f32[1,256], index: 20, kind: input, shape index: {}]   ;;  %s19551_s21 = inlined_call_operand.hbm [shape: f32[3,1,512], index: 21, kind: output, shape index: {0}]   ;;  %s19552_s22 = inlined_call_operand.hbm [shape: f32[3,1,512], index: 22, kind: output, shape index: {1}]   ;;  %s19553_s23 = inlined_call_operand.hbm [shape: f32[1,256], index: 23, kind: output, shape index: {2}]  }
   0x1   :  { %19583 = sst [smem:[#allocation25_spill]] %s19530_s0 }
   0x2   :  { %19584 = sst [smem:[#allocation26_spill]] %s19531_s1 }
   0x3   :  { %19585 = sst [smem:[#allocation27_spill]] %s19532_s2 }
   0x4   :  { %19586 = sst [smem:[#allocation28_spill]] %s19533_s3 }
   0x5   :  { %19587 = sst [smem:[#allocation29_spill]] %s19534_s4 }
   0x6   :  { %19588 = sst [smem:[#allocation30_spill]] %s19535_s5 }
   0x7   :  { %19589 = sst [smem:[#allocation31_spill]] %s19536_s6 }
   0x8   :  { %19590 = sst [smem:[#allocation32_spill]] %s19537_s7 }
   0x9   :  { %19591 = sst [smem:[#allocation33_spill]] %s19538_s8 }
   0xa   :  { %19592 = sst [smem:[#allocation34_spill]] %s19539_s9 }
   0xb   :  { %19593 = sst [smem:[#allocation35_spill]] %s19540_s10 }
   0xc   :  { %19594 = sst [smem:[#allocation36_spill]] %s19541_s11 }
   0xd   :  { %19595 = sst [smem:[#allocation37_spill]] %s19542_s12 }
   0xe   :  { %19596 = sst [smem:[#allocation38_spill]] %s19543_s13 }
   0xf   :  { %19597 = sst [smem:[#allocation39_spill]] %s19544_s14 }
  0x10   :  { %19598 = sst [smem:[#allocation40_spill]] %s19546_s16 }
  0x11   :  { %19599 = sst [smem:[#allocation41_spill]] %s19547_s17 }
  0x12   :  { %19600 = sst [smem:[#allocation42_spill]] %s19549_s19 }
  0x13   :  { %19601 = sst [smem:[#allocation43_spill]] %s19550_s20 }
  0x14   :  { %19602 = sst [smem:[#allocation44_spill]] %s19551_s21 }
  0x15   :  { %19603 = sst [smem:[#allocation45_spill]] %s19552_s22 }
  0x16   :  { %19604 = sst [smem:[#allocation46_spill]] %s19553_s23 }
  0x17   :  { %29 = vsyncpa [#allocation7], 0 }
  0x18   :  { %31 = vsyncpa [#allocation7 + $0x1], 0 }
  0x19   :  { %32 = vsyncpa [#allocation9], 0 }
  0x1a   :  { %34 = vsyncpa [#allocation9 + $0x1], 0  ;;  %s15449_s4 = smov 0   ;;  %s15451_s30 = smov 0  }
  0x1b   :  { %s15453_s24 = smov 0   ;;  %s15455_s25 = smov 0  }
  0x1c   :  { %s15457_s5 = smov 0   ;;  %s15459_s1 = smov 0  }
  0x1d   :  { %s15461_s26 = smov 0   ;;  %s15463_s2 = smov 0  }
  0x1e   :  { %s15465_s6 = smov 0   ;;  %s15467_s27 = smov 0  }
  0x1f LB: > { %19605 = sst [smem:[#allocation14_spill]] %s15281_s4  ;;  %s49_s29 = sadd.s32 1, %s15309_s2  ;;  %s15317_s27 = sphi %s15467_s27, %s40_s27   ;;  %s15313_s6 = sphi %s15465_s6, %s19675_s6   ;;  %s15309_s2 = sphi %s15463_s2, %s19669_s2   ;;  %s15305_s26 = sphi %s15461_s26, %s19668_s26   ;;  %s15301_s1 = sphi %s15459_s1, %s19674_s1   ;;  %s15297_s5 = sphi %s15457_s5, %s19666_s5   ;;  %s15293_s25 = sphi %s15455_s25, %s19673_s25   ;;  %s15289_s24 = sphi %s15453_s24, %s19664_s24   ;;  %s15285_s30 = sphi %s15451_s30, %s19672_s30   ;;  %s15281_s4 = sphi %s15449_s4, %s19671_s4  }
  0x20   : > { %19606 = sst [smem:[#allocation15_spill]] %s15289_s24  ;;  %s52_s3 = sadd.s32 1, %s15313_s6 }
  0x21   : > { %19607 = sst [smem:[#allocation16_spill]] %s15297_s5  ;;  %p50_p0 = scmp.ge.s32.totalorder %s49_s29, 2 }
  0x22   : > { %19608 = sst [smem:[#allocation17_spill]] %s15309_s2  ;;  %s407_s0 = sadd.s32 1, %s15297_s5 }
  0x23   : > { %19609 = sst [smem:[#allocation18_spill]] %s15313_s6  ;;  %p414_p1 = scmp.ne.s32.totalorder %s15297_s5, %s15293_s25 }
  0x24   : > { %p415_p2 = scmp.eq.s32.totalorder %s15317_s27, 0  ;;  %s19677_s29 = smov (%p50_p0, %s49_s29), 0 }
  0x25   : > { %19610 = sst [smem:[#allocation19_spill]] %s19677_s29  ;;  %s19679_s3 = smov (!%p50_p0, %s52_s3), %s15313_s6 }
  0x26   : > { %s403_s23 = ssub.s32 %s15309_s2, %s19677_s29  ;;  %p15512_p3 = por %p415_p2, %p414_p1 }
  0x27   : > { %p54_p4 = scmp.ge.s32.totalorder %s19679_s3, 3  ;;  %s524_s28 = sadd.s32 1, %s15289_s24 }
  0x28   : > { %p534_p5 = scmp.ne.s32.totalorder %s15289_s24, %s15285_s30  ;;  %s19612_s21 = sadd.s32 4294967295, %s15317_s27  }
  0x29   : > { %p15521_p6 = scmp.eq.s32.totalorder %s19612_s21, 5  ;;  %s19681_s3 = smov (%p54_p4, %s19679_s3), 0 }
  0x2a   : > { %19615 = sst [smem:[#allocation21_spill]] %s19681_s3  ;;  %p540_p8 = scmp.ne.s32.totalorder %s15285_s30, %s15281_s4 }
  0x2b   : > { %s19613_s22 = scalar_select %p15521_p6, 1, 0 }
  0x2c   : > { %p15529_p7 = por %p15521_p6, %p534_p5  ;;  %s402_s20 = ssub.s32 %s15313_s6, %s19681_s3 }
  0x2d   : > { %19614 = sst [smem:[#allocation20_spill]] %s19613_s22  ;;  %s19617_s19 = sadd.s32 4294967294, %s15317_s27  }
  0x2e   : > { %p541_p9 = scmp.eq.s32.totalorder %s19617_s19, 5  ;;  %s404_s17 = sor.u32 %s403_s23, %s402_s20 }
  0x2f   : > { %p522_p10 = scmp.eq.s32.totalorder %s402_s20, 0  ;;  %p405_p11 = scmp.eq.s32.totalorder %s404_s17, 0 }
  0x30   : > { %p15539_p12 = por %p541_p9, %p540_p8  ;;  %p12725_p13 = scmp.ge.s32.totalorder %s15317_s27, 6 }
  0x31   : > { %s15544_s13 = scalar_select %p522_p10, %s15289_s24, %s524_s28  }
  0x32   : > { %s19618_s21 = scalar_select %p15539_p12, 1, 0 }
  0x33   : > { %19620 = sst [smem:[#allocation23_spill]] %s15544_s13  ;;  %655 = sbr.rel (%p12725_p13) target bundleno = 322 (0x142), region = 84 }
  0x34   : > { %19619 = sst [smem:[#allocation22_spill]] %s19618_s21 }
  0x35   : > { %s15547_s11 = scalar_select %p405_p11, %s15297_s5, %s407_s0  }
  0x37   : > { %19621 = sst [smem:[#allocation24_spill]] %s15547_s11 }
  0x38   : > { %672 = sbr.rel (!%p15512_p3) target bundleno = 322 (0x142), region = 96  ;;  %s674_s19 = sand.u32 (%p15512_p3), 1, %s15297_s5  }
  0x39   : > { %s12727_s20 = sshll.u32 (%p15512_p3), %s15309_s2, 3  ;;  %s12726_s17 = sshll.u32 (%p15512_p3), %s674_s19, 12 }
  0x3a   : > { %s12728_s23 = sshll.u32 (%p15512_p3), %s15313_s6, 11  ;;  %s19622_s16 = sld [smem:[#allocation40_spill]] (%p15512_p3) }
  0x3b   : > { %s679_s3 = sadd.s32 (%p15512_p3), %s12728_s23, %s12727_s20  ;;  %s15563_s7 = scalar_lea.vmem (%p15512_p3), [#allocation5], %s12726_s17 }
  0x3c   : > { %s12729_s4 = sshll.u32 (%p15512_p3), %s679_s3, 2 }
  0x40   : > { %s15558_s0 = scalar_lea.vmem %s19622_s16, %s12729_s4 }
  0x41   : > { %v694_v0 = vld [vmem:[%s15558_s0] sm:$0xff]  ;;  %v696_v1 = vld [vmem:[%s15558_s0 + $0x8] sm:$0xff]  ;;  %v698_v2 = vld [vmem:[%s15558_s0 + $0x10] sm:$0xff] }
  0x42   : > { %695 = vst [vmem:[%s15563_s7] sm:$0xff] %v694_v0  ;;  %697 = vst [vmem:[%s15563_s7 + $0x8] sm:$0xff] %v696_v1  ;;  %v700_v3 = vld [vmem:[%s15558_s0 + $0x18] sm:$0xff]  ;;  %v702_v4 = vld [vmem:[%s15558_s0 + $0x40] sm:$0xff] }
  0x43   : > { %699 = vst [vmem:[%s15563_s7 + $0x10] sm:$0xff] %v698_v2  ;;  %v704_v5 = vld [vmem:[%s15558_s0 + $0x48] sm:$0xff]  ;;  %701 = vst [vmem:[%s15563_s7 + $0x18] sm:$0xff] %v700_v3  ;;  %v706_v6 = vld [vmem:[%s15558_s0 + $0x50] sm:$0xff] }
  0x44   : > { %703 = vst [vmem:[%s15563_s7 + $0x20] sm:$0xff] %v702_v4  ;;  %705 = vst [vmem:[%s15563_s7 + $0x28] sm:$0xff] %v704_v5  ;;  %v708_v7 = vld [vmem:[%s15558_s0 + $0x58] sm:$0xff]  ;;  %v710_v8 = vld [vmem:[%s15558_s0 + $0x80] sm:$0xff] }
  0x45   : > { %707 = vst [vmem:[%s15563_s7 + $0x30] sm:$0xff] %v706_v6  ;;  %709 = vst [vmem:[%s15563_s7 + $0x38] sm:$0xff] %v708_v7  ;;  %v712_v9 = vld [vmem:[%s15558_s0 + $0x88] sm:$0xff]  ;;  %v714_v10 = vld [vmem:[%s15558_s0 + $0x90] sm:$0xff] }
  0x46   : > { %711 = vst [vmem:[%s15563_s7 + $0x40] sm:$0xff] %v710_v8  ;;  %v716_v11 = vld [vmem:[%s15558_s0 + $0x98] sm:$0xff]  ;;  %713 = vst [vmem:[%s15563_s7 + $0x48] sm:$0xff] %v712_v9  ;;  %v718_v12 = vld [vmem:[%s15558_s0 + $0xc0] sm:$0xff] }
  0x47   : > { %715 = vst [vmem:[%s15563_s7 + $0x50] sm:$0xff] %v714_v10  ;;  %717 = vst [vmem:[%s15563_s7 + $0x58] sm:$0xff] %v716_v11  ;;  %v720_v13 = vld [vmem:[%s15558_s0 + $0xc8] sm:$0xff]  ;;  %v722_v14 = vld [vmem:[%s15558_s0 + $0xd0] sm:$0xff] }
  0x48   : > { %719 = vst [vmem:[%s15563_s7 + $0x60] sm:$0xff] %v718_v12  ;;  %721 = vst [vmem:[%s15563_s7 + $0x68] sm:$0xff] %v720_v13  ;;  %v724_v15 = vld [vmem:[%s15558_s0 + $0xd8] sm:$0xff]  ;;  %v726_v16 = vld [vmem:[%s15558_s0 + $0x100] sm:$0xff] }
  0x49   : > { %723 = vst [vmem:[%s15563_s7 + $0x70] sm:$0xff] %v722_v14  ;;  %v728_v17 = vld [vmem:[%s15558_s0 + $0x108] sm:$0xff]  ;;  %725 = vst [vmem:[%s15563_s7 + $0x78] sm:$0xff] %v724_v15  ;;  %v730_v18 = vld [vmem:[%s15558_s0 + $0x110] sm:$0xff] }
  0x4a   : > { %727 = vst [vmem:[%s15563_s7 + $0x80] sm:$0xff] %v726_v16  ;;  %729 = vst [vmem:[%s15563_s7 + $0x88] sm:$0xff] %v728_v17  ;;  %v732_v19 = vld [vmem:[%s15558_s0 + $0x118] sm:$0xff]  ;;  %v734_v20 = vld [vmem:[%s15558_s0 + $0x140] sm:$0xff] }
  0x4b   : > { %731 = vst [vmem:[%s15563_s7 + $0x90] sm:$0xff] %v730_v18  ;;  %733 = vst [vmem:[%s15563_s7 + $0x98] sm:$0xff] %v732_v19  ;;  %v736_v21 = vld [vmem:[%s15558_s0 + $0x148] sm:$0xff]  ;;  %v738_v22 = vld [vmem:[%s15558_s0 + $0x150] sm:$0xff] }
  0x4c   : > { %735 = vst [vmem:[%s15563_s7 + $0xa0] sm:$0xff] %v734_v20  ;;  %v740_v23 = vld [vmem:[%s15558_s0 + $0x158] sm:$0xff]  ;;  %737 = vst [vmem:[%s15563_s7 + $0xa8] sm:$0xff] %v736_v21  ;;  %v742_v24 = vld [vmem:[%s15558_s0 + $0x180] sm:$0xff] }
  0x4d   : > { %739 = vst [vmem:[%s15563_s7 + $0xb0] sm:$0xff] %v738_v22  ;;  %741 = vst [vmem:[%s15563_s7 + $0xb8] sm:$0xff] %v740_v23  ;;  %v744_v25 = vld [vmem:[%s15558_s0 + $0x188] sm:$0xff]  ;;  %v746_v26 = vld [vmem:[%s15558_s0 + $0x190] sm:$0xff] }
  0x4e   : > { %743 = vst [vmem:[%s15563_s7 + $0xc0] sm:$0xff] %v742_v24  ;;  %745 = vst [vmem:[%s15563_s7 + $0xc8] sm:$0xff] %v744_v25  ;;  %v748_v27 = vld [vmem:[%s15558_s0 + $0x198] sm:$0xff]  ;;  %v750_v28 = vld [vmem:[%s15558_s0 + $0x1c0] sm:$0xff] }
  0x4f   : > { %747 = vst [vmem:[%s15563_s7 + $0xd0] sm:$0xff] %v746_v26  ;;  %v752_v29 = vld [vmem:[%s15558_s0 + $0x1c8] sm:$0xff]  ;;  %749 = vst [vmem:[%s15563_s7 + $0xd8] sm:$0xff] %v748_v27  ;;  %v754_v30 = vld [vmem:[%s15558_s0 + $0x1d0] sm:$0xff] }
  0x50   : > { %751 = vst [vmem:[%s15563_s7 + $0xe0] sm:$0xff] %v750_v28  ;;  %753 = vst [vmem:[%s15563_s7 + $0xe8] sm:$0xff] %v752_v29  ;;  %v756_v31 = vld [vmem:[%s15558_s0 + $0x1d8] sm:$0xff]  ;;  %v758_v32 = vld [vmem:[%s15558_s0 + $0x200] sm:$0xff] }
  0x51   : > { %755 = vst [vmem:[%s15563_s7 + $0xf0] sm:$0xff] %v754_v30  ;;  %757 = vst [vmem:[%s15563_s7 + $0xf8] sm:$0xff] %v756_v31  ;;  %v760_v33 = vld [vmem:[%s15558_s0 + $0x208] sm:$0xff]  ;;  %v762_v34 = vld [vmem:[%s15558_s0 + $0x210] sm:$0xff] }
  0x52   : > { %759 = vst [vmem:[%s15563_s7 + $0x100] sm:$0xff] %v758_v32  ;;  %v764_v35 = vld [vmem:[%s15558_s0 + $0x218] sm:$0xff]  ;;  %761 = vst [vmem:[%s15563_s7 + $0x108] sm:$0xff] %v760_v33  ;;  %v766_v36 = vld [vmem:[%s15558_s0 + $0x240] sm:$0xff] }
  0x53   : > { %763 = vst [vmem:[%s15563_s7 + $0x110] sm:$0xff] %v762_v34  ;;  %765 = vst [vmem:[%s15563_s7 + $0x118] sm:$0xff] %v764_v35  ;;  %v768_v37 = vld [vmem:[%s15558_s0 + $0x248] sm:$0xff]  ;;  %v770_v38 = vld [vmem:[%s15558_s0 + $0x250] sm:$0xff] }
  0x54   : > { %767 = vst [vmem:[%s15563_s7 + $0x120] sm:$0xff] %v766_v36  ;;  %769 = vst [vmem:[%s15563_s7 + $0x128] sm:$0xff] %v768_v37  ;;  %v772_v39 = vld [vmem:[%s15558_s0 + $0x258] sm:$0xff]  ;;  %v774_v40 = vld [vmem:[%s15558_s0 + $0x280] sm:$0xff] }
  0x55   : > { %771 = vst [vmem:[%s15563_s7 + $0x130] sm:$0xff] %v770_v38  ;;  %v776_v41 = vld [vmem:[%s15558_s0 + $0x288] sm:$0xff]  ;;  %773 = vst [vmem:[%s15563_s7 + $0x138] sm:$0xff] %v772_v39  ;;  %v778_v42 = vld [vmem:[%s15558_s0 + $0x290] sm:$0xff] }
  0x56   : > { %775 = vst [vmem:[%s15563_s7 + $0x140] sm:$0xff] %v774_v40  ;;  %777 = vst [vmem:[%s15563_s7 + $0x148] sm:$0xff] %v776_v41  ;;  %v780_v43 = vld [vmem:[%s15558_s0 + $0x298] sm:$0xff]  ;;  %v782_v44 = vld [vmem:[%s15558_s0 + $0x2c0] sm:$0xff] }
  0x57   : > { %779 = vst [vmem:[%s15563_s7 + $0x150] sm:$0xff] %v778_v42  ;;  %781 = vst [vmem:[%s15563_s7 + $0x158] sm:$0xff] %v780_v43  ;;  %v784_v45 = vld [vmem:[%s15558_s0 + $0x2c8] sm:$0xff]  ;;  %v786_v46 = vld [vmem:[%s15558_s0 + $0x2d0] sm:$0xff] }
  0x58   : > { %783 = vst [vmem:[%s15563_s7 + $0x160] sm:$0xff] %v782_v44  ;;  %v788_v47 = vld [vmem:[%s15558_s0 + $0x2d8] sm:$0xff]  ;;  %785 = vst [vmem:[%s15563_s7 + $0x168] sm:$0xff] %v784_v45  ;;  %v790_v48 = vld [vmem:[%s15558_s0 + $0x300] sm:$0xff] }
  0x59   : > { %787 = vst [vmem:[%s15563_s7 + $0x170] sm:$0xff] %v786_v46  ;;  %789 = vst [vmem:[%s15563_s7 + $0x178] sm:$0xff] %v788_v47  ;;  %v792_v49 = vld [vmem:[%s15558_s0 + $0x308] sm:$0xff]  ;;  %v794_v50 = vld [vmem:[%s15558_s0 + $0x310] sm:$0xff] }
  0x5a   : > { %791 = vst [vmem:[%s15563_s7 + $0x180] sm:$0xff] %v790_v48  ;;  %793 = vst [vmem:[%s15563_s7 + $0x188] sm:$0xff] %v792_v49  ;;  %v796_v51 = vld [vmem:[%s15558_s0 + $0x318] sm:$0xff]  ;;  %v798_v52 = vld [vmem:[%s15558_s0 + $0x340] sm:$0xff] }
  0x5b   : > { %795 = vst [vmem:[%s15563_s7 + $0x190] sm:$0xff] %v794_v50  ;;  %v800_v53 = vld [vmem:[%s15558_s0 + $0x348] sm:$0xff]  ;;  %797 = vst [vmem:[%s15563_s7 + $0x198] sm:$0xff] %v796_v51  ;;  %v802_v54 = vld [vmem:[%s15558_s0 + $0x350] sm:$0xff] }
  0x5c   : > { %799 = vst [vmem:[%s15563_s7 + $0x1a0] sm:$0xff] %v798_v52  ;;  %801 = vst [vmem:[%s15563_s7 + $0x1a8] sm:$0xff] %v800_v53  ;;  %v804_v55 = vld [vmem:[%s15558_s0 + $0x358] sm:$0xff]  ;;  %v806_v56 = vld [vmem:[%s15558_s0 + $0x380] sm:$0xff] }
  0x5d   : > { %803 = vst [vmem:[%s15563_s7 + $0x1b0] sm:$0xff] %v802_v54  ;;  %805 = vst [vmem:[%s15563_s7 + $0x1b8] sm:$0xff] %v804_v55  ;;  %v808_v57 = vld [vmem:[%s15558_s0 + $0x388] sm:$0xff]  ;;  %v810_v58 = vld [vmem:[%s15558_s0 + $0x390] sm:$0xff] }
  0x5e   : > { %807 = vst [vmem:[%s15563_s7 + $0x1c0] sm:$0xff] %v806_v56  ;;  %v812_v59 = vld [vmem:[%s15558_s0 + $0x398] sm:$0xff]  ;;  %809 = vst [vmem:[%s15563_s7 + $0x1c8] sm:$0xff] %v808_v57  ;;  %v814_v60 = vld [vmem:[%s15558_s0 + $0x3c0] sm:$0xff] }
  0x5f   : > { %811 = vst [vmem:[%s15563_s7 + $0x1d0] sm:$0xff] %v810_v58  ;;  %813 = vst [vmem:[%s15563_s7 + $0x1d8] sm:$0xff] %v812_v59  ;;  %v816_v61 = vld [vmem:[%s15558_s0 + $0x3c8] sm:$0xff]  ;;  %v818_v62 = vld [vmem:[%s15558_s0 + $0x3d0] sm:$0xff] }
  0x60   : > { %815 = vst [vmem:[%s15563_s7 + $0x1e0] sm:$0xff] %v814_v60  ;;  %817 = vst [vmem:[%s15563_s7 + $0x1e8] sm:$0xff] %v816_v61  ;;  %v820_v63 = vld [vmem:[%s15558_s0 + $0x3d8] sm:$0xff]  ;;  %v822_v0 = vld [vmem:[%s15558_s0 + $0x400] sm:$0xff] }
  0x61   : > { %819 = vst [vmem:[%s15563_s7 + $0x1f0] sm:$0xff] %v818_v62  ;;  %v824_v1 = vld [vmem:[%s15558_s0 + $0x408] sm:$0xff]  ;;  %821 = vst [vmem:[%s15563_s7 + $0x1f8] sm:$0xff] %v820_v63  ;;  %v826_v2 = vld [vmem:[%s15558_s0 + $0x410] sm:$0xff] }
  0x62   : > { %823 = vst [vmem:[%s15563_s7 + $0x200] sm:$0xff] %v822_v0  ;;  %825 = vst [vmem:[%s15563_s7 + $0x208] sm:$0xff] %v824_v1  ;;  %v828_v3 = vld [vmem:[%s15558_s0 + $0x418] sm:$0xff]  ;;  %v830_v4 = vld [vmem:[%s15558_s0 + $0x440] sm:$0xff] }
  0x63   : > { %827 = vst [vmem:[%s15563_s7 + $0x210] sm:$0xff] %v826_v2  ;;  %829 = vst [vmem:[%s15563_s7 + $0x218] sm:$0xff] %v828_v3  ;;  %v832_v5 = vld [vmem:[%s15558_s0 + $0x448] sm:$0xff]  ;;  %v834_v6 = vld [vmem:[%s15558_s0 + $0x450] sm:$0xff] }
  0x64   : > { %831 = vst [vmem:[%s15563_s7 + $0x220] sm:$0xff] %v830_v4  ;;  %v836_v7 = vld [vmem:[%s15558_s0 + $0x458] sm:$0xff]  ;;  %833 = vst [vmem:[%s15563_s7 + $0x228] sm:$0xff] %v832_v5  ;;  %v838_v8 = vld [vmem:[%s15558_s0 + $0x480] sm:$0xff] }
  0x65   : > { %835 = vst [vmem:[%s15563_s7 + $0x230] sm:$0xff] %v834_v6  ;;  %837 = vst [vmem:[%s15563_s7 + $0x238] sm:$0xff] %v836_v7  ;;  %v840_v9 = vld [vmem:[%s15558_s0 + $0x488] sm:$0xff]  ;;  %v842_v10 = vld [vmem:[%s15558_s0 + $0x490] sm:$0xff] }
  0x66   : > { %839 = vst [vmem:[%s15563_s7 + $0x240] sm:$0xff] %v838_v8  ;;  %841 = vst [vmem:[%s15563_s7 + $0x248] sm:$0xff] %v840_v9  ;;  %v844_v11 = vld [vmem:[%s15558_s0 + $0x498] sm:$0xff]  ;;  %v846_v12 = vld [vmem:[%s15558_s0 + $0x4c0] sm:$0xff] }
  0x67   : > { %843 = vst [vmem:[%s15563_s7 + $0x250] sm:$0xff] %v842_v10  ;;  %v848_v13 = vld [vmem:[%s15558_s0 + $0x4c8] sm:$0xff]  ;;  %845 = vst [vmem:[%s15563_s7 + $0x258] sm:$0xff] %v844_v11  ;;  %v850_v14 = vld [vmem:[%s15558_s0 + $0x4d0] sm:$0xff] }
  0x68   : > { %847 = vst [vmem:[%s15563_s7 + $0x260] sm:$0xff] %v846_v12  ;;  %849 = vst [vmem:[%s15563_s7 + $0x268] sm:$0xff] %v848_v13  ;;  %v852_v15 = vld [vmem:[%s15558_s0 + $0x4d8] sm:$0xff]  ;;  %v854_v16 = vld [vmem:[%s15558_s0 + $0x500] sm:$0xff] }
  0x69   : > { %851 = vst [vmem:[%s15563_s7 + $0x270] sm:$0xff] %v850_v14  ;;  %853 = vst [vmem:[%s15563_s7 + $0x278] sm:$0xff] %v852_v15  ;;  %v856_v17 = vld [vmem:[%s15558_s0 + $0x508] sm:$0xff]  ;;  %v858_v18 = vld [vmem:[%s15558_s0 + $0x510] sm:$0xff] }
  0x6a   : > { %855 = vst [vmem:[%s15563_s7 + $0x280] sm:$0xff] %v854_v16  ;;  %v860_v19 = vld [vmem:[%s15558_s0 + $0x518] sm:$0xff]  ;;  %857 = vst [vmem:[%s15563_s7 + $0x288] sm:$0xff] %v856_v17  ;;  %v862_v20 = vld [vmem:[%s15558_s0 + $0x540] sm:$0xff] }
  0x6b   : > { %859 = vst [vmem:[%s15563_s7 + $0x290] sm:$0xff] %v858_v18  ;;  %861 = vst [vmem:[%s15563_s7 + $0x298] sm:$0xff] %v860_v19  ;;  %v864_v21 = vld [vmem:[%s15558_s0 + $0x548] sm:$0xff]  ;;  %v866_v22 = vld [vmem:[%s15558_s0 + $0x550] sm:$0xff] }
  0x6c   : > { %863 = vst [vmem:[%s15563_s7 + $0x2a0] sm:$0xff] %v862_v20  ;;  %865 = vst [vmem:[%s15563_s7 + $0x2a8] sm:$0xff] %v864_v21  ;;  %v868_v23 = vld [vmem:[%s15558_s0 + $0x558] sm:$0xff]  ;;  %v870_v24 = vld [vmem:[%s15558_s0 + $0x580] sm:$0xff] }
  0x6d   : > { %867 = vst [vmem:[%s15563_s7 + $0x2b0] sm:$0xff] %v866_v22  ;;  %v872_v25 = vld [vmem:[%s15558_s0 + $0x588] sm:$0xff]  ;;  %869 = vst [vmem:[%s15563_s7 + $0x2b8] sm:$0xff] %v868_v23  ;;  %v874_v26 = vld [vmem:[%s15558_s0 + $0x590] sm:$0xff] }
  0x6e   : > { %871 = vst [vmem:[%s15563_s7 + $0x2c0] sm:$0xff] %v870_v24  ;;  %873 = vst [vmem:[%s15563_s7 + $0x2c8] sm:$0xff] %v872_v25  ;;  %v876_v27 = vld [vmem:[%s15558_s0 + $0x598] sm:$0xff]  ;;  %v878_v28 = vld [vmem:[%s15558_s0 + $0x5c0] sm:$0xff] }
  0x6f   : > { %875 = vst [vmem:[%s15563_s7 + $0x2d0] sm:$0xff] %v874_v26  ;;  %877 = vst [vmem:[%s15563_s7 + $0x2d8] sm:$0xff] %v876_v27  ;;  %v880_v29 = vld [vmem:[%s15558_s0 + $0x5c8] sm:$0xff]  ;;  %v882_v30 = vld [vmem:[%s15558_s0 + $0x5d0] sm:$0xff] }
  0x70   : > { %879 = vst [vmem:[%s15563_s7 + $0x2e0] sm:$0xff] %v878_v28  ;;  %v884_v31 = vld [vmem:[%s15558_s0 + $0x5d8] sm:$0xff]  ;;  %881 = vst [vmem:[%s15563_s7 + $0x2e8] sm:$0xff] %v880_v29  ;;  %v886_v32 = vld [vmem:[%s15558_s0 + $0x600] sm:$0xff] }
  0x71   : > { %883 = vst [vmem:[%s15563_s7 + $0x2f0] sm:$0xff] %v882_v30  ;;  %885 = vst [vmem:[%s15563_s7 + $0x2f8] sm:$0xff] %v884_v31  ;;  %v888_v33 = vld [vmem:[%s15558_s0 + $0x608] sm:$0xff]  ;;  %v890_v34 = vld [vmem:[%s15558_s0 + $0x610] sm:$0xff] }
  0x72   : > { %887 = vst [vmem:[%s15563_s7 + $0x300] sm:$0xff] %v886_v32  ;;  %889 = vst [vmem:[%s15563_s7 + $0x308] sm:$0xff] %v888_v33  ;;  %v892_v35 = vld [vmem:[%s15558_s0 + $0x618] sm:$0xff]  ;;  %v894_v36 = vld [vmem:[%s15558_s0 + $0x640] sm:$0xff] }
  0x73   : > { %891 = vst [vmem:[%s15563_s7 + $0x310] sm:$0xff] %v890_v34  ;;  %v896_v37 = vld [vmem:[%s15558_s0 + $0x648] sm:$0xff]  ;;  %893 = vst [vmem:[%s15563_s7 + $0x318] sm:$0xff] %v892_v35  ;;  %v898_v38 = vld [vmem:[%s15558_s0 + $0x650] sm:$0xff] }
  0x74   : > { %895 = vst [vmem:[%s15563_s7 + $0x320] sm:$0xff] %v894_v36  ;;  %897 = vst [vmem:[%s15563_s7 + $0x328] sm:$0xff] %v896_v37  ;;  %v900_v39 = vld [vmem:[%s15558_s0 + $0x658] sm:$0xff]  ;;  %v902_v40 = vld [vmem:[%s15558_s0 + $0x680] sm:$0xff] }
  0x75   : > { %899 = vst [vmem:[%s15563_s7 + $0x330] sm:$0xff] %v898_v38  ;;  %901 = vst [vmem:[%s15563_s7 + $0x338] sm:$0xff] %v900_v39  ;;  %v904_v41 = vld [vmem:[%s15558_s0 + $0x688] sm:$0xff]  ;;  %v906_v42 = vld [vmem:[%s15558_s0 + $0x690] sm:$0xff] }
  0x76   : > { %903 = vst [vmem:[%s15563_s7 + $0x340] sm:$0xff] %v902_v40  ;;  %v908_v43 = vld [vmem:[%s15558_s0 + $0x698] sm:$0xff]  ;;  %905 = vst [vmem:[%s15563_s7 + $0x348] sm:$0xff] %v904_v41  ;;  %v910_v44 = vld [vmem:[%s15558_s0 + $0x6c0] sm:$0xff] }
  0x77   : > { %907 = vst [vmem:[%s15563_s7 + $0x350] sm:$0xff] %v906_v42  ;;  %909 = vst [vmem:[%s15563_s7 + $0x358] sm:$0xff] %v908_v43  ;;  %v912_v45 = vld [vmem:[%s15558_s0 + $0x6c8] sm:$0xff]  ;;  %v914_v46 = vld [vmem:[%s15558_s0 + $0x6d0] sm:$0xff] }
  0x78   : > { %911 = vst [vmem:[%s15563_s7 + $0x360] sm:$0xff] %v910_v44  ;;  %913 = vst [vmem:[%s15563_s7 + $0x368] sm:$0xff] %v912_v45  ;;  %v916_v47 = vld [vmem:[%s15558_s0 + $0x6d8] sm:$0xff]  ;;  %v918_v48 = vld [vmem:[%s15558_s0 + $0x700] sm:$0xff] }
  0x79   : > { %915 = vst [vmem:[%s15563_s7 + $0x370] sm:$0xff] %v914_v46  ;;  %v920_v49 = vld [vmem:[%s15558_s0 + $0x708] sm:$0xff]  ;;  %917 = vst [vmem:[%s15563_s7 + $0x378] sm:$0xff] %v916_v47  ;;  %v922_v50 = vld [vmem:[%s15558_s0 + $0x710] sm:$0xff] }
  0x7a   : > { %919 = vst [vmem:[%s15563_s7 + $0x380] sm:$0xff] %v918_v48  ;;  %921 = vst [vmem:[%s15563_s7 + $0x388] sm:$0xff] %v920_v49  ;;  %v924_v51 = vld [vmem:[%s15558_s0 + $0x718] sm:$0xff]  ;;  %v926_v52 = vld [vmem:[%s15558_s0 + $0x740] sm:$0xff] }
  0x7b   : > { %923 = vst [vmem:[%s15563_s7 + $0x390] sm:$0xff] %v922_v50  ;;  %925 = vst [vmem:[%s15563_s7 + $0x398] sm:$0xff] %v924_v51  ;;  %v928_v53 = vld [vmem:[%s15558_s0 + $0x748] sm:$0xff]  ;;  %v930_v54 = vld [vmem:[%s15558_s0 + $0x750] sm:$0xff] }
  0x7c   : > { %927 = vst [vmem:[%s15563_s7 + $0x3a0] sm:$0xff] %v926_v52  ;;  %v932_v55 = vld [vmem:[%s15558_s0 + $0x758] sm:$0xff]  ;;  %929 = vst [vmem:[%s15563_s7 + $0x3a8] sm:$0xff] %v928_v53  ;;  %v934_v56 = vld [vmem:[%s15558_s0 + $0x780] sm:$0xff] }
  0x7d   : > { %931 = vst [vmem:[%s15563_s7 + $0x3b0] sm:$0xff] %v930_v54  ;;  %933 = vst [vmem:[%s15563_s7 + $0x3b8] sm:$0xff] %v932_v55  ;;  %v936_v57 = vld [vmem:[%s15558_s0 + $0x788] sm:$0xff]  ;;  %v938_v58 = vld [vmem:[%s15558_s0 + $0x790] sm:$0xff] }
  0x7e   : > { %935 = vst [vmem:[%s15563_s7 + $0x3c0] sm:$0xff] %v934_v56  ;;  %937 = vst [vmem:[%s15563_s7 + $0x3c8] sm:$0xff] %v936_v57  ;;  %v940_v59 = vld [vmem:[%s15558_s0 + $0x798] sm:$0xff]  ;;  %v942_v60 = vld [vmem:[%s15558_s0 + $0x7c0] sm:$0xff] }
  0x7f   : > { %939 = vst [vmem:[%s15563_s7 + $0x3d0] sm:$0xff] %v938_v58  ;;  %v944_v61 = vld [vmem:[%s15558_s0 + $0x7c8] sm:$0xff]  ;;  %941 = vst [vmem:[%s15563_s7 + $0x3d8] sm:$0xff] %v940_v59  ;;  %v946_v62 = vld [vmem:[%s15558_s0 + $0x7d0] sm:$0xff] }
  0x80   : > { %943 = vst [vmem:[%s15563_s7 + $0x3e0] sm:$0xff] %v942_v60  ;;  %945 = vst [vmem:[%s15563_s7 + $0x3e8] sm:$0xff] %v944_v61  ;;  %v948_v63 = vld [vmem:[%s15558_s0 + $0x7d8] sm:$0xff]  ;;  %v950_v0 = vld [vmem:[%s15558_s0 + $0x800] sm:$0xff] }
  0x81   : > { %947 = vst [vmem:[%s15563_s7 + $0x3f0] sm:$0xff] %v946_v62  ;;  %949 = vst [vmem:[%s15563_s7 + $0x3f8] sm:$0xff] %v948_v63  ;;  %v952_v1 = vld [vmem:[%s15558_s0 + $0x808] sm:$0xff]  ;;  %v954_v2 = vld [vmem:[%s15558_s0 + $0x810] sm:$0xff] }
  0x82   : > { %951 = vst [vmem:[%s15563_s7 + $0x400] sm:$0xff] %v950_v0  ;;  %v956_v3 = vld [vmem:[%s15558_s0 + $0x818] sm:$0xff]  ;;  %953 = vst [vmem:[%s15563_s7 + $0x408] sm:$0xff] %v952_v1  ;;  %v958_v4 = vld [vmem:[%s15558_s0 + $0x840] sm:$0xff] }
  0x83   : > { %955 = vst [vmem:[%s15563_s7 + $0x410] sm:$0xff] %v954_v2  ;;  %957 = vst [vmem:[%s15563_s7 + $0x418] sm:$0xff] %v956_v3  ;;  %v960_v5 = vld [vmem:[%s15558_s0 + $0x848] sm:$0xff]  ;;  %v962_v6 = vld [vmem:[%s15558_s0 + $0x850] sm:$0xff] }
  0x84   : > { %959 = vst [vmem:[%s15563_s7 + $0x420] sm:$0xff] %v958_v4  ;;  %961 = vst [vmem:[%s15563_s7 + $0x428] sm:$0xff] %v960_v5  ;;  %v964_v7 = vld [vmem:[%s15558_s0 + $0x858] sm:$0xff]  ;;  %v966_v8 = vld [vmem:[%s15558_s0 + $0x880] sm:$0xff] }
  0x85   : > { %963 = vst [vmem:[%s15563_s7 + $0x430] sm:$0xff] %v962_v6  ;;  %v968_v9 = vld [vmem:[%s15558_s0 + $0x888] sm:$0xff]  ;;  %965 = vst [vmem:[%s15563_s7 + $0x438] sm:$0xff] %v964_v7  ;;  %v970_v10 = vld [vmem:[%s15558_s0 + $0x890] sm:$0xff] }
  0x86   : > { %967 = vst [vmem:[%s15563_s7 + $0x440] sm:$0xff] %v966_v8  ;;  %969 = vst [vmem:[%s15563_s7 + $0x448] sm:$0xff] %v968_v9  ;;  %v972_v11 = vld [vmem:[%s15558_s0 + $0x898] sm:$0xff]  ;;  %v974_v12 = vld [vmem:[%s15558_s0 + $0x8c0] sm:$0xff] }
  0x87   : > { %971 = vst [vmem:[%s15563_s7 + $0x450] sm:$0xff] %v970_v10  ;;  %973 = vst [vmem:[%s15563_s7 + $0x458] sm:$0xff] %v972_v11  ;;  %v976_v13 = vld [vmem:[%s15558_s0 + $0x8c8] sm:$0xff]  ;;  %v978_v14 = vld [vmem:[%s15558_s0 + $0x8d0] sm:$0xff] }
  0x88   : > { %975 = vst [vmem:[%s15563_s7 + $0x460] sm:$0xff] %v974_v12  ;;  %v980_v15 = vld [vmem:[%s15558_s0 + $0x8d8] sm:$0xff]  ;;  %977 = vst [vmem:[%s15563_s7 + $0x468] sm:$0xff] %v976_v13  ;;  %v982_v16 = vld [vmem:[%s15558_s0 + $0x900] sm:$0xff] }
  0x89   : > { %979 = vst [vmem:[%s15563_s7 + $0x470] sm:$0xff] %v978_v14  ;;  %981 = vst [vmem:[%s15563_s7 + $0x478] sm:$0xff] %v980_v15  ;;  %v984_v17 = vld [vmem:[%s15558_s0 + $0x908] sm:$0xff]  ;;  %v986_v18 = vld [vmem:[%s15558_s0 + $0x910] sm:$0xff] }
  0x8a   : > { %983 = vst [vmem:[%s15563_s7 + $0x480] sm:$0xff] %v982_v16  ;;  %985 = vst [vmem:[%s15563_s7 + $0x488] sm:$0xff] %v984_v17  ;;  %v988_v19 = vld [vmem:[%s15558_s0 + $0x918] sm:$0xff]  ;;  %v990_v20 = vld [vmem:[%s15558_s0 + $0x940] sm:$0xff] }
  0x8b   : > { %987 = vst [vmem:[%s15563_s7 + $0x490] sm:$0xff] %v986_v18  ;;  %v992_v21 = vld [vmem:[%s15558_s0 + $0x948] sm:$0xff]  ;;  %989 = vst [vmem:[%s15563_s7 + $0x498] sm:$0xff] %v988_v19  ;;  %v994_v22 = vld [vmem:[%s15558_s0 + $0x950] sm:$0xff] }
  0x8c   : > { %991 = vst [vmem:[%s15563_s7 + $0x4a0] sm:$0xff] %v990_v20  ;;  %993 = vst [vmem:[%s15563_s7 + $0x4a8] sm:$0xff] %v992_v21  ;;  %v996_v23 = vld [vmem:[%s15558_s0 + $0x958] sm:$0xff]  ;;  %v998_v24 = vld [vmem:[%s15558_s0 + $0x980] sm:$0xff] }
  0x8d   : > { %995 = vst [vmem:[%s15563_s7 + $0x4b0] sm:$0xff] %v994_v22  ;;  %997 = vst [vmem:[%s15563_s7 + $0x4b8] sm:$0xff] %v996_v23  ;;  %v1000_v25 = vld [vmem:[%s15558_s0 + $0x988] sm:$0xff]  ;;  %v1002_v26 = vld [vmem:[%s15558_s0 + $0x990] sm:$0xff] }
  0x8e   : > { %999 = vst [vmem:[%s15563_s7 + $0x4c0] sm:$0xff] %v998_v24  ;;  %v1004_v27 = vld [vmem:[%s15558_s0 + $0x998] sm:$0xff]  ;;  %1001 = vst [vmem:[%s15563_s7 + $0x4c8] sm:$0xff] %v1000_v25  ;;  %v1006_v28 = vld [vmem:[%s15558_s0 + $0x9c0] sm:$0xff] }
  0x8f   : > { %1003 = vst [vmem:[%s15563_s7 + $0x4d0] sm:$0xff] %v1002_v26  ;;  %1005 = vst [vmem:[%s15563_s7 + $0x4d8] sm:$0xff] %v1004_v27  ;;  %v1008_v29 = vld [vmem:[%s15558_s0 + $0x9c8] sm:$0xff]  ;;  %v1010_v30 = vld [vmem:[%s15558_s0 + $0x9d0] sm:$0xff] }
  0x90   : > { %1007 = vst [vmem:[%s15563_s7 + $0x4e0] sm:$0xff] %v1006_v28  ;;  %1009 = vst [vmem:[%s15563_s7 + $0x4e8] sm:$0xff] %v1008_v29  ;;  %v1012_v31 = vld [vmem:[%s15558_s0 + $0x9d8] sm:$0xff]  ;;  %v1014_v32 = vld [vmem:[%s15558_s0 + $0xa00] sm:$0xff] }
  0x91   : > { %1011 = vst [vmem:[%s15563_s7 + $0x4f0] sm:$0xff] %v1010_v30  ;;  %v1016_v33 = vld [vmem:[%s15558_s0 + $0xa08] sm:$0xff]  ;;  %1013 = vst [vmem:[%s15563_s7 + $0x4f8] sm:$0xff] %v1012_v31  ;;  %v1018_v34 = vld [vmem:[%s15558_s0 + $0xa10] sm:$0xff] }
  0x92   : > { %1015 = vst [vmem:[%s15563_s7 + $0x500] sm:$0xff] %v1014_v32  ;;  %1017 = vst [vmem:[%s15563_s7 + $0x508] sm:$0xff] %v1016_v33  ;;  %v1020_v35 = vld [vmem:[%s15558_s0 + $0xa18] sm:$0xff]  ;;  %v1022_v36 = vld [vmem:[%s15558_s0 + $0xa40] sm:$0xff] }
  0x93   : > { %1019 = vst [vmem:[%s15563_s7 + $0x510] sm:$0xff] %v1018_v34  ;;  %1021 = vst [vmem:[%s15563_s7 + $0x518] sm:$0xff] %v1020_v35  ;;  %v1024_v37 = vld [vmem:[%s15558_s0 + $0xa48] sm:$0xff]  ;;  %v1026_v38 = vld [vmem:[%s15558_s0 + $0xa50] sm:$0xff] }
  0x94   : > { %1023 = vst [vmem:[%s15563_s7 + $0x520] sm:$0xff] %v1022_v36  ;;  %v1028_v39 = vld [vmem:[%s15558_s0 + $0xa58] sm:$0xff]  ;;  %1025 = vst [vmem:[%s15563_s7 + $0x528] sm:$0xff] %v1024_v37  ;;  %v1030_v40 = vld [vmem:[%s15558_s0 + $0xa80] sm:$0xff] }
  0x95   : > { %1027 = vst [vmem:[%s15563_s7 + $0x530] sm:$0xff] %v1026_v38  ;;  %1029 = vst [vmem:[%s15563_s7 + $0x538] sm:$0xff] %v1028_v39  ;;  %v1032_v41 = vld [vmem:[%s15558_s0 + $0xa88] sm:$0xff]  ;;  %v1034_v42 = vld [vmem:[%s15558_s0 + $0xa90] sm:$0xff] }
  0x96   : > { %1031 = vst [vmem:[%s15563_s7 + $0x540] sm:$0xff] %v1030_v40  ;;  %1033 = vst [vmem:[%s15563_s7 + $0x548] sm:$0xff] %v1032_v41  ;;  %v1036_v43 = vld [vmem:[%s15558_s0 + $0xa98] sm:$0xff]  ;;  %v1038_v44 = vld [vmem:[%s15558_s0 + $0xac0] sm:$0xff] }
  0x97   : > { %1035 = vst [vmem:[%s15563_s7 + $0x550] sm:$0xff] %v1034_v42  ;;  %v1040_v45 = vld [vmem:[%s15558_s0 + $0xac8] sm:$0xff]  ;;  %1037 = vst [vmem:[%s15563_s7 + $0x558] sm:$0xff] %v1036_v43  ;;  %v1042_v46 = vld [vmem:[%s15558_s0 + $0xad0] sm:$0xff] }
  0x98   : > { %1039 = vst [vmem:[%s15563_s7 + $0x560] sm:$0xff] %v1038_v44  ;;  %1041 = vst [vmem:[%s15563_s7 + $0x568] sm:$0xff] %v1040_v45  ;;  %v1044_v47 = vld [vmem:[%s15558_s0 + $0xad8] sm:$0xff]  ;;  %v1046_v48 = vld [vmem:[%s15558_s0 + $0xb00] sm:$0xff] }
  0x99   : > { %1043 = vst [vmem:[%s15563_s7 + $0x570] sm:$0xff] %v1042_v46  ;;  %1045 = vst [vmem:[%s15563_s7 + $0x578] sm:$0xff] %v1044_v47  ;;  %v1048_v49 = vld [vmem:[%s15558_s0 + $0xb08] sm:$0xff]  ;;  %v1050_v50 = vld [vmem:[%s15558_s0 + $0xb10] sm:$0xff] }
  0x9a   : > { %1047 = vst [vmem:[%s15563_s7 + $0x580] sm:$0xff] %v1046_v48  ;;  %v1052_v51 = vld [vmem:[%s15558_s0 + $0xb18] sm:$0xff]  ;;  %1049 = vst [vmem:[%s15563_s7 + $0x588] sm:$0xff] %v1048_v49  ;;  %v1054_v52 = vld [vmem:[%s15558_s0 + $0xb40] sm:$0xff] }
  0x9b   : > { %1051 = vst [vmem:[%s15563_s7 + $0x590] sm:$0xff] %v1050_v50  ;;  %1053 = vst [vmem:[%s15563_s7 + $0x598] sm:$0xff] %v1052_v51  ;;  %v1056_v53 = vld [vmem:[%s15558_s0 + $0xb48] sm:$0xff]  ;;  %v1058_v54 = vld [vmem:[%s15558_s0 + $0xb50] sm:$0xff] }
  0x9c   : > { %1055 = vst [vmem:[%s15563_s7 + $0x5a0] sm:$0xff] %v1054_v52  ;;  %1057 = vst [vmem:[%s15563_s7 + $0x5a8] sm:$0xff] %v1056_v53  ;;  %v1060_v55 = vld [vmem:[%s15558_s0 + $0xb58] sm:$0xff]  ;;  %v1062_v56 = vld [vmem:[%s15558_s0 + $0xb80] sm:$0xff] }
  0x9d   : > { %1059 = vst [vmem:[%s15563_s7 + $0x5b0] sm:$0xff] %v1058_v54  ;;  %v1064_v57 = vld [vmem:[%s15558_s0 + $0xb88] sm:$0xff]  ;;  %1061 = vst [vmem:[%s15563_s7 + $0x5b8] sm:$0xff] %v1060_v55  ;;  %v1066_v58 = vld [vmem:[%s15558_s0 + $0xb90] sm:$0xff] }
  0x9e   : > { %1063 = vst [vmem:[%s15563_s7 + $0x5c0] sm:$0xff] %v1062_v56  ;;  %1065 = vst [vmem:[%s15563_s7 + $0x5c8] sm:$0xff] %v1064_v57  ;;  %v1068_v59 = vld [vmem:[%s15558_s0 + $0xb98] sm:$0xff]  ;;  %v1070_v60 = vld [vmem:[%s15558_s0 + $0xbc0] sm:$0xff] }
  0x9f   : > { %1067 = vst [vmem:[%s15563_s7 + $0x5d0] sm:$0xff] %v1066_v58  ;;  %1069 = vst [vmem:[%s15563_s7 + $0x5d8] sm:$0xff] %v1068_v59  ;;  %v1072_v61 = vld [vmem:[%s15558_s0 + $0xbc8] sm:$0xff]  ;;  %v1074_v62 = vld [vmem:[%s15558_s0 + $0xbd0] sm:$0xff] }
  0xa0   : > { %1071 = vst [vmem:[%s15563_s7 + $0x5e0] sm:$0xff] %v1070_v60  ;;  %v1076_v63 = vld [vmem:[%s15558_s0 + $0xbd8] sm:$0xff]  ;;  %1073 = vst [vmem:[%s15563_s7 + $0x5e8] sm:$0xff] %v1072_v61  ;;  %v1078_v0 = vld [vmem:[%s15558_s0 + $0xc00] sm:$0xff] }
  0xa1   : > { %1075 = vst [vmem:[%s15563_s7 + $0x5f0] sm:$0xff] %v1074_v62  ;;  %1077 = vst [vmem:[%s15563_s7 + $0x5f8] sm:$0xff] %v1076_v63  ;;  %v1080_v1 = vld [vmem:[%s15558_s0 + $0xc08] sm:$0xff]  ;;  %v1082_v2 = vld [vmem:[%s15558_s0 + $0xc10] sm:$0xff] }
  0xa2   : > { %1079 = vst [vmem:[%s15563_s7 + $0x600] sm:$0xff] %v1078_v0  ;;  %1081 = vst [vmem:[%s15563_s7 + $0x608] sm:$0xff] %v1080_v1  ;;  %v1084_v3 = vld [vmem:[%s15558_s0 + $0xc18] sm:$0xff]  ;;  %v1086_v4 = vld [vmem:[%s15558_s0 + $0xc40] sm:$0xff] }
  0xa3   : > { %1083 = vst [vmem:[%s15563_s7 + $0x610] sm:$0xff] %v1082_v2  ;;  %v1088_v5 = vld [vmem:[%s15558_s0 + $0xc48] sm:$0xff]  ;;  %1085 = vst [vmem:[%s15563_s7 + $0x618] sm:$0xff] %v1084_v3  ;;  %v1090_v6 = vld [vmem:[%s15558_s0 + $0xc50] sm:$0xff] }
  0xa4   : > { %1087 = vst [vmem:[%s15563_s7 + $0x620] sm:$0xff] %v1086_v4  ;;  %1089 = vst [vmem:[%s15563_s7 + $0x628] sm:$0xff] %v1088_v5  ;;  %v1092_v7 = vld [vmem:[%s15558_s0 + $0xc58] sm:$0xff]  ;;  %v1094_v8 = vld [vmem:[%s15558_s0 + $0xc80] sm:$0xff] }
  0xa5   : > { %1091 = vst [vmem:[%s15563_s7 + $0x630] sm:$0xff] %v1090_v6  ;;  %1093 = vst [vmem:[%s15563_s7 + $0x638] sm:$0xff] %v1092_v7  ;;  %v1096_v9 = vld [vmem:[%s15558_s0 + $0xc88] sm:$0xff]  ;;  %v1098_v10 = vld [vmem:[%s15558_s0 + $0xc90] sm:$0xff] }
  0xa6   : > { %1095 = vst [vmem:[%s15563_s7 + $0x640] sm:$0xff] %v1094_v8  ;;  %v1100_v11 = vld [vmem:[%s15558_s0 + $0xc98] sm:$0xff]  ;;  %1097 = vst [vmem:[%s15563_s7 + $0x648] sm:$0xff] %v1096_v9  ;;  %v1102_v12 = vld [vmem:[%s15558_s0 + $0xcc0] sm:$0xff] }
  0xa7   : > { %1099 = vst [vmem:[%s15563_s7 + $0x650] sm:$0xff] %v1098_v10  ;;  %1101 = vst [vmem:[%s15563_s7 + $0x658] sm:$0xff] %v1100_v11  ;;  %v1104_v13 = vld [vmem:[%s15558_s0 + $0xcc8] sm:$0xff]  ;;  %v1106_v14 = vld [vmem:[%s15558_s0 + $0xcd0] sm:$0xff] }
  0xa8   : > { %1103 = vst [vmem:[%s15563_s7 + $0x660] sm:$0xff] %v1102_v12  ;;  %1105 = vst [vmem:[%s15563_s7 + $0x668] sm:$0xff] %v1104_v13  ;;  %v1108_v15 = vld [vmem:[%s15558_s0 + $0xcd8] sm:$0xff]  ;;  %v1110_v16 = vld [vmem:[%s15558_s0 + $0xd00] sm:$0xff] }
  0xa9   : > { %1107 = vst [vmem:[%s15563_s7 + $0x670] sm:$0xff] %v1106_v14  ;;  %v1112_v17 = vld [vmem:[%s15558_s0 + $0xd08] sm:$0xff]  ;;  %1109 = vst [vmem:[%s15563_s7 + $0x678] sm:$0xff] %v1108_v15  ;;  %v1114_v18 = vld [vmem:[%s15558_s0 + $0xd10] sm:$0xff] }
  0xaa   : > { %1111 = vst [vmem:[%s15563_s7 + $0x680] sm:$0xff] %v1110_v16  ;;  %1113 = vst [vmem:[%s15563_s7 + $0x688] sm:$0xff] %v1112_v17  ;;  %v1116_v19 = vld [vmem:[%s15558_s0 + $0xd18] sm:$0xff]  ;;  %v1118_v20 = vld [vmem:[%s15558_s0 + $0xd40] sm:$0xff] }
  0xab   : > { %1115 = vst [vmem:[%s15563_s7 + $0x690] sm:$0xff] %v1114_v18  ;;  %1117 = vst [vmem:[%s15563_s7 + $0x698] sm:$0xff] %v1116_v19  ;;  %v1120_v21 = vld [vmem:[%s15558_s0 + $0xd48] sm:$0xff]  ;;  %v1122_v22 = vld [vmem:[%s15558_s0 + $0xd50] sm:$0xff] }
  0xac   : > { %1119 = vst [vmem:[%s15563_s7 + $0x6a0] sm:$0xff] %v1118_v20  ;;  %v1124_v23 = vld [vmem:[%s15558_s0 + $0xd58] sm:$0xff]  ;;  %1121 = vst [vmem:[%s15563_s7 + $0x6a8] sm:$0xff] %v1120_v21  ;;  %v1126_v24 = vld [vmem:[%s15558_s0 + $0xd80] sm:$0xff] }
  0xad   : > { %1123 = vst [vmem:[%s15563_s7 + $0x6b0] sm:$0xff] %v1122_v22  ;;  %1125 = vst [vmem:[%s15563_s7 + $0x6b8] sm:$0xff] %v1124_v23  ;;  %v1128_v25 = vld [vmem:[%s15558_s0 + $0xd88] sm:$0xff]  ;;  %v1130_v26 = vld [vmem:[%s15558_s0 + $0xd90] sm:$0xff] }
  0xae   : > { %1127 = vst [vmem:[%s15563_s7 + $0x6c0] sm:$0xff] %v1126_v24  ;;  %1129 = vst [vmem:[%s15563_s7 + $0x6c8] sm:$0xff] %v1128_v25  ;;  %v1132_v27 = vld [vmem:[%s15558_s0 + $0xd98] sm:$0xff]  ;;  %v1134_v28 = vld [vmem:[%s15558_s0 + $0xdc0] sm:$0xff] }
  0xaf   : > { %1131 = vst [vmem:[%s15563_s7 + $0x6d0] sm:$0xff] %v1130_v26  ;;  %v1136_v29 = vld [vmem:[%s15558_s0 + $0xdc8] sm:$0xff]  ;;  %1133 = vst [vmem:[%s15563_s7 + $0x6d8] sm:$0xff] %v1132_v27  ;;  %v1138_v30 = vld [vmem:[%s15558_s0 + $0xdd0] sm:$0xff] }
  0xb0   : > { %1135 = vst [vmem:[%s15563_s7 + $0x6e0] sm:$0xff] %v1134_v28  ;;  %1137 = vst [vmem:[%s15563_s7 + $0x6e8] sm:$0xff] %v1136_v29  ;;  %v1140_v31 = vld [vmem:[%s15558_s0 + $0xdd8] sm:$0xff]  ;;  %v1142_v32 = vld [vmem:[%s15558_s0 + $0xe00] sm:$0xff] }
  0xb1   : > { %1139 = vst [vmem:[%s15563_s7 + $0x6f0] sm:$0xff] %v1138_v30  ;;  %1141 = vst [vmem:[%s15563_s7 + $0x6f8] sm:$0xff] %v1140_v31  ;;  %v1144_v33 = vld [vmem:[%s15558_s0 + $0xe08] sm:$0xff]  ;;  %v1146_v34 = vld [vmem:[%s15558_s0 + $0xe10] sm:$0xff] }
  0xb2   : > { %1143 = vst [vmem:[%s15563_s7 + $0x700] sm:$0xff] %v1142_v32  ;;  %v1148_v35 = vld [vmem:[%s15558_s0 + $0xe18] sm:$0xff]  ;;  %1145 = vst [vmem:[%s15563_s7 + $0x708] sm:$0xff] %v1144_v33  ;;  %v1150_v36 = vld [vmem:[%s15558_s0 + $0xe40] sm:$0xff] }
  0xb3   : > { %1147 = vst [vmem:[%s15563_s7 + $0x710] sm:$0xff] %v1146_v34  ;;  %1149 = vst [vmem:[%s15563_s7 + $0x718] sm:$0xff] %v1148_v35  ;;  %v1152_v37 = vld [vmem:[%s15558_s0 + $0xe48] sm:$0xff]  ;;  %v1154_v38 = vld [vmem:[%s15558_s0 + $0xe50] sm:$0xff] }
  0xb4   : > { %1151 = vst [vmem:[%s15563_s7 + $0x720] sm:$0xff] %v1150_v36  ;;  %1153 = vst [vmem:[%s15563_s7 + $0x728] sm:$0xff] %v1152_v37  ;;  %v1156_v39 = vld [vmem:[%s15558_s0 + $0xe58] sm:$0xff]  ;;  %v1158_v40 = vld [vmem:[%s15558_s0 + $0xe80] sm:$0xff] }
  0xb5   : > { %1155 = vst [vmem:[%s15563_s7 + $0x730] sm:$0xff] %v1154_v38  ;;  %v1160_v41 = vld [vmem:[%s15558_s0 + $0xe88] sm:$0xff]  ;;  %1157 = vst [vmem:[%s15563_s7 + $0x738] sm:$0xff] %v1156_v39  ;;  %v1162_v42 = vld [vmem:[%s15558_s0 + $0xe90] sm:$0xff] }
  0xb6   : > { %1159 = vst [vmem:[%s15563_s7 + $0x740] sm:$0xff] %v1158_v40  ;;  %1161 = vst [vmem:[%s15563_s7 + $0x748] sm:$0xff] %v1160_v41  ;;  %v1164_v43 = vld [vmem:[%s15558_s0 + $0xe98] sm:$0xff]  ;;  %v1166_v44 = vld [vmem:[%s15558_s0 + $0xec0] sm:$0xff] }
  0xb7   : > { %1163 = vst [vmem:[%s15563_s7 + $0x750] sm:$0xff] %v1162_v42  ;;  %1165 = vst [vmem:[%s15563_s7 + $0x758] sm:$0xff] %v1164_v43  ;;  %v1168_v45 = vld [vmem:[%s15558_s0 + $0xec8] sm:$0xff]  ;;  %v1170_v46 = vld [vmem:[%s15558_s0 + $0xed0] sm:$0xff] }
  0xb8   : > { %1167 = vst [vmem:[%s15563_s7 + $0x760] sm:$0xff] %v1166_v44  ;;  %v1172_v47 = vld [vmem:[%s15558_s0 + $0xed8] sm:$0xff]  ;;  %1169 = vst [vmem:[%s15563_s7 + $0x768] sm:$0xff] %v1168_v45  ;;  %v1174_v48 = vld [vmem:[%s15558_s0 + $0xf00] sm:$0xff] }
  0xb9   : > { %1171 = vst [vmem:[%s15563_s7 + $0x770] sm:$0xff] %v1170_v46  ;;  %1173 = vst [vmem:[%s15563_s7 + $0x778] sm:$0xff] %v1172_v47  ;;  %v1176_v49 = vld [vmem:[%s15558_s0 + $0xf08] sm:$0xff]  ;;  %v1178_v50 = vld [vmem:[%s15558_s0 + $0xf10] sm:$0xff] }
  0xba   : > { %1175 = vst [vmem:[%s15563_s7 + $0x780] sm:$0xff] %v1174_v48  ;;  %1177 = vst [vmem:[%s15563_s7 + $0x788] sm:$0xff] %v1176_v49  ;;  %v1180_v51 = vld [vmem:[%s15558_s0 + $0xf18] sm:$0xff]  ;;  %v1182_v52 = vld [vmem:[%s15558_s0 + $0xf40] sm:$0xff] }
  0xbb   : > { %1179 = vst [vmem:[%s15563_s7 + $0x790] sm:$0xff] %v1178_v50  ;;  %v1184_v53 = vld [vmem:[%s15558_s0 + $0xf48] sm:$0xff]  ;;  %1181 = vst [vmem:[%s15563_s7 + $0x798] sm:$0xff] %v1180_v51  ;;  %v1186_v54 = vld [vmem:[%s15558_s0 + $0xf50] sm:$0xff] }
  0xbc   : > { %1183 = vst [vmem:[%s15563_s7 + $0x7a0] sm:$0xff] %v1182_v52  ;;  %1185 = vst [vmem:[%s15563_s7 + $0x7a8] sm:$0xff] %v1184_v53  ;;  %v1188_v55 = vld [vmem:[%s15558_s0 + $0xf58] sm:$0xff]  ;;  %v1190_v56 = vld [vmem:[%s15558_s0 + $0xf80] sm:$0xff] }
  0xbd   : > { %1187 = vst [vmem:[%s15563_s7 + $0x7b0] sm:$0xff] %v1186_v54  ;;  %1189 = vst [vmem:[%s15563_s7 + $0x7b8] sm:$0xff] %v1188_v55  ;;  %v1192_v57 = vld [vmem:[%s15558_s0 + $0xf88] sm:$0xff]  ;;  %v1194_v58 = vld [vmem:[%s15558_s0 + $0xf90] sm:$0xff] }
  0xbe   : > { %1191 = vst [vmem:[%s15563_s7 + $0x7c0] sm:$0xff] %v1190_v56  ;;  %v1196_v59 = vld [vmem:[%s15558_s0 + $0xf98] sm:$0xff]  ;;  %1193 = vst [vmem:[%s15563_s7 + $0x7c8] sm:$0xff] %v1192_v57  ;;  %v1198_v60 = vld [vmem:[%s15558_s0 + $0xfc0] sm:$0xff] }
  0xbf   : > { %1195 = vst [vmem:[%s15563_s7 + $0x7d0] sm:$0xff] %v1194_v58  ;;  %1197 = vst [vmem:[%s15563_s7 + $0x7d8] sm:$0xff] %v1196_v59  ;;  %v1200_v61 = vld [vmem:[%s15558_s0 + $0xfc8] sm:$0xff]  ;;  %v1202_v62 = vld [vmem:[%s15558_s0 + $0xfd0] sm:$0xff] }
  0xc0   : > { %1199 = vst [vmem:[%s15563_s7 + $0x7e0] sm:$0xff] %v1198_v60  ;;  %1201 = vst [vmem:[%s15563_s7 + $0x7e8] sm:$0xff] %v1200_v61  ;;  %v1204_v63 = vld [vmem:[%s15558_s0 + $0xfd8] sm:$0xff]  ;;  %v1206_v0 = vld [vmem:[%s15558_s0 + $0x1000] sm:$0xff] }
  0xc1   : > { %1203 = vst [vmem:[%s15563_s7 + $0x7f0] sm:$0xff] %v1202_v62  ;;  %v1208_v1 = vld [vmem:[%s15558_s0 + $0x1008] sm:$0xff]  ;;  %1205 = vst [vmem:[%s15563_s7 + $0x7f8] sm:$0xff] %v1204_v63  ;;  %v1210_v2 = vld [vmem:[%s15558_s0 + $0x1010] sm:$0xff] }
  0xc2   : > { %1207 = vst [vmem:[%s15563_s7 + $0x800] sm:$0xff] %v1206_v0  ;;  %1209 = vst [vmem:[%s15563_s7 + $0x808] sm:$0xff] %v1208_v1  ;;  %v1212_v3 = vld [vmem:[%s15558_s0 + $0x1018] sm:$0xff]  ;;  %v1214_v4 = vld [vmem:[%s15558_s0 + $0x1040] sm:$0xff] }
  0xc3   : > { %1211 = vst [vmem:[%s15563_s7 + $0x810] sm:$0xff] %v1210_v2  ;;  %1213 = vst [vmem:[%s15563_s7 + $0x818] sm:$0xff] %v1212_v3  ;;  %v1216_v5 = vld [vmem:[%s15558_s0 + $0x1048] sm:$0xff]  ;;  %v1218_v6 = vld [vmem:[%s15558_s0 + $0x1050] sm:$0xff] }
  0xc4   : > { %1215 = vst [vmem:[%s15563_s7 + $0x820] sm:$0xff] %v1214_v4  ;;  %v1220_v7 = vld [vmem:[%s15558_s0 + $0x1058] sm:$0xff]  ;;  %1217 = vst [vmem:[%s15563_s7 + $0x828] sm:$0xff] %v1216_v5  ;;  %v1222_v8 = vld [vmem:[%s15558_s0 + $0x1080] sm:$0xff] }
  0xc5   : > { %1219 = vst [vmem:[%s15563_s7 + $0x830] sm:$0xff] %v1218_v6  ;;  %1221 = vst [vmem:[%s15563_s7 + $0x838] sm:$0xff] %v1220_v7  ;;  %v1224_v9 = vld [vmem:[%s15558_s0 + $0x1088] sm:$0xff]  ;;  %v1226_v10 = vld [vmem:[%s15558_s0 + $0x1090] sm:$0xff] }
  0xc6   : > { %1223 = vst [vmem:[%s15563_s7 + $0x840] sm:$0xff] %v1222_v8  ;;  %1225 = vst [vmem:[%s15563_s7 + $0x848] sm:$0xff] %v1224_v9  ;;  %v1228_v11 = vld [vmem:[%s15558_s0 + $0x1098] sm:$0xff]  ;;  %v1230_v12 = vld [vmem:[%s15558_s0 + $0x10c0] sm:$0xff] }
  0xc7   : > { %1227 = vst [vmem:[%s15563_s7 + $0x850] sm:$0xff] %v1226_v10  ;;  %v1232_v13 = vld [vmem:[%s15558_s0 + $0x10c8] sm:$0xff]  ;;  %1229 = vst [vmem:[%s15563_s7 + $0x858] sm:$0xff] %v1228_v11  ;;  %v1234_v14 = vld [vmem:[%s15558_s0 + $0x10d0] sm:$0xff] }
  0xc8   : > { %1231 = vst [vmem:[%s15563_s7 + $0x860] sm:$0xff] %v1230_v12  ;;  %1233 = vst [vmem:[%s15563_s7 + $0x868] sm:$0xff] %v1232_v13  ;;  %v1236_v15 = vld [vmem:[%s15558_s0 + $0x10d8] sm:$0xff]  ;;  %v1238_v16 = vld [vmem:[%s15558_s0 + $0x1100] sm:$0xff] }
  0xc9   : > { %1235 = vst [vmem:[%s15563_s7 + $0x870] sm:$0xff] %v1234_v14  ;;  %1237 = vst [vmem:[%s15563_s7 + $0x878] sm:$0xff] %v1236_v15  ;;  %v1240_v17 = vld [vmem:[%s15558_s0 + $0x1108] sm:$0xff]  ;;  %v1242_v18 = vld [vmem:[%s15558_s0 + $0x1110] sm:$0xff] }
  0xca   : > { %1239 = vst [vmem:[%s15563_s7 + $0x880] sm:$0xff] %v1238_v16  ;;  %v1244_v19 = vld [vmem:[%s15558_s0 + $0x1118] sm:$0xff]  ;;  %1241 = vst [vmem:[%s15563_s7 + $0x888] sm:$0xff] %v1240_v17  ;;  %v1246_v20 = vld [vmem:[%s15558_s0 + $0x1140] sm:$0xff] }
  0xcb   : > { %1243 = vst [vmem:[%s15563_s7 + $0x890] sm:$0xff] %v1242_v18  ;;  %1245 = vst [vmem:[%s15563_s7 + $0x898] sm:$0xff] %v1244_v19  ;;  %v1248_v21 = vld [vmem:[%s15558_s0 + $0x1148] sm:$0xff]  ;;  %v1250_v22 = vld [vmem:[%s15558_s0 + $0x1150] sm:$0xff] }
  0xcc   : > { %1247 = vst [vmem:[%s15563_s7 + $0x8a0] sm:$0xff] %v1246_v20  ;;  %1249 = vst [vmem:[%s15563_s7 + $0x8a8] sm:$0xff] %v1248_v21  ;;  %v1252_v23 = vld [vmem:[%s15558_s0 + $0x1158] sm:$0xff]  ;;  %v1254_v24 = vld [vmem:[%s15558_s0 + $0x1180] sm:$0xff] }
  0xcd   : > { %1251 = vst [vmem:[%s15563_s7 + $0x8b0] sm:$0xff] %v1250_v22  ;;  %v1256_v25 = vld [vmem:[%s15558_s0 + $0x1188] sm:$0xff]  ;;  %1253 = vst [vmem:[%s15563_s7 + $0x8b8] sm:$0xff] %v1252_v23  ;;  %v1258_v26 = vld [vmem:[%s15558_s0 + $0x1190] sm:$0xff] }
  0xce   : > { %1255 = vst [vmem:[%s15563_s7 + $0x8c0] sm:$0xff] %v1254_v24  ;;  %1257 = vst [vmem:[%s15563_s7 + $0x8c8] sm:$0xff] %v1256_v25  ;;  %v1260_v27 = vld [vmem:[%s15558_s0 + $0x1198] sm:$0xff]  ;;  %v1262_v28 = vld [vmem:[%s15558_s0 + $0x11c0] sm:$0xff] }
  0xcf   : > { %1259 = vst [vmem:[%s15563_s7 + $0x8d0] sm:$0xff] %v1258_v26  ;;  %1261 = vst [vmem:[%s15563_s7 + $0x8d8] sm:$0xff] %v1260_v27  ;;  %v1264_v29 = vld [vmem:[%s15558_s0 + $0x11c8] sm:$0xff]  ;;  %v1266_v30 = vld [vmem:[%s15558_s0 + $0x11d0] sm:$0xff] }
  0xd0   : > { %1263 = vst [vmem:[%s15563_s7 + $0x8e0] sm:$0xff] %v1262_v28  ;;  %v1268_v31 = vld [vmem:[%s15558_s0 + $0x11d8] sm:$0xff]  ;;  %1265 = vst [vmem:[%s15563_s7 + $0x8e8] sm:$0xff] %v1264_v29  ;;  %v1270_v32 = vld [vmem:[%s15558_s0 + $0x1200] sm:$0xff] }
  0xd1   : > { %1267 = vst [vmem:[%s15563_s7 + $0x8f0] sm:$0xff] %v1266_v30  ;;  %1269 = vst [vmem:[%s15563_s7 + $0x8f8] sm:$0xff] %v1268_v31  ;;  %v1272_v33 = vld [vmem:[%s15558_s0 + $0x1208] sm:$0xff]  ;;  %v1274_v34 = vld [vmem:[%s15558_s0 + $0x1210] sm:$0xff] }
  0xd2   : > { %1271 = vst [vmem:[%s15563_s7 + $0x900] sm:$0xff] %v1270_v32  ;;  %1273 = vst [vmem:[%s15563_s7 + $0x908] sm:$0xff] %v1272_v33  ;;  %v1276_v35 = vld [vmem:[%s15558_s0 + $0x1218] sm:$0xff]  ;;  %v1278_v36 = vld [vmem:[%s15558_s0 + $0x1240] sm:$0xff] }
  0xd3   : > { %1275 = vst [vmem:[%s15563_s7 + $0x910] sm:$0xff] %v1274_v34  ;;  %v1280_v37 = vld [vmem:[%s15558_s0 + $0x1248] sm:$0xff]  ;;  %1277 = vst [vmem:[%s15563_s7 + $0x918] sm:$0xff] %v1276_v35  ;;  %v1282_v38 = vld [vmem:[%s15558_s0 + $0x1250] sm:$0xff] }
  0xd4   : > { %1279 = vst [vmem:[%s15563_s7 + $0x920] sm:$0xff] %v1278_v36  ;;  %1281 = vst [vmem:[%s15563_s7 + $0x928] sm:$0xff] %v1280_v37  ;;  %v1284_v39 = vld [vmem:[%s15558_s0 + $0x1258] sm:$0xff]  ;;  %v1286_v40 = vld [vmem:[%s15558_s0 + $0x1280] sm:$0xff] }
  0xd5   : > { %1283 = vst [vmem:[%s15563_s7 + $0x930] sm:$0xff] %v1282_v38  ;;  %1285 = vst [vmem:[%s15563_s7 + $0x938] sm:$0xff] %v1284_v39  ;;  %v1288_v41 = vld [vmem:[%s15558_s0 + $0x1288] sm:$0xff]  ;;  %v1290_v42 = vld [vmem:[%s15558_s0 + $0x1290] sm:$0xff] }
  0xd6   : > { %1287 = vst [vmem:[%s15563_s7 + $0x940] sm:$0xff] %v1286_v40  ;;  %v1292_v43 = vld [vmem:[%s15558_s0 + $0x1298] sm:$0xff]  ;;  %1289 = vst [vmem:[%s15563_s7 + $0x948] sm:$0xff] %v1288_v41  ;;  %v1294_v44 = vld [vmem:[%s15558_s0 + $0x12c0] sm:$0xff] }
  0xd7   : > { %1291 = vst [vmem:[%s15563_s7 + $0x950] sm:$0xff] %v1290_v42  ;;  %1293 = vst [vmem:[%s15563_s7 + $0x958] sm:$0xff] %v1292_v43  ;;  %v1296_v45 = vld [vmem:[%s15558_s0 + $0x12c8] sm:$0xff]  ;;  %v1298_v46 = vld [vmem:[%s15558_s0 + $0x12d0] sm:$0xff] }
  0xd8   : > { %1295 = vst [vmem:[%s15563_s7 + $0x960] sm:$0xff] %v1294_v44  ;;  %1297 = vst [vmem:[%s15563_s7 + $0x968] sm:$0xff] %v1296_v45  ;;  %v1300_v47 = vld [vmem:[%s15558_s0 + $0x12d8] sm:$0xff]  ;;  %v1302_v48 = vld [vmem:[%s15558_s0 + $0x1300] sm:$0xff] }
  0xd9   : > { %1299 = vst [vmem:[%s15563_s7 + $0x970] sm:$0xff] %v1298_v46  ;;  %v1304_v49 = vld [vmem:[%s15558_s0 + $0x1308] sm:$0xff]  ;;  %1301 = vst [vmem:[%s15563_s7 + $0x978] sm:$0xff] %v1300_v47  ;;  %v1306_v50 = vld [vmem:[%s15558_s0 + $0x1310] sm:$0xff] }
  0xda   : > { %1303 = vst [vmem:[%s15563_s7 + $0x980] sm:$0xff] %v1302_v48  ;;  %1305 = vst [vmem:[%s15563_s7 + $0x988] sm:$0xff] %v1304_v49  ;;  %v1308_v51 = vld [vmem:[%s15558_s0 + $0x1318] sm:$0xff]  ;;  %v1310_v52 = vld [vmem:[%s15558_s0 + $0x1340] sm:$0xff] }
  0xdb   : > { %1307 = vst [vmem:[%s15563_s7 + $0x990] sm:$0xff] %v1306_v50  ;;  %1309 = vst [vmem:[%s15563_s7 + $0x998] sm:$0xff] %v1308_v51  ;;  %v1312_v53 = vld [vmem:[%s15558_s0 + $0x1348] sm:$0xff]  ;;  %v1314_v54 = vld [vmem:[%s15558_s0 + $0x1350] sm:$0xff] }
  0xdc   : > { %1311 = vst [vmem:[%s15563_s7 + $0x9a0] sm:$0xff] %v1310_v52  ;;  %v1316_v55 = vld [vmem:[%s15558_s0 + $0x1358] sm:$0xff]  ;;  %1313 = vst [vmem:[%s15563_s7 + $0x9a8] sm:$0xff] %v1312_v53  ;;  %v1318_v56 = vld [vmem:[%s15558_s0 + $0x1380] sm:$0xff] }
  0xdd   : > { %1315 = vst [vmem:[%s15563_s7 + $0x9b0] sm:$0xff] %v1314_v54  ;;  %1317 = vst [vmem:[%s15563_s7 + $0x9b8] sm:$0xff] %v1316_v55  ;;  %v1320_v57 = vld [vmem:[%s15558_s0 + $0x1388] sm:$0xff]  ;;  %v1322_v58 = vld [vmem:[%s15558_s0 + $0x1390] sm:$0xff] }
  0xde   : > { %1319 = vst [vmem:[%s15563_s7 + $0x9c0] sm:$0xff] %v1318_v56  ;;  %1321 = vst [vmem:[%s15563_s7 + $0x9c8] sm:$0xff] %v1320_v57  ;;  %v1324_v59 = vld [vmem:[%s15558_s0 + $0x1398] sm:$0xff]  ;;  %v1326_v60 = vld [vmem:[%s15558_s0 + $0x13c0] sm:$0xff] }
  0xdf   : > { %1323 = vst [vmem:[%s15563_s7 + $0x9d0] sm:$0xff] %v1322_v58  ;;  %v1328_v61 = vld [vmem:[%s15558_s0 + $0x13c8] sm:$0xff]  ;;  %1325 = vst [vmem:[%s15563_s7 + $0x9d8] sm:$0xff] %v1324_v59  ;;  %v1330_v62 = vld [vmem:[%s15558_s0 + $0x13d0] sm:$0xff] }
  0xe0   : > { %1327 = vst [vmem:[%s15563_s7 + $0x9e0] sm:$0xff] %v1326_v60  ;;  %1329 = vst [vmem:[%s15563_s7 + $0x9e8] sm:$0xff] %v1328_v61  ;;  %v1332_v63 = vld [vmem:[%s15558_s0 + $0x13d8] sm:$0xff]  ;;  %v1334_v0 = vld [vmem:[%s15558_s0 + $0x1400] sm:$0xff] }
  0xe1   : > { %1331 = vst [vmem:[%s15563_s7 + $0x9f0] sm:$0xff] %v1330_v62  ;;  %1333 = vst [vmem:[%s15563_s7 + $0x9f8] sm:$0xff] %v1332_v63  ;;  %v1336_v1 = vld [vmem:[%s15558_s0 + $0x1408] sm:$0xff]  ;;  %v1338_v2 = vld [vmem:[%s15558_s0 + $0x1410] sm:$0xff] }
  0xe2   : > { %1335 = vst [vmem:[%s15563_s7 + $0xa00] sm:$0xff] %v1334_v0  ;;  %v1340_v3 = vld [vmem:[%s15558_s0 + $0x1418] sm:$0xff]  ;;  %1337 = vst [vmem:[%s15563_s7 + $0xa08] sm:$0xff] %v1336_v1  ;;  %v1342_v4 = vld [vmem:[%s15558_s0 + $0x1440] sm:$0xff] }
  0xe3   : > { %1339 = vst [vmem:[%s15563_s7 + $0xa10] sm:$0xff] %v1338_v2  ;;  %1341 = vst [vmem:[%s15563_s7 + $0xa18] sm:$0xff] %v1340_v3  ;;  %v1344_v5 = vld [vmem:[%s15558_s0 + $0x1448] sm:$0xff]  ;;  %v1346_v6 = vld [vmem:[%s15558_s0 + $0x1450] sm:$0xff] }
  0xe4   : > { %1343 = vst [vmem:[%s15563_s7 + $0xa20] sm:$0xff] %v1342_v4  ;;  %1345 = vst [vmem:[%s15563_s7 + $0xa28] sm:$0xff] %v1344_v5  ;;  %v1348_v7 = vld [vmem:[%s15558_s0 + $0x1458] sm:$0xff]  ;;  %v1350_v8 = vld [vmem:[%s15558_s0 + $0x1480] sm:$0xff] }
  0xe5   : > { %1347 = vst [vmem:[%s15563_s7 + $0xa30] sm:$0xff] %v1346_v6  ;;  %v1352_v9 = vld [vmem:[%s15558_s0 + $0x1488] sm:$0xff]  ;;  %1349 = vst [vmem:[%s15563_s7 + $0xa38] sm:$0xff] %v1348_v7  ;;  %v1354_v10 = vld [vmem:[%s15558_s0 + $0x1490] sm:$0xff] }
  0xe6   : > { %1351 = vst [vmem:[%s15563_s7 + $0xa40] sm:$0xff] %v1350_v8  ;;  %1353 = vst [vmem:[%s15563_s7 + $0xa48] sm:$0xff] %v1352_v9  ;;  %v1356_v11 = vld [vmem:[%s15558_s0 + $0x1498] sm:$0xff]  ;;  %v1358_v12 = vld [vmem:[%s15558_s0 + $0x14c0] sm:$0xff] }
  0xe7   : > { %1355 = vst [vmem:[%s15563_s7 + $0xa50] sm:$0xff] %v1354_v10  ;;  %1357 = vst [vmem:[%s15563_s7 + $0xa58] sm:$0xff] %v1356_v11  ;;  %v1360_v13 = vld [vmem:[%s15558_s0 + $0x14c8] sm:$0xff]  ;;  %v1362_v14 = vld [vmem:[%s15558_s0 + $0x14d0] sm:$0xff] }
  0xe8   : > { %1359 = vst [vmem:[%s15563_s7 + $0xa60] sm:$0xff] %v1358_v12  ;;  %v1364_v15 = vld [vmem:[%s15558_s0 + $0x14d8] sm:$0xff]  ;;  %1361 = vst [vmem:[%s15563_s7 + $0xa68] sm:$0xff] %v1360_v13  ;;  %v1366_v16 = vld [vmem:[%s15558_s0 + $0x1500] sm:$0xff] }
  0xe9   : > { %1363 = vst [vmem:[%s15563_s7 + $0xa70] sm:$0xff] %v1362_v14  ;;  %1365 = vst [vmem:[%s15563_s7 + $0xa78] sm:$0xff] %v1364_v15  ;;  %v1368_v17 = vld [vmem:[%s15558_s0 + $0x1508] sm:$0xff]  ;;  %v1370_v18 = vld [vmem:[%s15558_s0 + $0x1510] sm:$0xff] }
  0xea   : > { %1367 = vst [vmem:[%s15563_s7 + $0xa80] sm:$0xff] %v1366_v16  ;;  %1369 = vst [vmem:[%s15563_s7 + $0xa88] sm:$0xff] %v1368_v17  ;;  %v1372_v19 = vld [vmem:[%s15558_s0 + $0x1518] sm:$0xff]  ;;  %v1374_v20 = vld [vmem:[%s15558_s0 + $0x1540] sm:$0xff] }
  0xeb   : > { %1371 = vst [vmem:[%s15563_s7 + $0xa90] sm:$0xff] %v1370_v18  ;;  %v1376_v21 = vld [vmem:[%s15558_s0 + $0x1548] sm:$0xff]  ;;  %1373 = vst [vmem:[%s15563_s7 + $0xa98] sm:$0xff] %v1372_v19  ;;  %v1378_v22 = vld [vmem:[%s15558_s0 + $0x1550] sm:$0xff] }
  0xec   : > { %1375 = vst [vmem:[%s15563_s7 + $0xaa0] sm:$0xff] %v1374_v20  ;;  %1377 = vst [vmem:[%s15563_s7 + $0xaa8] sm:$0xff] %v1376_v21  ;;  %v1380_v23 = vld [vmem:[%s15558_s0 + $0x1558] sm:$0xff]  ;;  %v1382_v24 = vld [vmem:[%s15558_s0 + $0x1580] sm:$0xff] }
  0xed   : > { %1379 = vst [vmem:[%s15563_s7 + $0xab0] sm:$0xff] %v1378_v22  ;;  %1381 = vst [vmem:[%s15563_s7 + $0xab8] sm:$0xff] %v1380_v23  ;;  %v1384_v25 = vld [vmem:[%s15558_s0 + $0x1588] sm:$0xff]  ;;  %v1386_v26 = vld [vmem:[%s15558_s0 + $0x1590] sm:$0xff] }
  0xee   : > { %1383 = vst [vmem:[%s15563_s7 + $0xac0] sm:$0xff] %v1382_v24  ;;  %v1388_v27 = vld [vmem:[%s15558_s0 + $0x1598] sm:$0xff]  ;;  %1385 = vst [vmem:[%s15563_s7 + $0xac8] sm:$0xff] %v1384_v25  ;;  %v1390_v28 = vld [vmem:[%s15558_s0 + $0x15c0] sm:$0xff] }
  0xef   : > { %1387 = vst [vmem:[%s15563_s7 + $0xad0] sm:$0xff] %v1386_v26  ;;  %1389 = vst [vmem:[%s15563_s7 + $0xad8] sm:$0xff] %v1388_v27  ;;  %v1392_v29 = vld [vmem:[%s15558_s0 + $0x15c8] sm:$0xff]  ;;  %v1394_v30 = vld [vmem:[%s15558_s0 + $0x15d0] sm:$0xff] }
  0xf0   : > { %1391 = vst [vmem:[%s15563_s7 + $0xae0] sm:$0xff] %v1390_v28  ;;  %1393 = vst [vmem:[%s15563_s7 + $0xae8] sm:$0xff] %v1392_v29  ;;  %v1396_v31 = vld [vmem:[%s15558_s0 + $0x15d8] sm:$0xff]  ;;  %v1398_v32 = vld [vmem:[%s15558_s0 + $0x1600] sm:$0xff] }
  0xf1   : > { %1395 = vst [vmem:[%s15563_s7 + $0xaf0] sm:$0xff] %v1394_v30  ;;  %v1400_v33 = vld [vmem:[%s15558_s0 + $0x1608] sm:$0xff]  ;;  %1397 = vst [vmem:[%s15563_s7 + $0xaf8] sm:$0xff] %v1396_v31  ;;  %v1402_v34 = vld [vmem:[%s15558_s0 + $0x1610] sm:$0xff] }
  0xf2   : > { %1399 = vst [vmem:[%s15563_s7 + $0xb00] sm:$0xff] %v1398_v32  ;;  %1401 = vst [vmem:[%s15563_s7 + $0xb08] sm:$0xff] %v1400_v33  ;;  %v1404_v35 = vld [vmem:[%s15558_s0 + $0x1618] sm:$0xff]  ;;  %v1406_v36 = vld [vmem:[%s15558_s0 + $0x1640] sm:$0xff] }
  0xf3   : > { %1403 = vst [vmem:[%s15563_s7 + $0xb10] sm:$0xff] %v1402_v34  ;;  %1405 = vst [vmem:[%s15563_s7 + $0xb18] sm:$0xff] %v1404_v35  ;;  %v1408_v37 = vld [vmem:[%s15558_s0 + $0x1648] sm:$0xff]  ;;  %v1410_v38 = vld [vmem:[%s15558_s0 + $0x1650] sm:$0xff] }
  0xf4   : > { %1407 = vst [vmem:[%s15563_s7 + $0xb20] sm:$0xff] %v1406_v36  ;;  %v1412_v39 = vld [vmem:[%s15558_s0 + $0x1658] sm:$0xff]  ;;  %1409 = vst [vmem:[%s15563_s7 + $0xb28] sm:$0xff] %v1408_v37  ;;  %v1414_v40 = vld [vmem:[%s15558_s0 + $0x1680] sm:$0xff] }
  0xf5   : > { %1411 = vst [vmem:[%s15563_s7 + $0xb30] sm:$0xff] %v1410_v38  ;;  %1413 = vst [vmem:[%s15563_s7 + $0xb38] sm:$0xff] %v1412_v39  ;;  %v1416_v41 = vld [vmem:[%s15558_s0 + $0x1688] sm:$0xff]  ;;  %v1418_v42 = vld [vmem:[%s15558_s0 + $0x1690] sm:$0xff] }
  0xf6   : > { %1415 = vst [vmem:[%s15563_s7 + $0xb40] sm:$0xff] %v1414_v40  ;;  %1417 = vst [vmem:[%s15563_s7 + $0xb48] sm:$0xff] %v1416_v41  ;;  %v1420_v43 = vld [vmem:[%s15558_s0 + $0x1698] sm:$0xff]  ;;  %v1422_v44 = vld [vmem:[%s15558_s0 + $0x16c0] sm:$0xff] }
  0xf7   : > { %1419 = vst [vmem:[%s15563_s7 + $0xb50] sm:$0xff] %v1418_v42  ;;  %v1424_v45 = vld [vmem:[%s15558_s0 + $0x16c8] sm:$0xff]  ;;  %1421 = vst [vmem:[%s15563_s7 + $0xb58] sm:$0xff] %v1420_v43  ;;  %v1426_v46 = vld [vmem:[%s15558_s0 + $0x16d0] sm:$0xff] }
  0xf8   : > { %1423 = vst [vmem:[%s15563_s7 + $0xb60] sm:$0xff] %v1422_v44  ;;  %1425 = vst [vmem:[%s15563_s7 + $0xb68] sm:$0xff] %v1424_v45  ;;  %v1428_v47 = vld [vmem:[%s15558_s0 + $0x16d8] sm:$0xff]  ;;  %v1430_v48 = vld [vmem:[%s15558_s0 + $0x1700] sm:$0xff] }
  0xf9   : > { %1427 = vst [vmem:[%s15563_s7 + $0xb70] sm:$0xff] %v1426_v46  ;;  %1429 = vst [vmem:[%s15563_s7 + $0xb78] sm:$0xff] %v1428_v47  ;;  %v1432_v49 = vld [vmem:[%s15558_s0 + $0x1708] sm:$0xff]  ;;  %v1434_v50 = vld [vmem:[%s15558_s0 + $0x1710] sm:$0xff] }
  0xfa   : > { %1431 = vst [vmem:[%s15563_s7 + $0xb80] sm:$0xff] %v1430_v48  ;;  %v1436_v51 = vld [vmem:[%s15558_s0 + $0x1718] sm:$0xff]  ;;  %1433 = vst [vmem:[%s15563_s7 + $0xb88] sm:$0xff] %v1432_v49  ;;  %v1438_v52 = vld [vmem:[%s15558_s0 + $0x1740] sm:$0xff] }
  0xfb   : > { %1435 = vst [vmem:[%s15563_s7 + $0xb90] sm:$0xff] %v1434_v50  ;;  %1437 = vst [vmem:[%s15563_s7 + $0xb98] sm:$0xff] %v1436_v51  ;;  %v1440_v53 = vld [vmem:[%s15558_s0 + $0x1748] sm:$0xff]  ;;  %v1442_v54 = vld [vmem:[%s15558_s0 + $0x1750] sm:$0xff] }
  0xfc   : > { %1439 = vst [vmem:[%s15563_s7 + $0xba0] sm:$0xff] %v1438_v52  ;;  %1441 = vst [vmem:[%s15563_s7 + $0xba8] sm:$0xff] %v1440_v53  ;;  %v1444_v55 = vld [vmem:[%s15558_s0 + $0x1758] sm:$0xff]  ;;  %v1446_v56 = vld [vmem:[%s15558_s0 + $0x1780] sm:$0xff] }
  0xfd   : > { %1443 = vst [vmem:[%s15563_s7 + $0xbb0] sm:$0xff] %v1442_v54  ;;  %v1448_v57 = vld [vmem:[%s15558_s0 + $0x1788] sm:$0xff]  ;;  %1445 = vst [vmem:[%s15563_s7 + $0xbb8] sm:$0xff] %v1444_v55  ;;  %v1450_v58 = vld [vmem:[%s15558_s0 + $0x1790] sm:$0xff] }
  0xfe   : > { %1447 = vst [vmem:[%s15563_s7 + $0xbc0] sm:$0xff] %v1446_v56  ;;  %1449 = vst [vmem:[%s15563_s7 + $0xbc8] sm:$0xff] %v1448_v57  ;;  %v1452_v59 = vld [vmem:[%s15558_s0 + $0x1798] sm:$0xff]  ;;  %v1454_v60 = vld [vmem:[%s15558_s0 + $0x17c0] sm:$0xff] }
  0xff   : > { %1451 = vst [vmem:[%s15563_s7 + $0xbd0] sm:$0xff] %v1450_v58  ;;  %1453 = vst [vmem:[%s15563_s7 + $0xbd8] sm:$0xff] %v1452_v59  ;;  %v1456_v61 = vld [vmem:[%s15558_s0 + $0x17c8] sm:$0xff]  ;;  %v1458_v62 = vld [vmem:[%s15558_s0 + $0x17d0] sm:$0xff] }
 0x100   : > { %1455 = vst [vmem:[%s15563_s7 + $0xbe0] sm:$0xff] %v1454_v60  ;;  %v1460_v63 = vld [vmem:[%s15558_s0 + $0x17d8] sm:$0xff]  ;;  %1457 = vst [vmem:[%s15563_s7 + $0xbe8] sm:$0xff] %v1456_v61  ;;  %v1462_v0 = vld [vmem:[%s15558_s0 + $0x1800] sm:$0xff] }
 0x101   : > { %1459 = vst [vmem:[%s15563_s7 + $0xbf0] sm:$0xff] %v1458_v62  ;;  %1461 = vst [vmem:[%s15563_s7 + $0xbf8] sm:$0xff] %v1460_v63  ;;  %v1464_v1 = vld [vmem:[%s15558_s0 + $0x1808] sm:$0xff]  ;;  %v1466_v2 = vld [vmem:[%s15558_s0 + $0x1810] sm:$0xff] }
 0x102   : > { %1463 = vst [vmem:[%s15563_s7 + $0xc00] sm:$0xff] %v1462_v0  ;;  %1465 = vst [vmem:[%s15563_s7 + $0xc08] sm:$0xff] %v1464_v1  ;;  %v1468_v3 = vld [vmem:[%s15558_s0 + $0x1818] sm:$0xff]  ;;  %v1470_v4 = vld [vmem:[%s15558_s0 + $0x1840] sm:$0xff] }
 0x103   : > { %1467 = vst [vmem:[%s15563_s7 + $0xc10] sm:$0xff] %v1466_v2  ;;  %v1472_v5 = vld [vmem:[%s15558_s0 + $0x1848] sm:$0xff]  ;;  %1469 = vst [vmem:[%s15563_s7 + $0xc18] sm:$0xff] %v1468_v3  ;;  %v1474_v6 = vld [vmem:[%s15558_s0 + $0x1850] sm:$0xff] }
 0x104   : > { %1471 = vst [vmem:[%s15563_s7 + $0xc20] sm:$0xff] %v1470_v4  ;;  %1473 = vst [vmem:[%s15563_s7 + $0xc28] sm:$0xff] %v1472_v5  ;;  %v1476_v7 = vld [vmem:[%s15558_s0 + $0x1858] sm:$0xff]  ;;  %v1478_v8 = vld [vmem:[%s15558_s0 + $0x1880] sm:$0xff] }
 0x105   : > { %1475 = vst [vmem:[%s15563_s7 + $0xc30] sm:$0xff] %v1474_v6  ;;  %1477 = vst [vmem:[%s15563_s7 + $0xc38] sm:$0xff] %v1476_v7  ;;  %v1480_v9 = vld [vmem:[%s15558_s0 + $0x1888] sm:$0xff]  ;;  %v1482_v10 = vld [vmem:[%s15558_s0 + $0x1890] sm:$0xff] }
 0x106   : > { %1479 = vst [vmem:[%s15563_s7 + $0xc40] sm:$0xff] %v1478_v8  ;;  %v1484_v11 = vld [vmem:[%s15558_s0 + $0x1898] sm:$0xff]  ;;  %1481 = vst [vmem:[%s15563_s7 + $0xc48] sm:$0xff] %v1480_v9  ;;  %v1486_v12 = vld [vmem:[%s15558_s0 + $0x18c0] sm:$0xff] }
 0x107   : > { %1483 = vst [vmem:[%s15563_s7 + $0xc50] sm:$0xff] %v1482_v10  ;;  %1485 = vst [vmem:[%s15563_s7 + $0xc58] sm:$0xff] %v1484_v11  ;;  %v1488_v13 = vld [vmem:[%s15558_s0 + $0x18c8] sm:$0xff]  ;;  %v1490_v14 = vld [vmem:[%s15558_s0 + $0x18d0] sm:$0xff] }
 0x108   : > { %1487 = vst [vmem:[%s15563_s7 + $0xc60] sm:$0xff] %v1486_v12  ;;  %1489 = vst [vmem:[%s15563_s7 + $0xc68] sm:$0xff] %v1488_v13  ;;  %v1492_v15 = vld [vmem:[%s15558_s0 + $0x18d8] sm:$0xff]  ;;  %v1494_v16 = vld [vmem:[%s15558_s0 + $0x1900] sm:$0xff] }
 0x109   : > { %1491 = vst [vmem:[%s15563_s7 + $0xc70] sm:$0xff] %v1490_v14  ;;  %v1496_v17 = vld [vmem:[%s15558_s0 + $0x1908] sm:$0xff]  ;;  %1493 = vst [vmem:[%s15563_s7 + $0xc78] sm:$0xff] %v1492_v15  ;;  %v1498_v18 = vld [vmem:[%s15558_s0 + $0x1910] sm:$0xff] }
 0x10a   : > { %1495 = vst [vmem:[%s15563_s7 + $0xc80] sm:$0xff] %v1494_v16  ;;  %1497 = vst [vmem:[%s15563_s7 + $0xc88] sm:$0xff] %v1496_v17  ;;  %v1500_v19 = vld [vmem:[%s15558_s0 + $0x1918] sm:$0xff]  ;;  %v1502_v20 = vld [vmem:[%s15558_s0 + $0x1940] sm:$0xff] }
 0x10b   : > { %1499 = vst [vmem:[%s15563_s7 + $0xc90] sm:$0xff] %v1498_v18  ;;  %1501 = vst [vmem:[%s15563_s7 + $0xc98] sm:$0xff] %v1500_v19  ;;  %v1504_v21 = vld [vmem:[%s15558_s0 + $0x1948] sm:$0xff]  ;;  %v1506_v22 = vld [vmem:[%s15558_s0 + $0x1950] sm:$0xff] }
 0x10c   : > { %1503 = vst [vmem:[%s15563_s7 + $0xca0] sm:$0xff] %v1502_v20  ;;  %v1508_v23 = vld [vmem:[%s15558_s0 + $0x1958] sm:$0xff]  ;;  %1505 = vst [vmem:[%s15563_s7 + $0xca8] sm:$0xff] %v1504_v21  ;;  %v1510_v24 = vld [vmem:[%s15558_s0 + $0x1980] sm:$0xff] }
 0x10d   : > { %1507 = vst [vmem:[%s15563_s7 + $0xcb0] sm:$0xff] %v1506_v22  ;;  %1509 = vst [vmem:[%s15563_s7 + $0xcb8] sm:$0xff] %v1508_v23  ;;  %v1512_v25 = vld [vmem:[%s15558_s0 + $0x1988] sm:$0xff]  ;;  %v1514_v26 = vld [vmem:[%s15558_s0 + $0x1990] sm:$0xff] }
 0x10e   : > { %1511 = vst [vmem:[%s15563_s7 + $0xcc0] sm:$0xff] %v1510_v24  ;;  %1513 = vst [vmem:[%s15563_s7 + $0xcc8] sm:$0xff] %v1512_v25  ;;  %v1516_v27 = vld [vmem:[%s15558_s0 + $0x1998] sm:$0xff]  ;;  %v1518_v28 = vld [vmem:[%s15558_s0 + $0x19c0] sm:$0xff] }
 0x10f   : > { %1515 = vst [vmem:[%s15563_s7 + $0xcd0] sm:$0xff] %v1514_v26  ;;  %v1520_v29 = vld [vmem:[%s15558_s0 + $0x19c8] sm:$0xff]  ;;  %1517 = vst [vmem:[%s15563_s7 + $0xcd8] sm:$0xff] %v1516_v27  ;;  %v1522_v30 = vld [vmem:[%s15558_s0 + $0x19d0] sm:$0xff] }
 0x110   : > { %1519 = vst [vmem:[%s15563_s7 + $0xce0] sm:$0xff] %v1518_v28  ;;  %1521 = vst [vmem:[%s15563_s7 + $0xce8] sm:$0xff] %v1520_v29  ;;  %v1524_v31 = vld [vmem:[%s15558_s0 + $0x19d8] sm:$0xff]  ;;  %v1526_v32 = vld [vmem:[%s15558_s0 + $0x1a00] sm:$0xff] }
 0x111   : > { %1523 = vst [vmem:[%s15563_s7 + $0xcf0] sm:$0xff] %v1522_v30  ;;  %1525 = vst [vmem:[%s15563_s7 + $0xcf8] sm:$0xff] %v1524_v31  ;;  %v1528_v33 = vld [vmem:[%s15558_s0 + $0x1a08] sm:$0xff]  ;;  %v1530_v34 = vld [vmem:[%s15558_s0 + $0x1a10] sm:$0xff] }
 0x112   : > { %1527 = vst [vmem:[%s15563_s7 + $0xd00] sm:$0xff] %v1526_v32  ;;  %v1532_v35 = vld [vmem:[%s15558_s0 + $0x1a18] sm:$0xff]  ;;  %1529 = vst [vmem:[%s15563_s7 + $0xd08] sm:$0xff] %v1528_v33  ;;  %v1534_v36 = vld [vmem:[%s15558_s0 + $0x1a40] sm:$0xff] }
 0x113   : > { %1531 = vst [vmem:[%s15563_s7 + $0xd10] sm:$0xff] %v1530_v34  ;;  %1533 = vst [vmem:[%s15563_s7 + $0xd18] sm:$0xff] %v1532_v35  ;;  %v1536_v37 = vld [vmem:[%s15558_s0 + $0x1a48] sm:$0xff]  ;;  %v1538_v38 = vld [vmem:[%s15558_s0 + $0x1a50] sm:$0xff] }
 0x114   : > { %1535 = vst [vmem:[%s15563_s7 + $0xd20] sm:$0xff] %v1534_v36  ;;  %1537 = vst [vmem:[%s15563_s7 + $0xd28] sm:$0xff] %v1536_v37  ;;  %v1540_v39 = vld [vmem:[%s15558_s0 + $0x1a58] sm:$0xff]  ;;  %v1542_v40 = vld [vmem:[%s15558_s0 + $0x1a80] sm:$0xff] }
 0x115   : > { %1539 = vst [vmem:[%s15563_s7 + $0xd30] sm:$0xff] %v1538_v38  ;;  %v1544_v41 = vld [vmem:[%s15558_s0 + $0x1a88] sm:$0xff]  ;;  %1541 = vst [vmem:[%s15563_s7 + $0xd38] sm:$0xff] %v1540_v39  ;;  %v1546_v42 = vld [vmem:[%s15558_s0 + $0x1a90] sm:$0xff] }
 0x116   : > { %1543 = vst [vmem:[%s15563_s7 + $0xd40] sm:$0xff] %v1542_v40  ;;  %1545 = vst [vmem:[%s15563_s7 + $0xd48] sm:$0xff] %v1544_v41  ;;  %v1548_v43 = vld [vmem:[%s15558_s0 + $0x1a98] sm:$0xff]  ;;  %v1550_v44 = vld [vmem:[%s15558_s0 + $0x1ac0] sm:$0xff] }
 0x117   : > { %1547 = vst [vmem:[%s15563_s7 + $0xd50] sm:$0xff] %v1546_v42  ;;  %1549 = vst [vmem:[%s15563_s7 + $0xd58] sm:$0xff] %v1548_v43  ;;  %v1552_v45 = vld [vmem:[%s15558_s0 + $0x1ac8] sm:$0xff]  ;;  %v1554_v46 = vld [vmem:[%s15558_s0 + $0x1ad0] sm:$0xff] }
 0x118   : > { %1551 = vst [vmem:[%s15563_s7 + $0xd60] sm:$0xff] %v1550_v44  ;;  %v1556_v47 = vld [vmem:[%s15558_s0 + $0x1ad8] sm:$0xff]  ;;  %1553 = vst [vmem:[%s15563_s7 + $0xd68] sm:$0xff] %v1552_v45  ;;  %v1558_v48 = vld [vmem:[%s15558_s0 + $0x1b00] sm:$0xff] }
 0x119   : > { %1555 = vst [vmem:[%s15563_s7 + $0xd70] sm:$0xff] %v1554_v46  ;;  %1557 = vst [vmem:[%s15563_s7 + $0xd78] sm:$0xff] %v1556_v47  ;;  %v1560_v49 = vld [vmem:[%s15558_s0 + $0x1b08] sm:$0xff]  ;;  %v1562_v50 = vld [vmem:[%s15558_s0 + $0x1b10] sm:$0xff] }
 0x11a   : > { %1559 = vst [vmem:[%s15563_s7 + $0xd80] sm:$0xff] %v1558_v48  ;;  %1561 = vst [vmem:[%s15563_s7 + $0xd88] sm:$0xff] %v1560_v49  ;;  %v1564_v51 = vld [vmem:[%s15558_s0 + $0x1b18] sm:$0xff]  ;;  %v1566_v52 = vld [vmem:[%s15558_s0 + $0x1b40] sm:$0xff] }
 0x11b   : > { %1563 = vst [vmem:[%s15563_s7 + $0xd90] sm:$0xff] %v1562_v50  ;;  %v1568_v53 = vld [vmem:[%s15558_s0 + $0x1b48] sm:$0xff]  ;;  %1565 = vst [vmem:[%s15563_s7 + $0xd98] sm:$0xff] %v1564_v51  ;;  %v1570_v54 = vld [vmem:[%s15558_s0 + $0x1b50] sm:$0xff] }
 0x11c   : > { %1567 = vst [vmem:[%s15563_s7 + $0xda0] sm:$0xff] %v1566_v52  ;;  %1569 = vst [vmem:[%s15563_s7 + $0xda8] sm:$0xff] %v1568_v53  ;;  %v1572_v55 = vld [vmem:[%s15558_s0 + $0x1b58] sm:$0xff]  ;;  %v1574_v56 = vld [vmem:[%s15558_s0 + $0x1b80] sm:$0xff] }
 0x11d   : > { %1571 = vst [vmem:[%s15563_s7 + $0xdb0] sm:$0xff] %v1570_v54  ;;  %1573 = vst [vmem:[%s15563_s7 + $0xdb8] sm:$0xff] %v1572_v55  ;;  %v1576_v57 = vld [vmem:[%s15558_s0 + $0x1b88] sm:$0xff]  ;;  %v1578_v58 = vld [vmem:[%s15558_s0 + $0x1b90] sm:$0xff] }
 0x11e   : > { %1575 = vst [vmem:[%s15563_s7 + $0xdc0] sm:$0xff] %v1574_v56  ;;  %v1580_v59 = vld [vmem:[%s15558_s0 + $0x1b98] sm:$0xff]  ;;  %1577 = vst [vmem:[%s15563_s7 + $0xdc8] sm:$0xff] %v1576_v57  ;;  %v1582_v60 = vld [vmem:[%s15558_s0 + $0x1bc0] sm:$0xff] }
 0x11f   : > { %1579 = vst [vmem:[%s15563_s7 + $0xdd0] sm:$0xff] %v1578_v58  ;;  %1581 = vst [vmem:[%s15563_s7 + $0xdd8] sm:$0xff] %v1580_v59  ;;  %v1584_v61 = vld [vmem:[%s15558_s0 + $0x1bc8] sm:$0xff]  ;;  %v1586_v62 = vld [vmem:[%s15558_s0 + $0x1bd0] sm:$0xff] }
 0x120   : > { %1583 = vst [vmem:[%s15563_s7 + $0xde0] sm:$0xff] %v1582_v60  ;;  %1585 = vst [vmem:[%s15563_s7 + $0xde8] sm:$0xff] %v1584_v61  ;;  %v1588_v63 = vld [vmem:[%s15558_s0 + $0x1bd8] sm:$0xff]  ;;  %v1590_v0 = vld [vmem:[%s15558_s0 + $0x1c00] sm:$0xff] }
 0x121   : > { %1587 = vst [vmem:[%s15563_s7 + $0xdf0] sm:$0xff] %v1586_v62  ;;  %v1592_v1 = vld [vmem:[%s15558_s0 + $0x1c08] sm:$0xff]  ;;  %1589 = vst [vmem:[%s15563_s7 + $0xdf8] sm:$0xff] %v1588_v63  ;;  %v1594_v2 = vld [vmem:[%s15558_s0 + $0x1c10] sm:$0xff] }
 0x122   : > { %1591 = vst [vmem:[%s15563_s7 + $0xe00] sm:$0xff] %v1590_v0  ;;  %1593 = vst [vmem:[%s15563_s7 + $0xe08] sm:$0xff] %v1592_v1  ;;  %v1596_v3 = vld [vmem:[%s15558_s0 + $0x1c18] sm:$0xff]  ;;  %v1598_v4 = vld [vmem:[%s15558_s0 + $0x1c40] sm:$0xff] }
 0x123   : > { %1595 = vst [vmem:[%s15563_s7 + $0xe10] sm:$0xff] %v1594_v2  ;;  %1597 = vst [vmem:[%s15563_s7 + $0xe18] sm:$0xff] %v1596_v3  ;;  %v1600_v5 = vld [vmem:[%s15558_s0 + $0x1c48] sm:$0xff]  ;;  %v1602_v6 = vld [vmem:[%s15558_s0 + $0x1c50] sm:$0xff] }
 0x124   : > { %1599 = vst [vmem:[%s15563_s7 + $0xe20] sm:$0xff] %v1598_v4  ;;  %v1604_v7 = vld [vmem:[%s15558_s0 + $0x1c58] sm:$0xff]  ;;  %1601 = vst [vmem:[%s15563_s7 + $0xe28] sm:$0xff] %v1600_v5  ;;  %v1606_v8 = vld [vmem:[%s15558_s0 + $0x1c80] sm:$0xff] }
 0x125   : > { %1603 = vst [vmem:[%s15563_s7 + $0xe30] sm:$0xff] %v1602_v6  ;;  %1605 = vst [vmem:[%s15563_s7 + $0xe38] sm:$0xff] %v1604_v7  ;;  %v1608_v9 = vld [vmem:[%s15558_s0 + $0x1c88] sm:$0xff]  ;;  %v1610_v10 = vld [vmem:[%s15558_s0 + $0x1c90] sm:$0xff] }
 0x126   : > { %1607 = vst [vmem:[%s15563_s7 + $0xe40] sm:$0xff] %v1606_v8  ;;  %1609 = vst [vmem:[%s15563_s7 + $0xe48] sm:$0xff] %v1608_v9  ;;  %v1612_v11 = vld [vmem:[%s15558_s0 + $0x1c98] sm:$0xff]  ;;  %v1614_v12 = vld [vmem:[%s15558_s0 + $0x1cc0] sm:$0xff] }
 0x127   : > { %1611 = vst [vmem:[%s15563_s7 + $0xe50] sm:$0xff] %v1610_v10  ;;  %v1616_v13 = vld [vmem:[%s15558_s0 + $0x1cc8] sm:$0xff]  ;;  %1613 = vst [vmem:[%s15563_s7 + $0xe58] sm:$0xff] %v1612_v11  ;;  %v1618_v14 = vld [vmem:[%s15558_s0 + $0x1cd0] sm:$0xff] }
 0x128   : > { %1615 = vst [vmem:[%s15563_s7 + $0xe60] sm:$0xff] %v1614_v12  ;;  %1617 = vst [vmem:[%s15563_s7 + $0xe68] sm:$0xff] %v1616_v13  ;;  %v1620_v15 = vld [vmem:[%s15558_s0 + $0x1cd8] sm:$0xff]  ;;  %v1622_v16 = vld [vmem:[%s15558_s0 + $0x1d00] sm:$0xff] }
 0x129   : > { %1619 = vst [vmem:[%s15563_s7 + $0xe70] sm:$0xff] %v1618_v14  ;;  %1621 = vst [vmem:[%s15563_s7 + $0xe78] sm:$0xff] %v1620_v15  ;;  %v1624_v17 = vld [vmem:[%s15558_s0 + $0x1d08] sm:$0xff]  ;;  %v1626_v18 = vld [vmem:[%s15558_s0 + $0x1d10] sm:$0xff] }
 0x12a   : > { %1623 = vst [vmem:[%s15563_s7 + $0xe80] sm:$0xff] %v1622_v16  ;;  %v1628_v19 = vld [vmem:[%s15558_s0 + $0x1d18] sm:$0xff]  ;;  %1625 = vst [vmem:[%s15563_s7 + $0xe88] sm:$0xff] %v1624_v17  ;;  %v1630_v20 = vld [vmem:[%s15558_s0 + $0x1d40] sm:$0xff] }
 0x12b   : > { %1627 = vst [vmem:[%s15563_s7 + $0xe90] sm:$0xff] %v1626_v18  ;;  %1629 = vst [vmem:[%s15563_s7 + $0xe98] sm:$0xff] %v1628_v19  ;;  %v1632_v21 = vld [vmem:[%s15558_s0 + $0x1d48] sm:$0xff]  ;;  %v1634_v22 = vld [vmem:[%s15558_s0 + $0x1d50] sm:$0xff] }
 0x12c   : > { %1631 = vst [vmem:[%s15563_s7 + $0xea0] sm:$0xff] %v1630_v20  ;;  %1633 = vst [vmem:[%s15563_s7 + $0xea8] sm:$0xff] %v1632_v21  ;;  %v1636_v23 = vld [vmem:[%s15558_s0 + $0x1d58] sm:$0xff]  ;;  %v1638_v24 = vld [vmem:[%s15558_s0 + $0x1d80] sm:$0xff] }
 0x12d   : > { %1635 = vst [vmem:[%s15563_s7 + $0xeb0] sm:$0xff] %v1634_v22  ;;  %v1640_v25 = vld [vmem:[%s15558_s0 + $0x1d88] sm:$0xff]  ;;  %1637 = vst [vmem:[%s15563_s7 + $0xeb8] sm:$0xff] %v1636_v23  ;;  %v1642_v26 = vld [vmem:[%s15558_s0 + $0x1d90] sm:$0xff] }
 0x12e   : > { %1639 = vst [vmem:[%s15563_s7 + $0xec0] sm:$0xff] %v1638_v24  ;;  %1641 = vst [vmem:[%s15563_s7 + $0xec8] sm:$0xff] %v1640_v25  ;;  %v1644_v27 = vld [vmem:[%s15558_s0 + $0x1d98] sm:$0xff]  ;;  %v1646_v28 = vld [vmem:[%s15558_s0 + $0x1dc0] sm:$0xff] }
 0x12f   : > { %1643 = vst [vmem:[%s15563_s7 + $0xed0] sm:$0xff] %v1642_v26  ;;  %1645 = vst [vmem:[%s15563_s7 + $0xed8] sm:$0xff] %v1644_v27  ;;  %v1648_v29 = vld [vmem:[%s15558_s0 + $0x1dc8] sm:$0xff]  ;;  %v1650_v30 = vld [vmem:[%s15558_s0 + $0x1dd0] sm:$0xff] }
 0x130   : > { %1647 = vst [vmem:[%s15563_s7 + $0xee0] sm:$0xff] %v1646_v28  ;;  %v1652_v31 = vld [vmem:[%s15558_s0 + $0x1dd8] sm:$0xff]  ;;  %1649 = vst [vmem:[%s15563_s7 + $0xee8] sm:$0xff] %v1648_v29  ;;  %v1654_v32 = vld [vmem:[%s15558_s0 + $0x1e00] sm:$0xff] }
 0x131   : > { %1651 = vst [vmem:[%s15563_s7 + $0xef0] sm:$0xff] %v1650_v30  ;;  %1653 = vst [vmem:[%s15563_s7 + $0xef8] sm:$0xff] %v1652_v31  ;;  %v1656_v33 = vld [vmem:[%s15558_s0 + $0x1e08] sm:$0xff]  ;;  %v1658_v34 = vld [vmem:[%s15558_s0 + $0x1e10] sm:$0xff] }
 0x132   : > { %1655 = vst [vmem:[%s15563_s7 + $0xf00] sm:$0xff] %v1654_v32  ;;  %1657 = vst [vmem:[%s15563_s7 + $0xf08] sm:$0xff] %v1656_v33  ;;  %v1660_v35 = vld [vmem:[%s15558_s0 + $0x1e18] sm:$0xff]  ;;  %v1662_v36 = vld [vmem:[%s15558_s0 + $0x1e40] sm:$0xff] }
 0x133   : > { %1659 = vst [vmem:[%s15563_s7 + $0xf10] sm:$0xff] %v1658_v34  ;;  %v1664_v37 = vld [vmem:[%s15558_s0 + $0x1e48] sm:$0xff]  ;;  %1661 = vst [vmem:[%s15563_s7 + $0xf18] sm:$0xff] %v1660_v35  ;;  %v1666_v38 = vld [vmem:[%s15558_s0 + $0x1e50] sm:$0xff] }
 0x134   : > { %1663 = vst [vmem:[%s15563_s7 + $0xf20] sm:$0xff] %v1662_v36  ;;  %1665 = vst [vmem:[%s15563_s7 + $0xf28] sm:$0xff] %v1664_v37  ;;  %v1668_v39 = vld [vmem:[%s15558_s0 + $0x1e58] sm:$0xff]  ;;  %v1670_v40 = vld [vmem:[%s15558_s0 + $0x1e80] sm:$0xff] }
 0x135   : > { %1667 = vst [vmem:[%s15563_s7 + $0xf30] sm:$0xff] %v1666_v38  ;;  %1669 = vst [vmem:[%s15563_s7 + $0xf38] sm:$0xff] %v1668_v39  ;;  %v1672_v41 = vld [vmem:[%s15558_s0 + $0x1e88] sm:$0xff]  ;;  %v1674_v42 = vld [vmem:[%s15558_s0 + $0x1e90] sm:$0xff] }
 0x136   : > { %1671 = vst [vmem:[%s15563_s7 + $0xf40] sm:$0xff] %v1670_v40  ;;  %v1676_v43 = vld [vmem:[%s15558_s0 + $0x1e98] sm:$0xff]  ;;  %1673 = vst [vmem:[%s15563_s7 + $0xf48] sm:$0xff] %v1672_v41  ;;  %v1678_v44 = vld [vmem:[%s15558_s0 + $0x1ec0] sm:$0xff] }
 0x137   : > { %1675 = vst [vmem:[%s15563_s7 + $0xf50] sm:$0xff] %v1674_v42  ;;  %1677 = vst [vmem:[%s15563_s7 + $0xf58] sm:$0xff] %v1676_v43  ;;  %v1680_v45 = vld [vmem:[%s15558_s0 + $0x1ec8] sm:$0xff]  ;;  %v1682_v46 = vld [vmem:[%s15558_s0 + $0x1ed0] sm:$0xff] }
 0x138   : > { %1679 = vst [vmem:[%s15563_s7 + $0xf60] sm:$0xff] %v1678_v44  ;;  %1681 = vst [vmem:[%s15563_s7 + $0xf68] sm:$0xff] %v1680_v45  ;;  %v1684_v47 = vld [vmem:[%s15558_s0 + $0x1ed8] sm:$0xff]  ;;  %v1686_v48 = vld [vmem:[%s15558_s0 + $0x1f00] sm:$0xff] }
 0x139   : > { %1683 = vst [vmem:[%s15563_s7 + $0xf70] sm:$0xff] %v1682_v46  ;;  %v1688_v49 = vld [vmem:[%s15558_s0 + $0x1f08] sm:$0xff]  ;;  %1685 = vst [vmem:[%s15563_s7 + $0xf78] sm:$0xff] %v1684_v47  ;;  %v1690_v50 = vld [vmem:[%s15558_s0 + $0x1f10] sm:$0xff] }
 0x13a   : > { %1687 = vst [vmem:[%s15563_s7 + $0xf80] sm:$0xff] %v1686_v48  ;;  %1689 = vst [vmem:[%s15563_s7 + $0xf88] sm:$0xff] %v1688_v49  ;;  %v1692_v51 = vld [vmem:[%s15558_s0 + $0x1f18] sm:$0xff]  ;;  %v1694_v52 = vld [vmem:[%s15558_s0 + $0x1f40] sm:$0xff] }
 0x13b   : > { %1691 = vst [vmem:[%s15563_s7 + $0xf90] sm:$0xff] %v1690_v50  ;;  %1693 = vst [vmem:[%s15563_s7 + $0xf98] sm:$0xff] %v1692_v51  ;;  %v1696_v53 = vld [vmem:[%s15558_s0 + $0x1f48] sm:$0xff]  ;;  %v1698_v54 = vld [vmem:[%s15558_s0 + $0x1f50] sm:$0xff] }
 0x13c   : > { %1695 = vst [vmem:[%s15563_s7 + $0xfa0] sm:$0xff] %v1694_v52  ;;  %v1700_v55 = vld [vmem:[%s15558_s0 + $0x1f58] sm:$0xff]  ;;  %1697 = vst [vmem:[%s15563_s7 + $0xfa8] sm:$0xff] %v1696_v53  ;;  %v1702_v56 = vld [vmem:[%s15558_s0 + $0x1f80] sm:$0xff] }
 0x13d   : > { %1699 = vst [vmem:[%s15563_s7 + $0xfb0] sm:$0xff] %v1698_v54  ;;  %1701 = vst [vmem:[%s15563_s7 + $0xfb8] sm:$0xff] %v1700_v55  ;;  %v1704_v57 = vld [vmem:[%s15558_s0 + $0x1f88] sm:$0xff]  ;;  %v1706_v58 = vld [vmem:[%s15558_s0 + $0x1f90] sm:$0xff] }
 0x13e   : > { %1703 = vst [vmem:[%s15563_s7 + $0xfc0] sm:$0xff] %v1702_v56  ;;  %1705 = vst [vmem:[%s15563_s7 + $0xfc8] sm:$0xff] %v1704_v57  ;;  %v1708_v59 = vld [vmem:[%s15558_s0 + $0x1f98] sm:$0xff]  ;;  %v1710_v60 = vld [vmem:[%s15558_s0 + $0x1fc0] sm:$0xff] }
 0x13f   : > { %1707 = vst [vmem:[%s15563_s7 + $0xfd0] sm:$0xff] %v1706_v58  ;;  %v1712_v61 = vld [vmem:[%s15558_s0 + $0x1fc8] sm:$0xff]  ;;  %1709 = vst [vmem:[%s15563_s7 + $0xfd8] sm:$0xff] %v1708_v59  ;;  %v1714_v62 = vld [vmem:[%s15558_s0 + $0x1fd0] sm:$0xff] }
 0x140   : > { %1711 = vst [vmem:[%s15563_s7 + $0xfe0] sm:$0xff] %v1710_v60  ;;  %1713 = vst [vmem:[%s15563_s7 + $0xfe8] sm:$0xff] %v1712_v61  ;;  %v1716_v63 = vld [vmem:[%s15558_s0 + $0x1fd8] sm:$0xff] }
 0x141   : > { %1715 = vst [vmem:[%s15563_s7 + $0xff0] sm:$0xff] %v1714_v62  ;;  %1717 = vst [vmem:[%s15563_s7 + $0xff8] sm:$0xff] %v1716_v63 }
 0x142 PF: > { %p12730_p0 = scmp.ge.s32.totalorder %s15317_s27, 1  ;;  %p1734_p1 = scmp.lt.s32.totalorder %s15317_s27, 7 }
 0x144   : > { %p1735_p2 = pnand %p12730_p0, %p1734_p1 }
 0x145   : > { %s1741_s4 = sand.u32 (!%p1735_p2), 1, %s15293_s25   ;;  %s19572_s3 = sand.u32 (!%p1735_p2), 1, %s15285_s30  }
 0x146   : > { %1738 = sbr.rel (%p1735_p2) target bundleno = 5770 (0x168a), region = 123  ;;  %s12731_s21 = sshll.u32 (!%p1735_p2), %s1741_s4, 12 }
 0x147   : > { %s16592_s19 = sshll.u32 (!%p1735_p2), %s19572_s3, 2  ;;  %p1825_p3 = scmp.lt.s32.totalorder (!%p1735_p2), %s15305_s26, 2 }
 0x148   : > { %s16596_s20 = sshll.u32 (!%p1735_p2), %s15301_s1, 3  ;;  %p1845_p4 = scmp.eq.s32.totalorder (!%p1735_p2), %s15305_s26, 0 }
 0x149   : > { %p1837_p5 = scmp.lt.s32.totalorder (!%p1735_p2), %s16596_s20, 15  ;;  %p1846_p8 = scmp.eq.s32.totalorder (!%p1735_p2), %s15301_s1, 0 }
 0x14a   : > { %s19623_s14 = sld [smem:[#allocation39_spill]] (!%p1735_p2)  ;;  %s16618_s24 = scalar_lea.vmem (!%p1735_p2), [#allocation5], %s12731_s21 }
 0x14b   : > { %s1826_s17 = scalar_select %p1825_p3, %s15305_s26, 2 }
 0x14c   : > { %s1838_s6 = scalar_select %p1837_p5, %s16596_s20, 15 }
 0x14d   : > { %s12734_s23 = sshll.u32 %s1826_s17, 2  ;;  %s12737_s28 = sshll.u32 %s1826_s17, 4 }
 0x14e   : > { %s16610_s16 = scalar_lea.vmem %s19545_s15, %s12734_s23  ;;  %p1847_p9 = pnand %p1846_p8, %p1845_p4 }
 0x14f   : > { %s1840_s2 = sadd.s32 %s12737_s28, %s1838_s6  ;;  %s19625_s4 = sld [smem:[#allocation26_spill]] (!%p1847_p9) }
 0x150   : > { %s16605_s7 = scalar_lea.vmem %s19623_s14, %s12734_s23  ;;  %s16616_s13 = scalar_lea.vmem %s19548_s18, %s1840_s2 }
 0x151   : > { %1850 = sbr.rel (%p1847_p9) target bundleno = 4304 (0x10d0), region = 131  ;;  %s19624_s14 = sld [smem:[#allocation25_spill]] (!%p1847_p9) }
 0x152   : > { %s19627_s23 = sld [smem:[#allocation27_spill]] (!%p1847_p9) }
 0x153   : > { %s19628_s5 = sld [smem:[#allocation28_spill]] (!%p1847_p9) }
 0x154   : > { %s19630_s3 = sld [smem:[#allocation29_spill]] (!%p1847_p9) }
 0x155   : > { %s19626_s0 = smov (!%p1847_p9), %s19625_s4  ;;  %s19631_s9 = sld [smem:[#allocation34_spill]] (!%p1847_p9) }
 0x156   : > { %vm1902_vm0 = vcmask 1043456   ;;  %vm1903_vm1 = vcmask 1044480   ;;  %v15319_v3 = vmov 65535   ;;  %vm1895_vm2 = vcmask 203776   ;;  %v14856_v8 = vld [vmem:[%s19625_s4] sm:$0xff]   ;;  %v14857_v16 = vld [vmem:[%s19626_s0 + $0x8] sm:$0xff]  }
 0x157   : > { %v1857_v0 = vld [vmem:[%s19624_s14 + $0x10] sm:$0xff]  ;;  %v1858_v1 = vld [vmem:[%s19624_s14 + $0x18] sm:$0x1]  ;;  %v1904_v4 = vsel %vm1902_vm0, 4294967295, %v15319_v3  ;;  %v1855_v5 = vld [vmem:[%s19624_s14] sm:$0xff]  ;;  %14332 = vmatprep.mubr.msk.bf16.mxu0 %vm1895_vm2, %v14856_v8  ;;  %v15320_v12 = vmov 0  }
 0x158   : > { %v1860_v2 = vpack.c.bf16 %v1858_v1, %v1857_v0  ;;  %v1856_v6 = vld [vmem:[%s19624_s14 + $0x8] sm:$0xff]  ;;  %v16634_v7 = vsel %vm1903_vm1, %v1904_v4, 0  ;;  %v1861_v11 = vld [vmem:[%s19627_s23] sm:$0xff]  ;;  %14854 = vset.pattern.permute.xlu0 %v15320_v12  ;;  %v1863_v13 = vld [vmem:[%s19627_s23 + $0x10] sm:$0xff]  ;;  %14855 = vset.pattern.permute.xlu1 %v15320_v12  ;;  %vm1962_vm3 = vcmask 990208   ;;  %s19632_s4 = sld [smem:[#allocation31_spill]] }
 0x159   : > { %v1859_v10 = vpack.c.bf16 %v1856_v6, %v1855_v5  ;;  %v1862_v14 = vld [vmem:[%s19627_s23 + $0x8] sm:$0xff]  ;;  %1867 = vperm.xlu0 %14854, %v1861_v11   ;;  %v1864_v15 = vld [vmem:[%s19627_s23 + $0x18] sm:$0xff]  ;;  %1877 = vperm.xlu1 %14855, %v1863_v13   ;;  %s19629_s21 = smov %s19628_s5  ;;  %v2016_v37 = vld [vmem:[%s19628_s5] sm:$0xff]  ;;  %s19634_s2 = sld [smem:[#allocation30_spill]]  ;;  %vm2457_vm4 = vcmask 261120   ;;  %vm3827_vm5 = vcmask 662528  }
 0x15a   : > { %v1907_v9 = vand.u32 %v16634_v7, %v1860_v2  ;;  %v2018_v38 = vld [vmem:[%s19629_s21 + $0x10] sm:$0xff]  ;;  %v2019_v39 = vld [vmem:[%s19629_s21 + $0x18] sm:$0xff]  ;;  %v2017_v40 = vld [vmem:[%s19629_s21 + $0x8] sm:$0xff]  ;;  %s19636_s17 = sld [smem:[#allocation32_spill]]  ;;  %vm3996_vm6 = vcmask 1040384   ;;  %vm15323_vm7 = vmmov 0  }
 0x15b   : > { %v2045_v41 = vld [vmem:[%s19630_s3 + $0x8] sm:$0xff]  ;;  %v2044_v42 = vld [vmem:[%s19630_s3] sm:$0xff]  ;;  %v14858_v63 = vld [vmem:[%s19631_s9 + $0x38] sm:$0x1f]   ;;  %s19637_s8 = sld [smem:[#allocation33_spill]] }
 0x15c   : > { %14328 = vmatprep.subr.bf16.mxu0 %v1907_v9  ;;  %v14859_v0 = vld [vmem:[%s19631_s9 + $0x78] sm:$0x1f]   ;;  %v2144_v1 = vand.u32 %v14858_v63, %v16634_v7  ;;  %v14860_v3 = vld [vmem:[%s19631_s9 + $0x30] sm:$0xff]   ;;  %v14862_v6 = vld [vmem:[%s19631_s9 + $0x28] sm:$0xff]   ;;  %s19638_s10 = sld [smem:[#allocation35_spill]] }
 0x15d   : > { %14329 = vmatpush3.bf16.msra.mxu0 %v1907_v9  ;;  %1872 = vperm.xlu0 %14854, %v1862_v14   ;;  %v2266_v2 = vand.u32 %v14859_v0, %v16634_v7  ;;  %v14861_v4 = vld [vmem:[%s19631_s9 + $0x70] sm:$0xff]   ;;  %v2047_v5 = vld [vmem:[%s19630_s3 + $0x18] sm:$0xff]  ;;  %v14863_v8 = vld [vmem:[%s19631_s9 + $0x68] sm:$0xff]   ;;  %s19639_s12 = sld [smem:[#allocation37_spill]] }
 0x15e   : > { %14330 = vmatprep.subr.bf16.mxu0 %v1859_v10  ;;  %1882 = vperm.xlu1 %14855, %v1864_v15   ;;  %s19633_s14 = smov %s19632_s4  ;;  %v3796_v9 = vld [vmem:[%s19632_s4 + $0x8] sm:$0xff]  ;;  %v14865_v11 = vld [vmem:[%s19631_s9 + $0x60] sm:$0xff]   ;;  %v2046_v14 = vld [vmem:[%s19630_s3 + $0x10] sm:$0xff]  ;;  %s19640_s6 = sld [smem:[#allocation36_spill]] }
 0x15f   : > { %14336 = vmatprep.subr.bf16.mxu1 %v2144_v1  ;;  %v3798_v13 = vld [vmem:[%s19633_s14 + $0x18] sm:$0xff]  ;;  %s19635_s28 = smov %s19634_s2  ;;  %s19644_s0 = sld [smem:[#allocation41_spill]] }
 0x160   : > { %14337 = vmatpush3.bf16.msra.mxu1 %v2144_v1  ;;  %v14866_v15 = vld [vmem:[%s19631_s9 + $0x18] sm:$0xff]  }
 0x161   : > { %14331 = vmatpush3.bf16.msra.mxu0 %v1859_v10  ;;  %14338 = vmatprep.subr.bf16.mxu1 %v14860_v3  ;;  %v14864_v10 = vld [vmem:[%s19631_s9 + $0x20] sm:$0xff]  }
 0x162   : > { %14356 = vmatprep.subr.bf16.mxu0 %v2266_v2 }
 0x164   : > { %14333 = vmatmul.mubr.msk.bf16.vlgmr.msra.gmra.mxu0 %vm1895_vm2, %v14857_v16  ;;  %14339 = vmatpush3.bf16.msra.mxu1 %v14860_v3  ;;  %v14867_v16 = vld [vmem:[%s19631_s9 + $0x58] sm:$0xff]   ;;  %s19641_s11 = smov %s19640_s6 }
 0x165   : > { %14357 = vmatpush3.bf16.msra.mxu0 %v2266_v2  ;;  %14340 = vmatprep.subr.bf16.mxu1 %v14862_v6 }
 0x166   : > { %14358 = vmatprep.subr.bf16.mxu0 %v14861_v4 }
 0x168   : > { %14341 = vmatpush3.bf16.msra.mxu1 %v14862_v6  ;;  %v14880_v6 = vld [vmem:[%s19631_s9 + $0x88] sm:$0xff]  }
 0x169   : > { %14359 = vmatpush3.bf16.msra.mxu0 %v14861_v4  ;;  %14342 = vmatprep.subr.bf16.mxu1 %v14864_v10  ;;  %v14878_v4 = vld [vmem:[%s19631_s9 + $0x98] sm:$0xff]  }
 0x16a   : > { %14360 = vmatprep.subr.bf16.mxu0 %v14863_v8 }
 0x16c   : > { %14343 = vmatpush3.bf16.msra.mxu1 %v14864_v10 }
 0x16d   : > { %14361 = vmatpush3.bf16.msra.mxu0 %v14863_v8  ;;  %14344 = vmatprep.subr.bf16.mxu1 %v14866_v15  ;;  %v14881_v8 = vld [vmem:[%s19631_s9 + $0x80] sm:$0xff]  }
 0x16e   : > { %14362 = vmatprep.subr.bf16.mxu0 %v14865_v11 }
 0x170   : > { %14345 = vmatpush3.bf16.msra.mxu1 %v14866_v15 }
 0x171   : > { %14363 = vmatpush3.bf16.msra.mxu0 %v14865_v11 }
 0x172   : > { %14364 = vmatprep.subr.bf16.mxu0 %v14867_v16 }
 0x175   : > { %14365 = vmatpush3.bf16.msra.mxu0 %v14867_v16 }
 0x1d4   : > { %v1878_v17 = vpop.permute.xlu1 %1877  ;;  %v1868_v18 = vpop.permute.xlu0 %1867 }
 0x1d8   : > { %v1873_v26 = vpop.permute.xlu0 %1872 }
 0x1d9   : > { %v1883_v23 = vpop.permute.xlu1 %1882 }
 0x224   : > { %v14334_v19 = vpop.f32.mrf.mxu0 }
 0x225   : > { %v1952_v21 = vadd.f32 %v14334_v19, %v1878_v17  ;;  %v3795_v17 = vld [vmem:[%s19633_s14] sm:$0xff]  ;;  %v14869_v19 = vld [vmem:[%s19631_s9 + $0x50] sm:$0xff]  }
 0x226   : > { %v1943_v20 = vpop.f32.mrf.mxu0  ;;  %14366 = vmatprep.subr.bf16.mxu0 %v14869_v19 }
 0x227   : > { %v1944_v22 = vadd.f32 %v1943_v20, %v1868_v18  ;;  %v1960_v28 = vmax.f32 %v1952_v21, 0.0  ;;  %v14868_v18 = vld [vmem:[%s19631_s9 + $0x10] sm:$0xff]   ;;  %v14870_v21 = vld [vmem:[%s19631_s9 + $0x8] sm:$0xff]   ;;  %14367 = vmatpush3.bf16.msra.mxu0 %v14869_v19 }
 0x228   : > { %v14335_v24 = vpop.f32.mrf.mxu0  ;;  %14346 = vmatprep.subr.bf16.mxu1 %v14868_v18  ;;  %v3797_v20 = vld [vmem:[%s19633_s14 + $0x10] sm:$0xff] }
 0x229   : > { %v1958_v25 = vmax.f32 %v1944_v22, 0.0  ;;  %v1955_v29 = vadd.f32 %v14335_v24, %v1883_v23  ;;  %v1969_v35 = vsel %vm1962_vm3, %v1960_v28, 0.0  ;;  %14347 = vmatpush3.bf16.msra.mxu1 %v14868_v18  ;;  %v14871_v22 = vld [vmem:[%s19631_s9 + $0x48] sm:$0xff]   ;;  %v14872_v23 = vld [vmem:[%s19631_s9] sm:$0xff]  }
 0x22a   : > { %v1946_v27 = vpop.f32.mrf.mxu0  ;;  %14348 = vmatprep.subr.bf16.mxu1 %v14870_v21  ;;  %14368 = vmatprep.subr.bf16.mxu0 %v14871_v22  ;;  %v14873_v24 = vld [vmem:[%s19631_s9 + $0x40] sm:$0xff]  }
 0x22b   : > { %v1947_v30 = vadd.f32 %v1946_v27, %v1873_v26  ;;  %v1963_v31 = vsel %vm1962_vm3, %v1958_v25, 0.0  ;;  %v1961_v33 = vmax.f32 %v1955_v29, 0.0  ;;  %14369 = vmatpush3.bf16.msra.mxu0 %v14871_v22  ;;  %v14883_v22 = vld [vmem:[%s19635_s28 + $0x28] sm:$0xff]  }
 0x22c   : > { %1964 = vadd.xlane.f32.xlu0 %v1963_v31  ;;  %14370 = vmatprep.subr.bf16.mxu0 %v14873_v24 }
 0x22d   : > { %v1959_v32 = vmax.f32 %v1947_v30, 0.0  ;;  %v1972_v36 = vsel %vm1962_vm3, %v1961_v33, 0.0  ;;  %14349 = vmatpush3.bf16.msra.mxu1 %v14870_v21 }
 0x22e   : > { %14350 = vmatprep.subr.bf16.mxu1 %v14872_v23 }
 0x22f   : > { %v1966_v34 = vsel %vm1962_vm3, %v1959_v32, 0.0  ;;  %14371 = vmatpush3.bf16.msra.mxu0 %v14873_v24  ;;  %v14886_v24 = vld [vmem:[%s19631_s9 + $0xf8] sm:$0x1f]  }
 0x230   : > { %1967 = vadd.xlane.f32.xlu1 %v1966_v34  ;;  %1970 = vadd.xlane.f32.xlu0 %v1969_v35 }
 0x231   : > { %14351 = vmatpush3.bf16.msra.mxu1 %v14872_v23  ;;  %v14884_v23 = vld [vmem:[%s19635_s28] sm:$0xff]  }
 0x234   : > { %1973 = vadd.xlane.f32.xlu0 %v1972_v36 }
 0x241   : > { %2022 = vperm.xlu1 %14855, %v2016_v37  }
 0x245   : > { %2032 = vperm.xlu1 %14855, %v2018_v38  }
 0x249   : > { %2037 = vperm.xlu1 %14855, %v2019_v39  }
 0x24a   : > { %2027 = vperm.xlu0 %14854, %v2017_v40  }
 0x24d   : > { %2055 = vperm.xlu1 %14855, %v2045_v41  }
 0x24e   : > { %2050 = vperm.xlu0 %14854, %v2044_v42  }
 0x2b5   : > { %v1965_v43 = vpop.xlane.xlu0 %1964 }
 0x2b6   : > { %v1976_v44 = vmul.f32 0.008264462, %v1965_v43 }
 0x2b8   : > { %v16681_v48 = vsub.f32 %v1958_v25, %v1976_v44  ;;  %v14874_v25 = vld [vmem:[%s19631_s9 + $0xb8] sm:$0x1f]  }
 0x2b9   : > { %v1968_v45 = vpop.xlane.xlu1 %1967  ;;  %v1971_v46 = vpop.xlane.xlu0 %1970  ;;  %v2389_v26 = vand.u32 %v14874_v25, %v16634_v7 }
 0x2ba   : > { %v1978_v47 = vmul.f32 0.008264462, %v1971_v46  ;;  %v1977_v49 = vmul.f32 0.008264462, %v1968_v45  ;;  %v1984_v57 = vmul.f32 %v16681_v48, %v16681_v48 }
 0x2bb   : > { %14376 = vmatprep.subr.bf16.mxu1 %v2389_v26 }
 0x2bc   : > { %v16683_v50 = vsub.f32 %v1960_v28, %v1978_v47  ;;  %v16687_v54 = vsub.f32 %v1959_v32, %v1977_v49  ;;  %v1988_v59 = vsel %vm1962_vm3, %v1984_v57, 0.0 }
 0x2bd   : > { %v1974_v51 = vpop.xlane.xlu0 %1973  ;;  %v2023_v27 = vpop.permute.xlu1 %2022 }
 0x2be   : > { %v1979_v52 = vmul.f32 0.008264462, %v1974_v51  ;;  %v1986_v53 = vmul.f32 %v16683_v50, %v16683_v50  ;;  %v1985_v61 = vmul.f32 %v16687_v54, %v16687_v54 }
 0x2c0   : > { %v16689_v55 = vsub.f32 %v1961_v33, %v1979_v52  ;;  %v1994_v56 = vsel %vm1962_vm3, %v1986_v53, 0.0  ;;  %v1991_v62 = vsel %vm1962_vm3, %v1985_v61, 0.0 }
 0x2c1   : > { %1995 = vadd.xlane.f32.xlu1 %v1994_v56  ;;  %v2033_v28 = vpop.permute.xlu1 %2032 }
 0x2c2   : > { %v1987_v58 = vmul.f32 %v16689_v55, %v16689_v55 }
 0x2c4   : > { %v1997_v60 = vsel %vm1962_vm3, %v1987_v58, 0.0 }
 0x2c5   : > { %1989 = vadd.xlane.f32.xlu1 %v1988_v59  ;;  %1998 = vadd.xlane.f32.xlu0 %v1997_v60  ;;  %v2038_v29 = vpop.permute.xlu1 %2037  ;;  %v2028_v30 = vpop.permute.xlu0 %2027 }
 0x2c9   : > { %1992 = vadd.xlane.f32.xlu0 %v1991_v62  ;;  %v2056_v31 = vpop.permute.xlu1 %2055  ;;  %v2051_v32 = vpop.permute.xlu0 %2050 }
 0x2d6   : > { %2065 = vperm.xlu1 %14855, %v2047_v5   ;;  %v14879_v5 = vld [vmem:[%s19631_s9 + $0x90] sm:$0xff]  }
 0x2da   : > { %3806 = vperm.xlu1 %14855, %v3796_v9   ;;  %v14882_v9 = vld [vmem:[%s19634_s2 + $0x20] sm:$0xff]  }
 0x2de   : > { %3816 = vperm.xlu1 %14855, %v3798_v13  }
 0x2df   : > { %2060 = vperm.xlu0 %14854, %v2046_v14  }
 0x2e3   : > { %3801 = vperm.xlu0 %14854, %v3795_v17  }
 0x2e7   : > { %3811 = vperm.xlu0 %14854, %v3797_v20  }
 0x34a   : > { %v1996_v33 = vpop.xlane.xlu1 %1995 }
 0x34b   : > { %v2002_v34 = vmul.f32 0.008264462, %v1996_v33  ;;  %v14892_v33 = vld [vmem:[%s19631_s9 + $0xc8] sm:$0xff]  }
 0x34d   : > { %v2006_v35 = vadd.f32 1e-05, %v2002_v34  ;;  %v14893_v34 = vld [vmem:[%s19631_s9 + $0xc0] sm:$0xff]  }
 0x34e   : > { %v1990_v36 = vpop.xlane.xlu1 %1989  ;;  %v1999_v37 = vpop.xlane.xlu0 %1998 }
 0x34f   : > { %v2000_v38 = vmul.f32 0.008264462, %v1990_v36  ;;  %v2003_v39 = vmul.f32 0.008264462, %v1999_v37  ;;  %15022 = vrsqrt.f32 %v2006_v35  ;;  %v14894_v35 = vld [vmem:[%s19635_s28 + $0x30] sm:$0xff]  }
 0x351   : > { %v2004_v40 = vadd.f32 1e-05, %v2000_v38  ;;  %v2007_v41 = vadd.f32 1e-05, %v2003_v39 }
 0x352   : > { %v1993_v42 = vpop.xlane.xlu0 %1992  ;;  %v2066_v60 = vpop.permute.xlu1 %2065 }
 0x353   : > { %15024 = vrsqrt.f32 %v2004_v40  ;;  %v2001_v43 = vmul.f32 0.008264462, %v1993_v42 }
 0x354   : > { %15026 = vrsqrt.f32 %v2007_v41 }
 0x355   : > { %v2005_v44 = vadd.f32 1e-05, %v2001_v43 }
 0x357   : > { %15028 = vrsqrt.f32 %v2005_v44 }
 0x35a   : > { %v2061_v1 = vpop.permute.xlu0 %2060 }
 0x35c   : > { %v15023_v45 = vpop.eup %15022 }
 0x35d   : > { %v2014_v52 = vmul.f32 %v15023_v45, %v16683_v50  ;;  %v14875_v50 = vld [vmem:[%s19631_s9 + $0xb0] sm:$0xff]  }
 0x35f   : > { %v2042_v59 = vmul.f32 %v2033_v28, %v2014_v52  ;;  %v14887_v28 = vld [vmem:[%s19631_s9 + $0xf0] sm:$0xff]  }
 0x360   : > { %v15025_v46 = vpop.eup %15024 }
 0x361   : > { %v15027_v47 = vpop.eup %15026  ;;  %v2012_v49 = vmul.f32 %v15025_v46, %v16681_v48  ;;  %v2070_v2 = vadd.f32 %v2061_v1, %v2042_v59  ;;  %v14898_v1 = vld [vmem:[%s19631_s9 + $0x138] sm:$0x1f]  }
 0x362   : > { %v2015_v51 = vmul.f32 %v15027_v47, %v16689_v55  ;;  %v14877_v55 = vld [vmem:[%s19631_s9 + $0xa0] sm:$0xff]  }
 0x363   : > { %v2040_v57 = vmul.f32 %v2023_v27, %v2012_v49  ;;  %v14885_v27 = vld [vmem:[%s19635_s28 + $0x8] sm:$0xff]  }
 0x364   : > { %v15029_v53 = vpop.eup %15028  ;;  %v2043_v56 = vmul.f32 %v2038_v29, %v2015_v51  ;;  %v14888_v29 = vld [vmem:[%s19631_s9 + $0xe8] sm:$0xff]  }
 0x365   : > { %v2013_v58 = vmul.f32 %v15029_v53, %v16687_v54  ;;  %v2068_v63 = vadd.f32 %v2051_v32, %v2040_v57  ;;  %v14876_v54 = vld [vmem:[%s19631_s9 + $0xa8] sm:$0xff]   ;;  %v14891_v32 = vld [vmem:[%s19631_s9 + $0xd0] sm:$0xff]  }
 0x366   : > { %v2071_v62 = vadd.f32 %v2066_v60, %v2043_v56 }
 0x367   : > { %v2041_v61 = vmul.f32 %v2028_v30, %v2013_v58  ;;  %v14889_v30 = vld [vmem:[%s19631_s9 + $0xe0] sm:$0xff]  }
 0x368   : > { %v16779_v48 = vpack.c.bf16 %v2071_v62, %v2070_v2 }
 0x369   : > { %v2069_v0 = vadd.f32 %v2056_v31, %v2041_v61  ;;  %v14890_v31 = vld [vmem:[%s19631_s9 + $0xd8] sm:$0xff]  }
 0x36b   : > { %v16777_v3 = vpack.c.bf16 %v2069_v0, %v2068_v63  ;;  %v14895_v63 = vld [vmem:[%s19635_s28 + $0x38] sm:$0xff]   ;;  %v14896_v0 = vld [vmem:[%s19635_s28 + $0x10] sm:$0xff]  }
 0x36d   : > { %14352 = vmatprep.mubr.msk.bf16.mxu1 %vm1962_vm3, %v16777_v3  ;;  %14372 = vmatprep.mubr.msk.bf16.mxu0 %vm1962_vm3, %v16777_v3 }
 0x36e   : > { %14353 = vmatmul.mubr.msk.bf16.vlgmr.msra.gmra.mxu1 %vm1962_vm3, %v16779_v48  ;;  %14373 = vmatmul.mubr.msk.bf16.vlgmr.msra.gmra.mxu0 %vm1962_vm3, %v16779_v48 }
 0x36f   : > { %14377 = vmatpush3.bf16.msra.mxu1 %v2389_v26  ;;  %14392 = vmatprep.mubr.msk.bf16.mxu1 %vm1962_vm3, %v16777_v3  ;;  %v2643_v26 = vand.u32 %v14886_v24, %v16634_v7 }
 0x370   : > { %14378 = vmatprep.subr.bf16.mxu1 %v14875_v50  ;;  %14400 = vmatprep.mubr.msk.bf16.mxu0 %vm2457_vm4, %v14882_v9  ;;  %v14904_v9 = vld [vmem:[%s19631_s9 + $0x108] sm:$0xff]  }
 0x373   : > { %14379 = vmatpush3.bf16.msra.mxu1 %v14875_v50  ;;  %v2896_v50 = vand.u32 %v14898_v1, %v16634_v7  ;;  %v14921_v1 = vld [vmem:[%s19631_s9 + $0x1a0] sm:$0xff]  }
 0x374   : > { %14380 = vmatprep.subr.bf16.mxu1 %v14876_v54 }
 0x377   : > { %14381 = vmatpush3.bf16.msra.mxu1 %v14876_v54  ;;  %v14897_v54 = vld [vmem:[%s19635_s28 + $0x18] sm:$0xff]  }
 0x378   : > { %14382 = vmatprep.subr.bf16.mxu1 %v14877_v55 }
 0x37b   : > { %14383 = vmatpush3.bf16.msra.mxu1 %v14877_v55  ;;  %v14899_v55 = vld [vmem:[%s19631_s9 + $0x130] sm:$0xff]  }
 0x37c   : > { %14384 = vmatprep.subr.bf16.mxu1 %v14878_v4 }
 0x37f   : > { %14385 = vmatpush3.bf16.msra.mxu1 %v14878_v4  ;;  %v14900_v4 = vld [vmem:[%s19631_s9 + $0x128] sm:$0xff]  }
 0x380   : > { %14386 = vmatprep.subr.bf16.mxu1 %v14879_v5 }
 0x383   : > { %14387 = vmatpush3.bf16.msra.mxu1 %v14879_v5  ;;  %v14901_v5 = vld [vmem:[%s19631_s9 + $0x120] sm:$0xff]  }
 0x384   : > { %14388 = vmatprep.subr.bf16.mxu1 %v14880_v6 }
 0x387   : > { %14389 = vmatpush3.bf16.msra.mxu1 %v14880_v6  ;;  %v14902_v6 = vld [vmem:[%s19631_s9 + $0x118] sm:$0xff]  }
 0x388   : > { %14390 = vmatprep.subr.bf16.mxu1 %v14881_v8 }
 0x38b   : > { %14391 = vmatpush3.bf16.msra.mxu1 %v14881_v8  ;;  %v14903_v8 = vld [vmem:[%s19631_s9 + $0x110] sm:$0xff]  }
 0x38e   : > { %14393 = vmatmul.mubr.msk.bf16.vlgmr.msra.gmra.mxu1 %vm1962_vm3, %v16779_v48 }
 0x38f   : > { %14436 = vmatprep.mubr.msk.bf16.mxu1 %vm2457_vm4, %v14894_v35  ;;  %v14910_v35 = vld [vmem:[%s19631_s9 + $0x168] sm:$0xff]  }
 0x42e   : > { %v14354_v10 = vpop.f32.mrf.mxu1  ;;  %v14374_v36 = vpop.f32.mrf.mxu0 }
 0x430   : > { %v2180_v11 = vpop.f32.mrf.mxu1  ;;  %v2302_v37 = vpop.f32.mrf.mxu0 }
 0x432   : > { %v14355_v13 = vpop.f32.mrf.mxu1  ;;  %v14375_v38 = vpop.f32.mrf.mxu0 }
 0x433   : > { %v2196_v21 = vpack.c.bf16 %v14355_v13, %v14354_v10  ;;  %v2318_v62 = vpack.c.bf16 %v14375_v38, %v14374_v36  ;;  %v14905_v10 = vld [vmem:[%s19631_s9 + $0x100] sm:$0xff]   ;;  %v14913_v38 = vld [vmem:[%s19631_s9 + $0x150] sm:$0xff]  }
 0x434   : > { %v2183_v14 = vpop.f32.mrf.mxu1  ;;  %v2305_v39 = vpop.f32.mrf.mxu0  ;;  %v14911_v36 = vld [vmem:[%s19631_s9 + $0x160] sm:$0xff]  }
 0x435   : > { %v2195_v25 = vpack.c.bf16 %v2183_v14, %v2180_v11  ;;  %v2317_v2 = vpack.c.bf16 %v2305_v39, %v2302_v37  ;;  %v14906_v11 = vld [vmem:[%s19635_s28 + $0x40] sm:$0xff]   ;;  %v14912_v37 = vld [vmem:[%s19631_s9 + $0x158] sm:$0xff]   ;;  %v14914_v39 = vld [vmem:[%s19631_s9 + $0x148] sm:$0xff]  }
 0x44e   : > { %v14394_v15 = vpop.f32.mrf.mxu1 }
 0x450   : > { %v2425_v16 = vpop.f32.mrf.mxu1 }
 0x452   : > { %v14395_v17 = vpop.f32.mrf.mxu1 }
 0x453   : > { %v2441_v18 = vpack.c.bf16 %v14395_v17, %v14394_v15 }
 0x454   : > { %v2428_v19 = vpop.f32.mrf.mxu1 }
 0x455   : > { %v2440_v20 = vpack.c.bf16 %v2428_v19, %v2425_v16  ;;  %14396 = vmatprep.subr.bf16.mxu0 %v2441_v18 }
 0x456   : > { %14397 = vmatpush3.bf16.msra.mxu0 %v2441_v18 }
 0x457   : > { %14398 = vmatprep.subr.bf16.mxu0 %v2440_v20 }
 0x45a   : > { %14399 = vmatpush3.bf16.msra.mxu0 %v2440_v20 }
 0x45b   : > { %14404 = vmatprep.subr.bf16.mxu0 %v2196_v21 }
 0x45d   : > { %14401 = vmatmul.mubr.msk.bf16.vlgmr.msra.gmra.mxu0 %vm2457_vm4, %v14883_v22 }
 0x45e   : > { %14405 = vmatpush3.bf16.msra.mxu0 %v2196_v21  ;;  %14408 = vmatprep.mubr.msk.bf16.mxu0 %vm2457_vm4, %v14884_v23 }
 0x45f   : > { %14406 = vmatprep.subr.bf16.mxu0 %v2195_v25 }
 0x462   : > { %14407 = vmatpush3.bf16.msra.mxu0 %v2195_v25 }
 0x463   : > { %14412 = vmatprep.subr.bf16.mxu0 %v2643_v26 }
 0x465   : > { %14409 = vmatmul.mubr.msk.bf16.vlgmr.msra.gmra.mxu0 %vm2457_vm4, %v14885_v27 }
 0x466   : > { %14413 = vmatpush3.bf16.msra.mxu0 %v2643_v26  ;;  %14428 = vmatprep.mubr.msk.bf16.mxu0 %vm1962_vm3, %v16777_v3 }
 0x467   : > { %14414 = vmatprep.subr.bf16.mxu0 %v14887_v28 }
 0x46a   : > { %14415 = vmatpush3.bf16.msra.mxu0 %v14887_v28 }
 0x46b   : > { %14416 = vmatprep.subr.bf16.mxu0 %v14888_v29 }
 0x46e   : > { %14417 = vmatpush3.bf16.msra.mxu0 %v14888_v29  ;;  %v14908_v29 = vld [vmem:[%s19631_s9 + $0x178] sm:$0x1f]  }
 0x46f   : > { %14418 = vmatprep.subr.bf16.mxu0 %v14889_v30 }
 0x472   : > { %14419 = vmatpush3.bf16.msra.mxu0 %v14889_v30 }
 0x473   : > { %14420 = vmatprep.subr.bf16.mxu0 %v14890_v31 }
 0x476   : > { %14421 = vmatpush3.bf16.msra.mxu0 %v14890_v31 }
 0x477   : > { %14422 = vmatprep.subr.bf16.mxu0 %v14891_v32 }
 0x47a   : > { %14423 = vmatpush3.bf16.msra.mxu0 %v14891_v32  ;;  %v3088_v32 = vand.u32 %v14908_v29, %v16634_v7  ;;  %v14934_v29 = vld [vmem:[%s19631_s9 + $0x1c8] sm:$0xff]  }
 0x47b   : > { %14424 = vmatprep.subr.bf16.mxu0 %v14892_v33 }
 0x47e   : > { %14425 = vmatpush3.bf16.msra.mxu0 %v14892_v33  ;;  %v14907_v33 = vld [vmem:[%s19635_s28 + $0x48] sm:$0xff]  }
 0x47f   : > { %14426 = vmatprep.subr.bf16.mxu0 %v14893_v34 }
 0x482   : > { %14427 = vmatpush3.bf16.msra.mxu0 %v14893_v34  ;;  %v14909_v34 = vld [vmem:[%s19631_s9 + $0x170] sm:$0xff]  }
 0x485   : > { %14429 = vmatmul.mubr.msk.bf16.vlgmr.msra.gmra.mxu0 %vm1962_vm3, %v16779_v48 }
 0x486   : > { %14472 = vmatprep.mubr.msk.bf16.mxu0 %vm2457_vm4, %v14906_v11 }
 0x51d   : > { %v14402_v40 = vpop.f32.mrf.mxu0 }
 0x51f   : > { %v2498_v41 = vpop.f32.mrf.mxu0 }
 0x521   : > { %v14403_v42 = vpop.f32.mrf.mxu0 }
 0x523   : > { %v2501_v43 = vpop.f32.mrf.mxu0 }
 0x525   : > { %v14410_v44 = vpop.f32.mrf.mxu0 }
 0x526   : > { %v16863_v45 = vadd.f32 %v14410_v44, %v14402_v40  ;;  %v14915_v40 = vld [vmem:[%s19631_s9 + $0x140] sm:$0xff]  }
 0x527   : > { %v2563_v46 = vpop.f32.mrf.mxu0 }
 0x528   : > { %v16865_v47 = vadd.f32 %v2563_v46, %v2498_v41  ;;  %v14916_v41 = vld [vmem:[%s19635_s28 + $0x50] sm:$0xff]  }
 0x529   : > { %v14411_v49 = vpop.f32.mrf.mxu0 }
 0x52a   : > { %v16867_v51 = vadd.f32 %v14411_v49, %v14403_v42 }
 0x52b   : > { %v2566_v52 = vpop.f32.mrf.mxu0 }
 0x52c   : > { %v16869_v53 = vadd.f32 %v2566_v52, %v2501_v43 }
 0x545   : > { %v14430_v56 = vpop.f32.mrf.mxu0 }
 0x547   : > { %v2679_v57 = vpop.f32.mrf.mxu0 }
 0x549   : > { %v14431_v58 = vpop.f32.mrf.mxu0 }
 0x54a   : > { %v2695_v59 = vpack.c.bf16 %v14431_v58, %v14430_v56 }
 0x54b   : > { %v2682_v60 = vpop.f32.mrf.mxu0 }
 0x54c   : > { %v2694_v61 = vpack.c.bf16 %v2682_v60, %v2679_v57  ;;  %14432 = vmatprep.subr.bf16.mxu1 %v2695_v59 }
 0x54d   : > { %14433 = vmatpush3.bf16.msra.mxu1 %v2695_v59 }
 0x54e   : > { %14434 = vmatprep.subr.bf16.mxu1 %v2694_v61 }
 0x551   : > { %14435 = vmatpush3.bf16.msra.mxu1 %v2694_v61 }
 0x552   : > { %14440 = vmatprep.subr.bf16.mxu1 %v2318_v62 }
 0x554   : > { %14437 = vmatmul.mubr.msk.bf16.vlgmr.msra.gmra.mxu1 %vm2457_vm4, %v14895_v63 }
 0x555   : > { %14441 = vmatpush3.bf16.msra.mxu1 %v2318_v62  ;;  %14444 = vmatprep.mubr.msk.bf16.mxu1 %vm2457_vm4, %v14896_v0  ;;  %v14920_v0 = vld [vmem:[%s19631_s9 + $0x1a8] sm:$0xff]  }
 0x556   : > { %14442 = vmatprep.subr.bf16.mxu1 %v2317_v2 }
 0x559   : > { %14443 = vmatpush3.bf16.msra.mxu1 %v2317_v2  ;;  %v14922_v2 = vld [vmem:[%s19631_s9 + $0x198] sm:$0xff]  }
 0x55a   : > { %14448 = vmatprep.subr.bf16.mxu1 %v2896_v50 }
 0x55c   : > { %14445 = vmatmul.mubr.msk.bf16.vlgmr.msra.gmra.mxu1 %vm2457_vm4, %v14897_v54  ;;  %v14924_v54 = vld [vmem:[%s19631_s9 + $0x188] sm:$0xff]  }
 0x55d   : > { %14449 = vmatpush3.bf16.msra.mxu1 %v2896_v50  ;;  %14464 = vmatprep.mubr.msk.bf16.mxu1 %vm1962_vm3, %v16777_v3  ;;  %v14923_v50 = vld [vmem:[%s19631_s9 + $0x190] sm:$0xff]  }
 0x55e   : > { %14450 = vmatprep.subr.bf16.mxu1 %v14899_v55 }
 0x561   : > { %14451 = vmatpush3.bf16.msra.mxu1 %v14899_v55  ;;  %v14925_v55 = vld [vmem:[%s19631_s9 + $0x180] sm:$0xff]  }
 0x562   : > { %14452 = vmatprep.subr.bf16.mxu1 %v14900_v4 }
 0x565   : > { %14453 = vmatpush3.bf16.msra.mxu1 %v14900_v4  ;;  %v14926_v4 = vld [vmem:[%s19635_s28 + $0x60] sm:$0xff]  }
 0x566   : > { %14454 = vmatprep.subr.bf16.mxu1 %v14901_v5 }
 0x569   : > { %14455 = vmatpush3.bf16.msra.mxu1 %v14901_v5 }
 0x56a   : > { %14456 = vmatprep.subr.bf16.mxu1 %v14902_v6 }
 0x56d   : > { %14457 = vmatpush3.bf16.msra.mxu1 %v14902_v6 }
 0x56e   : > { %14458 = vmatprep.subr.bf16.mxu1 %v14903_v8 }
 0x571   : > { %14459 = vmatpush3.bf16.msra.mxu1 %v14903_v8 }
 0x572   : > { %14460 = vmatprep.subr.bf16.mxu1 %v14904_v9 }
 0x575   : > { %14461 = vmatpush3.bf16.msra.mxu1 %v14904_v9 }
 0x576   : > { %14462 = vmatprep.subr.bf16.mxu1 %v14905_v10 }
 0x579   : > { %14463 = vmatpush3.bf16.msra.mxu1 %v14905_v10 }
 0x57c   : > { %14465 = vmatmul.mubr.msk.bf16.vlgmr.msra.gmra.mxu1 %vm1962_vm3, %v16779_v48 }
 0x57d   : > { %14500 = vmatprep.mubr.msk.bf16.mxu1 %vm2457_vm4, %v14916_v41 }
 0x614   : > { %v14438_v13 = vpop.f32.mrf.mxu1 }
 0x616   : > { %v2751_v14 = vpop.f32.mrf.mxu1 }
 0x618   : > { %v14439_v15 = vpop.f32.mrf.mxu1 }
 0x61a   : > { %v2754_v16 = vpop.f32.mrf.mxu1 }
 0x61c   : > { %v14446_v17 = vpop.f32.mrf.mxu1 }
 0x61d   : > { %v16916_v18 = vadd.f32 %v14446_v17, %v14438_v13 }
 0x61e   : > { %v2816_v19 = vpop.f32.mrf.mxu1 }
 0x61f   : > { %v16918_v20 = vadd.f32 %v2816_v19, %v2751_v14 }
 0x620   : > { %v14447_v21 = vpop.f32.mrf.mxu1 }
 0x621   : > { %v16920_v22 = vadd.f32 %v14447_v21, %v14439_v15 }
 0x622   : > { %v2819_v23 = vpop.f32.mrf.mxu1 }
 0x623   : > { %v16922_v24 = vadd.f32 %v2819_v23, %v2754_v16 }
 0x63c   : > { %v14466_v25 = vpop.f32.mrf.mxu1 }
 0x63e   : > { %v2932_v26 = vpop.f32.mrf.mxu1 }
 0x640   : > { %v14467_v27 = vpop.f32.mrf.mxu1 }
 0x641   : > { %v2948_v28 = vpack.c.bf16 %v14467_v27, %v14466_v25  ;;  %v14930_v25 = vld [vmem:[%s19631_s9 + $0x1e8] sm:$0xff]   ;;  %v14932_v27 = vld [vmem:[%s19631_s9 + $0x1d8] sm:$0xff]  }
 0x642   : > { %v2935_v30 = vpop.f32.mrf.mxu1 }
 0x643   : > { %v2947_v31 = vpack.c.bf16 %v2935_v30, %v2932_v26  ;;  %14468 = vmatprep.subr.bf16.mxu0 %v2948_v28  ;;  %v14931_v26 = vld [vmem:[%s19631_s9 + $0x1e0] sm:$0xff]  }
 0x644   : > { %14469 = vmatpush3.bf16.msra.mxu0 %v2948_v28  ;;  %v14933_v28 = vld [vmem:[%s19631_s9 + $0x1d0] sm:$0xff]   ;;  %v14935_v30 = vld [vmem:[%s19631_s9 + $0x1c0] sm:$0xff]  }
 0x645   : > { %14470 = vmatprep.subr.bf16.mxu0 %v2947_v31 }
 0x648   : > { %14471 = vmatpush3.bf16.msra.mxu0 %v2947_v31  ;;  %v14936_v31 = vld [vmem:[%s19635_s28 + $0x70] sm:$0xff]  }
 0x649   : > { %14476 = vmatprep.subr.bf16.mxu0 %v3088_v32 }
 0x64b   : > { %14473 = vmatmul.mubr.msk.bf16.vlgmr.msra.gmra.mxu0 %vm2457_vm4, %v14907_v33 }
 0x64c   : > { %14477 = vmatpush3.bf16.msra.mxu0 %v3088_v32  ;;  %14492 = vmatprep.mubr.msk.bf16.mxu0 %vm1962_vm3, %v16777_v3 }
 0x64d   : > { %14478 = vmatprep.subr.bf16.mxu0 %v14909_v34 }
 0x650   : > { %14479 = vmatpush3.bf16.msra.mxu0 %v14909_v34 }
 0x651   : > { %14480 = vmatprep.subr.bf16.mxu0 %v14910_v35 }
 0x654   : > { %14481 = vmatpush3.bf16.msra.mxu0 %v14910_v35 }
 0x655   : > { %14482 = vmatprep.subr.bf16.mxu0 %v14911_v36 }
 0x658   : > { %14483 = vmatpush3.bf16.msra.mxu0 %v14911_v36 }
 0x659   : > { %14484 = vmatprep.subr.bf16.mxu0 %v14912_v37 }
 0x65c   : > { %14485 = vmatpush3.bf16.msra.mxu0 %v14912_v37 }
 0x65d   : > { %14486 = vmatprep.subr.bf16.mxu0 %v14913_v38 }
 0x660   : > { %14487 = vmatpush3.bf16.msra.mxu0 %v14913_v38 }
 0x661   : > { %14488 = vmatprep.subr.bf16.mxu0 %v14914_v39 }
 0x664   : > { %14489 = vmatpush3.bf16.msra.mxu0 %v14914_v39 }
 0x665   : > { %14490 = vmatprep.subr.bf16.mxu0 %v14915_v40 }
 0x668   : > { %14491 = vmatpush3.bf16.msra.mxu0 %v14915_v40 }
 0x66b   : > { %14493 = vmatmul.mubr.msk.bf16.vlgmr.msra.gmra.mxu0 %vm1962_vm3, %v16779_v48 }
 0x66c   : > { %14528 = vmatprep.mubr.msk.bf16.mxu0 %vm2457_vm4, %v14926_v4 }
 0x70b   : > { %v14474_v42 = vpop.f32.mrf.mxu0 }
 0x70c   : > { %v16962_v43 = vadd.f32 %v14474_v42, %v16863_v45  ;;  %v14918_v45 = vld [vmem:[%s19631_s9 + $0x1b8] sm:$0x1f]  }
 0x70d   : > { %v3004_v44 = vpop.f32.mrf.mxu0 }
 0x70e   : > { %v16965_v46 = vadd.f32 %v3004_v44, %v16865_v47  ;;  %v3280_v47 = vand.u32 %v14918_v45, %v16634_v7  ;;  %v14945_v45 = vld [vmem:[%s19631_s9 + $0x200] sm:$0xff]  }
 0x70f   : > { %v14475_v49 = vpop.f32.mrf.mxu0 }
 0x710   : > { %v16968_v52 = vadd.f32 %v14475_v49, %v16867_v51  ;;  %v14917_v51 = vld [vmem:[%s19635_s28 + $0x58] sm:$0xff]  }
 0x711   : > { %v3007_v56 = vpop.f32.mrf.mxu0 }
 0x712   : > { %v16971_v57 = vadd.f32 %v3007_v56, %v16869_v53  ;;  %v14919_v53 = vld [vmem:[%s19631_s9 + $0x1b0] sm:$0xff]  }
 0x72b   : > { %v14494_v58 = vpop.f32.mrf.mxu0 }
 0x72d   : > { %v3124_v59 = vpop.f32.mrf.mxu0 }
 0x72f   : > { %v14495_v60 = vpop.f32.mrf.mxu0 }
 0x730   : > { %v3140_v61 = vpack.c.bf16 %v14495_v60, %v14494_v58  ;;  %v14940_v58 = vld [vmem:[%s19631_s9 + $0x228] sm:$0xff]   ;;  %v14942_v60 = vld [vmem:[%s19631_s9 + $0x218] sm:$0xff]  }
 0x731   : > { %v3127_v62 = vpop.f32.mrf.mxu0 }
 0x732   : > { %v3139_v63 = vpack.c.bf16 %v3127_v62, %v3124_v59  ;;  %14496 = vmatprep.subr.bf16.mxu1 %v3140_v61  ;;  %v14941_v59 = vld [vmem:[%s19631_s9 + $0x220] sm:$0xff]  }
 0x733   : > { %14497 = vmatpush3.bf16.msra.mxu1 %v3140_v61  ;;  %v14944_v61 = vld [vmem:[%s19631_s9 + $0x208] sm:$0xff]   ;;  %v14946_v62 = vld [vmem:[%s19635_s28 + $0x80] sm:$0xff]  }
 0x734   : > { %14498 = vmatprep.subr.bf16.mxu1 %v3139_v63 }
 0x737   : > { %14499 = vmatpush3.bf16.msra.mxu1 %v3139_v63 }
 0x738   : > { %14504 = vmatprep.subr.bf16.mxu1 %v3280_v47 }
 0x73a   : > { %14501 = vmatmul.mubr.msk.bf16.vlgmr.msra.gmra.mxu1 %vm2457_vm4, %v14917_v51 }
 0x73b   : > { %14505 = vmatpush3.bf16.msra.mxu1 %v3280_v47  ;;  %14520 = vmatprep.mubr.msk.bf16.mxu1 %vm1962_vm3, %v16777_v3 }
 0x73c   : > { %14506 = vmatprep.subr.bf16.mxu1 %v14919_v53 }
 0x73f   : > { %14507 = vmatpush3.bf16.msra.mxu1 %v14919_v53 }
 0x740   : > { %14508 = vmatprep.subr.bf16.mxu1 %v14920_v0 }
 0x743   : > { %14509 = vmatpush3.bf16.msra.mxu1 %v14920_v0 }
 0x744   : > { %14510 = vmatprep.subr.bf16.mxu1 %v14921_v1 }
 0x747   : > { %14511 = vmatpush3.bf16.msra.mxu1 %v14921_v1 }
 0x748   : > { %14512 = vmatprep.subr.bf16.mxu1 %v14922_v2 }
 0x74b   : > { %14513 = vmatpush3.bf16.msra.mxu1 %v14922_v2 }
 0x74c   : > { %14514 = vmatprep.subr.bf16.mxu1 %v14923_v50 }
 0x74f   : > { %14515 = vmatpush3.bf16.msra.mxu1 %v14923_v50 }
 0x750   : > { %14516 = vmatprep.subr.bf16.mxu1 %v14924_v54 }
 0x753   : > { %14517 = vmatpush3.bf16.msra.mxu1 %v14924_v54 }
 0x754   : > { %14518 = vmatprep.subr.bf16.mxu1 %v14925_v55 }
 0x757   : > { %14519 = vmatpush3.bf16.msra.mxu1 %v14925_v55 }
 0x75a   : > { %14521 = vmatmul.mubr.msk.bf16.vlgmr.msra.gmra.mxu1 %vm1962_vm3, %v16779_v48 }
 0x75b   : > { %14556 = vmatprep.mubr.msk.bf16.mxu1 %vm2457_vm4, %v14936_v31 }
 0x7fa   : > { %v14502_v5 = vpop.f32.mrf.mxu1 }
 0x7fb   : > { %v17011_v6 = vadd.f32 %v14502_v5, %v16916_v18  ;;  %v14928_v18 = vld [vmem:[%s19631_s9 + $0x1f8] sm:$0x1f]  }
 0x7fc   : > { %v3196_v8 = vpop.f32.mrf.mxu1 }
 0x7fd   : > { %v17014_v9 = vadd.f32 %v3196_v8, %v16918_v20  ;;  %v3472_v20 = vand.u32 %v14928_v18, %v16634_v7 }
 0x7fe   : > { %v14503_v10 = vpop.f32.mrf.mxu1 }
 0x7ff   : > { %v17017_v11 = vadd.f32 %v14503_v10, %v16920_v22  ;;  %v14927_v22 = vld [vmem:[%s19635_s28 + $0x68] sm:$0xff]  }
 0x800   : > { %v3199_v13 = vpop.f32.mrf.mxu1 }
 0x801   : > { %v17020_v14 = vadd.f32 %v3199_v13, %v16922_v24  ;;  %v14929_v24 = vld [vmem:[%s19631_s9 + $0x1f0] sm:$0xff]  }
 0x81a   : > { %v14522_v15 = vpop.f32.mrf.mxu1 }
 0x81c   : > { %v3316_v16 = vpop.f32.mrf.mxu1 }
 0x81e   : > { %v14523_v17 = vpop.f32.mrf.mxu1 }
 0x81f   : > { %v3332_v19 = vpack.c.bf16 %v14523_v17, %v14522_v15 }
 0x820   : > { %v3319_v21 = vpop.f32.mrf.mxu1 }
 0x821   : > { %v3331_v23 = vpack.c.bf16 %v3319_v21, %v3316_v16  ;;  %14524 = vmatprep.subr.bf16.mxu0 %v3332_v19  ;;  %v3807_v16 = vpop.permute.xlu1 %3806 }
 0x822   : > { %14525 = vmatpush3.bf16.msra.mxu0 %v3332_v19 }
 0x823   : > { %14526 = vmatprep.subr.bf16.mxu0 %v3331_v23 }
 0x826   : > { %14527 = vmatpush3.bf16.msra.mxu0 %v3331_v23 }
 0x827   : > { %14532 = vmatprep.subr.bf16.mxu0 %v3472_v20 }
 0x829   : > { %14529 = vmatmul.mubr.msk.bf16.vlgmr.msra.gmra.mxu0 %vm2457_vm4, %v14927_v22 }
 0x82a   : > { %14533 = vmatpush3.bf16.msra.mxu0 %v3472_v20  ;;  %14548 = vmatprep.mubr.msk.bf16.mxu0 %vm1962_vm3, %v16777_v3 }
 0x82b   : > { %14534 = vmatprep.subr.bf16.mxu0 %v14929_v24 }
 0x82e   : > { %14535 = vmatpush3.bf16.msra.mxu0 %v14929_v24 }
 0x82f   : > { %14536 = vmatprep.subr.bf16.mxu0 %v14930_v25 }
 0x832   : > { %14537 = vmatpush3.bf16.msra.mxu0 %v14930_v25 }
 0x833   : > { %14538 = vmatprep.subr.bf16.mxu0 %v14931_v26 }
 0x836   : > { %14539 = vmatpush3.bf16.msra.mxu0 %v14931_v26 }
 0x837   : > { %14540 = vmatprep.subr.bf16.mxu0 %v14932_v27 }
 0x83a   : > { %14541 = vmatpush3.bf16.msra.mxu0 %v14932_v27 }
 0x83b   : > { %14542 = vmatprep.subr.bf16.mxu0 %v14933_v28 }
 0x83e   : > { %14543 = vmatpush3.bf16.msra.mxu0 %v14933_v28  ;;  %v3817_v28 = vpop.permute.xlu1 %3816 }
 0x83f   : > { %14544 = vmatprep.subr.bf16.mxu0 %v14934_v29 }
 0x842   : > { %14545 = vmatpush3.bf16.msra.mxu0 %v14934_v29 }
 0x843   : > { %14546 = vmatprep.subr.bf16.mxu0 %v14935_v30 }
 0x846   : > { %14547 = vmatpush3.bf16.msra.mxu0 %v14935_v30 }
 0x849   : > { %14549 = vmatmul.mubr.msk.bf16.vlgmr.msra.gmra.mxu0 %vm1962_vm3, %v16779_v48 }
 0x84a   : > { %14584 = vmatprep.mubr.msk.bf16.mxu0 %vm2457_vm4, %v14946_v62 }
 0x8e9   : > { %v14530_v32 = vpop.f32.mrf.mxu0 }
 0x8ea   : > { %v17060_v33 = vadd.f32 %v14530_v32, %v16962_v43  ;;  %v14938_v43 = vld [vmem:[%s19631_s9 + $0x238] sm:$0x1f]  }
 0x8eb   : > { %v3388_v34 = vpop.f32.mrf.mxu0 }
 0x8ec   : > { %v17063_v35 = vadd.f32 %v3388_v34, %v16965_v46  ;;  %v3664_v46 = vand.u32 %v14938_v43, %v16634_v7 }
 0x8ed   : > { %v14531_v36 = vpop.f32.mrf.mxu0 }
 0x8ee   : > { %v17066_v37 = vadd.f32 %v14531_v36, %v16968_v52  ;;  %v14937_v52 = vld [vmem:[%s19635_s28 + $0x78] sm:$0xff]  }
 0x8ef   : > { %v3391_v38 = vpop.f32.mrf.mxu0 }
 0x8f0   : > { %v17069_v39 = vadd.f32 %v3391_v38, %v16971_v57  ;;  %v14939_v57 = vld [vmem:[%s19631_s9 + $0x230] sm:$0xff]   ;;  %v3881_v38 = vld [vmem:[%s19636_s17] sm:$0xff] }
 0x909   : > { %v14550_v40 = vpop.f32.mrf.mxu0 }
 0x90b   : > { %v3508_v41 = vpop.f32.mrf.mxu0 }
 0x90d   : > { %v14551_v42 = vpop.f32.mrf.mxu0 }
 0x90e   : > { %v3524_v44 = vpack.c.bf16 %v14551_v42, %v14550_v40  ;;  %v3884_v40 = vld [vmem:[%s19636_s17 + $0x18] sm:$0xff]  ;;  %v3910_v42 = vld [vmem:[%s19637_s8 + $0x8] sm:$0xff] }
 0x90f   : > { %v3511_v49 = vpop.f32.mrf.mxu0 }
 0x910   : > { %v3523_v56 = vpack.c.bf16 %v3511_v49, %v3508_v41  ;;  %14552 = vmatprep.subr.bf16.mxu1 %v3524_v44  ;;  %v3882_v41 = vld [vmem:[%s19636_s17 + $0x8] sm:$0xff] }
 0x911   : > { %14553 = vmatpush3.bf16.msra.mxu1 %v3524_v44  ;;  %v3909_v44 = vld [vmem:[%s19637_s8] sm:$0xff] }
 0x912   : > { %14554 = vmatprep.subr.bf16.mxu1 %v3523_v56 }
 0x915   : > { %14555 = vmatpush3.bf16.msra.mxu1 %v3523_v56 }
 0x916   : > { %14560 = vmatprep.subr.bf16.mxu1 %v3664_v46 }
 0x918   : > { %14557 = vmatmul.mubr.msk.bf16.vlgmr.msra.gmra.mxu1 %vm2457_vm4, %v14937_v52 }
 0x919   : > { %14561 = vmatpush3.bf16.msra.mxu1 %v3664_v46  ;;  %14576 = vmatprep.mubr.msk.bf16.mxu1 %vm1962_vm3, %v16777_v3  ;;  %v14943_v3 = vld [vmem:[%s19631_s9 + $0x210] sm:$0xff]  }
 0x91a   : > { %14562 = vmatprep.subr.bf16.mxu1 %v14939_v57 }
 0x91d   : > { %14563 = vmatpush3.bf16.msra.mxu1 %v14939_v57 }
 0x91e   : > { %14564 = vmatprep.subr.bf16.mxu1 %v14940_v58 }
 0x921   : > { %14565 = vmatpush3.bf16.msra.mxu1 %v14940_v58 }
 0x922   : > { %14566 = vmatprep.subr.bf16.mxu1 %v14941_v59 }
 0x925   : > { %14567 = vmatpush3.bf16.msra.mxu1 %v14941_v59 }
 0x926   : > { %14568 = vmatprep.subr.bf16.mxu1 %v14942_v60 }
 0x929   : > { %14569 = vmatpush3.bf16.msra.mxu1 %v14942_v60 }
 0x92a   : > { %14570 = vmatprep.subr.bf16.mxu1 %v14943_v3 }
 0x92d   : > { %14571 = vmatpush3.bf16.msra.mxu1 %v14943_v3 }
 0x92e   : > { %14572 = vmatprep.subr.bf16.mxu1 %v14944_v61 }
 0x931   : > { %14573 = vmatpush3.bf16.msra.mxu1 %v14944_v61 }
 0x932   : > { %14574 = vmatprep.subr.bf16.mxu1 %v14945_v45 }
 0x935   : > { %14575 = vmatpush3.bf16.msra.mxu1 %v14945_v45 }
 0x938   : > { %14577 = vmatmul.mubr.msk.bf16.vlgmr.msra.gmra.mxu1 %vm1962_vm3, %v16779_v48 }
 0x9d8   : > { %v14558_v63 = vpop.f32.mrf.mxu1 }
 0x9d9   : > { %v3597_v47 = vadd.f32 %v14558_v63, %v17011_v6  ;;  %v14947_v6 = vld [vmem:[%s19635_s28 + $0x88] sm:$0xff]  }
 0x9da   : > { %v3580_v51 = vpop.f32.mrf.mxu1 }
 0x9db   : > { %v3595_v53 = vadd.f32 %v3580_v51, %v17014_v9  ;;  %v3802_v9 = vpop.permute.xlu0 %3801 }
 0x9dc   : > { %v14559_v0 = vpop.f32.mrf.mxu1 }
 0x9dd   : > { %v3598_v1 = vadd.f32 %v14559_v0, %v17017_v11 }
 0x9de   : > { %v3583_v2 = vpop.f32.mrf.mxu1 }
 0x9df   : > { %v3596_v50 = vadd.f32 %v3583_v2, %v17020_v14  ;;  %v3812_v21 = vpop.permute.xlu0 %3811 }
 0x9f8   : > { %v14578_v54 = vpop.f32.mrf.mxu1 }
 0x9fa   : > { %v3700_v48 = vpop.f32.mrf.mxu1 }
 0x9fc   : > { %v14579_v55 = vpop.f32.mrf.mxu1 }
 0x9fd   : > { %v3716_v4 = vpack.c.bf16 %v14579_v55, %v14578_v54  ;;  %v3912_v54 = vld [vmem:[%s19637_s8 + $0x18] sm:$0xff]  ;;  %v14949_v55 = vld [vmem:[%s19638_s10 + $0x54] ss:$0 sps:$4 sm:$0x11]  }
 0x9fe   : > { %v3703_v5 = vpop.f32.mrf.mxu1 }
 0x9ff   : > { %v3715_v8 = vpack.c.bf16 %v3703_v5, %v3700_v48  ;;  %14580 = vmatprep.subr.bf16.mxu0 %v3716_v4  ;;  %v17169_v48 = vsel %vm3996_vm6, 65535, %v15320_v12 }
 0xa00   : > { %14581 = vmatpush3.bf16.msra.mxu0 %v3716_v4  ;;  %v4109_v5 = vand.u32 %v14949_v55, %v17169_v48  ;;  %v14967_v55 = vld [vmem:[%s19638_s10 + $0x94] sm:$0xff]  }
 0xa01   : > { %14582 = vmatprep.subr.bf16.mxu0 %v3715_v8 }
 0xa02   : > { %14604 = vmatprep.subr.bf16.mxu1 %v4109_v5 }
 0xa03   : > { %14605 = vmatpush3.bf16.msra.mxu1 %v4109_v5  ;;  %v14969_v5 = vld [vmem:[%s19638_s10 + $0x8c] sm:$0xff]  }
 0xa04   : > { %14583 = vmatpush3.bf16.msra.mxu0 %v3715_v8  ;;  %v14950_v8 = vld [vmem:[%s19638_s10 + $0x20] sm:$0xff]  }
 0xa07   : > { %14585 = vmatmul.mubr.msk.bf16.vlgmr.msra.gmra.mxu0 %vm2457_vm4, %v14947_v6  ;;  %v14951_v6 = vld [vmem:[%s19638_s10 + $0x4c] sm:$0xff]  }
 0xa08   : > { %14606 = vmatprep.subr.bf16.mxu1 %v14951_v6 }
 0xa09   : > { %14607 = vmatpush3.bf16.msra.mxu1 %v14951_v6  ;;  %v14971_v6 = vld [vmem:[%s19638_s10 + $0x84] sm:$0xff]  }
 0xac7   : > { %v14586_v10 = vpop.f32.mrf.mxu0 }
 0xac8   : > { %v3789_v11 = vadd.f32 %v14586_v10, %v17060_v33  ;;  %v14952_v10 = vld [vmem:[%s19638_s10 + $0x18] sm:$0xff]  }
 0xac9   : > { %v3772_v13 = vpop.f32.mrf.mxu0 }
 0xaca   : > { %v3793_v14 = vadd.f32 %v3789_v11, %v3597_v47  ;;  %v3787_v15 = vadd.f32 %v3772_v13, %v17063_v35  ;;  %v14953_v11 = vld [vmem:[%s19638_s10 + $0x44] sm:$0xff]   ;;  %v14954_v13 = vld [vmem:[%s19638_s10 + $0x10] sm:$0xff]  }
 0xacb   : > { %v14587_v17 = vpop.f32.mrf.mxu0  ;;  %14608 = vmatprep.subr.bf16.mxu1 %v14953_v11 }
 0xacc   : > { %v3791_v19 = vadd.f32 %v3787_v15, %v3595_v53  ;;  %v3790_v18 = vadd.f32 %v14587_v17, %v17066_v37  ;;  %v3821_v25 = vadd.f32 %v3812_v21, %v3793_v14  ;;  %14609 = vmatpush3.bf16.msra.mxu1 %v14953_v11  ;;  %v14955_v14 = vld [vmem:[%s19638_s10 + $0x3c] sm:$0xff]   ;;  %v14956_v15 = vld [vmem:[%s19638_s10 + $0x8] sm:$0xff]  }
 0xacd   : > { %v3775_v23 = vpop.f32.mrf.mxu0  ;;  %14610 = vmatprep.subr.bf16.mxu1 %v14955_v14  ;;  %v14958_v17 = vld [vmem:[%s19638_s10] sm:$0xff]   ;;  %v14961_v21 = vld [vmem:[%s19638_s10 + $0xac] ss:$0 sps:$4 sm:$0x11]  }
 0xace   : > { %v3794_v20 = vadd.f32 %v3790_v18, %v3598_v1  ;;  %v3788_v22 = vadd.f32 %v3775_v23, %v17069_v39  ;;  %v3819_v24 = vadd.f32 %v3802_v9, %v3791_v19  ;;  %v3825_v31 = vmax.f32 %v3821_v25, 0.0  ;;  %v3883_v39 = vld [vmem:[%s19636_s17 + $0x10] sm:$0xff]  ;;  %v14960_v18 = vld [vmem:[%s19638_s10 + $0x80] ss:$0 sps:$4 sm:$0x11]  }
 0xacf   : > { %v3911_v9 = vld [vmem:[%s19637_s8 + $0x10] sm:$0xff]  ;;  %v4218_v23 = vand.u32 %v14960_v18, %v17169_v48 }
 0xad0   : > { %v3792_v26 = vadd.f32 %v3788_v22, %v3596_v50  ;;  %v3823_v27 = vmax.f32 %v3819_v24, 0.0  ;;  %v3822_v32 = vadd.f32 %v3817_v28, %v3794_v20  ;;  %v3834_v35 = vsel %vm3827_vm5, %v3825_v31, 0.0  ;;  %v14948_v50 = vld [vmem:[%s19638_s10 + $0x28] ss:$0 sps:$4 sm:$0x11]   ;;  %14611 = vmatpush3.bf16.msra.mxu1 %v14955_v14  ;;  %v14959_v19 = vld [vmem:[%s19638_s10 + $0x2c] sm:$0xff]  }
 0xad1   : > { %v4000_v4 = vand.u32 %v14948_v50, %v17169_v48  ;;  %v4327_v20 = vand.u32 %v14961_v21, %v17169_v48  ;;  %v14965_v50 = vld [vmem:[%s19638_s10 + $0x9c] sm:$0xff]   ;;  %v14974_v14 = vld [vmem:[%s19638_s10 + $0xd0] sm:$0xff]  }
 0xad2   : > { %v3828_v29 = vsel %vm3827_vm5, %v3823_v27, 0.0  ;;  %v3820_v30 = vadd.f32 %v3807_v16, %v3792_v26  ;;  %v3826_v36 = vmax.f32 %v3822_v32, 0.0  ;;  %v14957_v16 = vld [vmem:[%s19638_s10 + $0x34] sm:$0xff]   ;;  %v14979_v18 = vld [vmem:[%s19638_s10 + $0xec] sm:$0xff]  }
 0xad3   : > { %3829 = vadd.xlane.f32.xlu0 %v3828_v29  ;;  %14588 = vmatprep.subr.bf16.mxu0 %v4000_v4  ;;  %v14980_v21 = vld [vmem:[%s19638_s10 + $0xb8] sm:$0xff]  }
 0xad4   : > { %v3824_v33 = vmax.f32 %v3820_v30, 0.0  ;;  %v3837_v37 = vsel %vm3827_vm5, %v3826_v36, 0.0  ;;  %14589 = vmatpush3.bf16.msra.mxu0 %v4000_v4  ;;  %14612 = vmatprep.subr.bf16.mxu1 %v14957_v16  ;;  %v14968_v4 = vld [vmem:[%s19638_s10 + $0x60] sm:$0xff]  }
 0xad5   : > { %14590 = vmatprep.subr.bf16.mxu0 %v14950_v8  ;;  %14613 = vmatpush3.bf16.msra.mxu1 %v14957_v16  ;;  %v14976_v16 = vld [vmem:[%s19638_s10 + $0xc8] sm:$0xff]  }
 0xad6   : > { %v3831_v34 = vsel %vm3827_vm5, %v3824_v33, 0.0  ;;  %14614 = vmatprep.subr.bf16.mxu1 %v14959_v19 }
 0xad7   : > { %3832 = vadd.xlane.f32.xlu1 %v3831_v34  ;;  %3835 = vadd.xlane.f32.xlu0 %v3834_v35 }
 0xad8   : > { %14591 = vmatpush3.bf16.msra.mxu0 %v14950_v8  ;;  %v14970_v8 = vld [vmem:[%s19638_s10 + $0x58] sm:$0xff]  }
 0xad9   : > { %14592 = vmatprep.subr.bf16.mxu0 %v14952_v10  ;;  %14615 = vmatpush3.bf16.msra.mxu1 %v14959_v19  ;;  %v14978_v19 = vld [vmem:[%s19638_s10 + $0xc0] sm:$0xff]  }
 0xada   : > { %14636 = vmatprep.subr.bf16.mxu1 %v4327_v20 }
 0xadb   : > { %3838 = vadd.xlane.f32.xlu0 %v3837_v37 }
 0xadc   : > { %14593 = vmatpush3.bf16.msra.mxu0 %v14952_v10  ;;  %v14973_v10 = vld [vmem:[%s19638_s10 + $0x104] ss:$0 sps:$4 sm:$0x11]  }
 0xadd   : > { %14594 = vmatprep.subr.bf16.mxu0 %v14954_v13 }
 0xae0   : > { %14595 = vmatpush3.bf16.msra.mxu0 %v14954_v13  ;;  %v4545_v13 = vand.u32 %v14973_v10, %v17169_v48 }
 0xae1   : > { %14596 = vmatprep.subr.bf16.mxu0 %v14956_v15 }
 0xae4   : > { %14597 = vmatpush3.bf16.msra.mxu0 %v14956_v15  ;;  %v14975_v15 = vld [vmem:[%s19638_s10 + $0xfc] sm:$0xff]  }
 0xae5   : > { %14598 = vmatprep.subr.bf16.mxu0 %v14958_v17 }
 0xae8   : > { %3887 = vperm.xlu1 %14855, %v3881_v38   ;;  %14599 = vmatpush3.bf16.msra.mxu0 %v14958_v17  ;;  %v14977_v17 = vld [vmem:[%s19638_s10 + $0xf4] sm:$0xff]  }
 0xae9   : > { %14620 = vmatprep.subr.bf16.mxu0 %v4218_v23 }
 0xaec   : > { %3897 = vperm.xlu1 %14855, %v3883_v39  }
 0xaf0   : > { %3902 = vperm.xlu1 %14855, %v3884_v40  }
 0xaf1   : > { %3892 = vperm.xlu0 %14854, %v3882_v41  }
 0xaf4   : > { %3920 = vperm.xlu1 %14855, %v3910_v42  }
 0xaf5   : > { %3915 = vperm.xlu0 %14854, %v3909_v44  }
 0xb5c   : > { %v3830_v43 = vpop.xlane.xlu0 %3829 }
 0xb5d   : > { %v3841_v49 = vmul.f32 0.012345679, %v3830_v43 }
 0xb5f   : > { %v17142_v57 = vsub.f32 %v3823_v27, %v3841_v49 }
 0xb60   : > { %v3833_v56 = vpop.xlane.xlu1 %3832  ;;  %v3836_v46 = vpop.xlane.xlu0 %3835 }
 0xb61   : > { %v3843_v52 = vmul.f32 0.012345679, %v3836_v46  ;;  %v3842_v58 = vmul.f32 0.012345679, %v3833_v56  ;;  %v3849_v47 = vmul.f32 %v17142_v57, %v17142_v57 }
 0xb63   : > { %v17144_v59 = vsub.f32 %v3825_v31, %v3843_v52  ;;  %v17148_v45 = vsub.f32 %v3824_v33, %v3842_v58  ;;  %v3853_v53 = vsel %vm3827_vm5, %v3849_v47, 0.0 }
 0xb64   : > { %v3839_v60 = vpop.xlane.xlu0 %3838  ;;  %v3888_v22 = vpop.permute.xlu1 %3887 }
 0xb65   : > { %v3844_v3 = vmul.f32 0.012345679, %v3839_v60  ;;  %v3851_v61 = vmul.f32 %v17144_v59, %v17144_v59  ;;  %v3850_v1 = vmul.f32 %v17148_v45, %v17148_v45 }
 0xb67   : > { %v17150_v62 = vsub.f32 %v3826_v36, %v3844_v3  ;;  %v3859_v63 = vsel %vm3827_vm5, %v3851_v61, 0.0  ;;  %v3856_v2 = vsel %vm3827_vm5, %v3850_v1, 0.0 }
 0xb68   : > { %3860 = vadd.xlane.f32.xlu1 %v3859_v63  ;;  %v3898_v24 = vpop.permute.xlu1 %3897 }
 0xb69   : > { %v3852_v51 = vmul.f32 %v17150_v62, %v17150_v62 }
 0xb6b   : > { %v3862_v0 = vsel %vm3827_vm5, %v3852_v51, 0.0 }
 0xb6c   : > { %3854 = vadd.xlane.f32.xlu1 %v3853_v53  ;;  %3863 = vadd.xlane.f32.xlu0 %v3862_v0  ;;  %v3903_v25 = vpop.permute.xlu1 %3902  ;;  %v3893_v26 = vpop.permute.xlu0 %3892 }
 0xb70   : > { %3857 = vadd.xlane.f32.xlu0 %v3856_v2  ;;  %v3921_v27 = vpop.permute.xlu1 %3920  ;;  %v3916_v28 = vpop.permute.xlu0 %3915 }
 0xb7d   : > { %3930 = vperm.xlu1 %14855, %v3912_v54   ;;  %v14966_v54 = vld [vmem:[%s19638_s10 + $0x68] sm:$0xff]  }
 0xb86   : > { %3925 = vperm.xlu0 %14854, %v3911_v9   ;;  %v14972_v9 = vld [vmem:[%s19638_s10 + $0xd8] ss:$0 sps:$4 sm:$0x11]  }
 0xb87   : > { %v4436_v11 = vand.u32 %v14972_v9, %v17169_v48 }
 0xbf1   : > { %v3861_v29 = vpop.xlane.xlu1 %3860 }
 0xbf2   : > { %v3867_v30 = vmul.f32 0.012345679, %v3861_v29  ;;  %v14987_v29 = vld [vmem:[%s19638_s10 + $0x154] sm:$0xff]  }
 0xbf4   : > { %v3871_v31 = vadd.f32 1e-05, %v3867_v30  ;;  %v14988_v30 = vld [vmem:[%s19638_s10 + $0x120] sm:$0xff]  }
 0xbf5   : > { %v3855_v32 = vpop.xlane.xlu1 %3854  ;;  %v3864_v33 = vpop.xlane.xlu0 %3863 }
 0xbf6   : > { %v3865_v34 = vmul.f32 0.012345679, %v3855_v32  ;;  %v3868_v35 = vmul.f32 0.012345679, %v3864_v33  ;;  %15030 = vrsqrt.f32 %v3871_v31  ;;  %v14989_v31 = vld [vmem:[%s19638_s10 + $0x14c] sm:$0xff]   ;;  %v14990_v32 = vld [vmem:[%s19638_s10 + $0x118] sm:$0xff]  }
 0xbf7   : > { %v14991_v33 = vld [vmem:[%s19638_s10 + $0x144] sm:$0xff]  }
 0xbf8   : > { %v3869_v36 = vadd.f32 1e-05, %v3865_v34  ;;  %v3872_v37 = vadd.f32 1e-05, %v3868_v35  ;;  %v14992_v34 = vld [vmem:[%s19638_s10 + $0x110] sm:$0xff]   ;;  %v14993_v35 = vld [vmem:[%s19638_s10 + $0x13c] sm:$0xff]  }
 0xbf9   : > { %v3858_v38 = vpop.xlane.xlu0 %3857  ;;  %v3931_v61 = vpop.permute.xlu1 %3930 }
 0xbfa   : > { %15032 = vrsqrt.f32 %v3869_v36  ;;  %v3866_v39 = vmul.f32 0.012345679, %v3858_v38  ;;  %v14994_v36 = vld [vmem:[%s19638_s10 + $0x108] sm:$0xff]   ;;  %v14995_v38 = vld [vmem:[%s19638_s10 + $0x134] sm:$0xff]  }
 0xbfb   : > { %15034 = vrsqrt.f32 %v3872_v37  ;;  %v14996_v37 = vld [vmem:[%s19638_s10 + $0x188] ss:$0 sps:$4 sm:$0x11]  }
 0xbfc   : > { %v3870_v40 = vadd.f32 1e-05, %v3866_v39  ;;  %v4872_v39 = vand.u32 %v14996_v37, %v17169_v48 }
 0xbfe   : > { %15036 = vrsqrt.f32 %v3870_v40  ;;  %v14997_v40 = vld [vmem:[%s19638_s10 + $0x180] sm:$0xff]  }
 0xc01   : > { %v3926_v0 = vpop.permute.xlu0 %3925 }
 0xc03   : > { %v15031_v41 = vpop.eup %15030 }
 0xc04   : > { %v3879_v56 = vmul.f32 %v15031_v41, %v17144_v59  ;;  %v14962_v59 = vld [vmem:[%s19638_s10 + $0x78] sm:$0xff]   ;;  %v14999_v41 = vld [vmem:[%s19638_s10 + $0x170] sm:$0xff]  }
 0xc06   : > { %v3907_v3 = vmul.f32 %v3898_v24, %v3879_v56  ;;  %v14983_v24 = vld [vmem:[%s19638_s10 + $0xdc] sm:$0xff]   ;;  %v15002_v56 = vld [vmem:[%s19639_s12 + $0x38] ss:$28 sps:$4 sm:$0x1f]  }
 0xc07   : > { %v15033_v42 = vpop.eup %15032 }
 0xc08   : > { %v15035_v44 = vpop.eup %15034  ;;  %v3877_v43 = vmul.f32 %v15033_v42, %v17142_v57  ;;  %v3935_v1 = vadd.f32 %v3926_v0, %v3907_v3  ;;  %v15000_v42 = vld [vmem:[%s19638_s10 + $0x168] sm:$0xff]  }
 0xc09   : > { %v3880_v49 = vmul.f32 %v15035_v44, %v17150_v62  ;;  %v14964_v62 = vld [vmem:[%s19638_s10 + $0x70] sm:$0xff]   ;;  %v15001_v44 = vld [vmem:[%s19638_s10 + $0x160] sm:$0xff]  }
 0xc0a   : > { %v3905_v58 = vmul.f32 %v3888_v22, %v3877_v43  ;;  %v14984_v22 = vld [vmem:[%s19638_s10 + $0x130] ss:$0 sps:$4 sm:$0x11]   ;;  %v15004_v43 = vld [vmem:[%s19639_s12 + $0x3c] ss:$28 sps:$4 sm:$0x1f]  }
 0xc0b   : > { %v15037_v46 = vpop.eup %15036  ;;  %v3908_v52 = vmul.f32 %v3903_v25, %v3880_v49  ;;  %v14985_v25 = vld [vmem:[%s19638_s10 + $0x15c] ss:$0 sps:$4 sm:$0x11]   ;;  %v15007_v49 = vld [vmem:[%s19639_s12 + $0x44] ss:$28 sps:$4 sm:$0x1f]  }
 0xc0c   : > { %v3878_v60 = vmul.f32 %v15037_v46, %v17148_v45  ;;  %v3933_v51 = vadd.f32 %v3916_v28, %v3905_v58  ;;  %v14963_v45 = vld [vmem:[%s19638_s10 + $0xa4] sm:$0xff]   ;;  %v15005_v46 = vld [vmem:[%s19639_s12 + $0x40] ss:$28 sps:$4 sm:$0x1f]   ;;  %v5026_v58 = vand.u32 %v15007_v49, %v16634_v7 }
 0xc0d   : > { %v3936_v47 = vadd.f32 %v3931_v61, %v3908_v52  ;;  %v14986_v28 = vld [vmem:[%s19638_s10 + $0x128] sm:$0xff]   ;;  %v5020_v52 = vand.u32 %v15004_v43, %v16634_v7  ;;  %v5023_v3 = vand.u32 %v15005_v46, %v16634_v7  ;;  %v15010_v61 = vld [vmem:[%s19639_s12 + $0x4] ss:$28 sps:$4 sm:$0xff]  }
 0xc0e   : > { %v3906_v63 = vmul.f32 %v3893_v26, %v3878_v60  ;;  %v4654_v26 = vand.u32 %v14984_v22, %v17169_v48  ;;  %v5017_v60 = vand.u32 %v15002_v56, %v16634_v7  ;;  %v15017_v0 = vld [vmem:[%s19639_s12 + $0x50] ss:$28 sps:$4 sm:$0x1f]   ;;  %v13091_v49 = vld [vmem:[%s19641_s11 + $0x3] ss:$0 sm:$0xff] }
 0xc0f   : > { %v17223_v57 = vpack.c.bf16 %v3936_v47, %v3935_v1  ;;  %v15008_v47 = vld [vmem:[%s19639_s12] ss:$28 sps:$4 sm:$0xff]   ;;  %v13112_v46 = vld [vmem:[%s19641_s11 + $0x4] ss:$0 sm:$0xff] }
 0xc10   : > { %v3934_v53 = vadd.f32 %v3921_v27, %v3906_v63  ;;  %v4763_v27 = vand.u32 %v14985_v25, %v17169_v48  ;;  %v14998_v48 = vld [vmem:[%s19638_s10 + $0x178] sm:$0xff]   ;;  %v15013_v63 = vld [vmem:[%s19639_s12 + $0xc] ss:$28 sps:$4 sm:$0xff]  }
 0xc12   : > { %v17221_v2 = vpack.c.bf16 %v3934_v53, %v3933_v51  ;;  %v15011_v51 = vld [vmem:[%s19639_s12 + $0x8] ss:$28 sps:$4 sm:$0xff]  }
 0xc13   : > { %v15016_v53 = vld [vmem:[%s19639_s12 + $0x4c] ss:$28 sps:$4 sm:$0x1f]  }
 0xc14   : > { %14600 = vmatprep.mubr.msk.bf16.mxu0 %vm3827_vm5, %v17221_v2  ;;  %14616 = vmatprep.mubr.msk.bf16.mxu1 %vm3827_vm5, %v17221_v2  ;;  %v5032_v1 = vand.u32 %v15016_v53, %v16634_v7 }
 0xc15   : > { %14601 = vmatmul.mubr.msk.bf16.vlgmr.msra.gmra.mxu0 %vm3827_vm5, %v17223_v57  ;;  %14617 = vmatmul.mubr.msk.bf16.vlgmr.msra.gmra.mxu1 %vm3827_vm5, %v17223_v57 }
 0xc16   : > { %14621 = vmatpush3.bf16.msra.mxu0 %v4218_v23  ;;  %14637 = vmatpush3.bf16.msra.mxu1 %v4327_v20  ;;  %v14981_v23 = vld [vmem:[%s19638_s10 + $0xe4] sm:$0xff]   ;;  %v14982_v20 = vld [vmem:[%s19638_s10 + $0xb0] sm:$0xff]  }
 0xc17   : > { %14632 = vmatprep.mubr.msk.bf16.mxu0 %vm3827_vm5, %v17221_v2  ;;  %14648 = vmatprep.mubr.msk.bf16.mxu1 %vm3827_vm5, %v17221_v2 }
 0xc18   : > { %14622 = vmatprep.subr.bf16.mxu0 %v14962_v59  ;;  %14638 = vmatprep.subr.bf16.mxu1 %v14963_v45 }
 0xc1a   : > { %14623 = vmatpush3.bf16.msra.mxu0 %v14962_v59  ;;  %14639 = vmatpush3.bf16.msra.mxu1 %v14963_v45 }
 0xc1b   : > { %14624 = vmatprep.subr.bf16.mxu0 %v14964_v62  ;;  %14640 = vmatprep.subr.bf16.mxu1 %v14965_v50 }
 0xc1e   : > { %14625 = vmatpush3.bf16.msra.mxu0 %v14964_v62  ;;  %14641 = vmatpush3.bf16.msra.mxu1 %v14965_v50 }
 0xc1f   : > { %14626 = vmatprep.subr.bf16.mxu0 %v14966_v54  ;;  %14642 = vmatprep.subr.bf16.mxu1 %v14967_v55 }
 0xc22   : > { %14627 = vmatpush3.bf16.msra.mxu0 %v14966_v54  ;;  %14643 = vmatpush3.bf16.msra.mxu1 %v14967_v55 }
 0xc23   : > { %14628 = vmatprep.subr.bf16.mxu0 %v14968_v4  ;;  %14644 = vmatprep.subr.bf16.mxu1 %v14969_v5 }
 0xc26   : > { %14629 = vmatpush3.bf16.msra.mxu0 %v14968_v4  ;;  %14645 = vmatpush3.bf16.msra.mxu1 %v14969_v5 }
 0xc27   : > { %14630 = vmatprep.subr.bf16.mxu0 %v14970_v8  ;;  %14646 = vmatprep.subr.bf16.mxu1 %v14971_v6 }
 0xc2a   : > { %14631 = vmatpush3.bf16.msra.mxu0 %v14970_v8  ;;  %14647 = vmatpush3.bf16.msra.mxu1 %v14971_v6 }
 0xc2b   : > { %14652 = vmatprep.subr.bf16.mxu0 %v4436_v11  ;;  %14668 = vmatprep.subr.bf16.mxu1 %v4545_v13 }
 0xc2d   : > { %14633 = vmatmul.mubr.msk.bf16.vlgmr.msra.gmra.mxu0 %vm3827_vm5, %v17223_v57  ;;  %14649 = vmatmul.mubr.msk.bf16.vlgmr.msra.gmra.mxu1 %vm3827_vm5, %v17223_v57 }
 0xc2e   : > { %14653 = vmatpush3.bf16.msra.mxu0 %v4436_v11  ;;  %14664 = vmatprep.mubr.msk.bf16.mxu0 %vm3827_vm5, %v17221_v2 }
 0xc2f   : > { %14669 = vmatpush3.bf16.msra.mxu1 %v4545_v13  ;;  %14680 = vmatprep.mubr.msk.bf16.mxu1 %vm3827_vm5, %v17221_v2 }
 0xc30   : > { %14654 = vmatprep.subr.bf16.mxu0 %v14974_v14  ;;  %14670 = vmatprep.subr.bf16.mxu1 %v14975_v15 }
 0xc32   : > { %14655 = vmatpush3.bf16.msra.mxu0 %v14974_v14 }
 0xc33   : > { %14671 = vmatpush3.bf16.msra.mxu1 %v14975_v15  ;;  %14656 = vmatprep.subr.bf16.mxu0 %v14976_v16 }
 0xc34   : > { %14672 = vmatprep.subr.bf16.mxu1 %v14977_v17 }
 0xc36   : > { %14657 = vmatpush3.bf16.msra.mxu0 %v14976_v16 }
 0xc37   : > { %14673 = vmatpush3.bf16.msra.mxu1 %v14977_v17  ;;  %14658 = vmatprep.subr.bf16.mxu0 %v14978_v19 }
 0xc38   : > { %14674 = vmatprep.subr.bf16.mxu1 %v14979_v18 }
 0xc3a   : > { %14659 = vmatpush3.bf16.msra.mxu0 %v14978_v19 }
 0xc3b   : > { %14675 = vmatpush3.bf16.msra.mxu1 %v14979_v18  ;;  %14660 = vmatprep.subr.bf16.mxu0 %v14980_v21  ;;  %v13028_v18 = vld [vmem:[%s19640_s6] ss:$0 sm:$0xff]  ;;  %s19642_s6 = sld [smem:[#allocation38_spill]] }
 0xc3c   : > { %14676 = vmatprep.subr.bf16.mxu1 %v14981_v23 }
 0xc3e   : > { %14661 = vmatpush3.bf16.msra.mxu0 %v14980_v21 }
 0xc3f   : > { %14677 = vmatpush3.bf16.msra.mxu1 %v14981_v23  ;;  %14662 = vmatprep.subr.bf16.mxu0 %v14982_v20 }
 0xc40   : > { %14678 = vmatprep.subr.bf16.mxu1 %v14983_v24 }
 0xc41   : > { %s19643_s22 = smov %s19642_s6 }
 0xc42   : > { %14663 = vmatpush3.bf16.msra.mxu0 %v14982_v20 }
 0xc43   : > { %14679 = vmatpush3.bf16.msra.mxu1 %v14983_v24  ;;  %14684 = vmatprep.subr.bf16.mxu0 %v4654_v26 }
 0xc44   : > { %14700 = vmatprep.subr.bf16.mxu1 %v4763_v27 }
 0xc45   : > { %14665 = vmatmul.mubr.msk.bf16.vlgmr.msra.gmra.mxu0 %vm3827_vm5, %v17223_v57 }
 0xc46   : > { %14681 = vmatmul.mubr.msk.bf16.vlgmr.msra.gmra.mxu1 %vm3827_vm5, %v17223_v57  ;;  %14685 = vmatpush3.bf16.msra.mxu0 %v4654_v26 }
 0xc47   : > { %14696 = vmatprep.mubr.msk.bf16.mxu0 %vm3827_vm5, %v17221_v2  ;;  %14701 = vmatpush3.bf16.msra.mxu1 %v4763_v27 }
 0xc48   : > { %14712 = vmatprep.mubr.msk.bf16.mxu1 %vm3827_vm5, %v17221_v2  ;;  %14686 = vmatprep.subr.bf16.mxu0 %v14986_v28 }
 0xc49   : > { %14702 = vmatprep.subr.bf16.mxu1 %v14987_v29 }
 0xc4a   : > { %14687 = vmatpush3.bf16.msra.mxu0 %v14986_v28  ;;  %v13049_v28 = vld [vmem:[%s19641_s11 + $0x1] ss:$0 sm:$0xff] }
 0xc4b   : > { %14703 = vmatpush3.bf16.msra.mxu1 %v14987_v29  ;;  %14688 = vmatprep.subr.bf16.mxu0 %v14988_v30 }
 0xc4c   : > { %14704 = vmatprep.subr.bf16.mxu1 %v14989_v31 }
 0xc4e   : > { %14689 = vmatpush3.bf16.msra.mxu0 %v14988_v30  ;;  %v13070_v30 = vld [vmem:[%s19641_s11 + $0x2] ss:$0 sm:$0xff] }
 0xc4f   : > { %14705 = vmatpush3.bf16.msra.mxu1 %v14989_v31  ;;  %14690 = vmatprep.subr.bf16.mxu0 %v14990_v32 }
 0xc50   : > { %14706 = vmatprep.subr.bf16.mxu1 %v14991_v33 }
 0xc52   : > { %14691 = vmatpush3.bf16.msra.mxu0 %v14990_v32 }
 0xc53   : > { %14707 = vmatpush3.bf16.msra.mxu1 %v14991_v33  ;;  %14692 = vmatprep.subr.bf16.mxu0 %v14992_v34 }
 0xc54   : > { %14708 = vmatprep.subr.bf16.mxu1 %v14993_v35 }
 0xc56   : > { %14693 = vmatpush3.bf16.msra.mxu0 %v14992_v34 }
 0xc57   : > { %14709 = vmatpush3.bf16.msra.mxu1 %v14993_v35  ;;  %14694 = vmatprep.subr.bf16.mxu0 %v14994_v36 }
 0xc58   : > { %14710 = vmatprep.subr.bf16.mxu1 %v14995_v38 }
 0xc5a   : > { %14695 = vmatpush3.bf16.msra.mxu0 %v14994_v36 }
 0xc5b   : > { %14711 = vmatpush3.bf16.msra.mxu1 %v14995_v38  ;;  %14716 = vmatprep.subr.bf16.mxu0 %v4872_v39 }
 0xc5c   : > { %5049 = vmatprep.subr.bf16.mxu1 %v5020_v52 }
 0xc5d   : > { %14697 = vmatmul.mubr.msk.bf16.vlgmr.msra.gmra.mxu0 %vm3827_vm5, %v17223_v57 }
 0xc5e   : > { %14713 = vmatmul.mubr.msk.bf16.vlgmr.msra.gmra.mxu1 %vm3827_vm5, %v17223_v57  ;;  %14717 = vmatpush3.bf16.msra.mxu0 %v4872_v39 }
 0xc5f   : > { %14728 = vmatprep.mubr.msk.bf16.mxu0 %vm3827_vm5, %v17221_v2  ;;  %14718 = vmatprep.subr.bf16.mxu0 %v14997_v40  ;;  %v17424_v2 = vand.u32 %v15017_v0, %v16634_v7 }
 0xc60   : > { %5069 = vmatprep.mubr.bf16.mxu1 %v15320_v12  ;;  %5050 = vmatpush1.bf16.msra.mxu1 %v5017_v60 }
 0xc61   : > { %5051 = vmatprep.subr.bf16.mxu1 %v15010_v61 }
 0xc62   : > { %14719 = vmatpush3.bf16.msra.mxu0 %v14997_v40 }
 0xc63   : > { %14720 = vmatprep.subr.bf16.mxu0 %v14998_v48 }
 0xc64   : > { %5052 = vmatpush1.bf16.msra.mxu1 %v15008_v47 }
 0xc65   : > { %5155 = vmatprep.subr.bf16.mxu1 %v5032_v1 }
 0xc66   : > { %14721 = vmatpush3.bf16.msra.mxu0 %v14998_v48 }
 0xc67   : > { %14722 = vmatprep.subr.bf16.mxu0 %v14999_v41 }
 0xc6a   : > { %14723 = vmatpush3.bf16.msra.mxu0 %v14999_v41 }
 0xc6b   : > { %14724 = vmatprep.subr.bf16.mxu0 %v15000_v42 }
 0xc6e   : > { %14725 = vmatpush3.bf16.msra.mxu0 %v15000_v42 }
 0xc6f   : > { %14726 = vmatprep.subr.bf16.mxu0 %v15001_v44 }
 0xc72   : > { %14727 = vmatpush3.bf16.msra.mxu0 %v15001_v44 }
 0xc73   : > { %5102 = vmatprep.subr.bf16.mxu0 %v5026_v58 }
 0xc75   : > { %14729 = vmatmul.mubr.msk.bf16.vlgmr.msra.gmra.mxu0 %vm3827_vm5, %v17223_v57 }
 0xc76   : > { %5122 = vmatprep.mubr.bf16.mxu0 %v15320_v12  ;;  %5103 = vmatpush1.bf16.msra.mxu0 %v5023_v3 }
 0xc77   : > { %5104 = vmatprep.subr.bf16.mxu0 %v15013_v63 }
 0xc7a   : > { %5105 = vmatpush1.bf16.msra.mxu0 %v15011_v51 }
 0xc7b   : > { %14732 = vmatprep.subr.bf16.mxu0 %v17424_v2 }
 0xcd5   : > { %v14602_v57 = vpop.f32.mrf.mxu0  ;;  %v14618_v45 = vpop.f32.mrf.mxu1 }
 0xcd6   : > { %v4045_v35 = vadd.f32 %v14602_v57, %v13028_v18  ;;  %v4154_v63 = vadd.f32 %v14618_v45, %v13049_v28  ;;  %v13154_v45 = vld [vmem:[%s19641_s11 + $0x6] ss:$0 sm:$0xff] }
 0xcd7   : > { %v4036_v59 = vpop.f32.mrf.mxu0  ;;  %v4145_v50 = vpop.f32.mrf.mxu1 }
 0xcd8   : > { %v4037_v23 = vadd.f32 %v13028_v18, %v4036_v59  ;;  %v4146_v31 = vadd.f32 %v13049_v28, %v4145_v50  ;;  %v4053_v44 = vmax.f32 %v4045_v35, -1e+30 }
 0xcd9   : > { %v14603_v62 = vpop.f32.mrf.mxu0  ;;  %v14619_v55 = vpop.f32.mrf.mxu1 }
 0xcda   : > { %v4051_v26 = vmax.f32 %v4037_v23, -1e+30  ;;  %v4048_v29 = vadd.f32 %v14603_v62, %v13028_v18  ;;  %v4157_v43 = vadd.f32 %v14619_v55, %v13049_v28  ;;  %v4162_v57 = vmax.f32 %v4053_v44, %v4154_v63  ;;  %v15020_v63 = vld [vmem:[%s19639_s12 + $0x14] ss:$28 sps:$4 sm:$0xff]  }
 0xcdb   : > { %v4039_v54 = vpop.f32.mrf.mxu0  ;;  %v4148_v5 = vpop.f32.mrf.mxu1 }
 0xcdc   : > { %v4040_v20 = vadd.f32 %v13028_v18, %v4039_v54  ;;  %v4149_v32 = vadd.f32 %v13049_v28, %v4148_v5  ;;  %v4160_v38 = vmax.f32 %v4051_v26, %v4146_v31  ;;  %v4054_v40 = vmax.f32 %v4048_v29, -1e+30 }
 0xcde   : > { %v4052_v27 = vmax.f32 %v4040_v20, -1e+30  ;;  %v4163_v47 = vmax.f32 %v4054_v40, %v4157_v43 }
 0xce0   : > { %v4161_v39 = vmax.f32 %v4052_v27, %v4149_v32 }
 0xced   : > { %v14634_v4 = vpop.f32.mrf.mxu0  ;;  %v17427_v6 = vpop.f32.mrf.mxu1 }
 0xcee   : > { %v4263_v51 = vadd.f32 %v14634_v4, %v13070_v30  ;;  %v4372_v18 = vadd.f32 %v17427_v6, %v13091_v49  ;;  %v13196_v6 = vld [vmem:[%s19641_s11 + $0x8] ss:$0 sm:$0xff] }
 0xcef   : > { %v4254_v8 = vpop.f32.mrf.mxu0  ;;  %v4363_v10 = vpop.f32.mrf.mxu1 }
 0xcf0   : > { %v4255_v33 = vadd.f32 %v13070_v30, %v4254_v8  ;;  %v4364_v58 = vadd.f32 %v13091_v49, %v4363_v10  ;;  %v4271_v55 = vmax.f32 %v4162_v57, %v4263_v51  ;;  %v13133_v8 = vld [vmem:[%s19641_s11 + $0x5] ss:$0 sm:$0xff] }
 0xcf1   : > { %v14635_v9 = vpop.f32.mrf.mxu0  ;;  %v14651_v13 = vpop.f32.mrf.mxu1 }
 0xcf2   : > { %v4269_v41 = vmax.f32 %v4160_v38, %v4255_v33  ;;  %v4266_v56 = vadd.f32 %v14635_v9, %v13070_v30  ;;  %v4375_v5 = vadd.f32 %v14651_v13, %v13091_v49  ;;  %v4380_v27 = vmax.f32 %v4271_v55, %v4372_v18  ;;  %v13175_v33 = vld [vmem:[%s19641_s11 + $0x7] ss:$0 sm:$0xff]  ;;  %v5266_v18 = vld [vmem:[%s19643_s22 + $0xa8] sm:$0xff] }
 0xcf3   : > { %v4257_v11 = vpop.f32.mrf.mxu0  ;;  %v4366_v15 = vpop.f32.mrf.mxu1 }
 0xcf4   : > { %v4258_v34 = vadd.f32 %v13070_v30, %v4257_v11  ;;  %v4367_v60 = vadd.f32 %v13091_v49, %v4366_v15  ;;  %v4378_v0 = vmax.f32 %v4269_v41, %v4364_v58  ;;  %v4272_v59 = vmax.f32 %v4163_v47, %v4266_v56 }
 0xcf6   : > { %v4270_v42 = vmax.f32 %v4161_v39, %v4258_v34  ;;  %v4381_v23 = vmax.f32 %v4272_v59, %v4375_v5 }
 0xcf8   : > { %v4379_v1 = vmax.f32 %v4270_v42, %v4367_v60 }
 0xd05   : > { %v17429_v14 = vpop.f32.mrf.mxu0 }
 0xd06   : > { %v17431_v17 = vpop.f32.mrf.mxu1  ;;  %v4481_v20 = vadd.f32 %v17429_v14, %v13112_v46 }
 0xd07   : > { %v4472_v16 = vpop.f32.mrf.mxu0  ;;  %v4590_v38 = vadd.f32 %v17431_v17, %v13133_v8 }
 0xd08   : > { %v4581_v21 = vpop.f32.mrf.mxu1  ;;  %v4473_v3 = vadd.f32 %v13112_v46, %v4472_v16  ;;  %v4489_v32 = vmax.f32 %v4380_v27, %v4481_v20  ;;  %v5262_v20 = vld [vmem:[%s19643_s22 + $0x88] sm:$0xff]  ;;  %v5269_v27 = vld [vmem:[%s19643_s22 + $0xc0] sm:$0xff] }
 0xd09   : > { %v14667_v19 = vpop.f32.mrf.mxu0  ;;  %v4582_v10 = vadd.f32 %v13133_v8, %v4581_v21 }
 0xd0a   : > { %v17436_v24 = vpop.f32.mrf.mxu1  ;;  %v4487_v50 = vmax.f32 %v4378_v0, %v4473_v3  ;;  %v4484_v9 = vadd.f32 %v14667_v19, %v13112_v46  ;;  %v4598_v49 = vmax.f32 %v4489_v32, %v4590_v38 }
 0xd0b   : > { %v4475_v22 = vpop.f32.mrf.mxu0  ;;  %v4593_v21 = vadd.f32 %v17436_v24, %v13133_v8  ;;  %v15014_v24 = vld [vmem:[%s19639_s12 + $0x48] ss:$28 sps:$4 sm:$0x1f]  }
 0xd0c   : > { %v4584_v36 = vpop.f32.mrf.mxu1  ;;  %v4476_v61 = vadd.f32 %v13112_v46, %v4475_v22  ;;  %v4596_v22 = vmax.f32 %v4487_v50, %v4582_v10  ;;  %v4490_v28 = vmax.f32 %v4381_v23, %v4484_v9  ;;  %v5255_v10 = vld [vmem:[%s19643_s22 + $0x50] sm:$0xff]  ;;  %v5268_v23 = vld [vmem:[%s19643_s22 + $0xb8] sm:$0xff] }
 0xd0d   : > { %v4585_v11 = vadd.f32 %v13133_v8, %v4584_v36 }
 0xd0e   : > { %v4488_v54 = vmax.f32 %v4379_v1, %v4476_v61  ;;  %v4599_v39 = vmax.f32 %v4490_v28, %v4593_v21  ;;  %v15018_v1 = vld [vmem:[%s19639_s12 + $0x10] ss:$28 sps:$4 sm:$0xff]  }
 0xd0f   : > { %v5259_v28 = vld [vmem:[%s19643_s22 + $0x70] sm:$0xff] }
 0xd10   : > { %v4597_v26 = vmax.f32 %v4488_v54, %v4585_v11 }
 0xd1d   : > { %v17438_v25 = vpop.f32.mrf.mxu0 }
 0xd1e   : > { %v17446_v48 = vpop.f32.mrf.mxu1  ;;  %v4699_v41 = vadd.f32 %v17438_v25, %v13154_v45  ;;  %v15021_v25 = vld [vmem:[%s19639_s12 + $0x18] ss:$28 sps:$4 sm:$0xff]  }
 0xd1f   : > { %v4690_v37 = vpop.f32.mrf.mxu0  ;;  %v4808_v47 = vadd.f32 %v17446_v48, %v13175_v33 }
 0xd20   : > { %v4799_v53 = vpop.f32.mrf.mxu1  ;;  %v4691_v15 = vadd.f32 %v13154_v45, %v4690_v37  ;;  %v4707_v60 = vmax.f32 %v4598_v49, %v4699_v41 }
 0xd21   : > { %v14699_v52 = vpop.f32.mrf.mxu0  ;;  %v4800_v34 = vadd.f32 %v13175_v33, %v4799_v53 }
 0xd22   : > { %v14715_v4 = vpop.f32.mrf.mxu1  ;;  %v4705_v30 = vmax.f32 %v4596_v22, %v4691_v15  ;;  %v4702_v35 = vadd.f32 %v14699_v52, %v13154_v45  ;;  %v5029_v52 = vand.u32 %v15014_v24, %v16634_v7  ;;  %v4816_v7 = vmax.f32 %v4707_v60, %v4808_v47 }
 0xd23   : > { %v4693_v62 = vpop.f32.mrf.mxu0  ;;  %v4811_v3 = vadd.f32 %v14715_v4, %v13175_v33  ;;  %v5253_v4 = vld [vmem:[%s19642_s6 + $0x40] sm:$0xff] }
 0xd24   : > { %v4694_v16 = vadd.f32 %v13154_v45, %v4693_v62  ;;  %v4802_v19 = vpop.f32.mrf.mxu1  ;;  %v4814_v42 = vmax.f32 %v4705_v30, %v4800_v34  ;;  %v4708_v56 = vmax.f32 %v4599_v39, %v4702_v35  ;;  %v5248_v30 = vld [vmem:[%s19643_s22 + $0x18] sm:$0xff]  ;;  %v5254_v35 = vld [vmem:[%s19643_s22 + $0x48] sm:$0xff] }
 0xd25   : > { %v4803_v36 = vadd.f32 %v13175_v33, %v4802_v19  ;;  %v5261_v19 = vld [vmem:[%s19643_s22 + $0x80] sm:$0xff]  ;;  %v5252_v34 = vld [vmem:[%s19643_s22 + $0x38] sm:$0xff] }
 0xd26   : > { %v4706_v31 = vmax.f32 %v4597_v26, %v4694_v16  ;;  %v4817_v51 = vmax.f32 %v4708_v56, %v4811_v3  ;;  %v5260_v16 = vld [vmem:[%s19643_s22 + $0x78] sm:$0xff]  ;;  %v5267_v26 = vld [vmem:[%s19643_s22 + $0xb0] sm:$0xff] }
 0xd28   : > { %v4815_v44 = vmax.f32 %v4706_v31, %v4803_v36 }
 0xd35   : > { %v14730_v13 = vpop.f32.mrf.mxu0 }
 0xd36   : > { %v4917_v53 = vadd.f32 %v14730_v13, %v13196_v6 }
 0xd37   : > { %v4908_v29 = vpop.f32.mrf.mxu0 }
 0xd38   : > { %v4909_v37 = vadd.f32 %v13196_v6, %v4908_v29  ;;  %v4925_v48 = vmax.f32 %v4816_v7, %v4917_v53  ;;  %v5246_v29 = vld [vmem:[%s19643_s22 + $0x8] sm:$0xff] }
 0xd39   : > { %v14731_v14 = vpop.f32.mrf.mxu0 }
 0xd3a   : > { %v4923_v46 = vmax.f32 %v4814_v42, %v4909_v37  ;;  %v4920_v17 = vadd.f32 %v14731_v14, %v13196_v6 }
 0xd3b   : > { %v4911_v40 = vpop.f32.mrf.mxu0 }
 0xd3c   : > { %v4912_v43 = vadd.f32 %v13196_v6, %v4911_v40  ;;  %v4926_v0 = vmax.f32 %v4817_v51, %v4920_v17  ;;  %v5272_v51 = vld [vmem:[%s19643_s22 + $0xd8] sm:$0xff] }
 0xd3e   : > { %v4924_v58 = vmax.f32 %v4815_v44, %v4912_v43  ;;  %v4928_v57 = vpack.c.bf16 %v4926_v0, %v4925_v48  ;;  %v5245_v44 = vld [vmem:[%s19643_s22] sm:$0xff]  ;;  %v5247_v43 = vld [vmem:[%s19643_s22 + $0x10] sm:$0xff] }
 0xd3f   : > { %v5265_v48 = vld [vmem:[%s19643_s22 + $0xa0] sm:$0xff] }
 0xd40   : > { %v4927_v61 = vpack.c.bf16 %v4924_v58, %v4923_v46 }
 0xd42   : > { %13219 = vmatmul.mubr.msk.bf16.vlgmr.msra.gmra.mxu1 %vm1895_vm2, %v4927_v61  ;;  %13221 = vmatmul.mubr.msk.bf16.vlgmr.msra.gmra.mxu0 %vm1895_vm2, %v4927_v61 }
 0xd43   : > { %5079 = vmatprep.mubr.bf16.mxu1 %v15320_v12  ;;  %5132 = vmatprep.mubr.bf16.mxu0 %v15320_v12 }
 0xd44   : > { %5156 = vmatpush1.bf16.msra.mxu1 %v5029_v52  ;;  %14733 = vmatpush3.bf16.msra.mxu0 %v17424_v2 }
 0xd45   : > { %5157 = vmatprep.subr.bf16.mxu1 %v15020_v63  ;;  %14734 = vmatprep.subr.bf16.mxu0 %v15021_v25 }
 0xd48   : > { %5158 = vmatpush1.bf16.msra.mxu1 %v15018_v1  ;;  %14735 = vmatpush3.bf16.msra.mxu0 %v15021_v25 }
 0xd4a   : > { %13220 = vmatmul.mubr.msk.bf16.gmra.mxu1 %vm1895_vm2, %v4928_v57  ;;  %13222 = vmatmul.mubr.msk.bf16.gmra.mxu0 %vm1895_vm2, %v4928_v57 }
 0xd4b   : > { %14736 = vmatprep.mubr.msk.bf16.mxu0 %vm1895_vm2, %v4927_v61  ;;  %5175 = vmatprep.mubr.bf16.mxu1 %v15320_v12 }
 0xd52   : > { %13223 = vmatmul.mubr.msk.bf16.vlgmr.msra.gmra.mxu1 %vm1895_vm2, %v4927_v61  ;;  %14737 = vmatmul.mubr.msk.bf16.vlgmr.msra.gmra.mxu0 %vm1895_vm2, %v4928_v57 }
 0xd53   : > { %5185 = vmatprep.mubr.bf16.mxu1 %v15320_v12  ;;  %5350 = vmatprep.mubr.bf16.mxu0 %v15320_v12 }
 0xd5a   : > { %13224 = vmatmul.mubr.msk.bf16.gmra.mxu1 %vm1895_vm2, %v4928_v57 }
 0xd5b   : > { %5391 = vmatprep.mubr.bf16.mxu1 %v15320_v12 }
 0xe02   : > { %v5071_v2 = vpop.f32.mrf.mxu1  ;;  %v5124_v59 = vpop.f32.mrf.mxu0 }
 0xe03   : > { %v5273_v53 = vmul.f32 %v5245_v44, %v5071_v2  ;;  %v5275_v7 = vmul.f32 %v5247_v43, %v5124_v59  ;;  %v5258_v2 = vld [vmem:[%s19643_s22 + $0x68] sm:$0xff]  ;;  %v5622_v44 = vld [vmem:[%s19644_s0 + $0x340] sm:$0xff] }
 0xe04   : > { %v5073_v62 = vpop.f32.mrf.mxu1  ;;  %v5126_v50 = vpop.f32.mrf.mxu0 }
 0xe05   : > { %v5274_v49 = vmul.f32 %v5246_v29, %v5073_v62  ;;  %v5276_v56 = vmul.f32 %v5248_v30, %v5126_v50  ;;  %v5256_v29 = vld [vmem:[%s19643_s22 + $0x58] sm:$0xff] }
 0xe06   : > { %v5075_v54 = vpop.f32.mrf.mxu1  ;;  %v5128_v55 = vpop.f32.mrf.mxu0 }
 0xe07   : > { %v5280_v52 = vmul.f32 %v5252_v34, %v5075_v54  ;;  %v5282_v60 = vmul.f32 %v5254_v35, %v5128_v55 }
 0xe08   : > { %v5077_v5 = vpop.f32.mrf.mxu1  ;;  %v5130_v8 = vpop.f32.mrf.mxu0 }
 0xe09   : > { %v5281_v31 = vmul.f32 %v5253_v4, %v5077_v5  ;;  %v5283_v32 = vmul.f32 %v5255_v10, %v5130_v8  ;;  %v5301_v57 = vpack.c.bf16 %v5280_v52, %v5273_v53  ;;  %v5303_v62 = vpack.c.bf16 %v5282_v60, %v5275_v7  ;;  %v5251_v8 = vld [vmem:[%s19643_s22 + $0x30] sm:$0xff]  ;;  %v5582_v52 = vld [vmem:[%s19644_s0 + $0x200] sm:$0xff] }
 0xe0a   : > { %v5081_v9 = vpop.f32.mrf.mxu1  ;;  %v5134_v45 = vpop.f32.mrf.mxu0  ;;  %v5590_v60 = vld [vmem:[%s19644_s0 + $0x240] sm:$0xff] }
 0xe0b   : > { %v5287_v40 = vmul.f32 %v5259_v28, %v5081_v9  ;;  %v5289_v24 = vmul.f32 %v5261_v19, %v5134_v45  ;;  %v5302_v25 = vpack.c.bf16 %v5281_v31, %v5274_v49  ;;  %v5304_v47 = vpack.c.bf16 %v5283_v32, %v5276_v56  ;;  %v5606_v56 = vld [vmem:[%s19644_s0 + $0x2c0] sm:$0xff] }
 0xe0c   : > { %v5083_v11 = vpop.f32.mrf.mxu1  ;;  %v5136_v15 = vpop.f32.mrf.mxu0  ;;  %v15321_v9 = vmov 0.0   ;;  %v5558_v53 = vld [vmem:[%s19644_s0 + $0x140] sm:$0xff] }
 0xe0d   : > { %v5288_v36 = vmul.f32 %v5260_v16, %v5083_v11  ;;  %v5290_v37 = vmul.f32 %v5262_v20, %v5136_v15  ;;  %v15322_v11 = vmov 1065369472   ;;  %v5270_v15 = vld [vmem:[%s19643_s22 + $0xc8] sm:$0xff] }
 0xe0e   : > { %v5085_v13 = vpop.f32.mrf.mxu1  ;;  %v5138_v22 = vpop.f32.mrf.mxu0 }
 0xe0f   : > { %v5294_v21 = vmul.f32 %v5266_v18, %v5085_v13  ;;  %v5296_v33 = vmul.f32 %v5268_v23, %v5138_v22  ;;  %v5257_v18 = vld [vmem:[%s19643_s22 + $0x60] sm:$0xff]  ;;  %v5264_v23 = vld [vmem:[%s19643_s22 + $0x98] sm:$0xff]  ;;  %v5271_v13 = vld [vmem:[%s19643_s22 + $0xd0] sm:$0xff] }
 0xe10   : > { %v5087_v6 = vpop.f32.mrf.mxu1  ;;  %v5140_v14 = vpop.f32.mrf.mxu0  ;;  %v5263_v22 = vld [vmem:[%s19643_s22 + $0x90] sm:$0xff] }
 0xe11   : > { %v5295_v38 = vmul.f32 %v5267_v26, %v5087_v6  ;;  %v5297_v39 = vmul.f32 %v5269_v27, %v5140_v14  ;;  %v5308_v3 = vpack.c.bf16 %v5294_v21, %v5287_v40  ;;  %v5310_v17 = vpack.c.bf16 %v5296_v33, %v5289_v24  ;;  %v5250_v26 = vld [vmem:[%s19643_s22 + $0x28] sm:$0xff]  ;;  %v5249_v33 = vld [vmem:[%s19643_s22 + $0x20] sm:$0xff] }
 0xe12   : > { %v17542_v41 = vpop.f32.mrf.mxu1  ;;  %v14738_v42 = vpop.f32.mrf.mxu0 }
 0xe13   : > { %v5309_v46 = vpack.c.bf16 %v5295_v38, %v5288_v36  ;;  %v5311_v58 = vpack.c.bf16 %v5297_v39, %v5290_v37  ;;  %v5293_v59 = vmul.f32 %v14738_v42, %v5265_v48  ;;  %v5630_v36 = vld [vmem:[%s19644_s0 + $0x380] sm:$0xff]  ;;  %v5277_v39 = vmul.f32 %v5249_v33, %v17542_v41 }
 0xe14   : > { %v5179_v61 = vpop.f32.mrf.mxu1  ;;  %v5230_v63 = vpop.f32.mrf.mxu0  ;;  %v5638_v37 = vld [vmem:[%s19644_s0 + $0x3c0] sm:$0xff] }
 0xe15   : > { %5330 = vmatprep.subr.bf16.mxu0 %v5309_v46  ;;  %5371 = vmatprep.subr.bf16.mxu1 %v5311_v58  ;;  %v5279_v16 = vmul.f32 %v5251_v8, %v5230_v63  ;;  %v5278_v6 = vmul.f32 %v5250_v26, %v5179_v61  ;;  %v13344_v40 = vcombine.high %v5630_v36, %v5638_v37  ;;  %v5614_v42 = vld [vmem:[%s19644_s0 + $0x300] sm:$0xff] }
 0xe16   : > { %v5181_v0 = vpop.f32.mrf.mxu1  ;;  %v14739_v1 = vpop.f32.mrf.mxu0  ;;  %5331 = vmatpush1.bf16.msra.mxu0 %v5308_v3  ;;  %5372 = vmatpush1.bf16.msra.mxu1 %v5310_v17  ;;  %v13343_v43 = vcombine.low %v5630_v36, %v5638_v37  ;;  %v13328_v49 = vcombine.high %v5614_v42, %v5622_v44  ;;  %v5598_v41 = vld [vmem:[%s19644_s0 + $0x280] sm:$0xff]  ;;  %v13327_v46 = vcombine.low %v5614_v42, %v5622_v44 }
 0xe17   : > { %5332 = vmatprep.subr.bf16.mxu0 %v5302_v25  ;;  %5373 = vmatprep.subr.bf16.mxu1 %v5304_v47  ;;  %v5300_v50 = vmul.f32 %v14739_v1, %v5272_v51  ;;  %v5284_v34 = vmul.f32 %v5256_v29, %v5181_v0  ;;  %v13312_v58 = vcombine.high %v5598_v41, %v5606_v56  ;;  %v5566_v61 = vld [vmem:[%s19644_s0 + $0x180] sm:$0xff] }
 0xe18   : > { %v5183_v54 = vpop.f32.mrf.mxu1  ;;  %v5233_v55 = vpop.f32.mrf.mxu0  ;;  %v13311_v3 = vcombine.low %v5598_v41, %v5606_v56  ;;  %v13296_v17 = vcombine.high %v5582_v52, %v5590_v60  ;;  %v5574_v63 = vld [vmem:[%s19644_s0 + $0x1c0] sm:$0xff]  ;;  %v13295_v25 = vcombine.low %v5582_v52, %v5590_v60 }
 0xe19   : > { %v5314_v45 = vpack.c.bf16 %v5300_v50, %v5293_v59  ;;  %v5286_v4 = vmul.f32 %v5258_v2, %v5233_v55  ;;  %v5285_v30 = vmul.f32 %v5257_v18, %v5183_v54  ;;  %v5305_v24 = vpack.c.bf16 %v5284_v34, %v5277_v39  ;;  %v5550_v51 = vld [vmem:[%s19644_s0 + $0x100] sm:$0xff]  ;;  %v5631_v39 = vld [vmem:[%s19644_s0 + $0x388] sm:$0xff] }
 0xe1a   : > { %v5187_v5 = vpop.f32.mrf.mxu1  ;;  %5333 = vmatpush1.bf16.msra.mxu0 %v5301_v57  ;;  %5374 = vmatpush1.bf16.msra.mxu1 %v5303_v62  ;;  %v13280_v47 = vcombine.high %v5566_v61, %v5574_v63  ;;  %v13279_v7 = vcombine.low %v5566_v61, %v5574_v63  ;;  %v13264_v0 = vcombine.high %v5550_v51, %v5558_v53  ;;  %v5534_v1 = vld [vmem:[%s19644_s0 + $0x80] sm:$0xff] }
 0xe1b   : > { %14740 = vmatprep.subr.bf16.mxu1 %v15321_v9  ;;  %v5307_v27 = vpack.c.bf16 %v5286_v4, %v5279_v16  ;;  %v5291_v21 = vmul.f32 %v5263_v22, %v5187_v5  ;;  %v5306_v38 = vpack.c.bf16 %v5285_v30, %v5278_v6  ;;  %v5542_v48 = vld [vmem:[%s19644_s0 + $0xc0] sm:$0xff]  ;;  %v13263_v57 = vcombine.low %v5550_v51, %v5558_v53 }
 0xe1c   : > { %v5189_v10 = vpop.f32.mrf.mxu1  ;;  %v13248_v62 = vcombine.high %v5534_v1, %v5542_v48  ;;  %v5518_v50 = vld [vmem:[%s19644_s0] sm:$0xff]  ;;  %v13247_v55 = vcombine.low %v5534_v1, %v5542_v48  ;;  %v5490_v51 = vlaneseq }
 0xe1d   : > { %13228 = vmatmul.mubr.msk.bf16.vlgmr.msra.gmra.mxu1 %vm2457_vm4, %v15322_v11  ;;  %13227 = vmatmul.mubr.msk.bf16.vlgmr.msra.gmra.mxu0 %vm2457_vm4, %v15322_v11  ;;  %v5292_v31 = vmul.f32 %v5264_v23, %v5189_v10  ;;  %v5526_v54 = vld [vmem:[%s19644_s0 + $0x40] sm:$0xff] }
 0xe1e   : > { %v5191_v20 = vpop.f32.mrf.mxu1  ;;  %14741 = vmatpush3.bf16.msra.mxu1 %v5314_v45  ;;  %14744 = vmatprep.mubr.msk.bf16.mxu1 %vm15323_vm7, %v15321_v9  ;;  %v13232_v2 = vcombine.high %v5518_v50, %v5526_v54  ;;  %v5758_v59 = vld [vmem:[%s19644_s0 + $0x780] sm:$0xff]  ;;  %v13231_v8 = vcombine.low %v5518_v50, %v5526_v54  ;;  %vm5512_vm8 = vcmp.lt.s32.totalorder %v5490_v51, 512 }
 0xe1f   : > { %14742 = vmatprep.subr.bf16.mxu1 %v15321_v9  ;;  %5432 = vmatprep.mubr.bf16.mxu0 %v15320_v12  ;;  %v5298_v28 = vmul.f32 %v5270_v15, %v5191_v20  ;;  %v5766_v5 = vld [vmem:[%s19644_s0 + $0x7c0] sm:$0xff] }
 0xe20   : > { %v5193_v19 = vpop.f32.mrf.mxu1  ;;  %v13472_v9 = vcombine.high %v5758_v59, %v5766_v5  ;;  %v5742_v45 = vld [vmem:[%s19644_s0 + $0x700] sm:$0xff]  ;;  %v13471_v10 = vcombine.low %v5758_v59, %v5766_v5 }
 0xe21   : > { %v5299_v32 = vmul.f32 %v5271_v13, %v5193_v19  ;;  %v5312_v35 = vpack.c.bf16 %v5298_v28, %v5291_v21  ;;  %v5750_v4 = vld [vmem:[%s19644_s0 + $0x740] sm:$0xff] }
 0xe22   : > { %14743 = vmatpush3.bf16.msra.mxu1 %v5307_v27  ;;  %v5726_v15 = vld [vmem:[%s19644_s0 + $0x680] sm:$0xff]  ;;  %v13455_v18 = vcombine.low %v5742_v45, %v5750_v4 }
 0xe23   : > { %v5313_v14 = vpack.c.bf16 %v5299_v32, %v5292_v31  ;;  %v5734_v16 = vld [vmem:[%s19644_s0 + $0x6c0] sm:$0xff] }
 0xe24   : > { %v13440_v23 = vcombine.high %v5726_v15, %v5734_v16  ;;  %v13439_v20 = vcombine.low %v5726_v15, %v5734_v16  ;;  %v5710_v13 = vld [vmem:[%s19644_s0 + $0x600] sm:$0xff] }
 0xe25   : > { %5412 = vmatprep.subr.bf16.mxu0 %v5313_v14  ;;  %14745 = vmatmul.mubr.msk.bf16.vlgmr.msra.gmra.mxu1 %vm2457_vm4, %v15322_v11  ;;  %v5718_v22 = vld [vmem:[%s19644_s0 + $0x640] sm:$0xff] }
 0xe26   : > { %5413 = vmatpush1.bf16.msra.mxu0 %v5312_v35  ;;  %7322 = vmatprep.mubr.bf16.mxu1 %v15320_v12  ;;  %v13423_v26 = vcombine.low %v5710_v13, %v5718_v22  ;;  %v13424_v27 = vcombine.high %v5710_v13, %v5718_v22  ;;  %v5790_v28 = vld [vmem:[%s19644_s0 + $0x880] sm:$0xff]  ;;  %v5607_v13 = vld [vmem:[%s19644_s0 + $0x2c8] sm:$0xff] }
 0xe27   : > { %5414 = vmatprep.subr.bf16.mxu0 %v5306_v38  ;;  %v5798_v19 = vld [vmem:[%s19644_s0 + $0x8c0] sm:$0xff] }
 0xe28   : > { %v13504_v29 = vcombine.high %v5790_v28, %v5798_v19  ;;  %v13503_v30 = vcombine.low %v5790_v28, %v5798_v19  ;;  %v5694_v31 = vld [vmem:[%s19644_s0 + $0x580] sm:$0xff]  ;;  %v5583_v19 = vld [vmem:[%s19644_s0 + $0x208] sm:$0xff] }
 0xe29   : > { %v5702_v32 = vld [vmem:[%s19644_s0 + $0x5c0] sm:$0xff] }
 0xe2a   : > { %5415 = vmatpush1.bf16.msra.mxu0 %v5305_v24  ;;  %7302 = vmatprep.subr.bf16.mxu1 %v13504_v29  ;;  %v13407_v21 = vcombine.low %v5694_v31, %v5702_v32  ;;  %v13408_v33 = vcombine.high %v5694_v31, %v5702_v32  ;;  %v5774_v6 = vld [vmem:[%s19644_s0 + $0x800] sm:$0xff]  ;;  %v5591_v29 = vld [vmem:[%s19644_s0 + $0x248] sm:$0xff] }
 0xe2b   : > { %7249 = vmatprep.subr.bf16.mxu0 %v13344_v40  ;;  %7303 = vmatpush1.bf16.msra.mxu1 %v13503_v30  ;;  %v5782_v14 = vld [vmem:[%s19644_s0 + $0x840] sm:$0xff]  ;;  %v5639_v40 = vld [vmem:[%s19644_s0 + $0x3c8] sm:$0xff]  ;;  %v13298_v32 = vcombine.high %v5583_v19, %v5591_v29 }
 0xe2c   : > { %v13487_v34 = vcombine.low %v5774_v6, %v5782_v14  ;;  %v13488_v35 = vcombine.high %v5774_v6, %v5782_v14  ;;  %v5678_v36 = vld [vmem:[%s19644_s0 + $0x500] sm:$0xff]  ;;  %v13346_v42 = vcombine.high %v5631_v39, %v5639_v40  ;;  %v13345_v44 = vcombine.low %v5631_v39, %v5639_v40 }
 0xe2d   : > { %13229 = vmatmul.mubr.msk.bf16.vlgmr.msra.gmra.mxu0 %vm2457_vm4, %v15322_v11  ;;  %v13456_v11 = vcombine.high %v5742_v45, %v5750_v4  ;;  %v5686_v37 = vld [vmem:[%s19644_s0 + $0x540] sm:$0xff]  ;;  %v5615_v45 = vld [vmem:[%s19644_s0 + $0x308] sm:$0xff] }
 0xe2e   : > { %7250 = vmatpush1.bf16.msra.mxu0 %v13343_v43  ;;  %7304 = vmatprep.subr.bf16.mxu1 %v13488_v35  ;;  %v13392_v38 = vcombine.high %v5678_v36, %v5686_v37  ;;  %v13391_v24 = vcombine.low %v5678_v36, %v5686_v37  ;;  %v5662_v43 = vld [vmem:[%s19644_s0 + $0x480] sm:$0xff]  ;;  %v5623_v4 = vld [vmem:[%s19644_s0 + $0x348] sm:$0xff]  ;;  %v13297_v37 = vcombine.low %v5583_v19, %v5591_v29 }
 0xe2f   : > { %7251 = vmatprep.subr.bf16.mxu0 %v13328_v49  ;;  %7305 = vmatpush1.bf16.msra.mxu1 %v13487_v34  ;;  %v5670_v49 = vld [vmem:[%s19644_s0 + $0x4c0] sm:$0xff]  ;;  %v13329_v22 = vcombine.low %v5615_v45, %v5623_v4  ;;  %v5567_v34 = vld [vmem:[%s19644_s0 + $0x188] sm:$0xff] }
 0xe30   : > { %7331 = vmatprep.subr.bf16.mxu1 %v13346_v42  ;;  %v13375_v41 = vcombine.low %v5662_v43, %v5670_v49  ;;  %v13376_v56 = vcombine.high %v5662_v43, %v5670_v49  ;;  %v5575_v35 = vld [vmem:[%s19644_s0 + $0x1c8] sm:$0xff]  ;;  %v5640_v42 = vld [vmem:[%s19644_s0 + $0x3d0] sm:$0xff] }
 0xe31   : > { %v13282_v40 = vcombine.high %v5567_v34, %v5575_v35  ;;  %v5559_v43 = vld [vmem:[%s19644_s0 + $0x148] sm:$0xff] }
 0xe32   : > { %7252 = vmatpush1.bf16.msra.mxu0 %v13327_v46  ;;  %v5646_v46 = vld [vmem:[%s19644_s0 + $0x400] sm:$0xff] }
 0xe33   : > { %7253 = vmatprep.subr.bf16.mxu0 %v13312_v58  ;;  %v5654_v58 = vld [vmem:[%s19644_s0 + $0x440] sm:$0xff] }
 0xe34   : > { %v13359_v52 = vcombine.low %v5646_v46, %v5654_v58  ;;  %v13360_v60 = vcombine.high %v5646_v46, %v5654_v58 }
 0xe36   : > { %7254 = vmatpush1.bf16.msra.mxu0 %v13311_v3  ;;  %v17710_v3 = vld [vmem:[%s19644_s0 + $0x888] sm:$0xff] }
 0xe37   : > { %7255 = vmatprep.subr.bf16.mxu0 %v13296_v17  ;;  %v17715_v17 = vld [vmem:[%s19644_s0 + $0x8c8] sm:$0xff] }
 0xe38   : > { %v13505_v61 = vcombine.low %v17710_v3, %v17715_v17  ;;  %v13506_v63 = vcombine.high %v17710_v3, %v17715_v17  ;;  %v5535_v3 = vld [vmem:[%s19644_s0 + $0x88] sm:$0xff] }
 0xe39   : > { %v5543_v17 = vld [vmem:[%s19644_s0 + $0xc8] sm:$0xff] }
 0xe3a   : > { %7256 = vmatpush1.bf16.msra.mxu0 %v13295_v25  ;;  %v15324_v25 = vmov 1966171168  }
 0xe3b   : > { %7257 = vmatprep.subr.bf16.mxu0 %v13280_v47  ;;  %v5488_v47 = vunpack.c.l.s4 %v15324_v25 }
 0xe3d   : > { %v5489_v53 = vunpack.c.0.s8 %v5488_v47  ;;  %v13250_v47 = vcombine.high %v5535_v3, %v5543_v17 }
 0xe3e   : > { %7258 = vmatpush1.bf16.msra.mxu0 %v13279_v7  ;;  %v5491_v7 = vshrl.u32 %v5490_v51, 7  ;;  %v5600_v51 = vld [vmem:[%s19644_s0 + $0x290] sm:$0xff] }
 0xe3f   : > { %7259 = vmatprep.subr.bf16.mxu0 %v13264_v0 }
 0xe40   : > { %v17721_v48 = vsub.s32 %v5489_v53, %v5491_v7  ;;  %v5608_v53 = vld [vmem:[%s19644_s0 + $0x2d0] sm:$0xff]  ;;  %v5519_v7 = vld [vmem:[%s19644_s0 + $0x8] sm:$0xff] }
 0xe42   : > { %7260 = vmatpush1.bf16.msra.mxu0 %v13263_v57 }
 0xe43   : > { %7261 = vmatprep.subr.bf16.mxu0 %v13248_v62 }
 0xe46   : > { %7262 = vmatpush1.bf16.msra.mxu0 %v13247_v55 }
 0xe47   : > { %7263 = vmatprep.subr.bf16.mxu0 %v13232_v2 }
 0xe4a   : > { %7264 = vmatpush1.bf16.msra.mxu0 %v13231_v8 }
 0xe4b   : > { %7265 = vmatprep.subr.bf16.mxu0 %v13472_v9 }
 0xe4e   : > { %7266 = vmatpush2.bf16.msra.mxu0 %v13471_v10 }
 0xe4f   : > { %7267 = vmatprep.subr.bf16.mxu0 %v13456_v11 }
 0xe52   : > { %7268 = vmatpush2.bf16.msra.mxu0 %v13455_v18  ;;  %v13330_v18 = vcombine.high %v5615_v45, %v5623_v4  ;;  %v5568_v4 = vld [vmem:[%s19644_s0 + $0x190] sm:$0xff] }
 0xe53   : > { %7269 = vmatprep.subr.bf16.mxu0 %v13440_v23 }
 0xe56   : > { %7270 = vmatpush2.bf16.msra.mxu0 %v13439_v20  ;;  %v5599_v20 = vld [vmem:[%s19644_s0 + $0x288] sm:$0xff] }
 0xe57   : > { %7271 = vmatprep.subr.bf16.mxu0 %v13424_v27  ;;  %v13314_v27 = vcombine.high %v5599_v20, %v5607_v13  ;;  %v13313_v31 = vcombine.low %v5599_v20, %v5607_v13 }
 0xe5a   : > { %7272 = vmatpush2.bf16.msra.mxu0 %v13423_v26 }
 0xe5b   : > { %7273 = vmatprep.subr.bf16.mxu0 %v13408_v33  ;;  %v5783_v33 = vld [vmem:[%s19644_s0 + $0x848] sm:$0xff] }
 0xe5e   : > { %7274 = vmatpush2.bf16.msra.mxu0 %v13407_v21  ;;  %v5775_v21 = vld [vmem:[%s19644_s0 + $0x808] sm:$0xff] }
 0xe5f   : > { %7275 = vmatprep.subr.bf16.mxu0 %v13392_v38  ;;  %v13490_v38 = vcombine.high %v5775_v21, %v5783_v33 }
 0xe62   : > { %7276 = vmatpush2.bf16.msra.mxu0 %v13391_v24  ;;  %v5632_v24 = vld [vmem:[%s19644_s0 + $0x390] sm:$0xff] }
 0xe63   : > { %7277 = vmatprep.subr.bf16.mxu0 %v13376_v56  ;;  %v13281_v56 = vcombine.low %v5567_v34, %v5575_v35  ;;  %v13348_v46 = vcombine.high %v5632_v24, %v5640_v42 }
 0xe66   : > { %7278 = vmatpush2.bf16.msra.mxu0 %v13375_v41  ;;  %v13489_v41 = vcombine.low %v5775_v21, %v5783_v33  ;;  %v5544_v21 = vld [vmem:[%s19644_s0 + $0xd0] sm:$0xff]  ;;  %v5711_v33 = vld [vmem:[%s19644_s0 + $0x608] sm:$0xff] }
 0xe67   : > { %7279 = vmatprep.subr.bf16.mxu0 %v13360_v60  ;;  %v5624_v60 = vld [vmem:[%s19644_s0 + $0x350] sm:$0xff] }
 0xe6a   : > { %7280 = vmatpush2.bf16.msra.mxu0 %v13359_v52  ;;  %v5616_v52 = vld [vmem:[%s19644_s0 + $0x310] sm:$0xff] }
 0xe6b   : > { %7384 = vmatprep.subr.bf16.mxu0 %v13506_v63  ;;  %v13332_v25 = vcombine.high %v5616_v52, %v5624_v60 }
 0xedd   : > { %v5393_v0 = vpop.f32.mrf.mxu1  ;;  %v5352_v1 = vpop.f32.mrf.mxu0 }
 0xedf   : > { %v5395_v57 = vpop.f32.mrf.mxu1  ;;  %v5354_v62 = vpop.f32.mrf.mxu0 }
 0xee0   : > { %v5486_v50 = vcombine.low %v5393_v0, %v5395_v57  ;;  %v5485_v54 = vcombine.low %v5352_v1, %v5354_v62  ;;  %v5527_v0 = vld [vmem:[%s19644_s0 + $0x48] sm:$0xff]  ;;  %v13331_v1 = vcombine.low %v5616_v52, %v5624_v60  ;;  %v13249_v57 = vcombine.low %v5535_v3, %v5543_v17 }
 0xee1   : > { %v5397_v55 = vpop.f32.mrf.mxu1  ;;  %v5356_v2 = vpop.f32.mrf.mxu0  ;;  %v13316_v62 = vcombine.high %v5600_v51, %v5608_v53  ;;  %v5687_v52 = vld [vmem:[%s19644_s0 + $0x548] sm:$0xff] }
 0xee2   : > { %v5500_v59 = vrot.slane %v5486_v50, %v17721_v48  ;;  %v5493_v5 = vrot.slane %v5485_v54, %v17721_v48  ;;  %v13234_v50 = vcombine.high %v5519_v7, %v5527_v0  ;;  %v5584_v54 = vld [vmem:[%s19644_s0 + $0x210] sm:$0xff]  ;;  %v5759_v2 = vld [vmem:[%s19644_s0 + $0x788] sm:$0xff] }
 0xee3   : > { %v5398_v8 = vpop.f32.mrf.mxu1  ;;  %v5357_v9 = vpop.f32.mrf.mxu0  ;;  %v5592_v55 = vld [vmem:[%s19644_s0 + $0x250] sm:$0xff] }
 0xee4   : > { %v5501_v10 = vcombine.low %v5493_v5, %v5500_v59  ;;  %v5767_v59 = vld [vmem:[%s19644_s0 + $0x7c8] sm:$0xff]  ;;  %v13315_v5 = vcombine.low %v5600_v51, %v5608_v53  ;;  %v13233_v8 = vcombine.low %v5519_v7, %v5527_v0  ;;  %v13300_v9 = vcombine.high %v5584_v54, %v5592_v55 }
 0xee5   : > { %v5475_v11 = vpop.f32.mrf.mxu1  ;;  %v13474_v45 = vcombine.high %v5759_v2, %v5767_v59  ;;  %v5671_v51 = vld [vmem:[%s19644_s0 + $0x4c8] sm:$0xff] }
 0xee6   : > { %v17731_v15 = vpack.c.bf16 %v5475_v11, %v5475_v11  ;;  %v5508_v16 = vrot.slane %v5501_v10, %v17721_v48  ;;  %v5576_v10 = vld [vmem:[%s19644_s0 + $0x1d0] sm:$0xff]  ;;  %v5743_v11 = vld [vmem:[%s19644_s0 + $0x708] sm:$0xff] }
 0xee7   : > { %v14746_v23 = vpop.f32.mrf.mxu1  ;;  %v13284_v20 = vcombine.high %v5568_v4, %v5576_v10  ;;  %v13283_v19 = vcombine.low %v5568_v4, %v5576_v10  ;;  %v5800_v4 = vld [vmem:[%s19644_s0 + $0x8d0] sm:$0xff] }
 0xee8   : > { %5514 = vst.msk [vmem:[#allocation2 + $0x4] sm:$0xf] %vm5512_vm8, %v5508_v16  ;;  %13519 = vmatmul.mubr.msk.bf16.vlgmr.msra.gmra.mxu1 %vm2457_vm4, %v17731_v15  ;;  %v5751_v16 = vld [vmem:[%s19644_s0 + $0x748] sm:$0xff]  ;;  %v13473_v23 = vcombine.low %v5759_v2, %v5767_v59 }
 0xee9   : > { %7332 = vmatpush1.bf16.msra.mxu1 %v13345_v44  ;;  %v5478_v26 = vpop.f32.mrf.mxu1  ;;  %v5551_v44 = vld [vmem:[%s19644_s0 + $0x108] sm:$0xff]  ;;  %v13458_v13 = vcombine.high %v5743_v11, %v5751_v16  ;;  %v13457_v29 = vcombine.low %v5743_v11, %v5751_v16 }
 0xeea   : > { %7333 = vmatprep.subr.bf16.mxu1 %v13330_v18  ;;  %v13266_v58 = vcombine.high %v5551_v44, %v5559_v43  ;;  %v13265_v63 = vcombine.low %v5551_v44, %v5559_v43  ;;  %v13299_v18 = vcombine.low %v5584_v54, %v5592_v55  ;;  %v5560_v26 = vld [vmem:[%s19644_s0 + $0x150] sm:$0xff]  ;;  %v5655_v54 = vld [vmem:[%s19644_s0 + $0x448] sm:$0xff] }
 0xeeb   : > { %v14747_v28 = vpop.f32.mrf.mxu1 }
 0xeec   : > { %v5735_v28 = vld [vmem:[%s19644_s0 + $0x6c8] sm:$0xff] }
 0xeed   : > { %7334 = vmatpush1.bf16.msra.mxu1 %v13329_v22  ;;  %v5434_v30 = vpop.f32.mrf.mxu0  ;;  %v5552_v22 = vld [vmem:[%s19644_s0 + $0x110] sm:$0xff] }
 0xeee   : > { %7335 = vmatprep.subr.bf16.mxu1 %v13314_v27  ;;  %v17754_v6 = vpack.c.bf16 %v5434_v30, %v5434_v30  ;;  %v5727_v27 = vld [vmem:[%s19644_s0 + $0x688] sm:$0xff]  ;;  %v13268_v30 = vcombine.high %v5552_v22, %v5560_v26  ;;  %v13267_v34 = vcombine.low %v5552_v22, %v5560_v26  ;;  %v5784_v22 = vld [vmem:[%s19644_s0 + $0x850] sm:$0xff] }
 0xeef   : > { %v5436_v14 = vpop.f32.mrf.mxu0  ;;  %v13441_v35 = vcombine.low %v5727_v27, %v5735_v28 }
 0xef0   : > { %v17762_v36 = vpack.c.bf16 %v5436_v14, %v5436_v14  ;;  %v5719_v14 = vld [vmem:[%s19644_s0 + $0x648] sm:$0xff] }
 0xef1   : > { %7336 = vmatpush1.bf16.msra.mxu1 %v13313_v31  ;;  %v5438_v39 = vpop.f32.mrf.mxu0  ;;  %v13442_v31 = vcombine.high %v5727_v27, %v5735_v28  ;;  %v13425_v43 = vcombine.low %v5711_v33, %v5719_v14 }
 0xef2   : > { %7281 = vmatprep.mubr.bf16.mxu0 %v17762_v36  ;;  %7337 = vmatprep.subr.bf16.mxu1 %v13298_v32  ;;  %v5536_v32 = vld [vmem:[%s19644_s0 + $0x90] sm:$0xff] }
 0xef3   : > { %7282 = vmatmul.mubr.bf16.vlgmr.msra.gmra.mxu0 %v17754_v6  ;;  %v5439_v49 = vpop.f32.mrf.mxu0  ;;  %7363 = vmatprep.mubr.bf16.mxu1 %v17762_v36  ;;  %v5520_v39 = vld [vmem:[%s19644_s0 + $0x10] sm:$0xff]  ;;  %v13251_v44 = vcombine.low %v5536_v32, %v5544_v21 }
 0xef4   : > { %7385 = vmatpush1.bf16.msra.mxu0 %v13505_v61  ;;  %7404 = vmatprep.mubr.bf16.mxu0 %v15320_v12  ;;  %v13347_v61 = vcombine.low %v5632_v24, %v5640_v42  ;;  %v5695_v24 = vld [vmem:[%s19644_s0 + $0x588] sm:$0xff] }
 0xef5   : > { %7338 = vmatpush1.bf16.msra.mxu1 %v13297_v37  ;;  %7386 = vmatprep.subr.bf16.mxu0 %v13490_v38  ;;  %v13252_v37 = vcombine.high %v5536_v32, %v5544_v21  ;;  %v13426_v38 = vcombine.high %v5711_v33, %v5719_v14  ;;  %v5703_v42 = vld [vmem:[%s19644_s0 + $0x5c8] sm:$0xff]  ;;  %v5641_v32 = vld [vmem:[%s19644_s0 + $0x3d8] sm:$0xff] }
 0xef6   : > { %7339 = vmatprep.subr.bf16.mxu1 %v13282_v40  ;;  %v5528_v40 = vld [vmem:[%s19644_s0 + $0x50] sm:$0xff]  ;;  %v13409_v3 = vcombine.low %v5695_v24, %v5703_v42 }
 0xef7   : > { %v13236_v49 = vcombine.high %v5520_v39, %v5528_v40  ;;  %v13235_v60 = vcombine.low %v5520_v39, %v5528_v40  ;;  %v5625_v39 = vld [vmem:[%s19644_s0 + $0x358] sm:$0xff] }
 0xef8   : > { %7387 = vmatpush1.bf16.msra.mxu0 %v13489_v41  ;;  %v13410_v41 = vcombine.high %v5695_v24, %v5703_v42 }
 0xef9   : > { %7340 = vmatpush1.bf16.msra.mxu1 %v13281_v56  ;;  %7413 = vmatprep.subr.bf16.mxu0 %v13348_v46  ;;  %v5760_v56 = vld [vmem:[%s19644_s0 + $0x790] sm:$0xff] }
 0xefa   : > { %7341 = vmatprep.subr.bf16.mxu1 %v13266_v58  ;;  %v5768_v46 = vld [vmem:[%s19644_s0 + $0x7d0] sm:$0xff]  ;;  %v5679_v58 = vld [vmem:[%s19644_s0 + $0x508] sm:$0xff] }
 0xefb   : > { %13520 = vmatmul.mubr.msk.bf16.vlgmr.msra.gmra.mxu0 %vm2457_vm4, %v17731_v15  ;;  %v13476_v17 = vcombine.high %v5760_v56, %v5768_v46  ;;  %v13475_v53 = vcombine.low %v5760_v56, %v5768_v46  ;;  %v13393_v7 = vcombine.low %v5679_v58, %v5687_v52  ;;  %v5609_v56 = vld [vmem:[%s19644_s0 + $0x2d8] sm:$0xff] }
 0xefc   : > { %7414 = vmatpush1.bf16.msra.mxu0 %v13347_v61  ;;  %7445 = vmatprep.mubr.bf16.mxu0 %v17762_v36  ;;  %v13394_v61 = vcombine.high %v5679_v58, %v5687_v52 }
 0xefd   : > { %7342 = vmatpush1.bf16.msra.mxu1 %v13265_v63  ;;  %7415 = vmatprep.subr.bf16.mxu0 %v13332_v25  ;;  %v5744_v63 = vld [vmem:[%s19644_s0 + $0x710] sm:$0xff] }
 0xefe   : > { %7343 = vmatprep.subr.bf16.mxu1 %v13250_v47  ;;  %v5752_v25 = vld [vmem:[%s19644_s0 + $0x750] sm:$0xff]  ;;  %v5663_v47 = vld [vmem:[%s19644_s0 + $0x488] sm:$0xff] }
 0xeff   : > { %v13460_v0 = vcombine.high %v5744_v63, %v5752_v25  ;;  %v13459_v55 = vcombine.low %v5744_v63, %v5752_v25  ;;  %v13377_v2 = vcombine.low %v5663_v47, %v5671_v51  ;;  %v5593_v63 = vld [vmem:[%s19644_s0 + $0x258] sm:$0xff] }
 0xf00   : > { %7416 = vmatpush1.bf16.msra.mxu0 %v13331_v1  ;;  %v13378_v1 = vcombine.high %v5663_v47, %v5671_v51 }
 0xf01   : > { %7344 = vmatpush1.bf16.msra.mxu1 %v13249_v57  ;;  %7417 = vmatprep.subr.bf16.mxu0 %v13316_v62  ;;  %v5728_v57 = vld [vmem:[%s19644_s0 + $0x690] sm:$0xff] }
 0xf02   : > { %7345 = vmatprep.subr.bf16.mxu1 %v13234_v50  ;;  %v5736_v62 = vld [vmem:[%s19644_s0 + $0x6d0] sm:$0xff]  ;;  %v5647_v50 = vld [vmem:[%s19644_s0 + $0x408] sm:$0xff] }
 0xf03   : > { %v13444_v59 = vcombine.high %v5728_v57, %v5736_v62  ;;  %v13443_v10 = vcombine.low %v5728_v57, %v5736_v62  ;;  %v13361_v11 = vcombine.low %v5647_v50, %v5655_v54  ;;  %v5577_v57 = vld [vmem:[%s19644_s0 + $0x1d8] sm:$0xff] }
 0xf04   : > { %7418 = vmatpush1.bf16.msra.mxu0 %v13315_v5  ;;  %v13362_v5 = vcombine.high %v5647_v50, %v5655_v54 }
 0xf05   : > { %7346 = vmatpush1.bf16.msra.mxu1 %v13233_v8  ;;  %7419 = vmatprep.subr.bf16.mxu0 %v13300_v9  ;;  %v5712_v8 = vld [vmem:[%s19644_s0 + $0x610] sm:$0xff] }
 0xf06   : > { %7347 = vmatprep.subr.bf16.mxu1 %v13474_v45  ;;  %v5720_v9 = vld [vmem:[%s19644_s0 + $0x650] sm:$0xff] }
 0xf07   : > { %v5792_v45 = vld [vmem:[%s19644_s0 + $0x890] sm:$0xff]  ;;  %v13428_v16 = vcombine.high %v5712_v8, %v5720_v9  ;;  %v13427_v26 = vcombine.low %v5712_v8, %v5720_v9  ;;  %v5561_v8 = vld [vmem:[%s19644_s0 + $0x158] sm:$0xff] }
 0xf08   : > { %7420 = vmatpush1.bf16.msra.mxu0 %v13299_v18  ;;  %v13508_v18 = vcombine.high %v5792_v45, %v5800_v4  ;;  %v13507_v27 = vcombine.low %v5792_v45, %v5800_v4 }
 0xf09   : > { %7348 = vmatpush2.bf16.msra.mxu1 %v13473_v23  ;;  %7421 = vmatprep.subr.bf16.mxu0 %v13284_v20  ;;  %v5696_v23 = vld [vmem:[%s19644_s0 + $0x590] sm:$0xff] }
 0xf0a   : > { %7349 = vmatprep.subr.bf16.mxu1 %v13458_v13  ;;  %v5704_v20 = vld [vmem:[%s19644_s0 + $0x5d0] sm:$0xff] }
 0xf0b   : > { %v5776_v13 = vld [vmem:[%s19644_s0 + $0x810] sm:$0xff]  ;;  %v13412_v28 = vcombine.high %v5696_v23, %v5704_v20  ;;  %v13411_v21 = vcombine.low %v5696_v23, %v5704_v20  ;;  %v5545_v23 = vld [vmem:[%s19644_s0 + $0xd8] sm:$0xff] }
 0xf0c   : > { %7422 = vmatpush1.bf16.msra.mxu0 %v13283_v19  ;;  %v13492_v19 = vcombine.high %v5776_v13, %v5784_v22  ;;  %v13491_v33 = vcombine.low %v5776_v13, %v5784_v22 }
 0xf0d   : > { %7350 = vmatpush2.bf16.msra.mxu1 %v13457_v29  ;;  %7423 = vmatprep.subr.bf16.mxu0 %v13268_v30  ;;  %v5680_v29 = vld [vmem:[%s19644_s0 + $0x510] sm:$0xff] }
 0xf0e   : > { %7351 = vmatprep.subr.bf16.mxu1 %v13442_v31  ;;  %v5688_v30 = vld [vmem:[%s19644_s0 + $0x550] sm:$0xff]  ;;  %v5633_v31 = vld [vmem:[%s19644_s0 + $0x398] sm:$0xff] }
 0xf0f   : > { %v13396_v14 = vcombine.high %v5680_v29, %v5688_v30  ;;  %v13395_v40 = vcombine.low %v5680_v29, %v5688_v30  ;;  %v13349_v24 = vcombine.low %v5633_v31, %v5641_v32  ;;  %v5529_v29 = vld [vmem:[%s19644_s0 + $0x58] sm:$0xff] }
 0xf10   : > { %7424 = vmatpush1.bf16.msra.mxu0 %v13267_v34  ;;  %v13350_v34 = vcombine.high %v5633_v31, %v5641_v32 }
 0xf11   : > { %7352 = vmatpush2.bf16.msra.mxu1 %v13441_v35  ;;  %7425 = vmatprep.subr.bf16.mxu0 %v13252_v37  ;;  %v5664_v35 = vld [vmem:[%s19644_s0 + $0x490] sm:$0xff] }
 0xf12   : > { %7353 = vmatprep.subr.bf16.mxu1 %v13426_v38  ;;  %v5672_v37 = vld [vmem:[%s19644_s0 + $0x4d0] sm:$0xff]  ;;  %v5617_v38 = vld [vmem:[%s19644_s0 + $0x318] sm:$0xff] }
 0xf13   : > { %v13380_v42 = vcombine.high %v5664_v35, %v5672_v37  ;;  %v13379_v46 = vcombine.low %v5664_v35, %v5672_v37  ;;  %v13333_v58 = vcombine.low %v5617_v38, %v5625_v39  ;;  %v5769_v35 = vld [vmem:[%s19644_s0 + $0x7d8] sm:$0xff] }
 0xf14   : > { %7426 = vmatpush1.bf16.msra.mxu0 %v13251_v44  ;;  %v13334_v44 = vcombine.high %v5617_v38, %v5625_v39 }
 0xf15   : > { %7354 = vmatpush2.bf16.msra.mxu1 %v13425_v43  ;;  %7427 = vmatprep.subr.bf16.mxu0 %v13236_v49  ;;  %v5648_v43 = vld [vmem:[%s19644_s0 + $0x410] sm:$0xff] }
 0xf16   : > { %7355 = vmatprep.subr.bf16.mxu1 %v13410_v41  ;;  %v5656_v49 = vld [vmem:[%s19644_s0 + $0x450] sm:$0xff]  ;;  %v5601_v41 = vld [vmem:[%s19644_s0 + $0x298] sm:$0xff] }
 0xf17   : > { %v13364_v52 = vcombine.high %v5648_v43, %v5656_v49  ;;  %v13363_v25 = vcombine.low %v5648_v43, %v5656_v49  ;;  %v13317_v47 = vcombine.low %v5601_v41, %v5609_v56  ;;  %v5753_v43 = vld [vmem:[%s19644_s0 + $0x758] sm:$0xff] }
 0xf18   : > { %7428 = vmatpush1.bf16.msra.mxu0 %v13235_v60  ;;  %v13318_v60 = vcombine.high %v5601_v41, %v5609_v56 }
 0xf19   : > { %7356 = vmatpush2.bf16.msra.mxu1 %v13409_v3  ;;  %7429 = vmatprep.subr.bf16.mxu0 %v13476_v17  ;;  %v5793_v3 = vld [vmem:[%s19644_s0 + $0x898] sm:$0xff] }
 0xf1a   : > { %7357 = vmatprep.subr.bf16.mxu1 %v13394_v61  ;;  %v5801_v17 = vld [vmem:[%s19644_s0 + $0x8d8] sm:$0xff] }
 0xf1b   : > { %v5585_v61 = vld [vmem:[%s19644_s0 + $0x218] sm:$0xff]  ;;  %v13510_v51 = vcombine.high %v5793_v3, %v5801_v17  ;;  %v13509_v62 = vcombine.low %v5793_v3, %v5801_v17 }
 0xf1c   : > { %7430 = vmatpush2.bf16.msra.mxu0 %v13475_v53  ;;  %v13302_v53 = vcombine.high %v5585_v61, %v5593_v63  ;;  %v13301_v50 = vcombine.low %v5585_v61, %v5593_v63  ;;  %v5737_v3 = vld [vmem:[%s19644_s0 + $0x6d8] sm:$0xff] }
 0xf1d   : > { %7358 = vmatpush2.bf16.msra.mxu1 %v13393_v7  ;;  %7431 = vmatprep.subr.bf16.mxu0 %v13460_v0  ;;  %v5777_v7 = vld [vmem:[%s19644_s0 + $0x818] sm:$0xff] }
 0xf1e   : > { %7359 = vmatprep.subr.bf16.mxu1 %v13378_v1  ;;  %v5785_v0 = vld [vmem:[%s19644_s0 + $0x858] sm:$0xff] }
 0xf1f   : > { %v5569_v1 = vld [vmem:[%s19644_s0 + $0x198] sm:$0xff]  ;;  %v13494_v54 = vcombine.high %v5777_v7, %v5785_v0  ;;  %v13493_v9 = vcombine.low %v5777_v7, %v5785_v0 }
 0xf20   : > { %7432 = vmatpush2.bf16.msra.mxu0 %v13459_v55  ;;  %v13286_v55 = vcombine.high %v5569_v1, %v5577_v57  ;;  %v13285_v45 = vcombine.low %v5569_v1, %v5577_v57  ;;  %v5721_v7 = vld [vmem:[%s19644_s0 + $0x658] sm:$0xff] }
 0xf21   : > { %7360 = vmatpush2.bf16.msra.mxu1 %v13377_v2  ;;  %7433 = vmatprep.subr.bf16.mxu0 %v13444_v59  ;;  %v5634_v2 = vld [vmem:[%s19644_s0 + $0x3a0] sm:$0xff] }
 0xf22   : > { %7361 = vmatprep.subr.bf16.mxu1 %v13362_v5  ;;  %v5642_v59 = vld [vmem:[%s19644_s0 + $0x3e0] sm:$0xff]  ;;  %v5553_v5 = vld [vmem:[%s19644_s0 + $0x118] sm:$0xff] }
 0xf23   : > { %v13352_v4 = vcombine.high %v5634_v2, %v5642_v59  ;;  %v13351_v20 = vcombine.low %v5634_v2, %v5642_v59  ;;  %v13269_v13 = vcombine.low %v5553_v5, %v5561_v8  ;;  %v5705_v2 = vld [vmem:[%s19644_s0 + $0x5d8] sm:$0xff] }
 0xf24   : > { %7434 = vmatpush2.bf16.msra.mxu0 %v13443_v10  ;;  %v13270_v10 = vcombine.high %v5553_v5, %v5561_v8 }
 0xf25   : > { %7362 = vmatpush2.bf16.msra.mxu1 %v13361_v11  ;;  %7435 = vmatprep.subr.bf16.mxu0 %v13428_v16  ;;  %v5618_v11 = vld [vmem:[%s19644_s0 + $0x320] sm:$0xff] }
 0xf26   : > { %7466 = vmatprep.subr.bf16.mxu1 %v13508_v18  ;;  %v5626_v16 = vld [vmem:[%s19644_s0 + $0x360] sm:$0xff]  ;;  %v5537_v18 = vld [vmem:[%s19644_s0 + $0x98] sm:$0xff] }
 0xf27   : > { %v13336_v22 = vcombine.high %v5618_v11, %v5626_v16  ;;  %v13335_v30 = vcombine.low %v5618_v11, %v5626_v16  ;;  %v13253_v31 = vcombine.low %v5537_v18, %v5545_v23  ;;  %v5689_v11 = vld [vmem:[%s19644_s0 + $0x558] sm:$0xff] }
 0xf28   : > { %7364 = vmatmul.mubr.bf16.vlgmr.msra.gmra.mxu1 %v17754_v6  ;;  %7436 = vmatpush2.bf16.msra.mxu0 %v13427_v26  ;;  %v13254_v26 = vcombine.high %v5537_v18, %v5545_v23 }
 0xf29   : > { %7467 = vmatpush1.bf16.msra.mxu1 %v13507_v27  ;;  %7437 = vmatprep.subr.bf16.mxu0 %v13412_v28  ;;  %v5602_v27 = vld [vmem:[%s19644_s0 + $0x2a0] sm:$0xff] }
 0xf2a   : > { %7468 = vmatprep.subr.bf16.mxu1 %v13492_v19  ;;  %7486 = vmatprep.mubr.bf16.mxu1 %v15320_v12  ;;  %v5610_v28 = vld [vmem:[%s19644_s0 + $0x2e0] sm:$0xff]  ;;  %v5521_v19 = vld [vmem:[%s19644_s0 + $0x18] sm:$0xff] }
 0xf2b   : > { %v13320_v32 = vcombine.high %v5602_v27, %v5610_v28  ;;  %v13319_v37 = vcombine.low %v5602_v27, %v5610_v28  ;;  %v13237_v38 = vcombine.low %v5521_v19, %v5529_v29  ;;  %v5673_v27 = vld [vmem:[%s19644_s0 + $0x4d8] sm:$0xff] }
 0xf2c   : > { %7438 = vmatpush2.bf16.msra.mxu0 %v13411_v21  ;;  %v13238_v21 = vcombine.high %v5521_v19, %v5529_v29 }
 0xf2d   : > { %7469 = vmatpush1.bf16.msra.mxu1 %v13491_v33  ;;  %7439 = vmatprep.subr.bf16.mxu0 %v13396_v14  ;;  %v5586_v33 = vld [vmem:[%s19644_s0 + $0x220] sm:$0xff] }
 0xf2e   : > { %7495 = vmatprep.subr.bf16.mxu1 %v13350_v34  ;;  %v5594_v14 = vld [vmem:[%s19644_s0 + $0x260] sm:$0xff]  ;;  %v5761_v34 = vld [vmem:[%s19644_s0 + $0x798] sm:$0xff] }
 0xf2f   : > { %v13304_v39 = vcombine.high %v5586_v33, %v5594_v14  ;;  %v13303_v49 = vcombine.low %v5586_v33, %v5594_v14  ;;  %v13477_v41 = vcombine.low %v5761_v34, %v5769_v35  ;;  %v5657_v33 = vld [vmem:[%s19644_s0 + $0x458] sm:$0xff] }
 0xf30   : > { %7440 = vmatpush2.bf16.msra.mxu0 %v13395_v40  ;;  %13521 = vmatmul.mubr.msk.bf16.vlgmr.msra.gmra.mxu1 %vm2457_vm4, %v17731_v15  ;;  %v13478_v40 = vcombine.high %v5761_v34, %v5769_v35 }
 0xf31   : > { %7496 = vmatpush1.bf16.msra.mxu1 %v13349_v24  ;;  %7527 = vmatprep.mubr.bf16.mxu1 %v17762_v36  ;;  %v5570_v24 = vld [vmem:[%s19644_s0 + $0x1a0] sm:$0xff] }
 0xf32   : > { %7441 = vmatprep.subr.bf16.mxu0 %v13380_v42  ;;  %7497 = vmatprep.subr.bf16.mxu1 %v13334_v44  ;;  %v5578_v42 = vld [vmem:[%s19644_s0 + $0x1e0] sm:$0xff]  ;;  %v5745_v44 = vld [vmem:[%s19644_s0 + $0x718] sm:$0xff] }
 0xf33   : > { %v13288_v56 = vcombine.high %v5570_v24, %v5578_v42  ;;  %v13287_v17 = vcombine.low %v5570_v24, %v5578_v42  ;;  %v13461_v61 = vcombine.low %v5745_v44, %v5753_v43  ;;  %v5802_v24 = vld [vmem:[%s19644_s0 + $0x8e0] sm:$0xff] }
 0xf34   : > { %7442 = vmatpush2.bf16.msra.mxu0 %v13379_v46  ;;  %v13462_v46 = vcombine.high %v5745_v44, %v5753_v43 }
 0xf35   : > { %7498 = vmatpush1.bf16.msra.mxu1 %v13333_v58  ;;  %7443 = vmatprep.subr.bf16.mxu0 %v13364_v52  ;;  %v5554_v58 = vld [vmem:[%s19644_s0 + $0x120] sm:$0xff] }
 0xf36   : > { %7499 = vmatprep.subr.bf16.mxu1 %v13318_v60  ;;  %v5562_v52 = vld [vmem:[%s19644_s0 + $0x160] sm:$0xff]  ;;  %v5729_v60 = vld [vmem:[%s19644_s0 + $0x698] sm:$0xff] }
 0xf37   : > { %v13272_v63 = vcombine.high %v5554_v58, %v5562_v52  ;;  %v13271_v0 = vcombine.low %v5554_v58, %v5562_v52  ;;  %v13445_v1 = vcombine.low %v5729_v60, %v5737_v3  ;;  %v5786_v58 = vld [vmem:[%s19644_s0 + $0x860] sm:$0xff] }
 0xf38   : > { %7444 = vmatpush2.bf16.msra.mxu0 %v13363_v25  ;;  %v13446_v25 = vcombine.high %v5729_v60, %v5737_v3 }
 0xf39   : > { %7500 = vmatpush1.bf16.msra.mxu1 %v13317_v47  ;;  %7548 = vmatprep.subr.bf16.mxu0 %v13510_v51  ;;  %v5538_v47 = vld [vmem:[%s19644_s0 + $0xa0] sm:$0xff] }
 0xf3a   : > { %7501 = vmatprep.subr.bf16.mxu1 %v13302_v53  ;;  %v5546_v51 = vld [vmem:[%s19644_s0 + $0xe0] sm:$0xff]  ;;  %v5713_v53 = vld [vmem:[%s19644_s0 + $0x618] sm:$0xff] }
 0xf3b   : > { %7446 = vmatmul.mubr.bf16.vlgmr.msra.gmra.mxu0 %v17754_v6  ;;  %v13256_v57 = vcombine.high %v5538_v47, %v5546_v51  ;;  %v13255_v59 = vcombine.low %v5538_v47, %v5546_v51  ;;  %v13429_v5 = vcombine.low %v5713_v53, %v5721_v7  ;;  %v5643_v47 = vld [vmem:[%s19644_s0 + $0x3e8] sm:$0xff] }
 0xf3c   : > { %7549 = vmatpush1.bf16.msra.mxu0 %v13509_v62  ;;  %7568 = vmatprep.mubr.bf16.mxu0 %v15320_v12  ;;  %v13430_v62 = vcombine.high %v5713_v53, %v5721_v7 }
 0xf3d   : > { %7502 = vmatpush1.bf16.msra.mxu1 %v13301_v50  ;;  %7550 = vmatprep.subr.bf16.mxu0 %v13494_v54  ;;  %v5522_v50 = vld [vmem:[%s19644_s0 + $0x20] sm:$0xff] }
 0xf3e   : > { %7503 = vmatprep.subr.bf16.mxu1 %v13286_v55  ;;  %v5530_v54 = vld [vmem:[%s19644_s0 + $0x60] sm:$0xff]  ;;  %v5697_v55 = vld [vmem:[%s19644_s0 + $0x598] sm:$0xff] }
 0xf3f   : > { %v13240_v8 = vcombine.high %v5522_v50, %v5530_v54  ;;  %v13239_v16 = vcombine.low %v5522_v50, %v5530_v54  ;;  %v13413_v18 = vcombine.low %v5697_v55, %v5705_v2  ;;  %v5627_v50 = vld [vmem:[%s19644_s0 + $0x368] sm:$0xff] }
 0xf40   : > { %7551 = vmatpush1.bf16.msra.mxu0 %v13493_v9  ;;  %v13414_v9 = vcombine.high %v5697_v55, %v5705_v2 }
 0xf41   : > { %7504 = vmatpush1.bf16.msra.mxu1 %v13285_v45  ;;  %7577 = vmatprep.subr.bf16.mxu0 %v13352_v4  ;;  %v5762_v45 = vld [vmem:[%s19644_s0 + $0x7a0] sm:$0xff] }
 0xf42   : > { %7505 = vmatprep.subr.bf16.mxu1 %v13270_v10  ;;  %v5770_v4 = vld [vmem:[%s19644_s0 + $0x7e0] sm:$0xff]  ;;  %v5681_v10 = vld [vmem:[%s19644_s0 + $0x518] sm:$0xff] }
 0xf43   : > { %13522 = vmatmul.mubr.msk.bf16.vlgmr.msra.gmra.mxu0 %vm2457_vm4, %v17731_v15  ;;  %v13480_v23 = vcombine.high %v5762_v45, %v5770_v4  ;;  %v13479_v28 = vcombine.low %v5762_v45, %v5770_v4  ;;  %v13397_v19 = vcombine.low %v5681_v10, %v5689_v11  ;;  %v5611_v45 = vld [vmem:[%s19644_s0 + $0x2e8] sm:$0xff] }
 0xf44   : > { %7578 = vmatpush1.bf16.msra.mxu0 %v13351_v20  ;;  %7609 = vmatprep.mubr.bf16.mxu0 %v17762_v36  ;;  %v13398_v20 = vcombine.high %v5681_v10, %v5689_v11 }
 0xf45   : > { %7506 = vmatpush1.bf16.msra.mxu1 %v13269_v13  ;;  %7579 = vmatprep.subr.bf16.mxu0 %v13336_v22  ;;  %v5746_v13 = vld [vmem:[%s19644_s0 + $0x720] sm:$0xff] }
 0xf46   : > { %7507 = vmatprep.subr.bf16.mxu1 %v13254_v26  ;;  %v5754_v22 = vld [vmem:[%s19644_s0 + $0x760] sm:$0xff]  ;;  %v5665_v26 = vld [vmem:[%s19644_s0 + $0x498] sm:$0xff] }
 0xf47   : > { %v13464_v29 = vcombine.high %v5746_v13, %v5754_v22  ;;  %v13463_v14 = vcombine.low %v5746_v13, %v5754_v22  ;;  %v13381_v34 = vcombine.low %v5665_v26, %v5673_v27  ;;  %v5595_v13 = vld [vmem:[%s19644_s0 + $0x268] sm:$0xff] }
 0xf48   : > { %7580 = vmatpush1.bf16.msra.mxu0 %v13335_v30  ;;  %v13382_v30 = vcombine.high %v5665_v26, %v5673_v27 }
 0xf49   : > { %7508 = vmatpush1.bf16.msra.mxu1 %v13253_v31  ;;  %7581 = vmatprep.subr.bf16.mxu0 %v13320_v32  ;;  %v5730_v31 = vld [vmem:[%s19644_s0 + $0x6a0] sm:$0xff] }
 0xf4a   : > { %7509 = vmatprep.subr.bf16.mxu1 %v13238_v21  ;;  %v5738_v32 = vld [vmem:[%s19644_s0 + $0x6e0] sm:$0xff]  ;;  %v5649_v21 = vld [vmem:[%s19644_s0 + $0x418] sm:$0xff] }
 0xf4b   : > { %v13448_v35 = vcombine.high %v5730_v31, %v5738_v32  ;;  %v13447_v42 = vcombine.low %v5730_v31, %v5738_v32  ;;  %v13365_v44 = vcombine.low %v5649_v21, %v5657_v33  ;;  %v5579_v31 = vld [vmem:[%s19644_s0 + $0x1e8] sm:$0xff] }
 0xf4c   : > { %7582 = vmatpush1.bf16.msra.mxu0 %v13319_v37  ;;  %v13366_v37 = vcombine.high %v5649_v21, %v5657_v33 }
 0xf4d   : > { %7510 = vmatpush1.bf16.msra.mxu1 %v13237_v38  ;;  %7583 = vmatprep.subr.bf16.mxu0 %v13304_v39  ;;  %v5714_v38 = vld [vmem:[%s19644_s0 + $0x620] sm:$0xff] }
 0xf4e   : > { %7511 = vmatprep.subr.bf16.mxu1 %v13478_v40  ;;  %v5722_v39 = vld [vmem:[%s19644_s0 + $0x660] sm:$0xff] }
 0xf4f   : > { %v5794_v40 = vld [vmem:[%s19644_s0 + $0x8a0] sm:$0xff]  ;;  %v13432_v43 = vcombine.high %v5714_v38, %v5722_v39  ;;  %v13431_v52 = vcombine.low %v5714_v38, %v5722_v39  ;;  %v5563_v38 = vld [vmem:[%s19644_s0 + $0x168] sm:$0xff] }
 0xf50   : > { %7584 = vmatpush1.bf16.msra.mxu0 %v13303_v49  ;;  %v13512_v49 = vcombine.high %v5794_v40, %v5802_v24  ;;  %v13511_v60 = vcombine.low %v5794_v40, %v5802_v24 }
 0xf51   : > { %7512 = vmatpush2.bf16.msra.mxu1 %v13477_v41  ;;  %7585 = vmatprep.subr.bf16.mxu0 %v13288_v56  ;;  %v5698_v41 = vld [vmem:[%s19644_s0 + $0x5a0] sm:$0xff] }
 0xf52   : > { %7513 = vmatprep.subr.bf16.mxu1 %v13462_v46  ;;  %v5706_v56 = vld [vmem:[%s19644_s0 + $0x5e0] sm:$0xff] }
 0xf53   : > { %v5778_v46 = vld [vmem:[%s19644_s0 + $0x820] sm:$0xff]  ;;  %v13416_v3 = vcombine.high %v5698_v41, %v5706_v56  ;;  %v13415_v51 = vcombine.low %v5698_v41, %v5706_v56  ;;  %v5547_v41 = vld [vmem:[%s19644_s0 + $0xe8] sm:$0xff] }
 0xf54   : > { %7586 = vmatpush1.bf16.msra.mxu0 %v13287_v17  ;;  %v13496_v17 = vcombine.high %v5778_v46, %v5786_v58  ;;  %v13495_v53 = vcombine.low %v5778_v46, %v5786_v58 }
 0xf55   : > { %7514 = vmatpush2.bf16.msra.mxu1 %v13461_v61  ;;  %7587 = vmatprep.subr.bf16.mxu0 %v13272_v63  ;;  %v5682_v61 = vld [vmem:[%s19644_s0 + $0x520] sm:$0xff] }
 0xf56   : > { %7515 = vmatprep.subr.bf16.mxu1 %v13446_v25  ;;  %v5690_v63 = vld [vmem:[%s19644_s0 + $0x560] sm:$0xff]  ;;  %v5635_v25 = vld [vmem:[%s19644_s0 + $0x3a8] sm:$0xff] }
 0xf57   : > { %v13400_v7 = vcombine.high %v5682_v61, %v5690_v63  ;;  %v13399_v54 = vcombine.low %v5682_v61, %v5690_v63  ;;  %v13353_v55 = vcombine.low %v5635_v25, %v5643_v47  ;;  %v5531_v61 = vld [vmem:[%s19644_s0 + $0x68] sm:$0xff] }
 0xf58   : > { %7588 = vmatpush1.bf16.msra.mxu0 %v13271_v0  ;;  %v13354_v0 = vcombine.high %v5635_v25, %v5643_v47 }
 0xf59   : > { %7516 = vmatpush2.bf16.msra.mxu1 %v13445_v1  ;;  %7589 = vmatprep.subr.bf16.mxu0 %v13256_v57  ;;  %v5666_v1 = vld [vmem:[%s19644_s0 + $0x4a0] sm:$0xff] }
 0xf5a   : > { %7517 = vmatprep.subr.bf16.mxu1 %v13430_v62  ;;  %v5674_v57 = vld [vmem:[%s19644_s0 + $0x4e0] sm:$0xff]  ;;  %v5619_v62 = vld [vmem:[%s19644_s0 + $0x328] sm:$0xff] }
 0xf5b   : > { %v13384_v2 = vcombine.high %v5666_v1, %v5674_v57  ;;  %v13383_v4 = vcombine.low %v5666_v1, %v5674_v57  ;;  %v13337_v10 = vcombine.low %v5619_v62, %v5627_v50  ;;  %v5771_v1 = vld [vmem:[%s19644_s0 + $0x7e8] sm:$0xff] }
 0xf5c   : > { %7590 = vmatpush1.bf16.msra.mxu0 %v13255_v59  ;;  %v13338_v59 = vcombine.high %v5619_v62, %v5627_v50 }
 0xf5d   : > { %7518 = vmatpush2.bf16.msra.mxu1 %v13429_v5  ;;  %7591 = vmatprep.subr.bf16.mxu0 %v13240_v8  ;;  %v5650_v5 = vld [vmem:[%s19644_s0 + $0x420] sm:$0xff] }
 0xf5e   : > { %7519 = vmatprep.subr.bf16.mxu1 %v13414_v9  ;;  %v5658_v8 = vld [vmem:[%s19644_s0 + $0x460] sm:$0xff]  ;;  %v5603_v9 = vld [vmem:[%s19644_s0 + $0x2a8] sm:$0xff] }
 0xf5f   : > { %v13368_v11 = vcombine.high %v5650_v5, %v5658_v8  ;;  %v13367_v22 = vcombine.low %v5650_v5, %v5658_v8  ;;  %v13321_v26 = vcombine.low %v5603_v9, %v5611_v45  ;;  %v5755_v5 = vld [vmem:[%s19644_s0 + $0x768] sm:$0xff] }
 0xf60   : > { %7592 = vmatpush1.bf16.msra.mxu0 %v13239_v16  ;;  %v13322_v16 = vcombine.high %v5603_v9, %v5611_v45 }
 0xf61   : > { %7520 = vmatpush2.bf16.msra.mxu1 %v13413_v18  ;;  %7593 = vmatprep.subr.bf16.mxu0 %v13480_v23  ;;  %v5795_v18 = vld [vmem:[%s19644_s0 + $0x8a8] sm:$0xff] }
 0xf62   : > { %7521 = vmatprep.subr.bf16.mxu1 %v13398_v20  ;;  %v5803_v23 = vld [vmem:[%s19644_s0 + $0x8e8] sm:$0xff] }
 0xf63   : > { %v5587_v20 = vld [vmem:[%s19644_s0 + $0x228] sm:$0xff]  ;;  %v13514_v27 = vcombine.high %v5795_v18, %v5803_v23  ;;  %v13513_v32 = vcombine.low %v5795_v18, %v5803_v23 }
 0xf64   : > { %7594 = vmatpush2.bf16.msra.mxu0 %v13479_v28  ;;  %v13306_v28 = vcombine.high %v5587_v20, %v5595_v13  ;;  %v13305_v21 = vcombine.low %v5587_v20, %v5595_v13  ;;  %v5739_v18 = vld [vmem:[%s19644_s0 + $0x6e8] sm:$0xff] }
 0xf65   : > { %7522 = vmatpush2.bf16.msra.mxu1 %v13397_v19  ;;  %7595 = vmatprep.subr.bf16.mxu0 %v13464_v29  ;;  %v5779_v19 = vld [vmem:[%s19644_s0 + $0x828] sm:$0xff] }
 0xf66   : > { %7523 = vmatprep.subr.bf16.mxu1 %v13382_v30  ;;  %v5787_v29 = vld [vmem:[%s19644_s0 + $0x868] sm:$0xff] }
 0xf67   : > { %v5571_v30 = vld [vmem:[%s19644_s0 + $0x1a8] sm:$0xff]  ;;  %v13498_v33 = vcombine.high %v5779_v19, %v5787_v29  ;;  %v13497_v39 = vcombine.low %v5779_v19, %v5787_v29 }
 0xf68   : > { %7596 = vmatpush2.bf16.msra.mxu0 %v13463_v14  ;;  %v13290_v14 = vcombine.high %v5571_v30, %v5579_v31  ;;  %v13289_v40 = vcombine.low %v5571_v30, %v5579_v31  ;;  %v5723_v19 = vld [vmem:[%s19644_s0 + $0x668] sm:$0xff] }
 0xf69   : > { %7524 = vmatpush2.bf16.msra.mxu1 %v13381_v34  ;;  %7597 = vmatprep.subr.bf16.mxu0 %v13448_v35  ;;  %v5636_v34 = vld [vmem:[%s19644_s0 + $0x3b0] sm:$0xff] }
 0xf6a   : > { %7525 = vmatprep.subr.bf16.mxu1 %v13366_v37  ;;  %v5644_v35 = vld [vmem:[%s19644_s0 + $0x3f0] sm:$0xff]  ;;  %v5555_v37 = vld [vmem:[%s19644_s0 + $0x128] sm:$0xff] }
 0xf6b   : > { %v13356_v24 = vcombine.high %v5636_v34, %v5644_v35  ;;  %v13355_v56 = vcombine.low %v5636_v34, %v5644_v35  ;;  %v13273_v46 = vcombine.low %v5555_v37, %v5563_v38  ;;  %v5707_v34 = vld [vmem:[%s19644_s0 + $0x5e8] sm:$0xff] }
 0xf6c   : > { %7598 = vmatpush2.bf16.msra.mxu0 %v13447_v42  ;;  %v13274_v42 = vcombine.high %v5555_v37, %v5563_v38 }
 0xf6d   : > { %7526 = vmatpush2.bf16.msra.mxu1 %v13365_v44  ;;  %7599 = vmatprep.subr.bf16.mxu0 %v13432_v43  ;;  %v5620_v44 = vld [vmem:[%s19644_s0 + $0x330] sm:$0xff] }
 0xf6e   : > { %7630 = vmatprep.subr.bf16.mxu1 %v13512_v49  ;;  %v5628_v43 = vld [vmem:[%s19644_s0 + $0x370] sm:$0xff]  ;;  %v5539_v49 = vld [vmem:[%s19644_s0 + $0xa8] sm:$0xff] }
 0xf6f   : > { %v13340_v58 = vcombine.high %v5620_v44, %v5628_v43  ;;  %v13339_v63 = vcombine.low %v5620_v44, %v5628_v43  ;;  %v13257_v25 = vcombine.low %v5539_v49, %v5547_v41  ;;  %v5691_v44 = vld [vmem:[%s19644_s0 + $0x568] sm:$0xff] }
 0xf70   : > { %7528 = vmatmul.mubr.bf16.vlgmr.msra.gmra.mxu1 %v17754_v6  ;;  %7600 = vmatpush2.bf16.msra.mxu0 %v13431_v52  ;;  %v13258_v52 = vcombine.high %v5539_v49, %v5547_v41 }
 0xf71   : > { %7631 = vmatpush1.bf16.msra.mxu1 %v13511_v60  ;;  %7601 = vmatprep.subr.bf16.mxu0 %v13416_v3  ;;  %v5604_v60 = vld [vmem:[%s19644_s0 + $0x2b0] sm:$0xff] }
 0xf72   : > { %7632 = vmatprep.subr.bf16.mxu1 %v13496_v17  ;;  %7650 = vmatprep.mubr.bf16.mxu1 %v15320_v12  ;;  %v5612_v3 = vld [vmem:[%s19644_s0 + $0x2f0] sm:$0xff]  ;;  %v5523_v17 = vld [vmem:[%s19644_s0 + $0x28] sm:$0xff] }
 0xf73   : > { %v13324_v47 = vcombine.high %v5604_v60, %v5612_v3  ;;  %v13323_v57 = vcombine.low %v5604_v60, %v5612_v3  ;;  %v13241_v62 = vcombine.low %v5523_v17, %v5531_v61  ;;  %v5675_v60 = vld [vmem:[%s19644_s0 + $0x4e8] sm:$0xff] }
 0xf74   : > { %7602 = vmatpush2.bf16.msra.mxu0 %v13415_v51  ;;  %v13242_v51 = vcombine.high %v5523_v17, %v5531_v61 }
 0xf75   : > { %7633 = vmatpush1.bf16.msra.mxu1 %v13495_v53  ;;  %7603 = vmatprep.subr.bf16.mxu0 %v13400_v7  ;;  %v5588_v53 = vld [vmem:[%s19644_s0 + $0x230] sm:$0xff] }
 0xf76   : > { %7659 = vmatprep.subr.bf16.mxu1 %v13354_v0  ;;  %v5596_v7 = vld [vmem:[%s19644_s0 + $0x270] sm:$0xff]  ;;  %v5763_v0 = vld [vmem:[%s19644_s0 + $0x7a8] sm:$0xff] }
 0xf77   : > { %v13308_v50 = vcombine.high %v5588_v53, %v5596_v7  ;;  %v13307_v8 = vcombine.low %v5588_v53, %v5596_v7  ;;  %v13481_v9 = vcombine.low %v5763_v0, %v5771_v1  ;;  %v5740_v53 = vld [vmem:[%s19644_s0 + $0x6f0] sm:$0xff]  ;;  %v5651_v7 = vld [vmem:[%s19644_s0 + $0x428] sm:$0xff] }
 0xf78   : > { %7604 = vmatpush2.bf16.msra.mxu0 %v13399_v54  ;;  %13523 = vmatmul.mubr.msk.bf16.vlgmr.msra.gmra.mxu1 %vm2457_vm4, %v17731_v15  ;;  %v13482_v54 = vcombine.high %v5763_v0, %v5771_v1  ;;  %v5659_v0 = vld [vmem:[%s19644_s0 + $0x468] sm:$0xff] }
 0xf79   : > { %7660 = vmatpush1.bf16.msra.mxu1 %v13353_v55  ;;  %7691 = vmatprep.mubr.bf16.mxu1 %v17762_v36  ;;  %v5572_v55 = vld [vmem:[%s19644_s0 + $0x1b0] sm:$0xff] }
 0xf7a   : > { %7605 = vmatprep.subr.bf16.mxu0 %v13384_v2  ;;  %7661 = vmatprep.subr.bf16.mxu1 %v13338_v59  ;;  %v5580_v2 = vld [vmem:[%s19644_s0 + $0x1f0] sm:$0xff]  ;;  %v5747_v59 = vld [vmem:[%s19644_s0 + $0x728] sm:$0xff] }
 0xf7b   : > { %v13292_v45 = vcombine.high %v5572_v55, %v5580_v2  ;;  %v13291_v23 = vcombine.low %v5572_v55, %v5580_v2  ;;  %v13465_v20 = vcombine.low %v5747_v59, %v5755_v5  ;;  %v13370_v55 = vcombine.high %v5651_v7, %v5659_v0  ;;  %v5716_v2 = vld [vmem:[%s19644_s0 + $0x630] sm:$0xff] }
 0xf7c   : > { %7606 = vmatpush2.bf16.msra.mxu0 %v13383_v4  ;;  %v13466_v4 = vcombine.high %v5747_v59, %v5755_v5  ;;  %v5724_v59 = vld [vmem:[%s19644_s0 + $0x670] sm:$0xff] }
 0xf7d   : > { %7662 = vmatpush1.bf16.msra.mxu1 %v13337_v10  ;;  %7607 = vmatprep.subr.bf16.mxu0 %v13368_v11  ;;  %v5556_v10 = vld [vmem:[%s19644_s0 + $0x130] sm:$0xff] }
 0xf7e   : > { %7663 = vmatprep.subr.bf16.mxu1 %v13322_v16  ;;  %v5564_v11 = vld [vmem:[%s19644_s0 + $0x170] sm:$0xff]  ;;  %v5731_v16 = vld [vmem:[%s19644_s0 + $0x6a8] sm:$0xff] }
 0xf7f   : > { %v13276_v13 = vcombine.high %v5556_v10, %v5564_v11  ;;  %v13275_v29 = vcombine.low %v5556_v10, %v5564_v11  ;;  %v13449_v30 = vcombine.low %v5731_v16, %v5739_v18  ;;  %v5796_v5 = vld [vmem:[%s19644_s0 + $0x8b0] sm:$0xff] }
 0xf80   : > { %7608 = vmatpush2.bf16.msra.mxu0 %v13367_v22  ;;  %v13450_v22 = vcombine.high %v5731_v16, %v5739_v18  ;;  %v5700_v11 = vld [vmem:[%s19644_s0 + $0x5b0] sm:$0xff] }
 0xf81   : > { %7664 = vmatpush1.bf16.msra.mxu1 %v13321_v26  ;;  %7712 = vmatprep.subr.bf16.mxu0 %v13514_v27  ;;  %v5540_v26 = vld [vmem:[%s19644_s0 + $0xb0] sm:$0xff] }
 0xf82   : > { %7665 = vmatprep.subr.bf16.mxu1 %v13306_v28  ;;  %v5548_v27 = vld [vmem:[%s19644_s0 + $0xf0] sm:$0xff]  ;;  %v5715_v28 = vld [vmem:[%s19644_s0 + $0x628] sm:$0xff] }
 0xf83   : > { %7610 = vmatmul.mubr.bf16.vlgmr.msra.gmra.mxu0 %v17754_v6  ;;  %v13260_v31 = vcombine.high %v5540_v26, %v5548_v27  ;;  %v13259_v35 = vcombine.low %v5540_v26, %v5548_v27  ;;  %v13433_v37 = vcombine.low %v5715_v28, %v5723_v19  ;;  %v5708_v16 = vld [vmem:[%s19644_s0 + $0x5f0] sm:$0xff] }
 0xf84   : > { %7713 = vmatpush1.bf16.msra.mxu0 %v13513_v32  ;;  %7732 = vmatprep.mubr.bf16.mxu0 %v15320_v12  ;;  %v13434_v32 = vcombine.high %v5715_v28, %v5723_v19  ;;  %v13420_v28 = vcombine.high %v5700_v11, %v5708_v16 }
 0xf85   : > { %7666 = vmatpush1.bf16.msra.mxu1 %v13305_v21  ;;  %7714 = vmatprep.subr.bf16.mxu0 %v13498_v33  ;;  %v5524_v21 = vld [vmem:[%s19644_s0 + $0x30] sm:$0xff] }
 0xf86   : > { %7667 = vmatprep.subr.bf16.mxu1 %v13290_v14  ;;  %v5532_v33 = vld [vmem:[%s19644_s0 + $0x70] sm:$0xff]  ;;  %v5699_v14 = vld [vmem:[%s19644_s0 + $0x5a8] sm:$0xff] }
 0xf87   : > { %v13244_v38 = vcombine.high %v5524_v21, %v5532_v33  ;;  %v13243_v43 = vcombine.low %v5524_v21, %v5532_v33  ;;  %v13417_v49 = vcombine.low %v5699_v14, %v5707_v34  ;;  %v5637_v21 = vld [vmem:[%s19644_s0 + $0x3b8] sm:$0xff] }
 0xf88   : > { %7715 = vmatpush1.bf16.msra.mxu0 %v13497_v39  ;;  %v13418_v39 = vcombine.high %v5699_v14, %v5707_v34  ;;  %v5645_v33 = vld [vmem:[%s19644_s0 + $0x3f8] sm:$0xff]  ;;  %v13419_v34 = vcombine.low %v5700_v11, %v5708_v16 }
 0xf89   : > { %7668 = vmatpush1.bf16.msra.mxu1 %v13289_v40  ;;  %7741 = vmatprep.subr.bf16.mxu0 %v13356_v24  ;;  %v5764_v40 = vld [vmem:[%s19644_s0 + $0x7b0] sm:$0xff]  ;;  %v5565_v11 = vld [vmem:[%s19644_s0 + $0x178] sm:$0xff] }
 0xf8a   : > { %7669 = vmatprep.subr.bf16.mxu1 %v13274_v42  ;;  %v5772_v24 = vld [vmem:[%s19644_s0 + $0x7f0] sm:$0xff]  ;;  %v5683_v42 = vld [vmem:[%s19644_s0 + $0x528] sm:$0xff] }
 0xf8b   : > { %13524 = vmatmul.mubr.msk.bf16.vlgmr.msra.gmra.mxu0 %vm2457_vm4, %v17731_v15  ;;  %v13484_v41 = vcombine.high %v5764_v40, %v5772_v24  ;;  %v13483_v3 = vcombine.low %v5764_v40, %v5772_v24  ;;  %v13401_v61 = vcombine.low %v5683_v42, %v5691_v44  ;;  %v5668_v40 = vld [vmem:[%s19644_s0 + $0x4b0] sm:$0xff] }
 0xf8c   : > { %7742 = vmatpush1.bf16.msra.mxu0 %v13355_v56  ;;  %7773 = vmatprep.mubr.bf16.mxu0 %v17762_v36  ;;  %v13402_v56 = vcombine.high %v5683_v42, %v5691_v44  ;;  %v5676_v42 = vld [vmem:[%s19644_s0 + $0x4f0] sm:$0xff]  ;;  %v5621_v44 = vld [vmem:[%s19644_s0 + $0x338] sm:$0xff] }
 0xf8d   : > { %7670 = vmatpush1.bf16.msra.mxu1 %v13273_v46  ;;  %7743 = vmatprep.subr.bf16.mxu0 %v13340_v58  ;;  %v5748_v46 = vld [vmem:[%s19644_s0 + $0x730] sm:$0xff] }
 0xf8e   : > { %7671 = vmatprep.subr.bf16.mxu1 %v13258_v52  ;;  %v5756_v58 = vld [vmem:[%s19644_s0 + $0x770] sm:$0xff]  ;;  %v5667_v52 = vld [vmem:[%s19644_s0 + $0x4a8] sm:$0xff] }
 0xf8f   : > { %v13467_v1 = vcombine.low %v5748_v46, %v5756_v58 }
 0xf90   : > { %7744 = vmatpush1.bf16.msra.mxu0 %v13339_v63  ;;  %v13468_v63 = vcombine.high %v5748_v46, %v5756_v58  ;;  %v13388_v46 = vcombine.high %v5668_v40, %v5676_v42 }
 0xf91   : > { %7672 = vmatpush1.bf16.msra.mxu1 %v13257_v25  ;;  %7745 = vmatprep.subr.bf16.mxu0 %v13324_v47  ;;  %v13386_v47 = vcombine.high %v5667_v52, %v5675_v60 }
 0xf92   : > { %7673 = vmatprep.subr.bf16.mxu1 %v13242_v51  ;;  %v5732_v51 = vld [vmem:[%s19644_s0 + $0x6b0] sm:$0xff] }
 0xf94   : > { %7746 = vmatpush1.bf16.msra.mxu0 %v13323_v57 }
 0xf95   : > { %7674 = vmatpush1.bf16.msra.mxu1 %v13241_v62  ;;  %7747 = vmatprep.subr.bf16.mxu0 %v13308_v50  ;;  %v13385_v62 = vcombine.low %v5667_v52, %v5675_v60  ;;  %v13452_v50 = vcombine.high %v5732_v51, %v5740_v53  ;;  %v5652_v52 = vld [vmem:[%s19644_s0 + $0x430] sm:$0xff] }
 0xf96   : > { %7675 = vmatprep.subr.bf16.mxu1 %v13482_v54  ;;  %v5660_v60 = vld [vmem:[%s19644_s0 + $0x470] sm:$0xff] }
 0xf98   : > { %7748 = vmatpush1.bf16.msra.mxu0 %v13307_v8  ;;  %v5804_v8 = vld [vmem:[%s19644_s0 + $0x8f0] sm:$0xff] }
 0xf99   : > { %7676 = vmatpush2.bf16.msra.mxu1 %v13481_v9  ;;  %7749 = vmatprep.subr.bf16.mxu0 %v13292_v45  ;;  %v13451_v9 = vcombine.low %v5732_v51, %v5740_v53  ;;  %v13369_v45 = vcombine.low %v5651_v7, %v5659_v0  ;;  %v13516_v10 = vcombine.high %v5796_v5, %v5804_v8  ;;  %v5797_v7 = vld [vmem:[%s19644_s0 + $0x8b8] sm:$0xff] }
 0xf9a   : > { %7677 = vmatprep.subr.bf16.mxu1 %v13466_v4  ;;  %v13436_v4 = vcombine.high %v5716_v2, %v5724_v59  ;;  %v13515_v27 = vcombine.low %v5796_v5, %v5804_v8  ;;  %v13372_v51 = vcombine.high %v5652_v52, %v5660_v60  ;;  %v5805_v0 = vld [vmem:[%s19644_s0 + $0x8f8] sm:$0xff] }
 0xf9b   : > { %v5581_v5 = vld [vmem:[%s19644_s0 + $0x1f8] sm:$0xff]  ;;  %v13517_v8 = vcombine.low %v5797_v7, %v5805_v0 }
 0xf9c   : > { %7750 = vmatpush1.bf16.msra.mxu0 %v13291_v23  ;;  %v5780_v23 = vld [vmem:[%s19644_s0 + $0x830] sm:$0xff] }
 0xf9d   : > { %7678 = vmatpush2.bf16.msra.mxu1 %v13465_v20  ;;  %7751 = vmatprep.subr.bf16.mxu0 %v13276_v13  ;;  %v5788_v20 = vld [vmem:[%s19644_s0 + $0x870] sm:$0xff] }
 0xf9e   : > { %7679 = vmatprep.subr.bf16.mxu1 %v13450_v22  ;;  %v13435_v22 = vcombine.low %v5716_v2, %v5724_v59  ;;  %v5789_v2 = vld [vmem:[%s19644_s0 + $0x878] sm:$0xff] }
 0xf9f   : > { %v5573_v59 = vld [vmem:[%s19644_s0 + $0x1b8] sm:$0xff] }
 0xfa0   : > { %7752 = vmatpush1.bf16.msra.mxu0 %v13275_v29  ;;  %v13500_v29 = vcombine.high %v5780_v23, %v5788_v20 }
 0xfa1   : > { %7680 = vmatpush2.bf16.msra.mxu1 %v13449_v30  ;;  %7753 = vmatprep.subr.bf16.mxu0 %v13260_v31  ;;  %v5684_v30 = vld [vmem:[%s19644_s0 + $0x530] sm:$0xff] }
 0xfa2   : > { %7681 = vmatprep.subr.bf16.mxu1 %v13434_v32  ;;  %v5692_v31 = vld [vmem:[%s19644_s0 + $0x570] sm:$0xff] }
 0xfa4   : > { %7754 = vmatpush1.bf16.msra.mxu0 %v13259_v35 }
 0xfa5   : > { %7682 = vmatpush2.bf16.msra.mxu1 %v13433_v37  ;;  %7755 = vmatprep.subr.bf16.mxu0 %v13244_v38  ;;  %v13499_v37 = vcombine.low %v5780_v23, %v5788_v20  ;;  %v13404_v38 = vcombine.high %v5684_v30, %v5692_v31  ;;  %v5541_v20 = vld [vmem:[%s19644_s0 + $0xb8] sm:$0xff] }
 0xfa6   : > { %7683 = vmatprep.subr.bf16.mxu1 %v13418_v39  ;;  %v13358_v39 = vcombine.high %v5637_v21, %v5645_v33 }
 0xfa8   : > { %7756 = vmatpush1.bf16.msra.mxu0 %v13243_v43  ;;  %v7324_v17 = vpop.f32.mrf.mxu1  ;;  %v5629_v43 = vld [vmem:[%s19644_s0 + $0x378] sm:$0xff] }
 0xfa9   : > { %7684 = vmatpush2.bf16.msra.mxu1 %v13417_v49  ;;  %7757 = vmatprep.subr.bf16.mxu0 %v13484_v41  ;;  %v13403_v49 = vcombine.low %v5684_v30, %v5692_v31  ;;  %v13342_v58 = vcombine.high %v5621_v44, %v5629_v43  ;;  %v5765_v31 = vld [vmem:[%s19644_s0 + $0x7b8] sm:$0xff] }
 0xfaa   : > { %7685 = vmatprep.subr.bf16.mxu1 %v13402_v56  ;;  %v7326_v25 = vpop.f32.mrf.mxu1  ;;  %v13357_v56 = vcombine.low %v5637_v21, %v5645_v33  ;;  %v5749_v33 = vld [vmem:[%s19644_s0 + $0x738] sm:$0xff] }
 0xfac   : > { %7758 = vmatpush2.bf16.msra.mxu0 %v13483_v3  ;;  %v7328_v57 = vpop.f32.mrf.mxu1 }
 0xfad   : > { %7686 = vmatpush2.bf16.msra.mxu1 %v13401_v61  ;;  %7759 = vmatprep.subr.bf16.mxu0 %v13468_v63  ;;  %v5613_v61 = vld [vmem:[%s19644_s0 + $0x2f8] sm:$0xff]  ;;  %v13387_v63 = vcombine.low %v5668_v40, %v5676_v42  ;;  %v13371_v57 = vcombine.low %v5652_v52, %v5660_v60 }
 0xfae   : > { %7687 = vmatprep.subr.bf16.mxu1 %v13386_v47  ;;  %v7329_v54 = vpop.f32.mrf.mxu1  ;;  %v13341_v47 = vcombine.low %v5621_v44, %v5629_v43  ;;  %v5717_v44 = vld [vmem:[%s19644_s0 + $0x638] sm:$0xff] }
 0xfaf   : > { %v5725_v43 = vld [vmem:[%s19644_s0 + $0x678] sm:$0xff] }
 0xfb0   : > { %7760 = vmatpush2.bf16.msra.mxu0 %v13467_v1  ;;  %v5589_v1 = vld [vmem:[%s19644_s0 + $0x238] sm:$0xff] }
 0xfb1   : > { %7688 = vmatpush2.bf16.msra.mxu1 %v13385_v62  ;;  %7761 = vmatprep.subr.bf16.mxu0 %v13452_v50  ;;  %v13518_v50 = vcombine.high %v5797_v7, %v5805_v0 }
 0xfb2   : > { %7689 = vmatprep.subr.bf16.mxu1 %v13370_v55  ;;  %v5781_v55 = vld [vmem:[%s19644_s0 + $0x838] sm:$0xff] }
 0xfb3   : > { %v7283_v18 = vpop.f32.mrf.mxu0  ;;  %v13501_v16 = vcombine.low %v5781_v55, %v5789_v2 }
 0xfb4   : > { %v18382_v13 = vadd.f32 %v7324_v17, %v7283_v18  ;;  %7762 = vmatpush2.bf16.msra.mxu0 %v13451_v9  ;;  %v5605_v17 = vld [vmem:[%s19644_s0 + $0x2b8] sm:$0xff]  ;;  %v13293_v18 = vcombine.low %v5573_v59, %v5581_v5 }
 0xfb5   : > { %7690 = vmatpush2.bf16.msra.mxu1 %v13369_v45  ;;  %v7285_v26 = vpop.f32.mrf.mxu0  ;;  %7763 = vmatprep.subr.bf16.mxu0 %v13436_v4  ;;  %v13326_v53 = vcombine.high %v5605_v17, %v5613_v61  ;;  %v13325_v62 = vcombine.low %v5605_v17, %v5613_v61  ;;  %v13502_v45 = vcombine.high %v5781_v55, %v5789_v2 }
 0xfb6   : > { %v18384_v19 = vadd.f32 %v7326_v25, %v7285_v26  ;;  %7794 = vmatprep.subr.bf16.mxu1 %v13516_v10  ;;  %v13294_v4 = vcombine.high %v5573_v59, %v5581_v5  ;;  %v5557_v10 = vld [vmem:[%s19644_s0 + $0x138] sm:$0xff] }
 0xfb7   : > { %v7287_v32 = vpop.f32.mrf.mxu0  ;;  %v13278_v23 = vcombine.high %v5557_v10, %v5565_v11  ;;  %v13277_v26 = vcombine.low %v5557_v10, %v5565_v11 }
 0xfb8   : > { %v7913_v14 = vcombine.low %v18382_v13, %v18384_v19  ;;  %7692 = vmatmul.mubr.bf16.vlgmr.msra.gmra.mxu1 %v17754_v6  ;;  %7764 = vmatpush2.bf16.msra.mxu0 %v13435_v22  ;;  %v5549_v22 = vld [vmem:[%s19644_s0 + $0xf8] sm:$0xff] }
 0xfb9   : > { %7795 = vmatpush1.bf16.msra.mxu1 %v13515_v27  ;;  %v7288_v35 = vpop.f32.mrf.mxu0  ;;  %7765 = vmatprep.subr.bf16.mxu0 %v13420_v28  ;;  %v13262_v27 = vcombine.high %v5541_v20, %v5549_v22  ;;  %v5533_v28 = vld [vmem:[%s19644_s0 + $0x78] sm:$0xff] }
 0xfba   : > { %7796 = vmatprep.subr.bf16.mxu1 %v13500_v29  ;;  %7814 = vmatprep.mubr.bf16.mxu1 %v15320_v12  ;;  %v13261_v29 = vcombine.low %v5541_v20, %v5549_v22  ;;  %v5653_v13 = vld [vmem:[%s19644_s0 + $0x438] sm:$0xff] }
 0xfbb   : > { %v18405_v24 = vpop.f32.mrf.mxu0  ;;  %v5661_v19 = vld [vmem:[%s19644_s0 + $0x478] sm:$0xff] }
 0xfbc   : > { %7766 = vmatpush2.bf16.msra.mxu0 %v13419_v34  ;;  %v5757_v34 = vld [vmem:[%s19644_s0 + $0x778] sm:$0xff] }
 0xfbd   : > { %7797 = vmatpush1.bf16.msra.mxu1 %v13499_v37  ;;  %v18416_v41 = vpop.f32.mrf.mxu0  ;;  %7767 = vmatprep.subr.bf16.mxu0 %v13404_v38  ;;  %v13470_v37 = vcombine.high %v5749_v33, %v5757_v34  ;;  %v5733_v38 = vld [vmem:[%s19644_s0 + $0x6b8] sm:$0xff]  ;;  %v13469_v40 = vcombine.low %v5749_v33, %v5757_v34 }
 0xfbe   : > { %7823 = vmatprep.subr.bf16.mxu1 %v13358_v39  ;;  %v5741_v39 = vld [vmem:[%s19644_s0 + $0x6f8] sm:$0xff] }
 0xfbf   : > { %v7410_v3 = vpop.f32.mrf.mxu0  ;;  %v13454_v42 = vcombine.high %v5733_v38, %v5741_v39 }
 0xfc0   : > { %7768 = vmatpush2.bf16.msra.mxu0 %v13403_v49  ;;  %13525 = vmatmul.mubr.msk.bf16.vlgmr.msra.gmra.mxu1 %vm2457_vm4, %v17731_v15  ;;  %v13453_v49 = vcombine.low %v5733_v38, %v5741_v39  ;;  %v13437_v3 = vcombine.low %v5717_v44, %v5725_v43 }
 0xfc1   : > { %7824 = vmatpush1.bf16.msra.mxu1 %v13357_v56  ;;  %7855 = vmatprep.mubr.bf16.mxu1 %v17762_v36  ;;  %v7411_v25 = vpop.f32.mrf.mxu0  ;;  %v5597_v36 = vld [vmem:[%s19644_s0 + $0x278] sm:$0xff]  ;;  %v13438_v56 = vcombine.high %v5717_v44, %v5725_v43 }
 0xfc2   : > { %7769 = vmatprep.subr.bf16.mxu0 %v13388_v46  ;;  %7825 = vmatprep.subr.bf16.mxu1 %v13342_v58  ;;  %v13310_v54 = vcombine.high %v5589_v1, %v5597_v36  ;;  %v13309_v9 = vcombine.low %v5589_v1, %v5597_v36  ;;  %v5701_v46 = vld [vmem:[%s19644_s0 + $0x5b8] sm:$0xff] }
 0xfc3   : > { %v5709_v58 = vld [vmem:[%s19644_s0 + $0x5f8] sm:$0xff] }
 0xfc4   : > { %7770 = vmatpush2.bf16.msra.mxu0 %v13387_v63  ;;  %v13422_v61 = vcombine.high %v5701_v46, %v5709_v58  ;;  %v5685_v25 = vld [vmem:[%s19644_s0 + $0x538] sm:$0xff]  ;;  %v13421_v7 = vcombine.low %v5701_v46, %v5709_v58 }
 0xfc5   : > { %7826 = vmatpush1.bf16.msra.mxu1 %v13341_v47  ;;  %7771 = vmatprep.subr.bf16.mxu0 %v13372_v51  ;;  %v5693_v47 = vld [vmem:[%s19644_s0 + $0x578] sm:$0xff] }
 0xfc6   : > { %7827 = vmatprep.subr.bf16.mxu1 %v13326_v53  ;;  %v13406_v0 = vcombine.high %v5685_v25, %v5693_v47  ;;  %v5669_v36 = vld [vmem:[%s19644_s0 + $0x4b8] sm:$0xff] }
 0xfc8   : > { %7772 = vmatpush2.bf16.msra.mxu0 %v13371_v57  ;;  %v5677_v57 = vld [vmem:[%s19644_s0 + $0x4f8] sm:$0xff] }
 0xfc9   : > { %7828 = vmatpush1.bf16.msra.mxu1 %v13325_v62  ;;  %7876 = vmatprep.subr.bf16.mxu0 %v13518_v50  ;;  %v13390_v2 = vcombine.high %v5669_v36, %v5677_v57  ;;  %v13389_v59 = vcombine.low %v5669_v36, %v5677_v57 }
 0xfca   : > { %7829 = vmatprep.subr.bf16.mxu1 %v13310_v54  ;;  %v13405_v54 = vcombine.low %v5685_v25, %v5693_v47 }
 0xfcb   : > { %7774 = vmatmul.mubr.bf16.vlgmr.msra.gmra.mxu0 %v17754_v6 }
 0xfcc   : > { %7877 = vmatpush1.bf16.msra.mxu0 %v13517_v8  ;;  %7896 = vmatprep.mubr.bf16.mxu0 %v15320_v12  ;;  %v5525_v12 = vld [vmem:[%s19644_s0 + $0x38] sm:$0xff]  ;;  %v13374_v8 = vcombine.high %v5653_v13, %v5661_v19 }
 0xfcd   : > { %7830 = vmatpush1.bf16.msra.mxu1 %v13309_v9  ;;  %7878 = vmatprep.subr.bf16.mxu0 %v13502_v45  ;;  %v13246_v30 = vcombine.high %v5525_v12, %v5533_v28  ;;  %v13245_v32 = vcombine.low %v5525_v12, %v5533_v28  ;;  %v13373_v9 = vcombine.low %v5653_v13, %v5661_v19 }
 0xfce   : > { %7831 = vmatprep.subr.bf16.mxu1 %v13294_v4 }
 0xfd0   : > { %7879 = vmatpush1.bf16.msra.mxu0 %v13501_v16 }
 0xfd1   : > { %7832 = vmatpush1.bf16.msra.mxu1 %v13293_v18 }
 0xfd2   : > { %7833 = vmatprep.subr.bf16.mxu1 %v13278_v23 }
 0xfd3   : > { %13526 = vmatmul.mubr.msk.bf16.vlgmr.msra.gmra.mxu0 %vm2457_vm4, %v17731_v15  ;;  %v5773_v15 = vld [vmem:[%s19644_s0 + $0x7f8] sm:$0xff] }
 0xfd4   : > { %v13486_v21 = vcombine.high %v5765_v31, %v5773_v15  ;;  %v13485_v35 = vcombine.low %v5765_v31, %v5773_v15 }
 0xfd5   : > { %7834 = vmatpush1.bf16.msra.mxu1 %v13277_v26 }
 0xfd6   : > { %7835 = vmatprep.subr.bf16.mxu1 %v13262_v27 }
 0xfd9   : > { %7836 = vmatpush1.bf16.msra.mxu1 %v13261_v29 }
 0xfda   : > { %7837 = vmatprep.subr.bf16.mxu1 %v13246_v30 }
 0xfdd   : > { %7838 = vmatpush1.bf16.msra.mxu1 %v13245_v32 }
 0xfde   : > { %7839 = vmatprep.subr.bf16.mxu1 %v13486_v21 }
 0xfe1   : > { %7840 = vmatpush2.bf16.msra.mxu1 %v13485_v35 }
 0xfe2   : > { %7841 = vmatprep.subr.bf16.mxu1 %v13470_v37 }
 0xfe5   : > { %7842 = vmatpush2.bf16.msra.mxu1 %v13469_v40 }
 0xfe6   : > { %7843 = vmatprep.subr.bf16.mxu1 %v13454_v42 }
 0xfe8   : > { %v7365_v52 = vpop.f32.mrf.mxu1 }
 0xfe9   : > { %v7407_v60 = vadd.f32 %v18405_v24, %v7365_v52  ;;  %7844 = vmatpush2.bf16.msra.mxu1 %v13453_v49 }
 0xfea   : > { %v7367_v17 = vpop.f32.mrf.mxu1  ;;  %7845 = vmatprep.subr.bf16.mxu1 %v13438_v56 }
 0xfeb   : > { %v7409_v63 = vadd.f32 %v18416_v41, %v7367_v17  ;;  %v7923_v41 = vrot.slane %v7913_v14, %v17721_v48 }
 0xfec   : > { %v7369_v51 = vpop.f32.mrf.mxu1 }
 0xfed   : > { %v7914_v53 = vcombine.low %v7407_v60, %v7409_v63  ;;  %7846 = vmatpush2.bf16.msra.mxu1 %v13437_v3 }
 0xfee   : > { %v7370_v24 = vpop.f32.mrf.mxu1  ;;  %7847 = vmatprep.subr.bf16.mxu1 %v13422_v61 }
 0xfef   : > { %v7930_v1 = vrot.slane %v7914_v53, %v17721_v48 }
 0xff0   : > { %v7488_v62 = vpop.f32.mrf.mxu1 }
 0xff1   : > { %v7945_v50 = vcombine.low %v7923_v41, %v7930_v1  ;;  %7848 = vmatpush2.bf16.msra.mxu1 %v13421_v7 }
 0xff2   : > { %v7490_v55 = vpop.f32.mrf.mxu1  ;;  %7849 = vmatprep.subr.bf16.mxu1 %v13406_v0 }
 0xff4   : > { %v7492_v14 = vpop.f32.mrf.mxu1 }
 0xff5   : > { %7850 = vmatpush2.bf16.msra.mxu1 %v13405_v54 }
 0xff6   : > { %v7493_v5 = vpop.f32.mrf.mxu1  ;;  %7851 = vmatprep.subr.bf16.mxu1 %v13390_v2 }
 0xff9   : > { %7852 = vmatpush2.bf16.msra.mxu1 %v13389_v59 }
 0xffa   : > { %7853 = vmatprep.subr.bf16.mxu1 %v13374_v8 }
 0xffb   : > { %v7447_v45 = vpop.f32.mrf.mxu0 }
 0xffc   : > { %v7489_v10 = vadd.f32 %v7488_v62, %v7447_v45 }
 0xffd   : > { %v7449_v4 = vpop.f32.mrf.mxu0  ;;  %7854 = vmatpush2.bf16.msra.mxu1 %v13373_v9 }
 0xffe   : > { %v7491_v11 = vadd.f32 %v7490_v55, %v7449_v4 }
 0xfff   : > { %v7451_v16 = vpop.f32.mrf.mxu0 }
0x1000   : > { %v7915_v18 = vcombine.low %v7489_v10, %v7491_v11  ;;  %7856 = vmatmul.mubr.bf16.vlgmr.msra.gmra.mxu1 %v17754_v6  ;;  %v7953_v6 = vrot.slane %v7945_v50, %v17721_v48 }
0x1001   : > { %v7452_v23 = vpop.f32.mrf.mxu0 }
0x1002   : > { %v7937_v21 = vrot.slane %v7915_v18, %v17721_v48 }
0x1003   : > { %v7570_v20 = vpop.f32.mrf.mxu0 }
0x1005   : > { %v7572_v22 = vpop.f32.mrf.mxu0 }
0x1007   : > { %v7574_v26 = vpop.f32.mrf.mxu0 }
0x1009   : > { %v7575_v27 = vpop.f32.mrf.mxu0 }
0x1030   : > { %v7529_v12 = vpop.f32.mrf.mxu1 }
0x1031   : > { %v7571_v29 = vadd.f32 %v7570_v20, %v7529_v12 }
0x1032   : > { %v7531_v28 = vpop.f32.mrf.mxu1 }
0x1033   : > { %v7573_v30 = vadd.f32 %v7572_v22, %v7531_v28 }
0x1034   : > { %v7533_v31 = vpop.f32.mrf.mxu1 }
0x1035   : > { %v7916_v15 = vcombine.low %v7571_v29, %v7573_v30 }
0x1036   : > { %v7534_v32 = vpop.f32.mrf.mxu1 }
0x1037   : > { %v7944_v33 = vrot.slane %v7916_v15, %v17721_v48 }
0x1038   : > { %v7652_v34 = vpop.f32.mrf.mxu1 }
0x1039   : > { %v7946_v35 = vcombine.low %v7937_v21, %v7944_v33 }
0x103a   : > { %v7654_v37 = vpop.f32.mrf.mxu1 }
0x103b   : > { %v7960_v38 = vrot.slane %v7946_v35, %v17721_v48 }
0x103c   : > { %v7656_v39 = vpop.f32.mrf.mxu1 }
0x103d   : > { %v7961_v40 = vcombine.low %v7953_v6, %v7960_v38 }
0x103e   : > { %v7657_v42 = vpop.f32.mrf.mxu1 }
0x103f   : > { %7963 = vst [vmem:[#allocation4] sm:$0xff] %v7961_v40 }
0x1043   : > { %v7611_v44 = vpop.f32.mrf.mxu0 }
0x1044   : > { %v7653_v43 = vadd.f32 %v7652_v34, %v7611_v44 }
0x1045   : > { %v7613_v49 = vpop.f32.mrf.mxu0 }
0x1046   : > { %v7655_v56 = vadd.f32 %v7654_v37, %v7613_v49 }
0x1047   : > { %v7615_v46 = vpop.f32.mrf.mxu0 }
0x1048   : > { %v7972_v58 = vcombine.low %v7653_v43, %v7655_v56 }
0x1049   : > { %v7616_v52 = vpop.f32.mrf.mxu0 }
0x104a   : > { %v7982_v0 = vrot.slane %v7972_v58, %v17721_v48 }
0x104b   : > { %v7734_v60 = vpop.f32.mrf.mxu0 }
0x104d   : > { %v7736_v3 = vpop.f32.mrf.mxu0 }
0x104f   : > { %v7738_v17 = vpop.f32.mrf.mxu0 }
0x1051   : > { %v7739_v61 = vpop.f32.mrf.mxu0 }
0x1078   : > { %v7693_v63 = vpop.f32.mrf.mxu1 }
0x1079   : > { %v7735_v25 = vadd.f32 %v7734_v60, %v7693_v63 }
0x107a   : > { %v7695_v47 = vpop.f32.mrf.mxu1 }
0x107b   : > { %v7737_v51 = vadd.f32 %v7736_v3, %v7695_v47 }
0x107c   : > { %v7697_v53 = vpop.f32.mrf.mxu1 }
0x107d   : > { %v7973_v7 = vcombine.low %v7735_v25, %v7737_v51 }
0x107e   : > { %v7698_v24 = vpop.f32.mrf.mxu1 }
0x107f   : > { %v7989_v41 = vrot.slane %v7973_v7, %v17721_v48 }
0x1080   : > { %v7816_v1 = vpop.f32.mrf.mxu1 }
0x1081   : > { %v8004_v36 = vcombine.low %v7982_v0, %v7989_v41 }
0x1082   : > { %v7818_v57 = vpop.f32.mrf.mxu1 }
0x1083   : > { %v8012_v12 = vrot.slane %v8004_v36, %v17721_v48 }
0x1084   : > { %v7820_v62 = vpop.f32.mrf.mxu1 }
0x1086   : > { %v7821_v50 = vpop.f32.mrf.mxu1 }
0x108b   : > { %v7775_v54 = vpop.f32.mrf.mxu0 }
0x108c   : > { %v7817_v2 = vadd.f32 %v7816_v1, %v7775_v54 }
0x108d   : > { %v7777_v55 = vpop.f32.mrf.mxu0 }
0x108e   : > { %v7819_v13 = vadd.f32 %v7818_v57, %v7777_v55 }
0x108f   : > { %v7779_v19 = vpop.f32.mrf.mxu0 }
0x1090   : > { %v7974_v14 = vcombine.low %v7817_v2, %v7819_v13 }
0x1091   : > { %v7780_v59 = vpop.f32.mrf.mxu0 }
0x1092   : > { %v7996_v22 = vrot.slane %v7974_v14, %v17721_v48 }
0x1093   : > { %v7898_v5 = vpop.f32.mrf.mxu0 }
0x1095   : > { %v7900_v8 = vpop.f32.mrf.mxu0 }
0x1097   : > { %v7902_v9 = vpop.f32.mrf.mxu0 }
0x1099   : > { %v7903_v45 = vpop.f32.mrf.mxu0 }
0x10c0   : > { %v7857_v4 = vpop.f32.mrf.mxu1 }
0x10c1   : > { %v7899_v11 = vadd.f32 %v7898_v5, %v7857_v4 }
0x10c2   : > { %v7859_v10 = vpop.f32.mrf.mxu1 }
0x10c3   : > { %v7901_v16 = vadd.f32 %v7900_v8, %v7859_v10 }
0x10c4   : > { %v7861_v18 = vpop.f32.mrf.mxu1 }
0x10c5   : > { %v7975_v23 = vcombine.low %v7899_v11, %v7901_v16 }
0x10c6   : > { %v7862_v20 = vpop.f32.mrf.mxu1 }
0x10c7   : > { %v8003_v26 = vrot.slane %v7975_v23, %v17721_v48 }
0x10c9   : > { %v8005_v27 = vcombine.low %v7996_v22, %v8003_v26 }
0x10cb   : > { %v8019_v28 = vrot.slane %v8005_v27, %v17721_v48 }
0x10cd   : > { %v8020_v29 = vcombine.low %v8012_v12, %v8019_v28 }
0x10cf   : > { %8023 = vst [vmem:[#allocation4 + $0x8] sm:$0xff] %v8020_v29 }
0x10d0 PF: > { %p13527_p10 = scmp.ne.s32.totalorder %s15301_s1, 0 }
0x10d2   : > { %8026 = sbr.rel (%p13527_p10) target bundleno = 4315 (0x10db), region = 135 }
0x10d7   : > { %v8027_v30 = vld [vmem:[%s16605_s7] sm:$0xf]  ;;  %v8028_v31 = vlaneseq }
0x10d9   : > { %vm8030_vm9 = vcmp.lt.s32.totalorder %v8028_v31, 512 }
0x10da   : > { %8032 = vst.msk [vmem:[#allocation2] sm:$0xf] %vm8030_vm9, %v8027_v30 }
0x10db PF: > { %v8139_v48 = vld [vmem:[%s16618_s24 + $0x1c0] sm:$0xff]  ;;  %v8035_v41 = vlaneseq  ;;  %p14041_p11 = scmp.ne.s32.totalorder %s15305_s26, 0 }
0x10dc   : > { %v8143_v15 = vld [vmem:[%s16618_s24 + $0x1e0] sm:$0xff] }
0x10dd   : > { %v8267_v32 = vld [vmem:[%s16618_s24 + $0x5c0] sm:$0xff]  ;;  %v13585_v21 = vcombine.high %v8139_v48, %v8143_v15  ;;  %v13584_v34 = vcombine.low %v8139_v48, %v8143_v15  ;;  %v18570_v13 = vshrl.u32 %v8035_v41, 7 }
0x10de   : > { %v8271_v33 = vld [vmem:[%s16618_s24 + $0x5e0] sm:$0xff] }
0x10df   : > { %v8131_v35 = vld [vmem:[%s16618_s24 + $0x180] sm:$0xff]  ;;  %v13713_v6 = vcombine.high %v8267_v32, %v8271_v33  ;;  %v13712_v38 = vcombine.low %v8267_v32, %v8271_v33  ;;  %11197 = vmatprep.subr.bf16.mxu0 %v13585_v21  ;;  %v18577_v10 = vsub.s32 1, %v18570_v13  ;;  %v18580_v11 = vsub.s32 3, %v18570_v13 }
0x10e0   : > { %v8135_v37 = vld [vmem:[%s16618_s24 + $0x1a0] sm:$0xff]  ;;  %11198 = vmatpush1.bf16.msra.mxu0 %v13584_v34 }
0x10e1   : > { %v13577_v39 = vcombine.high %v8131_v35, %v8135_v37  ;;  %v8259_v40 = vld [vmem:[%s16618_s24 + $0x580] sm:$0xff]  ;;  %11238 = vmatprep.subr.bf16.mxu1 %v13713_v6  ;;  %v13576_v58 = vcombine.low %v8131_v35, %v8135_v37  ;;  %v18584_v26 = vld [vmem:[#allocation2] sm:$0xff] }
0x10e2   : > { %v8263_v42 = vld [vmem:[%s16618_s24 + $0x5a0] sm:$0xff]  ;;  %11239 = vmatpush1.bf16.msra.mxu1 %v13712_v38  ;;  %v8042_v29 = vrot.slane %v18584_v26, %v18577_v10  ;;  %v8050_v30 = vrot.slane %v18584_v26, %v18580_v11 }
0x10e3   : > { %v8123_v44 = vld [vmem:[%s16618_s24 + $0x140] sm:$0xff]  ;;  %v13705_v43 = vcombine.high %v8259_v40, %v8263_v42  ;;  %11199 = vmatprep.subr.bf16.mxu0 %v13577_v39  ;;  %v13704_v52 = vcombine.low %v8259_v40, %v8263_v42 }
0x10e4   : > { %v8127_v49 = vld [vmem:[%s16618_s24 + $0x160] sm:$0xff]  ;;  %11200 = vmatpush1.bf16.msra.mxu0 %v13576_v58  ;;  %v18594_v32 = vpack.c.bf16 %v8042_v29, %v8042_v29  ;;  %v18596_v21 = vpack.c.bf16 %v8050_v30, %v8050_v30 }
0x10e5   : > { %v8251_v56 = vld [vmem:[%s16618_s24 + $0x540] sm:$0xff]  ;;  %v13569_v60 = vcombine.high %v8123_v44, %v8127_v49  ;;  %11240 = vmatprep.subr.bf16.mxu1 %v13705_v43  ;;  %v13568_v47 = vcombine.low %v8123_v44, %v8127_v49 }
0x10e6   : > { %v8255_v46 = vld [vmem:[%s16618_s24 + $0x560] sm:$0xff]  ;;  %11241 = vmatpush1.bf16.msra.mxu1 %v13704_v52  ;;  %11229 = vmatprep.mubr.bf16.mxu0 %v18594_v32 }
0x10e7   : > { %v13697_v3 = vcombine.high %v8251_v56, %v8255_v46  ;;  %v8115_v17 = vld [vmem:[%s16618_s24 + $0x100] sm:$0xff]  ;;  %11201 = vmatprep.subr.bf16.mxu0 %v13569_v60  ;;  %v13696_v51 = vcombine.low %v8251_v56, %v8255_v46  ;;  %11270 = vmatprep.mubr.bf16.mxu1 %v18596_v21 }
0x10e8   : > { %v8119_v61 = vld [vmem:[%s16618_s24 + $0x120] sm:$0xff]  ;;  %11202 = vmatpush1.bf16.msra.mxu0 %v13568_v47 }
0x10e9   : > { %v8243_v63 = vld [vmem:[%s16618_s24 + $0x500] sm:$0xff]  ;;  %v13561_v53 = vcombine.high %v8115_v17, %v8119_v61  ;;  %11242 = vmatprep.subr.bf16.mxu1 %v13697_v3  ;;  %v13560_v57 = vcombine.low %v8115_v17, %v8119_v61 }
0x10ea   : > { %v8247_v25 = vld [vmem:[%s16618_s24 + $0x520] sm:$0xff]  ;;  %11243 = vmatpush1.bf16.msra.mxu1 %v13696_v51 }
0x10eb   : > { %v13689_v7 = vcombine.high %v8243_v63, %v8247_v25  ;;  %v8107_v24 = vld [vmem:[%s16618_s24 + $0xc0] sm:$0xff]  ;;  %11203 = vmatprep.subr.bf16.mxu0 %v13561_v53  ;;  %v13688_v62 = vcombine.low %v8243_v63, %v8247_v25 }
0x10ec   : > { %v8111_v0 = vld [vmem:[%s16618_s24 + $0xe0] sm:$0xff]  ;;  %11204 = vmatpush1.bf16.msra.mxu0 %v13560_v57 }
0x10ed   : > { %v8235_v1 = vld [vmem:[%s16618_s24 + $0x4c0] sm:$0xff]  ;;  %v13553_v50 = vcombine.high %v8107_v24, %v8111_v0  ;;  %11244 = vmatprep.subr.bf16.mxu1 %v13689_v7  ;;  %v13552_v59 = vcombine.low %v8107_v24, %v8111_v0 }
0x10ee   : > { %v8239_v36 = vld [vmem:[%s16618_s24 + $0x4e0] sm:$0xff]  ;;  %11245 = vmatpush1.bf16.msra.mxu1 %v13688_v62 }
0x10ef   : > { %v13681_v54 = vcombine.high %v8235_v1, %v8239_v36  ;;  %v8099_v55 = vld [vmem:[%s16618_s24 + $0x80] sm:$0xff]  ;;  %11205 = vmatprep.subr.bf16.mxu0 %v13553_v50  ;;  %v13680_v5 = vcombine.low %v8235_v1, %v8239_v36 }
0x10f0   : > { %v8103_v2 = vld [vmem:[%s16618_s24 + $0xa0] sm:$0xff]  ;;  %11206 = vmatpush1.bf16.msra.mxu0 %v13552_v59 }
0x10f1   : > { %v8227_v19 = vld [vmem:[%s16618_s24 + $0x480] sm:$0xff]  ;;  %v13545_v8 = vcombine.high %v8099_v55, %v8103_v2  ;;  %11246 = vmatprep.subr.bf16.mxu1 %v13681_v54  ;;  %v13544_v23 = vcombine.low %v8099_v55, %v8103_v2 }
0x10f2   : > { %v8231_v14 = vld [vmem:[%s16618_s24 + $0x4a0] sm:$0xff]  ;;  %11247 = vmatpush1.bf16.msra.mxu1 %v13680_v5 }
0x10f3   : > { %v13673_v9 = vcombine.high %v8227_v19, %v8231_v14  ;;  %v8091_v45 = vld [vmem:[%s16618_s24 + $0x40] sm:$0xff]  ;;  %11207 = vmatprep.subr.bf16.mxu0 %v13545_v8  ;;  %v13672_v20 = vcombine.low %v8227_v19, %v8231_v14 }
0x10f4   : > { %v8095_v4 = vld [vmem:[%s16618_s24 + $0x60] sm:$0xff]  ;;  %11208 = vmatpush1.bf16.msra.mxu0 %v13544_v23 }
0x10f5   : > { %v8219_v16 = vld [vmem:[%s16618_s24 + $0x440] sm:$0xff]  ;;  %v13537_v22 = vcombine.high %v8091_v45, %v8095_v4  ;;  %11248 = vmatprep.subr.bf16.mxu1 %v13673_v9  ;;  %v13536_v15 = vcombine.low %v8091_v45, %v8095_v4 }
0x10f6   : > { %v8223_v18 = vld [vmem:[%s16618_s24 + $0x460] sm:$0xff]  ;;  %11249 = vmatpush1.bf16.msra.mxu1 %v13672_v20 }
0x10f7   : > { %v13665_v27 = vcombine.high %v8219_v16, %v8223_v18  ;;  %v8083_v12 = vld [vmem:[%s16618_s24] sm:$0xff]  ;;  %11209 = vmatprep.subr.bf16.mxu0 %v13537_v22  ;;  %v13664_v33 = vcombine.low %v8219_v16, %v8223_v18 }
0x10f8   : > { %v8087_v28 = vld [vmem:[%s16618_s24 + $0x20] sm:$0xff]  ;;  %11210 = vmatpush1.bf16.msra.mxu0 %v13536_v15 }
0x10f9   : > { %v8211_v31 = vld [vmem:[%s16618_s24 + $0x400] sm:$0xff]  ;;  %v13529_v34 = vcombine.high %v8083_v12, %v8087_v28  ;;  %11250 = vmatprep.subr.bf16.mxu1 %v13665_v27  ;;  %v13528_v40 = vcombine.low %v8083_v12, %v8087_v28 }
0x10fa   : > { %v8215_v48 = vld [vmem:[%s16618_s24 + $0x420] sm:$0xff]  ;;  %11251 = vmatpush1.bf16.msra.mxu1 %v13664_v33 }
0x10fb   : > { %v13657_v35 = vcombine.high %v8211_v31, %v8215_v48  ;;  %v8203_v37 = vld [vmem:[%s16618_s24 + $0x3c0] sm:$0xff]  ;;  %11211 = vmatprep.subr.bf16.mxu0 %v13529_v34  ;;  %v13656_v42 = vcombine.low %v8211_v31, %v8215_v48 }
0x10fc   : > { %v8207_v6 = vld [vmem:[%s16618_s24 + $0x3e0] sm:$0xff]  ;;  %11212 = vmatpush1.bf16.msra.mxu0 %v13528_v40 }
0x10fd   : > { %v8331_v38 = vld [vmem:[%s16618_s24 + $0x7c0] sm:$0xff]  ;;  %v13649_v44 = vcombine.high %v8203_v37, %v8207_v6  ;;  %11252 = vmatprep.subr.bf16.mxu1 %v13657_v35  ;;  %v13648_v52 = vcombine.low %v8203_v37, %v8207_v6 }
0x10fe   : > { %v8335_v39 = vld [vmem:[%s16618_s24 + $0x7e0] sm:$0xff]  ;;  %11253 = vmatpush1.bf16.msra.mxu1 %v13656_v42  ;;  %v18636_v42 = vsub.s32 2, %v18570_v13 }
0x10ff   : > { %v13777_v43 = vcombine.high %v8331_v38, %v8335_v39  ;;  %v8195_v49 = vld [vmem:[%s16618_s24 + $0x380] sm:$0xff]  ;;  %11213 = vmatprep.subr.bf16.mxu0 %v13649_v44  ;;  %v13776_v60 = vcombine.low %v8331_v38, %v8335_v39  ;;  %v18633_v39 = vsub.s32 0, %v18570_v13 }
0x1100   : > { %v8199_v56 = vld [vmem:[%s16618_s24 + $0x3a0] sm:$0xff]  ;;  %11214 = vmatpush2.bf16.msra.mxu0 %v13648_v52 }
0x1101   : > { %v8323_v46 = vld [vmem:[%s16618_s24 + $0x780] sm:$0xff]  ;;  %v13641_v3 = vcombine.high %v8195_v49, %v8199_v56  ;;  %11254 = vmatprep.subr.bf16.mxu1 %v13777_v43  ;;  %v13640_v51 = vcombine.low %v8195_v49, %v8199_v56  ;;  %v8038_v52 = vrot.slane %v18584_v26, %v18633_v39 }
0x1102   : > { %v8327_v58 = vld [vmem:[%s16618_s24 + $0x7a0] sm:$0xff]  ;;  %11255 = vmatpush2.bf16.msra.mxu1 %v13776_v60 }
0x1103   : > { %v13769_v17 = vcombine.high %v8323_v46, %v8327_v58  ;;  %v8187_v61 = vld [vmem:[%s16618_s24 + $0x340] sm:$0xff]  ;;  %11215 = vmatprep.subr.bf16.mxu0 %v13641_v3  ;;  %v13768_v53 = vcombine.low %v8323_v46, %v8327_v58  ;;  %v8057_v58 = vsub.s32 5, %v18570_v13 }
0x1104   : > { %v8191_v63 = vld [vmem:[%s16618_s24 + $0x360] sm:$0xff]  ;;  %11216 = vmatpush2.bf16.msra.mxu0 %v13640_v51 }
0x1105   : > { %v8315_v25 = vld [vmem:[%s16618_s24 + $0x740] sm:$0xff]  ;;  %v13633_v7 = vcombine.high %v8187_v61, %v8191_v63  ;;  %11256 = vmatprep.subr.bf16.mxu1 %v13769_v17  ;;  %v13632_v62 = vcombine.low %v8187_v61, %v8191_v63  ;;  %v8065_v17 = vsub.s32 7, %v18570_v13  ;;  %v8046_v63 = vrot.slane %v18584_v26, %v18636_v42 }
0x1106   : > { %v8319_v47 = vld [vmem:[%s16618_s24 + $0x760] sm:$0xff]  ;;  %11257 = vmatpush2.bf16.msra.mxu1 %v13768_v53 }
0x1107   : > { %v13761_v24 = vcombine.high %v8315_v25, %v8319_v47  ;;  %v8179_v0 = vld [vmem:[%s16618_s24 + $0x300] sm:$0xff]  ;;  %11217 = vmatprep.subr.bf16.mxu0 %v13633_v7  ;;  %v13760_v50 = vcombine.low %v8315_v25, %v8319_v47 }
0x1108   : > { %v8183_v1 = vld [vmem:[%s16618_s24 + $0x320] sm:$0xff]  ;;  %11218 = vmatpush2.bf16.msra.mxu0 %v13632_v62  ;;  %v18660_v62 = vpack.c.bf16 %v8046_v63, %v8046_v63 }
0x1109   : > { %v8307_v36 = vld [vmem:[%s16618_s24 + $0x700] sm:$0xff]  ;;  %v13625_v54 = vcombine.high %v8179_v0, %v8183_v1  ;;  %11258 = vmatprep.subr.bf16.mxu1 %v13761_v24  ;;  %v13624_v5 = vcombine.low %v8179_v0, %v8183_v1  ;;  %v8058_v24 = vrot.slane %v18584_v26, %v8057_v58  ;;  %v18653_v0 = vpack.c.bf16 %v8038_v52, %v8038_v52 }
0x110a   : > { %v8311_v57 = vld [vmem:[%s16618_s24 + $0x720] sm:$0xff]  ;;  %11259 = vmatpush2.bf16.msra.mxu1 %v13760_v50 }
0x110b   : > { %v13753_v55 = vcombine.high %v8307_v36, %v8311_v57  ;;  %v8171_v2 = vld [vmem:[%s16618_s24 + $0x2c0] sm:$0xff]  ;;  %11219 = vmatprep.subr.bf16.mxu0 %v13625_v54  ;;  %v13752_v8 = vcombine.low %v8307_v36, %v8311_v57  ;;  %v8066_v57 = vrot.slane %v18584_v26, %v8065_v17 }
0x110c   : > { %v8175_v19 = vld [vmem:[%s16618_s24 + $0x2e0] sm:$0xff]  ;;  %11220 = vmatpush2.bf16.msra.mxu0 %v13624_v5 }
0x110d   : > { %v8299_v14 = vld [vmem:[%s16618_s24 + $0x6c0] sm:$0xff]  ;;  %v13617_v9 = vcombine.high %v8171_v2, %v8175_v19  ;;  %11260 = vmatprep.subr.bf16.mxu1 %v13753_v55  ;;  %v13616_v20 = vcombine.low %v8171_v2, %v8175_v19 }
0x110e   : > { %v8303_v59 = vld [vmem:[%s16618_s24 + $0x6e0] sm:$0xff]  ;;  %11261 = vmatpush2.bf16.msra.mxu1 %v13752_v8 }
0x110f   : > { %v13745_v45 = vcombine.high %v8299_v14, %v8303_v59  ;;  %v8163_v4 = vld [vmem:[%s16618_s24 + $0x280] sm:$0xff]  ;;  %11221 = vmatprep.subr.bf16.mxu0 %v13617_v9  ;;  %v13744_v22 = vcombine.low %v8299_v14, %v8303_v59  ;;  %v18664_v59 = vpack.c.bf16 %v8058_v24, %v8058_v24  ;;  %v18669_v9 = vpack.c.bf16 %v8066_v57, %v8066_v57 }
0x1110   : > { %v8167_v16 = vld [vmem:[%s16618_s24 + $0x2a0] sm:$0xff]  ;;  %11222 = vmatpush2.bf16.msra.mxu0 %v13616_v20 }
0x1111   : > { %v8291_v18 = vld [vmem:[%s16618_s24 + $0x680] sm:$0xff]  ;;  %v13609_v27 = vcombine.high %v8163_v4, %v8167_v16  ;;  %11262 = vmatprep.subr.bf16.mxu1 %v13745_v45  ;;  %v13608_v48 = vcombine.low %v8163_v4, %v8167_v16 }
0x1112   : > { %v8295_v23 = vld [vmem:[%s16618_s24 + $0x6a0] sm:$0xff]  ;;  %11263 = vmatpush2.bf16.msra.mxu1 %v13744_v22 }
0x1113   : > { %v13737_v12 = vcombine.high %v8291_v18, %v8295_v23  ;;  %v8155_v28 = vld [vmem:[%s16618_s24 + $0x240] sm:$0xff]  ;;  %11223 = vmatprep.subr.bf16.mxu0 %v13609_v27  ;;  %v13736_v15 = vcombine.low %v8291_v18, %v8295_v23 }
0x1114   : > { %v8159_v29 = vld [vmem:[%s16618_s24 + $0x260] sm:$0xff]  ;;  %11224 = vmatpush2.bf16.msra.mxu0 %v13608_v48 }
0x1115   : > { %v8283_v30 = vld [vmem:[%s16618_s24 + $0x640] sm:$0xff]  ;;  %v13601_v33 = vcombine.high %v8155_v28, %v8159_v29  ;;  %11264 = vmatprep.subr.bf16.mxu1 %v13737_v12  ;;  %v13600_v40 = vcombine.low %v8155_v28, %v8159_v29 }
0x1116   : > { %v8287_v31 = vld [vmem:[%s16618_s24 + $0x660] sm:$0xff]  ;;  %11265 = vmatpush2.bf16.msra.mxu1 %v13736_v15 }
0x1117   : > { %v13729_v34 = vcombine.high %v8283_v30, %v8287_v31  ;;  %v8147_v35 = vld [vmem:[%s16618_s24 + $0x200] sm:$0xff]  ;;  %11225 = vmatprep.subr.bf16.mxu0 %v13601_v33  ;;  %v13728_v44 = vcombine.low %v8283_v30, %v8287_v31 }
0x1118   : > { %v8151_v37 = vld [vmem:[%s16618_s24 + $0x220] sm:$0xff]  ;;  %11226 = vmatpush2.bf16.msra.mxu0 %v13600_v40 }
0x1119   : > { %v8275_v6 = vld [vmem:[%s16618_s24 + $0x600] sm:$0xff]  ;;  %v13593_v43 = vcombine.high %v8147_v35, %v8151_v37  ;;  %11266 = vmatprep.subr.bf16.mxu1 %v13729_v34  ;;  %v13592_v61 = vcombine.low %v8147_v35, %v8151_v37 }
0x111a   : > { %v8279_v38 = vld [vmem:[%s16618_s24 + $0x620] sm:$0xff]  ;;  %11267 = vmatpush2.bf16.msra.mxu1 %v13728_v44 }
0x111b   : > { %v13721_v49 = vcombine.high %v8275_v6, %v8279_v38  ;;  %v8395_v56 = vld [vmem:[%s16618_s24 + $0x9c0] sm:$0xff]  ;;  %11227 = vmatprep.subr.bf16.mxu0 %v13593_v43  ;;  %v13720_v25 = vcombine.low %v8275_v6, %v8279_v38 }
0x111c   : > { %v8399_v46 = vld [vmem:[%s16618_s24 + $0x9e0] sm:$0xff]  ;;  %11228 = vmatpush2.bf16.msra.mxu0 %v13592_v61 }
0x111d   : > { %v8523_v60 = vld [vmem:[%s16618_s24 + $0xdc0] sm:$0xff]  ;;  %v13841_v47 = vcombine.high %v8395_v56, %v8399_v46  ;;  %11268 = vmatprep.subr.bf16.mxu1 %v13721_v49  ;;  %v13840_v50 = vcombine.low %v8395_v56, %v8399_v46 }
0x111e   : > { %v8527_v3 = vld [vmem:[%s16618_s24 + $0xde0] sm:$0xff]  ;;  %11269 = vmatpush2.bf16.msra.mxu1 %v13720_v25 }
0x111f   : > { %v13969_v51 = vcombine.high %v8523_v60, %v8527_v3  ;;  %v8387_v53 = vld [vmem:[%s16618_s24 + $0x980] sm:$0xff]  ;;  %11279 = vmatprep.subr.bf16.mxu0 %v13841_v47  ;;  %v13968_v54 = vcombine.low %v8523_v60, %v8527_v3  ;;  %11230 = vmatmul.mubr.bf16.vlgmr.msra.gmra.mxu0 %v18653_v0 }
0x1120   : > { %v8391_v7 = vld [vmem:[%s16618_s24 + $0x9a0] sm:$0xff]  ;;  %11280 = vmatpush1.bf16.msra.mxu0 %v13840_v50  ;;  %11311 = vmatprep.mubr.bf16.mxu0 %v18664_v59 }
0x1121   : > { %v8515_v1 = vld [vmem:[%s16618_s24 + $0xd80] sm:$0xff]  ;;  %v13833_v55 = vcombine.high %v8387_v53, %v8391_v7  ;;  %11320 = vmatprep.subr.bf16.mxu1 %v13969_v51  ;;  %11271 = vmatmul.mubr.bf16.vlgmr.msra.gmra.mxu1 %v18660_v62  ;;  %v13832_v45 = vcombine.low %v8387_v53, %v8391_v7 }
0x1122   : > { %v8519_v36 = vld [vmem:[%s16618_s24 + $0xda0] sm:$0xff]  ;;  %11321 = vmatpush1.bf16.msra.mxu1 %v13968_v54  ;;  %11352 = vmatprep.mubr.bf16.mxu1 %v18669_v9 }
0x1123   : > { %v13961_v2 = vcombine.high %v8515_v1, %v8519_v36  ;;  %v8379_v19 = vld [vmem:[%s16618_s24 + $0x940] sm:$0xff]  ;;  %11281 = vmatprep.subr.bf16.mxu0 %v13833_v55  ;;  %v13960_v4 = vcombine.low %v8515_v1, %v8519_v36 }
0x1124   : > { %v8383_v14 = vld [vmem:[%s16618_s24 + $0x960] sm:$0xff]  ;;  %11282 = vmatpush1.bf16.msra.mxu0 %v13832_v45 }
0x1125   : > { %v8507_v5 = vld [vmem:[%s16618_s24 + $0xd40] sm:$0xff]  ;;  %v13825_v16 = vcombine.high %v8379_v19, %v8383_v14  ;;  %11322 = vmatprep.subr.bf16.mxu1 %v13961_v2  ;;  %v13824_v12 = vcombine.low %v8379_v19, %v8383_v14 }
0x1126   : > { %v8511_v8 = vld [vmem:[%s16618_s24 + $0xd60] sm:$0xff]  ;;  %11323 = vmatpush1.bf16.msra.mxu1 %v13960_v4 }
0x1127   : > { %v13953_v18 = vcombine.high %v8507_v5, %v8511_v8  ;;  %v8371_v23 = vld [vmem:[%s16618_s24 + $0x900] sm:$0xff]  ;;  %11283 = vmatprep.subr.bf16.mxu0 %v13825_v16  ;;  %v13952_v28 = vcombine.low %v8507_v5, %v8511_v8 }
0x1128   : > { %v8375_v20 = vld [vmem:[%s16618_s24 + $0x920] sm:$0xff]  ;;  %11284 = vmatpush1.bf16.msra.mxu0 %v13824_v12 }
0x1129   : > { %v8499_v22 = vld [vmem:[%s16618_s24 + $0xd00] sm:$0xff]  ;;  %v13817_v29 = vcombine.high %v8371_v23, %v8375_v20  ;;  %11324 = vmatprep.subr.bf16.mxu1 %v13953_v18  ;;  %v13816_v34 = vcombine.low %v8371_v23, %v8375_v20 }
0x112a   : > { %v8503_v27 = vld [vmem:[%s16618_s24 + $0xd20] sm:$0xff]  ;;  %11325 = vmatpush1.bf16.msra.mxu1 %v13952_v28 }
0x112b   : > { %v13945_v30 = vcombine.high %v8499_v22, %v8503_v27  ;;  %v8363_v31 = vld [vmem:[%s16618_s24 + $0x8c0] sm:$0xff]  ;;  %11285 = vmatprep.subr.bf16.mxu0 %v13817_v29  ;;  %v13944_v35 = vcombine.low %v8499_v22, %v8503_v27 }
0x112c   : > { %v8367_v48 = vld [vmem:[%s16618_s24 + $0x8e0] sm:$0xff]  ;;  %11286 = vmatpush1.bf16.msra.mxu0 %v13816_v34 }
0x112d   : > { %v8491_v15 = vld [vmem:[%s16618_s24 + $0xcc0] sm:$0xff]  ;;  %v13809_v37 = vcombine.high %v8363_v31, %v8367_v48  ;;  %11326 = vmatprep.subr.bf16.mxu1 %v13945_v30  ;;  %v13808_v49 = vcombine.low %v8363_v31, %v8367_v48 }
0x112e   : > { %v8495_v33 = vld [vmem:[%s16618_s24 + $0xce0] sm:$0xff]  ;;  %11327 = vmatpush1.bf16.msra.mxu1 %v13944_v35 }
0x112f   : > { %v13937_v6 = vcombine.high %v8491_v15, %v8495_v33  ;;  %v8355_v38 = vld [vmem:[%s16618_s24 + $0x880] sm:$0xff]  ;;  %11287 = vmatprep.subr.bf16.mxu0 %v13809_v37  ;;  %v13936_v56 = vcombine.low %v8491_v15, %v8495_v33 }
0x1130   : > { %v8359_v40 = vld [vmem:[%s16618_s24 + $0x8a0] sm:$0xff]  ;;  %11288 = vmatpush1.bf16.msra.mxu0 %v13808_v49 }
0x1131   : > { %v8483_v44 = vld [vmem:[%s16618_s24 + $0xc80] sm:$0xff]  ;;  %v13801_v46 = vcombine.high %v8355_v38, %v8359_v40  ;;  %11328 = vmatprep.subr.bf16.mxu1 %v13937_v6  ;;  %v13800_v25 = vcombine.low %v8355_v38, %v8359_v40 }
0x1132   : > { %v8487_v43 = vld [vmem:[%s16618_s24 + $0xca0] sm:$0xff]  ;;  %11329 = vmatpush1.bf16.msra.mxu1 %v13936_v56 }
0x1133   : > { %v13929_v52 = vcombine.high %v8483_v44, %v8487_v43  ;;  %v8347_v60 = vld [vmem:[%s16618_s24 + $0x840] sm:$0xff]  ;;  %11289 = vmatprep.subr.bf16.mxu0 %v13801_v46  ;;  %v13928_v47 = vcombine.low %v8483_v44, %v8487_v43 }
0x1134   : > { %v8351_v3 = vld [vmem:[%s16618_s24 + $0x860] sm:$0xff]  ;;  %11290 = vmatpush1.bf16.msra.mxu0 %v13800_v25 }
0x1135   : > { %v8475_v61 = vld [vmem:[%s16618_s24 + $0xc40] sm:$0xff]  ;;  %v13793_v51 = vcombine.high %v8347_v60, %v8351_v3  ;;  %11330 = vmatprep.subr.bf16.mxu1 %v13929_v52  ;;  %v13792_v57 = vcombine.low %v8347_v60, %v8351_v3 }
0x1136   : > { %v8479_v63 = vld [vmem:[%s16618_s24 + $0xc60] sm:$0xff]  ;;  %11331 = vmatpush1.bf16.msra.mxu1 %v13928_v47 }
0x1137   : > { %v13921_v53 = vcombine.high %v8475_v61, %v8479_v63  ;;  %v8339_v7 = vld [vmem:[%s16618_s24 + $0x800] sm:$0xff]  ;;  %11291 = vmatprep.subr.bf16.mxu0 %v13793_v51  ;;  %v13920_v50 = vcombine.low %v8475_v61, %v8479_v63 }
0x1138   : > { %v8343_v24 = vld [vmem:[%s16618_s24 + $0x820] sm:$0xff]  ;;  %11292 = vmatpush1.bf16.msra.mxu0 %v13792_v57 }
0x1139   : > { %v8467_v1 = vld [vmem:[%s16618_s24 + $0xc00] sm:$0xff]  ;;  %v13785_v54 = vcombine.high %v8339_v7, %v8343_v24  ;;  %11332 = vmatprep.subr.bf16.mxu1 %v13921_v53  ;;  %v13784_v8 = vcombine.low %v8339_v7, %v8343_v24 }
0x113a   : > { %v8471_v36 = vld [vmem:[%s16618_s24 + $0xc20] sm:$0xff]  ;;  %11333 = vmatpush1.bf16.msra.mxu1 %v13920_v50 }
0x113b   : > { %v13913_v55 = vcombine.high %v8467_v1, %v8471_v36  ;;  %v8459_v2 = vld [vmem:[%s16618_s24 + $0xbc0] sm:$0xff]  ;;  %11293 = vmatprep.subr.bf16.mxu0 %v13785_v54  ;;  %v13912_v45 = vcombine.low %v8467_v1, %v8471_v36 }
0x113c   : > { %v8463_v19 = vld [vmem:[%s16618_s24 + $0xbe0] sm:$0xff]  ;;  %11294 = vmatpush1.bf16.msra.mxu0 %v13784_v8 }
0x113d   : > { %v8587_v14 = vld [vmem:[%s16618_s24 + $0xfc0] sm:$0xff]  ;;  %v13905_v4 = vcombine.high %v8459_v2, %v8463_v19  ;;  %11334 = vmatprep.subr.bf16.mxu1 %v13913_v55  ;;  %v13904_v27 = vcombine.low %v8459_v2, %v8463_v19 }
0x113e   : > { %v8591_v5 = vld [vmem:[%s16618_s24 + $0xfe0] sm:$0xff]  ;;  %11335 = vmatpush1.bf16.msra.mxu1 %v13912_v45 }
0x113f   : > { %v14033_v16 = vcombine.high %v8587_v14, %v8591_v5  ;;  %v8451_v18 = vld [vmem:[%s16618_s24 + $0xb80] sm:$0xff]  ;;  %11295 = vmatprep.subr.bf16.mxu0 %v13905_v4  ;;  %v14032_v12 = vcombine.low %v8587_v14, %v8591_v5 }
0x1140   : > { %v8455_v23 = vld [vmem:[%s16618_s24 + $0xba0] sm:$0xff]  ;;  %11296 = vmatpush2.bf16.msra.mxu0 %v13904_v27 }
0x1141   : > { %v8579_v20 = vld [vmem:[%s16618_s24 + $0xf80] sm:$0xff]  ;;  %v13897_v28 = vcombine.high %v8451_v18, %v8455_v23  ;;  %11336 = vmatprep.subr.bf16.mxu1 %v14033_v16  ;;  %v13896_v33 = vcombine.low %v8451_v18, %v8455_v23 }
0x1142   : > { %v8583_v22 = vld [vmem:[%s16618_s24 + $0xfa0] sm:$0xff]  ;;  %11337 = vmatpush2.bf16.msra.mxu1 %v14032_v12  ;;  %v8061_v12 = vsub.s32 6, %v18570_v13 }
0x1143   : > { %v14025_v29 = vcombine.high %v8579_v20, %v8583_v22  ;;  %v8443_v30 = vld [vmem:[%s16618_s24 + $0xb40] sm:$0xff]  ;;  %11297 = vmatprep.subr.bf16.mxu0 %v13897_v28  ;;  %v14024_v34 = vcombine.low %v8579_v20, %v8583_v22  ;;  %v8053_v22 = vsub.s32 4, %v18570_v13 }
0x1144   : > { %v8447_v31 = vld [vmem:[%s16618_s24 + $0xb60] sm:$0xff]  ;;  %11298 = vmatpush2.bf16.msra.mxu0 %v13896_v33  ;;  %v8268_v33 = vld [vmem:[%s16618_s24 + $0x5c8] sm:$0xff] }
0x1145   : > { %v8571_v48 = vld [vmem:[%s16618_s24 + $0xf40] sm:$0xff]  ;;  %v13889_v35 = vcombine.high %v8443_v30, %v8447_v31  ;;  %11338 = vmatprep.subr.bf16.mxu1 %v14025_v29  ;;  %v13888_v43 = vcombine.low %v8443_v30, %v8447_v31  ;;  %v8140_v31 = vld [vmem:[%s16618_s24 + $0x1c8] sm:$0xff] }
0x1146   : > { %v8575_v15 = vld [vmem:[%s16618_s24 + $0xf60] sm:$0xff]  ;;  %11339 = vmatpush2.bf16.msra.mxu1 %v14024_v34  ;;  %v8272_v34 = vld [vmem:[%s16618_s24 + $0x5e8] sm:$0xff] }
0x1147   : > { %v14017_v37 = vcombine.high %v8571_v48, %v8575_v15  ;;  %v8435_v6 = vld [vmem:[%s16618_s24 + $0xb00] sm:$0xff]  ;;  %11299 = vmatprep.subr.bf16.mxu0 %v13889_v35  ;;  %v14016_v49 = vcombine.low %v8571_v48, %v8575_v15  ;;  %v8144_v48 = vld [vmem:[%s16618_s24 + $0x1e8] sm:$0xff]  ;;  %v8054_v15 = vrot.slane %v18584_v26, %v8053_v22 }
0x1148   : > { %v8439_v38 = vld [vmem:[%s16618_s24 + $0xb20] sm:$0xff]  ;;  %11300 = vmatpush2.bf16.msra.mxu0 %v13888_v43  ;;  %v8136_v43 = vld [vmem:[%s16618_s24 + $0x1a8] sm:$0xff] }
0x1149   : > { %v8563_v40 = vld [vmem:[%s16618_s24 + $0xf00] sm:$0xff]  ;;  %v13881_v56 = vcombine.high %v8435_v6, %v8439_v38  ;;  %11340 = vmatprep.subr.bf16.mxu1 %v14017_v37  ;;  %v13880_v63 = vcombine.low %v8435_v6, %v8439_v38  ;;  %v8062_v37 = vrot.slane %v18584_v26, %v8061_v12  ;;  %v13587_v38 = vcombine.high %v8140_v31, %v8144_v48 }
0x114a   : > { %v8567_v44 = vld [vmem:[%s16618_s24 + $0xf20] sm:$0xff]  ;;  %11341 = vmatpush2.bf16.msra.mxu1 %v14016_v49  ;;  %v18740_v49 = vpack.c.bf16 %v8054_v15, %v8054_v15  ;;  %v13586_v26 = vcombine.low %v8140_v31, %v8144_v48 }
0x114b   : > { %v14009_v46 = vcombine.high %v8563_v40, %v8567_v44  ;;  %v8427_v52 = vld [vmem:[%s16618_s24 + $0xac0] sm:$0xff]  ;;  %11301 = vmatprep.subr.bf16.mxu0 %v13881_v56  ;;  %v14008_v25 = vcombine.low %v8563_v40, %v8567_v44  ;;  %v13715_v40 = vcombine.high %v8268_v33, %v8272_v34  ;;  %v8132_v44 = vld [vmem:[%s16618_s24 + $0x188] sm:$0xff] }
0x114c   : > { %v8431_v60 = vld [vmem:[%s16618_s24 + $0xae0] sm:$0xff]  ;;  %11302 = vmatpush2.bf16.msra.mxu0 %v13880_v63  ;;  %v8260_v56 = vld [vmem:[%s16618_s24 + $0x588] sm:$0xff] }
0x114d   : > { %v8555_v3 = vld [vmem:[%s16618_s24 + $0xec0] sm:$0xff]  ;;  %v13873_v47 = vcombine.high %v8427_v52, %v8431_v60  ;;  %11342 = vmatprep.subr.bf16.mxu1 %v14009_v46  ;;  %v13872_v36 = vcombine.low %v8427_v52, %v8431_v60  ;;  %v8264_v46 = vld [vmem:[%s16618_s24 + $0x5a8] sm:$0xff]  ;;  %v18744_v52 = vpack.c.bf16 %v8062_v37, %v8062_v37  ;;  %v13714_v60 = vcombine.low %v8268_v33, %v8272_v34 }
0x114e   : > { %v8559_v61 = vld [vmem:[%s16618_s24 + $0xee0] sm:$0xff]  ;;  %11343 = vmatpush2.bf16.msra.mxu1 %v14008_v25  ;;  %v8124_v63 = vld [vmem:[%s16618_s24 + $0x148] sm:$0xff] }
0x114f   : > { %v14001_v51 = vcombine.high %v8555_v3, %v8559_v61  ;;  %v8419_v53 = vld [vmem:[%s16618_s24 + $0xa80] sm:$0xff]  ;;  %11303 = vmatprep.subr.bf16.mxu0 %v13873_v47  ;;  %v14000_v57 = vcombine.low %v8555_v3, %v8559_v61  ;;  %v13579_v3 = vcombine.high %v8132_v44, %v8136_v43  ;;  %v13707_v61 = vcombine.high %v8260_v56, %v8264_v46  ;;  %v8128_v25 = vld [vmem:[%s16618_s24 + $0x168] sm:$0xff] }
0x1150   : > { %v8423_v7 = vld [vmem:[%s16618_s24 + $0xaa0] sm:$0xff]  ;;  %11304 = vmatpush2.bf16.msra.mxu0 %v13872_v36  ;;  %v8252_v47 = vld [vmem:[%s16618_s24 + $0x548] sm:$0xff] }
0x1151   : > { %v8547_v24 = vld [vmem:[%s16618_s24 + $0xe80] sm:$0xff]  ;;  %v13865_v50 = vcombine.high %v8419_v53, %v8423_v7  ;;  %11344 = vmatprep.subr.bf16.mxu1 %v14001_v51  ;;  %v13864_v5 = vcombine.low %v8419_v53, %v8423_v7  ;;  %v8256_v51 = vld [vmem:[%s16618_s24 + $0x568] sm:$0xff]  ;;  %v13578_v53 = vcombine.low %v8132_v44, %v8136_v43  ;;  %v13706_v7 = vcombine.low %v8260_v56, %v8264_v46 }
0x1152   : > { %v8551_v1 = vld [vmem:[%s16618_s24 + $0xea0] sm:$0xff]  ;;  %11345 = vmatpush2.bf16.msra.mxu1 %v14000_v57  ;;  %v8116_v36 = vld [vmem:[%s16618_s24 + $0x108] sm:$0xff] }
0x1153   : > { %v13993_v54 = vcombine.high %v8547_v24, %v8551_v1  ;;  %v8411_v55 = vld [vmem:[%s16618_s24 + $0xa40] sm:$0xff]  ;;  %11305 = vmatprep.subr.bf16.mxu0 %v13865_v50  ;;  %v13992_v8 = vcombine.low %v8547_v24, %v8551_v1  ;;  %v13571_v24 = vcombine.high %v8124_v63, %v8128_v25  ;;  %v13699_v1 = vcombine.high %v8252_v47, %v8256_v51  ;;  %v8120_v57 = vld [vmem:[%s16618_s24 + $0x128] sm:$0xff] }
0x1154   : > { %v8415_v2 = vld [vmem:[%s16618_s24 + $0xa60] sm:$0xff]  ;;  %11306 = vmatpush2.bf16.msra.mxu0 %v13864_v5  ;;  %v8244_v50 = vld [vmem:[%s16618_s24 + $0x508] sm:$0xff] }
0x1155   : > { %v8539_v19 = vld [vmem:[%s16618_s24 + $0xe40] sm:$0xff]  ;;  %v13857_v45 = vcombine.high %v8411_v55, %v8415_v2  ;;  %11346 = vmatprep.subr.bf16.mxu1 %v13993_v54  ;;  %v13856_v27 = vcombine.low %v8411_v55, %v8415_v2  ;;  %v8248_v54 = vld [vmem:[%s16618_s24 + $0x528] sm:$0xff]  ;;  %v13570_v55 = vcombine.low %v8124_v63, %v8128_v25  ;;  %v13698_v2 = vcombine.low %v8252_v47, %v8256_v51 }
0x1156   : > { %v8543_v14 = vld [vmem:[%s16618_s24 + $0xe60] sm:$0xff]  ;;  %11347 = vmatpush2.bf16.msra.mxu1 %v13992_v8  ;;  %v8108_v5 = vld [vmem:[%s16618_s24 + $0xc8] sm:$0xff] }
0x1157   : > { %v13985_v4 = vcombine.high %v8539_v19, %v8543_v14  ;;  %v8403_v16 = vld [vmem:[%s16618_s24 + $0xa00] sm:$0xff]  ;;  %11307 = vmatprep.subr.bf16.mxu0 %v13857_v45  ;;  %v13984_v28 = vcombine.low %v8539_v19, %v8543_v14  ;;  %v13563_v19 = vcombine.high %v8116_v36, %v8120_v57  ;;  %v13691_v14 = vcombine.high %v8244_v50, %v8248_v54  ;;  %v8112_v8 = vld [vmem:[%s16618_s24 + $0xe8] sm:$0xff] }
0x1158   : > { %v8407_v18 = vld [vmem:[%s16618_s24 + $0xa20] sm:$0xff]  ;;  %11308 = vmatpush2.bf16.msra.mxu0 %v13856_v27  ;;  %v8236_v45 = vld [vmem:[%s16618_s24 + $0x4c8] sm:$0xff]  ;;  %v13554_v31 = vcombine.low %v8108_v5, %v8112_v8 }
0x1159   : > { %v8531_v23 = vld [vmem:[%s16618_s24 + $0xe00] sm:$0xff]  ;;  %v13849_v29 = vcombine.high %v8403_v16, %v8407_v18  ;;  %11348 = vmatprep.subr.bf16.mxu1 %v13985_v4  ;;  %v13848_v35 = vcombine.low %v8403_v16, %v8407_v18  ;;  %v8240_v4 = vld [vmem:[%s16618_s24 + $0x4e8] sm:$0xff]  ;;  %v13562_v16 = vcombine.low %v8116_v36, %v8120_v57  ;;  %v13690_v18 = vcombine.low %v8244_v50, %v8248_v54 }
0x115a   : > { %v8535_v20 = vld [vmem:[%s16618_s24 + $0xe20] sm:$0xff]  ;;  %11349 = vmatpush2.bf16.msra.mxu1 %v13984_v28  ;;  %v8100_v27 = vld [vmem:[%s16618_s24 + $0x88] sm:$0xff]  ;;  %v13682_v48 = vcombine.low %v8236_v45, %v8240_v4 }
0x115b   : > { %v13977_v30 = vcombine.high %v8531_v23, %v8535_v20  ;;  %11309 = vmatprep.subr.bf16.mxu0 %v13849_v29  ;;  %v13976_v6 = vcombine.low %v8531_v23, %v8535_v20  ;;  %v13555_v23 = vcombine.high %v8108_v5, %v8112_v8  ;;  %v13683_v20 = vcombine.high %v8236_v45, %v8240_v4  ;;  %v8104_v28 = vld [vmem:[%s16618_s24 + $0xa8] sm:$0xff] }
0x115c   : > { %11310 = vmatpush2.bf16.msra.mxu0 %v13848_v35  ;;  %v8228_v29 = vld [vmem:[%s16618_s24 + $0x488] sm:$0xff]  ;;  %v13547_v15 = vcombine.high %v8100_v27, %v8104_v28 }
0x115d   : > { %11350 = vmatprep.subr.bf16.mxu1 %v13977_v30  ;;  %11361 = vmatprep.subr.bf16.mxu0 %v13587_v38  ;;  %v8232_v30 = vld [vmem:[%s16618_s24 + $0x4a8] sm:$0xff]  ;;  %v13546_v38 = vcombine.low %v8100_v27, %v8104_v28 }
0x115e   : > { %11351 = vmatpush2.bf16.msra.mxu1 %v13976_v6  ;;  %v13675_v33 = vcombine.high %v8228_v29, %v8232_v30  ;;  %v8092_v34 = vld [vmem:[%s16618_s24 + $0x48] sm:$0xff] }
0x115f   : > { %11402 = vmatprep.subr.bf16.mxu1 %v13715_v40  ;;  %11312 = vmatmul.mubr.bf16.vlgmr.msra.gmra.mxu0 %v18740_v49  ;;  %v8096_v35 = vld [vmem:[%s16618_s24 + $0x68] sm:$0xff]  ;;  %v13674_v40 = vcombine.low %v8228_v29, %v8232_v30 }
0x1160   : > { %11362 = vmatpush1.bf16.msra.mxu0 %v13586_v26  ;;  %11393 = vmatprep.mubr.bf16.mxu0 %v18594_v32  ;;  %v8220_v37 = vld [vmem:[%s16618_s24 + $0x448] sm:$0xff]  ;;  %v13539_v44 = vcombine.high %v8092_v34, %v8096_v35 }
0x1161   : > { %11353 = vmatmul.mubr.bf16.vlgmr.msra.gmra.mxu1 %v18744_v52  ;;  %11363 = vmatprep.subr.bf16.mxu0 %v13579_v3  ;;  %v8224_v6 = vld [vmem:[%s16618_s24 + $0x468] sm:$0xff]  ;;  %v13538_v3 = vcombine.low %v8092_v34, %v8096_v35 }
0x1162   : > { %11403 = vmatpush1.bf16.msra.mxu1 %v13714_v60  ;;  %11434 = vmatprep.mubr.bf16.mxu1 %v18596_v21  ;;  %v13667_v43 = vcombine.high %v8220_v37, %v8224_v6  ;;  %v8084_v56 = vld [vmem:[%s16618_s24 + $0x8] sm:$0xff] }
0x1163   : > { %11404 = vmatprep.subr.bf16.mxu1 %v13707_v61  ;;  %v8088_v46 = vld [vmem:[%s16618_s24 + $0x28] sm:$0xff]  ;;  %v13666_v61 = vcombine.low %v8220_v37, %v8224_v6 }
0x1164   : > { %11364 = vmatpush1.bf16.msra.mxu0 %v13578_v53  ;;  %v8212_v26 = vld [vmem:[%s16618_s24 + $0x408] sm:$0xff]  ;;  %v13531_v63 = vcombine.high %v8084_v56, %v8088_v46 }
0x1165   : > { %11365 = vmatprep.subr.bf16.mxu0 %v13571_v24  ;;  %v8216_v60 = vld [vmem:[%s16618_s24 + $0x428] sm:$0xff]  ;;  %v13530_v24 = vcombine.low %v8084_v56, %v8088_v46 }
0x1166   : > { %11405 = vmatpush1.bf16.msra.mxu1 %v13706_v7  ;;  %v13659_v25 = vcombine.high %v8212_v26, %v8216_v60  ;;  %v8204_v47 = vld [vmem:[%s16618_s24 + $0x3c8] sm:$0xff] }
0x1167   : > { %11406 = vmatprep.subr.bf16.mxu1 %v13699_v1  ;;  %v8208_v51 = vld [vmem:[%s16618_s24 + $0x3e8] sm:$0xff]  ;;  %v13658_v1 = vcombine.low %v8212_v26, %v8216_v60 }
0x1168   : > { %11366 = vmatpush1.bf16.msra.mxu0 %v13570_v55  ;;  %v8332_v53 = vld [vmem:[%s16618_s24 + $0x7c8] sm:$0xff]  ;;  %v13651_v36 = vcombine.high %v8204_v47, %v8208_v51 }
0x1169   : > { %11367 = vmatprep.subr.bf16.mxu0 %v13563_v19  ;;  %v8336_v7 = vld [vmem:[%s16618_s24 + $0x7e8] sm:$0xff]  ;;  %v13650_v19 = vcombine.low %v8204_v47, %v8208_v51 }
0x116a   : > { %11407 = vmatpush1.bf16.msra.mxu1 %v13698_v2  ;;  %v13779_v57 = vcombine.high %v8332_v53, %v8336_v7  ;;  %v8196_v50 = vld [vmem:[%s16618_s24 + $0x388] sm:$0xff] }
0x116b   : > { %11408 = vmatprep.subr.bf16.mxu1 %v13691_v14  ;;  %v8200_v54 = vld [vmem:[%s16618_s24 + $0x3a8] sm:$0xff]  ;;  %v13778_v14 = vcombine.low %v8332_v53, %v8336_v7 }
0x116c   : > { %11368 = vmatpush1.bf16.msra.mxu0 %v13562_v16  ;;  %v8324_v55 = vld [vmem:[%s16618_s24 + $0x788] sm:$0xff]  ;;  %v13643_v5 = vcombine.high %v8196_v50, %v8200_v54 }
0x116d   : > { %11369 = vmatprep.subr.bf16.mxu0 %v13555_v23  ;;  %v8328_v2 = vld [vmem:[%s16618_s24 + $0x7a8] sm:$0xff]  ;;  %v13642_v23 = vcombine.low %v8196_v50, %v8200_v54 }
0x116e   : > { %11409 = vmatpush1.bf16.msra.mxu1 %v13690_v18  ;;  %v13771_v8 = vcombine.high %v8324_v55, %v8328_v2  ;;  %v8188_v45 = vld [vmem:[%s16618_s24 + $0x348] sm:$0xff] }
0x116f   : > { %11410 = vmatprep.subr.bf16.mxu1 %v13683_v20  ;;  %v8192_v4 = vld [vmem:[%s16618_s24 + $0x368] sm:$0xff]  ;;  %v13770_v20 = vcombine.low %v8324_v55, %v8328_v2 }
0x1170   : > { %11370 = vmatpush1.bf16.msra.mxu0 %v13554_v31  ;;  %v8316_v16 = vld [vmem:[%s16618_s24 + $0x748] sm:$0xff]  ;;  %v13635_v27 = vcombine.high %v8188_v45, %v8192_v4 }
0x1171   : > { %11371 = vmatprep.subr.bf16.mxu0 %v13547_v15  ;;  %v8320_v18 = vld [vmem:[%s16618_s24 + $0x768] sm:$0xff]  ;;  %v13634_v15 = vcombine.low %v8188_v45, %v8192_v4 }
0x1172   : > { %11411 = vmatpush1.bf16.msra.mxu1 %v13682_v48  ;;  %v13763_v28 = vcombine.high %v8316_v16, %v8320_v18  ;;  %v8180_v29 = vld [vmem:[%s16618_s24 + $0x308] sm:$0xff] }
0x1173   : > { %11412 = vmatprep.subr.bf16.mxu1 %v13675_v33  ;;  %v8184_v30 = vld [vmem:[%s16618_s24 + $0x328] sm:$0xff]  ;;  %v13762_v33 = vcombine.low %v8316_v16, %v8320_v18 }
0x1174   : > { %11372 = vmatpush1.bf16.msra.mxu0 %v13546_v38  ;;  %v8308_v31 = vld [vmem:[%s16618_s24 + $0x708] sm:$0xff]  ;;  %v13627_v34 = vcombine.high %v8180_v29, %v8184_v30 }
0x1175   : > { %11373 = vmatprep.subr.bf16.mxu0 %v13539_v44  ;;  %v8312_v48 = vld [vmem:[%s16618_s24 + $0x728] sm:$0xff]  ;;  %v13626_v44 = vcombine.low %v8180_v29, %v8184_v30 }
0x1176   : > { %11413 = vmatpush1.bf16.msra.mxu1 %v13674_v40  ;;  %v13755_v35 = vcombine.high %v8308_v31, %v8312_v48  ;;  %v8172_v37 = vld [vmem:[%s16618_s24 + $0x2c8] sm:$0xff] }
0x1177   : > { %11414 = vmatprep.subr.bf16.mxu1 %v13667_v43  ;;  %v8176_v6 = vld [vmem:[%s16618_s24 + $0x2e8] sm:$0xff]  ;;  %v13754_v43 = vcombine.low %v8308_v31, %v8312_v48 }
0x1178   : > { %11374 = vmatpush1.bf16.msra.mxu0 %v13538_v3  ;;  %v8300_v38 = vld [vmem:[%s16618_s24 + $0x6c8] sm:$0xff]  ;;  %v13619_v56 = vcombine.high %v8172_v37, %v8176_v6 }
0x1179   : > { %11375 = vmatprep.subr.bf16.mxu0 %v13531_v63  ;;  %v8304_v40 = vld [vmem:[%s16618_s24 + $0x6e8] sm:$0xff]  ;;  %v13618_v63 = vcombine.low %v8172_v37, %v8176_v6 }
0x117a   : > { %11415 = vmatpush1.bf16.msra.mxu1 %v13666_v61  ;;  %v13747_v46 = vcombine.high %v8300_v38, %v8304_v40  ;;  %v8164_v26 = vld [vmem:[%s16618_s24 + $0x288] sm:$0xff] }
0x117b   : > { %11416 = vmatprep.subr.bf16.mxu1 %v13659_v25  ;;  %v8168_v60 = vld [vmem:[%s16618_s24 + $0x2a8] sm:$0xff]  ;;  %v13746_v25 = vcombine.low %v8300_v38, %v8304_v40 }
0x117c   : > { %11376 = vmatpush1.bf16.msra.mxu0 %v13530_v24  ;;  %v8292_v3 = vld [vmem:[%s16618_s24 + $0x688] sm:$0xff]  ;;  %v13611_v47 = vcombine.high %v8164_v26, %v8168_v60 }
0x117d   : > { %11377 = vmatprep.subr.bf16.mxu0 %v13651_v36  ;;  %v8296_v61 = vld [vmem:[%s16618_s24 + $0x6a8] sm:$0xff]  ;;  %v13610_v36 = vcombine.low %v8164_v26, %v8168_v60 }
0x117e   : > { %11417 = vmatpush1.bf16.msra.mxu1 %v13658_v1  ;;  %v13739_v51 = vcombine.high %v8292_v3, %v8296_v61  ;;  %v8156_v53 = vld [vmem:[%s16618_s24 + $0x248] sm:$0xff] }
0x117f   : > { %11418 = vmatprep.subr.bf16.mxu1 %v13779_v57  ;;  %v8160_v7 = vld [vmem:[%s16618_s24 + $0x268] sm:$0xff]  ;;  %v13738_v57 = vcombine.low %v8292_v3, %v8296_v61 }
0x1180   : > { %11378 = vmatpush2.bf16.msra.mxu0 %v13650_v19  ;;  %v8284_v24 = vld [vmem:[%s16618_s24 + $0x648] sm:$0xff]  ;;  %v13603_v50 = vcombine.high %v8156_v53, %v8160_v7 }
0x1181   : > { %11379 = vmatprep.subr.bf16.mxu0 %v13643_v5  ;;  %v8288_v1 = vld [vmem:[%s16618_s24 + $0x668] sm:$0xff]  ;;  %v13602_v5 = vcombine.low %v8156_v53, %v8160_v7 }
0x1182   : > { %11419 = vmatpush2.bf16.msra.mxu1 %v13778_v14  ;;  %v13731_v54 = vcombine.high %v8284_v24, %v8288_v1  ;;  %v8148_v55 = vld [vmem:[%s16618_s24 + $0x208] sm:$0xff] }
0x1183   : > { %11420 = vmatprep.subr.bf16.mxu1 %v13771_v8  ;;  %v8152_v2 = vld [vmem:[%s16618_s24 + $0x228] sm:$0xff]  ;;  %v13730_v8 = vcombine.low %v8284_v24, %v8288_v1 }
0x1184   : > { %11380 = vmatpush2.bf16.msra.mxu0 %v13642_v23  ;;  %v8276_v19 = vld [vmem:[%s16618_s24 + $0x608] sm:$0xff]  ;;  %v13595_v45 = vcombine.high %v8148_v55, %v8152_v2 }
0x1185   : > { %11381 = vmatprep.subr.bf16.mxu0 %v13635_v27  ;;  %v8280_v14 = vld [vmem:[%s16618_s24 + $0x628] sm:$0xff]  ;;  %v13594_v27 = vcombine.low %v8148_v55, %v8152_v2 }
0x1186   : > { %11421 = vmatpush2.bf16.msra.mxu1 %v13770_v20  ;;  %v13723_v4 = vcombine.high %v8276_v19, %v8280_v14  ;;  %v8396_v16 = vld [vmem:[%s16618_s24 + $0x9c8] sm:$0xff] }
0x1187   : > { %11422 = vmatprep.subr.bf16.mxu1 %v13763_v28  ;;  %v8400_v18 = vld [vmem:[%s16618_s24 + $0x9e8] sm:$0xff]  ;;  %v13722_v28 = vcombine.low %v8276_v19, %v8280_v14 }
0x1188   : > { %11382 = vmatpush2.bf16.msra.mxu0 %v13634_v15  ;;  %v8524_v23 = vld [vmem:[%s16618_s24 + $0xdc8] sm:$0xff]  ;;  %v13843_v29 = vcombine.high %v8396_v16, %v8400_v18 }
0x1189   : > { %11383 = vmatprep.subr.bf16.mxu0 %v13627_v34  ;;  %v8528_v20 = vld [vmem:[%s16618_s24 + $0xde8] sm:$0xff]  ;;  %v13842_v34 = vcombine.low %v8396_v16, %v8400_v18 }
0x118a   : > { %11423 = vmatpush2.bf16.msra.mxu1 %v13762_v33  ;;  %v13971_v30 = vcombine.high %v8524_v23, %v8528_v20  ;;  %v8388_v31 = vld [vmem:[%s16618_s24 + $0x988] sm:$0xff] }
0x118b   : > { %11424 = vmatprep.subr.bf16.mxu1 %v13755_v35  ;;  %v8392_v48 = vld [vmem:[%s16618_s24 + $0x9a8] sm:$0xff]  ;;  %v13970_v35 = vcombine.low %v8524_v23, %v8528_v20 }
0x118c   : > { %11384 = vmatpush2.bf16.msra.mxu0 %v13626_v44  ;;  %v8516_v15 = vld [vmem:[%s16618_s24 + $0xd88] sm:$0xff]  ;;  %v13835_v37 = vcombine.high %v8388_v31, %v8392_v48 }
0x118d   : > { %11385 = vmatprep.subr.bf16.mxu0 %v13619_v56  ;;  %v8520_v33 = vld [vmem:[%s16618_s24 + $0xda8] sm:$0xff]  ;;  %v13834_v56 = vcombine.low %v8388_v31, %v8392_v48 }
0x118e   : > { %11425 = vmatpush2.bf16.msra.mxu1 %v13754_v43  ;;  %v13963_v6 = vcombine.high %v8516_v15, %v8520_v33  ;;  %v8380_v38 = vld [vmem:[%s16618_s24 + $0x948] sm:$0xff] }
0x118f   : > { %11426 = vmatprep.subr.bf16.mxu1 %v13747_v46  ;;  %v8384_v40 = vld [vmem:[%s16618_s24 + $0x968] sm:$0xff]  ;;  %v13962_v46 = vcombine.low %v8516_v15, %v8520_v33 }
0x1190   : > { %11386 = vmatpush2.bf16.msra.mxu0 %v13618_v63  ;;  %v8508_v44 = vld [vmem:[%s16618_s24 + $0xd48] sm:$0xff]  ;;  %v13827_v26 = vcombine.high %v8380_v38, %v8384_v40 }
0x1191   : > { %11387 = vmatprep.subr.bf16.mxu0 %v13611_v47  ;;  %v8512_v43 = vld [vmem:[%s16618_s24 + $0xd68] sm:$0xff]  ;;  %v13826_v47 = vcombine.low %v8380_v38, %v8384_v40 }
0x1192   : > { %11427 = vmatpush2.bf16.msra.mxu1 %v13746_v25  ;;  %v13955_v60 = vcombine.high %v8508_v44, %v8512_v43  ;;  %v8372_v3 = vld [vmem:[%s16618_s24 + $0x908] sm:$0xff] }
0x1193   : > { %11428 = vmatprep.subr.bf16.mxu1 %v13739_v51  ;;  %v8376_v61 = vld [vmem:[%s16618_s24 + $0x928] sm:$0xff]  ;;  %v13954_v51 = vcombine.low %v8508_v44, %v8512_v43 }
0x1194   : > { %11388 = vmatpush2.bf16.msra.mxu0 %v13610_v36  ;;  %v8500_v63 = vld [vmem:[%s16618_s24 + $0xd08] sm:$0xff]  ;;  %v13819_v53 = vcombine.high %v8372_v3, %v8376_v61 }
0x1195   : > { %11389 = vmatprep.subr.bf16.mxu0 %v13603_v50  ;;  %v8504_v25 = vld [vmem:[%s16618_s24 + $0xd28] sm:$0xff]  ;;  %v13818_v50 = vcombine.low %v8372_v3, %v8376_v61 }
0x1196   : > { %11429 = vmatpush2.bf16.msra.mxu1 %v13738_v57  ;;  %v13947_v7 = vcombine.high %v8500_v63, %v8504_v25  ;;  %v8364_v24 = vld [vmem:[%s16618_s24 + $0x8c8] sm:$0xff] }
0x1197   : > { %11430 = vmatprep.subr.bf16.mxu1 %v13731_v54  ;;  %v8368_v1 = vld [vmem:[%s16618_s24 + $0x8e8] sm:$0xff]  ;;  %v13946_v54 = vcombine.low %v8500_v63, %v8504_v25 }
0x1198   : > { %11390 = vmatpush2.bf16.msra.mxu0 %v13602_v5  ;;  %v8492_v36 = vld [vmem:[%s16618_s24 + $0xcc8] sm:$0xff]  ;;  %v13811_v55 = vcombine.high %v8364_v24, %v8368_v1 }
0x1199   : > { %11391 = vmatprep.subr.bf16.mxu0 %v13595_v45  ;;  %v8496_v57 = vld [vmem:[%s16618_s24 + $0xce8] sm:$0xff]  ;;  %v13810_v45 = vcombine.low %v8364_v24, %v8368_v1 }
0x119a   : > { %11431 = vmatpush2.bf16.msra.mxu1 %v13730_v8  ;;  %v13939_v2 = vcombine.high %v8492_v36, %v8496_v57  ;;  %v8356_v19 = vld [vmem:[%s16618_s24 + $0x888] sm:$0xff] }
0x119b   : > { %11432 = vmatprep.subr.bf16.mxu1 %v13723_v4  ;;  %v8360_v14 = vld [vmem:[%s16618_s24 + $0x8a8] sm:$0xff]  ;;  %v13938_v4 = vcombine.low %v8492_v36, %v8496_v57 }
0x119c   : > { %11392 = vmatpush2.bf16.msra.mxu0 %v13594_v27  ;;  %v8484_v5 = vld [vmem:[%s16618_s24 + $0xc88] sm:$0xff]  ;;  %v13803_v16 = vcombine.high %v8356_v19, %v8360_v14 }
0x119d   : > { %11443 = vmatprep.subr.bf16.mxu0 %v13843_v29  ;;  %v8488_v8 = vld [vmem:[%s16618_s24 + $0xca8] sm:$0xff]  ;;  %v13802_v29 = vcombine.low %v8356_v19, %v8360_v14 }
0x119e   : > { %11433 = vmatpush2.bf16.msra.mxu1 %v13722_v28  ;;  %v13931_v18 = vcombine.high %v8484_v5, %v8488_v8  ;;  %v8348_v23 = vld [vmem:[%s16618_s24 + $0x848] sm:$0xff] }
0x119f   : > { %11484 = vmatprep.subr.bf16.mxu1 %v13971_v30  ;;  %11394 = vmatmul.mubr.bf16.vlgmr.msra.gmra.mxu0 %v18653_v0  ;;  %v8352_v20 = vld [vmem:[%s16618_s24 + $0x868] sm:$0xff]  ;;  %v13930_v30 = vcombine.low %v8484_v5, %v8488_v8 }
0x11a0   : > { %11444 = vmatpush1.bf16.msra.mxu0 %v13842_v34  ;;  %11475 = vmatprep.mubr.bf16.mxu0 %v18664_v59  ;;  %v8476_v27 = vld [vmem:[%s16618_s24 + $0xc48] sm:$0xff]  ;;  %v13795_v31 = vcombine.high %v8348_v23, %v8352_v20 }
0x11a1   : > { %11435 = vmatmul.mubr.bf16.vlgmr.msra.gmra.mxu1 %v18660_v62  ;;  %11445 = vmatprep.subr.bf16.mxu0 %v13835_v37  ;;  %v8480_v28 = vld [vmem:[%s16618_s24 + $0xc68] sm:$0xff]  ;;  %v13794_v37 = vcombine.low %v8348_v23, %v8352_v20 }
0x11a2   : > { %11485 = vmatpush1.bf16.msra.mxu1 %v13970_v35  ;;  %11516 = vmatprep.mubr.bf16.mxu1 %v18669_v9  ;;  %v13923_v48 = vcombine.high %v8476_v27, %v8480_v28  ;;  %v8340_v15 = vld [vmem:[%s16618_s24 + $0x808] sm:$0xff] }
0x11a3   : > { %11486 = vmatprep.subr.bf16.mxu1 %v13963_v6  ;;  %v8344_v33 = vld [vmem:[%s16618_s24 + $0x828] sm:$0xff]  ;;  %v13922_v6 = vcombine.low %v8476_v27, %v8480_v28 }
0x11a4   : > { %11446 = vmatpush1.bf16.msra.mxu0 %v13834_v56  ;;  %v8468_v34 = vld [vmem:[%s16618_s24 + $0xc08] sm:$0xff]  ;;  %v13787_v38 = vcombine.high %v8340_v15, %v8344_v33 }
0x11a5   : > { %11447 = vmatprep.subr.bf16.mxu0 %v13827_v26  ;;  %v8472_v35 = vld [vmem:[%s16618_s24 + $0xc28] sm:$0xff]  ;;  %v13786_v26 = vcombine.low %v8340_v15, %v8344_v33 }
0x11a6   : > { %11487 = vmatpush1.bf16.msra.mxu1 %v13962_v46  ;;  %v13915_v40 = vcombine.high %v8468_v34, %v8472_v35  ;;  %v8460_v44 = vld [vmem:[%s16618_s24 + $0xbc8] sm:$0xff] }
0x11a7   : > { %11488 = vmatprep.subr.bf16.mxu1 %v13955_v60  ;;  %v8464_v43 = vld [vmem:[%s16618_s24 + $0xbe8] sm:$0xff]  ;;  %v13914_v60 = vcombine.low %v8468_v34, %v8472_v35 }
0x11a8   : > { %11448 = vmatpush1.bf16.msra.mxu0 %v13826_v47  ;;  %v8588_v56 = vld [vmem:[%s16618_s24 + $0xfc8] sm:$0xff]  ;;  %v13907_v3 = vcombine.high %v8460_v44, %v8464_v43 }
0x11a9   : > { %11449 = vmatprep.subr.bf16.mxu0 %v13819_v53  ;;  %v8592_v46 = vld [vmem:[%s16618_s24 + $0xfe8] sm:$0xff]  ;;  %v13906_v53 = vcombine.low %v8460_v44, %v8464_v43 }
0x11aa   : > { %11489 = vmatpush1.bf16.msra.mxu1 %v13954_v51  ;;  %v14035_v61 = vcombine.high %v8588_v56, %v8592_v46  ;;  %v8452_v63 = vld [vmem:[%s16618_s24 + $0xb88] sm:$0xff] }
0x11ab   : > { %11490 = vmatprep.subr.bf16.mxu1 %v13947_v7  ;;  %v8456_v25 = vld [vmem:[%s16618_s24 + $0xba8] sm:$0xff]  ;;  %v14034_v7 = vcombine.low %v8588_v56, %v8592_v46 }
0x11ac   : > { %11450 = vmatpush1.bf16.msra.mxu0 %v13818_v50  ;;  %v8580_v47 = vld [vmem:[%s16618_s24 + $0xf88] sm:$0xff]  ;;  %v13899_v24 = vcombine.high %v8452_v63, %v8456_v25 }
0x11ad   : > { %11451 = vmatprep.subr.bf16.mxu0 %v13811_v55  ;;  %v8584_v51 = vld [vmem:[%s16618_s24 + $0xfa8] sm:$0xff]  ;;  %v13898_v55 = vcombine.low %v8452_v63, %v8456_v25 }
0x11ae   : > { %11491 = vmatpush1.bf16.msra.mxu1 %v13946_v54  ;;  %v14027_v1 = vcombine.high %v8580_v47, %v8584_v51  ;;  %v8444_v36 = vld [vmem:[%s16618_s24 + $0xb48] sm:$0xff] }
0x11af   : > { %11492 = vmatprep.subr.bf16.mxu1 %v13939_v2  ;;  %v8448_v57 = vld [vmem:[%s16618_s24 + $0xb68] sm:$0xff]  ;;  %v14026_v2 = vcombine.low %v8580_v47, %v8584_v51 }
0x11b0   : > { %11452 = vmatpush1.bf16.msra.mxu0 %v13810_v45  ;;  %v8572_v50 = vld [vmem:[%s16618_s24 + $0xf48] sm:$0xff]  ;;  %v13891_v19 = vcombine.high %v8444_v36, %v8448_v57 }
0x11b1   : > { %11453 = vmatprep.subr.bf16.mxu0 %v13803_v16  ;;  %v8576_v54 = vld [vmem:[%s16618_s24 + $0xf68] sm:$0xff]  ;;  %v13890_v16 = vcombine.low %v8444_v36, %v8448_v57 }
0x11b2   : > { %11493 = vmatpush1.bf16.msra.mxu1 %v13938_v4  ;;  %v14019_v14 = vcombine.high %v8572_v50, %v8576_v54  ;;  %v8436_v5 = vld [vmem:[%s16618_s24 + $0xb08] sm:$0xff] }
0x11b3   : > { %11494 = vmatprep.subr.bf16.mxu1 %v13931_v18  ;;  %v8440_v8 = vld [vmem:[%s16618_s24 + $0xb28] sm:$0xff]  ;;  %v14018_v18 = vcombine.low %v8572_v50, %v8576_v54  ;;  %v8141_v50 = vld [vmem:[%s16618_s24 + $0x1d0] sm:$0xff] }
0x11b4   : > { %11454 = vmatpush1.bf16.msra.mxu0 %v13802_v29  ;;  %v8564_v45 = vld [vmem:[%s16618_s24 + $0xf08] sm:$0xff]  ;;  %v13883_v23 = vcombine.high %v8436_v5, %v8440_v8  ;;  %v8145_v54 = vld [vmem:[%s16618_s24 + $0x1f0] sm:$0xff] }
0x11b5   : > { %11455 = vmatprep.subr.bf16.mxu0 %v13795_v31  ;;  %v8568_v4 = vld [vmem:[%s16618_s24 + $0xf28] sm:$0xff]  ;;  %v13882_v31 = vcombine.low %v8436_v5, %v8440_v8  ;;  %v18879_v5 = vld [vmem:[%s16616_s13] sm:$0xff]  ;;  %v13589_v8 = vcombine.high %v8141_v50, %v8145_v54 }
0x11b6   : > { %11495 = vmatpush1.bf16.msra.mxu1 %v13930_v30  ;;  %v14011_v20 = vcombine.high %v8564_v45, %v8568_v4  ;;  %v8428_v27 = vld [vmem:[%s16618_s24 + $0xac8] sm:$0xff] }
0x11b7   : > { %11496 = vmatprep.subr.bf16.mxu1 %v13923_v48  ;;  %v8432_v28 = vld [vmem:[%s16618_s24 + $0xae8] sm:$0xff]  ;;  %v14010_v48 = vcombine.low %v8564_v45, %v8568_v4  ;;  %v8133_v4 = vld [vmem:[%s16618_s24 + $0x190] sm:$0xff] }
0x11b8   : > { %11456 = vmatpush1.bf16.msra.mxu0 %v13794_v37  ;;  %v8556_v29 = vld [vmem:[%s16618_s24 + $0xec8] sm:$0xff]  ;;  %v13875_v15 = vcombine.high %v8428_v27, %v8432_v28 }
0x11b9   : > { %11457 = vmatprep.subr.bf16.mxu0 %v13787_v38  ;;  %v8560_v30 = vld [vmem:[%s16618_s24 + $0xee8] sm:$0xff]  ;;  %v13874_v38 = vcombine.low %v8428_v27, %v8432_v28  ;;  %v13588_v27 = vcombine.low %v8141_v50, %v8145_v54  ;;  %v8109_v54 = vld [vmem:[%s16618_s24 + $0xd0] sm:$0xff] }
0x11ba   : > { %11497 = vmatpush1.bf16.msra.mxu1 %v13922_v6  ;;  %v14003_v33 = vcombine.high %v8556_v29, %v8560_v30  ;;  %v8420_v34 = vld [vmem:[%s16618_s24 + $0xa88] sm:$0xff] }
0x11bb   : > { %11498 = vmatprep.subr.bf16.mxu1 %v13915_v40  ;;  %v8424_v35 = vld [vmem:[%s16618_s24 + $0xaa8] sm:$0xff]  ;;  %v14002_v40 = vcombine.low %v8556_v29, %v8560_v30  ;;  %v11164_v30 = vrot.slane %v18879_v5, %v18577_v10 }
0x11bc   : > { %11458 = vmatpush1.bf16.msra.mxu0 %v13786_v26  ;;  %v8548_v37 = vld [vmem:[%s16618_s24 + $0xe88] sm:$0xff]  ;;  %v13867_v44 = vcombine.high %v8420_v34, %v8424_v35 }
0x11bd   : > { %11459 = vmatprep.subr.bf16.mxu0 %v13907_v3  ;;  %v8552_v6 = vld [vmem:[%s16618_s24 + $0xea8] sm:$0xff]  ;;  %v13866_v3 = vcombine.low %v8420_v34, %v8424_v35  ;;  %v8253_v34 = vld [vmem:[%s16618_s24 + $0x550] sm:$0xff] }
0x11be   : > { %11499 = vmatpush1.bf16.msra.mxu1 %v13914_v60  ;;  %v13995_v43 = vcombine.high %v8548_v37, %v8552_v6  ;;  %v8412_v56 = vld [vmem:[%s16618_s24 + $0xa48] sm:$0xff]  ;;  %v8257_v35 = vld [vmem:[%s16618_s24 + $0x570] sm:$0xff] }
0x11bf   : > { %11500 = vmatprep.subr.bf16.mxu1 %v14035_v61  ;;  %v8416_v46 = vld [vmem:[%s16618_s24 + $0xa68] sm:$0xff]  ;;  %v13994_v61 = vcombine.low %v8548_v37, %v8552_v6 }
0x11c0   : > { %11460 = vmatpush2.bf16.msra.mxu0 %v13906_v53  ;;  %v8540_v26 = vld [vmem:[%s16618_s24 + $0xe48] sm:$0xff]  ;;  %v13859_v63 = vcombine.high %v8412_v56, %v8416_v46 }
0x11c1   : > { %11461 = vmatprep.subr.bf16.mxu0 %v13899_v24  ;;  %v8544_v60 = vld [vmem:[%s16618_s24 + $0xe68] sm:$0xff]  ;;  %v13858_v24 = vcombine.low %v8412_v56, %v8416_v46 }
0x11c2   : > { %11501 = vmatpush2.bf16.msra.mxu1 %v14034_v7  ;;  %v13987_v25 = vcombine.high %v8540_v26, %v8544_v60  ;;  %v8404_v47 = vld [vmem:[%s16618_s24 + $0xa08] sm:$0xff] }
0x11c3   : > { %11502 = vmatprep.subr.bf16.mxu1 %v14027_v1  ;;  %v8408_v51 = vld [vmem:[%s16618_s24 + $0xa28] sm:$0xff]  ;;  %v13986_v1 = vcombine.low %v8540_v26, %v8544_v60  ;;  %v13701_v60 = vcombine.high %v8253_v34, %v8257_v35 }
0x11c4   : > { %11462 = vmatpush2.bf16.msra.mxu0 %v13898_v55  ;;  %v8532_v53 = vld [vmem:[%s16618_s24 + $0xe08] sm:$0xff]  ;;  %v13851_v36 = vcombine.high %v8404_v47, %v8408_v51  ;;  %v8269_v55 = vld [vmem:[%s16618_s24 + $0x5d0] sm:$0xff] }
0x11c5   : > { %11463 = vmatprep.subr.bf16.mxu0 %v13891_v19  ;;  %v8536_v7 = vld [vmem:[%s16618_s24 + $0xe28] sm:$0xff]  ;;  %v13850_v19 = vcombine.low %v8404_v47, %v8408_v51  ;;  %v8249_v47 = vld [vmem:[%s16618_s24 + $0x530] sm:$0xff] }
0x11c6   : > { %11503 = vmatpush2.bf16.msra.mxu1 %v14026_v2  ;;  %v13979_v57 = vcombine.high %v8532_v53, %v8536_v7  ;;  %v8273_v2 = vld [vmem:[%s16618_s24 + $0x5f0] sm:$0xff] }
0x11c7   : > { %11504 = vmatprep.subr.bf16.mxu1 %v14019_v14  ;;  %v13978_v14 = vcombine.low %v8532_v53, %v8536_v7  ;;  %v13717_v45 = vcombine.high %v8269_v55, %v8273_v2  ;;  %v13716_v28 = vcombine.low %v8269_v55, %v8273_v2  ;;  %v8113_v55 = vld [vmem:[%s16618_s24 + $0xf0] sm:$0xff] }
0x11c8   : > { %11464 = vmatpush2.bf16.msra.mxu0 %v13890_v16  ;;  %v8137_v16 = vld [vmem:[%s16618_s24 + $0x1b0] sm:$0xff] }
0x11c9   : > { %11465 = vmatprep.subr.bf16.mxu0 %v13883_v23  ;;  %v8265_v23 = vld [vmem:[%s16618_s24 + $0x5b0] sm:$0xff]  ;;  %v13581_v29 = vcombine.high %v8133_v4, %v8137_v16 }
0x11ca   : > { %11505 = vmatpush2.bf16.msra.mxu1 %v14018_v18  ;;  %v8261_v18 = vld [vmem:[%s16618_s24 + $0x590] sm:$0xff] }
0x11cb   : > { %11506 = vmatprep.subr.bf16.mxu1 %v14011_v20  ;;  %v11160_v20 = vrot.slane %v18879_v5, %v18633_v39  ;;  %v8237_v2 = vld [vmem:[%s16618_s24 + $0x4d0] sm:$0xff] }
0x11cc   : > { %11466 = vmatpush2.bf16.msra.mxu0 %v13882_v31  ;;  %v13709_v31 = vcombine.high %v8261_v18, %v8265_v23 }
0x11cd   : > { %11467 = vmatprep.subr.bf16.mxu0 %v13875_v15  ;;  %v8129_v15 = vld [vmem:[%s16618_s24 + $0x170] sm:$0xff] }
0x11ce   : > { %11507 = vmatpush2.bf16.msra.mxu1 %v14010_v48  ;;  %v8125_v48 = vld [vmem:[%s16618_s24 + $0x150] sm:$0xff] }
0x11cf   : > { %11508 = vmatprep.subr.bf16.mxu1 %v14003_v33  ;;  %v13572_v7 = vcombine.low %v8125_v48, %v8129_v15 }
0x11d0   : > { %11468 = vmatpush2.bf16.msra.mxu0 %v13874_v38  ;;  %v13580_v38 = vcombine.low %v8133_v4, %v8137_v16  ;;  %v8101_v16 = vld [vmem:[%s16618_s24 + $0x90] sm:$0xff] }
0x11d1   : > { %11469 = vmatprep.subr.bf16.mxu0 %v13867_v44  ;;  %v13708_v44 = vcombine.low %v8261_v18, %v8265_v23  ;;  %v8105_v18 = vld [vmem:[%s16618_s24 + $0xb0] sm:$0xff] }
0x11d2   : > { %11509 = vmatpush2.bf16.msra.mxu1 %v14002_v40  ;;  %v8229_v23 = vld [vmem:[%s16618_s24 + $0x490] sm:$0xff] }
0x11d3   : > { %11510 = vmatprep.subr.bf16.mxu1 %v13995_v43  ;;  %v13573_v43 = vcombine.high %v8125_v48, %v8129_v15  ;;  %v8097_v48 = vld [vmem:[%s16618_s24 + $0x70] sm:$0xff] }
0x11d4   : > { %11470 = vmatpush2.bf16.msra.mxu0 %v13866_v3  ;;  %v8117_v3 = vld [vmem:[%s16618_s24 + $0x110] sm:$0xff] }
0x11d5   : > { %11471 = vmatprep.subr.bf16.mxu0 %v13859_v63  ;;  %v8221_v15 = vld [vmem:[%s16618_s24 + $0x450] sm:$0xff] }
0x11d6   : > { %11511 = vmatpush2.bf16.msra.mxu1 %v13994_v61  ;;  %v8121_v61 = vld [vmem:[%s16618_s24 + $0x130] sm:$0xff] }
0x11d7   : > { %11512 = vmatprep.subr.bf16.mxu1 %v13987_v25  ;;  %v8245_v25 = vld [vmem:[%s16618_s24 + $0x510] sm:$0xff] }
0x11d8   : > { %11472 = vmatpush2.bf16.msra.mxu0 %v13858_v24  ;;  %v13693_v50 = vcombine.high %v8245_v25, %v8249_v47 }
0x11d9   : > { %11473 = vmatprep.subr.bf16.mxu0 %v13851_v36  ;;  %v13565_v36 = vcombine.high %v8117_v3, %v8121_v61 }
0x11da   : > { %11513 = vmatpush2.bf16.msra.mxu1 %v13986_v1  ;;  %v13700_v1 = vcombine.low %v8253_v34, %v8257_v35  ;;  %v13548_v34 = vcombine.low %v8101_v16, %v8105_v18 }
0x11db   : > { %11514 = vmatprep.subr.bf16.mxu1 %v13979_v57 }
0x11dc   : > { %11474 = vmatpush2.bf16.msra.mxu0 %v13850_v19  ;;  %v8241_v19 = vld [vmem:[%s16618_s24 + $0x4f0] sm:$0xff] }
0x11dd   : > { %11525 = vmatprep.subr.bf16.mxu0 %v13589_v8  ;;  %v13692_v8 = vcombine.low %v8245_v25, %v8249_v47  ;;  %v13685_v4 = vcombine.high %v8237_v2, %v8241_v19  ;;  %v8333_v25 = vld [vmem:[%s16618_s24 + $0x7d0] sm:$0xff] }
0x11de   : > { %11515 = vmatpush2.bf16.msra.mxu1 %v13978_v14  ;;  %v13564_v14 = vcombine.low %v8117_v3, %v8121_v61  ;;  %v8205_v61 = vld [vmem:[%s16618_s24 + $0x3d0] sm:$0xff] }
0x11df   : > { %11566 = vmatprep.subr.bf16.mxu1 %v13717_v45  ;;  %v11231_v33 = vpop.f32.mrf.mxu0  ;;  %11476 = vmatmul.mubr.bf16.vlgmr.msra.gmra.mxu0 %v18740_v49  ;;  %v13557_v45 = vcombine.high %v8109_v54, %v8113_v55  ;;  %v8337_v47 = vld [vmem:[%s16618_s24 + $0x7f0] sm:$0xff] }
0x11e0   : > { %v11232_v37 = vadd.f32 %v11231_v33, %v11160_v20  ;;  %11526 = vmatpush1.bf16.msra.mxu0 %v13588_v27  ;;  %11557 = vmatprep.mubr.bf16.mxu0 %v18594_v32  ;;  %v8233_v20 = vld [vmem:[%s16618_s24 + $0x4b0] sm:$0xff]  ;;  %v13556_v27 = vcombine.low %v8109_v54, %v8113_v55 }
0x11e1   : > { %v11272_v6 = vpop.f32.mrf.mxu1  ;;  %11517 = vmatmul.mubr.bf16.vlgmr.msra.gmra.mxu1 %v18744_v52  ;;  %v11233_v40 = vpop.f32.mrf.mxu0  ;;  %11527 = vmatprep.subr.bf16.mxu0 %v13581_v29  ;;  %v13549_v29 = vcombine.high %v8101_v16, %v8105_v18  ;;  %v8225_v33 = vld [vmem:[%s16618_s24 + $0x470] sm:$0xff]  ;;  %v13676_v35 = vcombine.low %v8229_v23, %v8233_v20 }
0x11e2   : > { %11567 = vmatpush1.bf16.msra.mxu1 %v13716_v28  ;;  %v18895_v56 = vadd.f32 %v11272_v6, %v11232_v37  ;;  %v11234_v46 = vadd.f32 %v11233_v40, %v11164_v30  ;;  %11598 = vmatprep.mubr.bf16.mxu1 %v18596_v21  ;;  %v13684_v28 = vcombine.low %v8237_v2, %v8241_v19  ;;  %v8089_v40 = vld [vmem:[%s16618_s24 + $0x30] sm:$0xff] }
0x11e3   : > { %v11274_v26 = vpop.f32.mrf.mxu1  ;;  %11568 = vmatprep.subr.bf16.mxu1 %v13709_v31  ;;  %v11235_v63 = vpop.f32.mrf.mxu0  ;;  %v13677_v30 = vcombine.high %v8229_v23, %v8233_v20  ;;  %v8093_v31 = vld [vmem:[%s16618_s24 + $0x50] sm:$0xff]  ;;  %v13669_v6 = vcombine.high %v8221_v15, %v8225_v33  ;;  %v13780_v2 = vcombine.low %v8333_v25, %v8337_v47 }
0x11e4   : > { %v18903_v51 = vadd.f32 %v11274_v26, %v11234_v46  ;;  %11528 = vmatpush1.bf16.msra.mxu0 %v13580_v38  ;;  %v13541_v37 = vcombine.high %v8093_v31, %v8097_v48  ;;  %v8085_v38 = vld [vmem:[%s16618_s24 + $0x10] sm:$0xff]  ;;  %v13540_v46 = vcombine.low %v8093_v31, %v8097_v48  ;;  %v13668_v26 = vcombine.low %v8221_v15, %v8225_v33 }
0x11e5   : > { %v11276_v53 = vpop.f32.mrf.mxu1  ;;  %v11236_v24 = vpop.f32.mrf.mxu0  ;;  %11529 = vmatprep.subr.bf16.mxu0 %v13573_v43  ;;  %v8217_v43 = vld [vmem:[%s16618_s24 + $0x430] sm:$0xff] }
0x11e6   : > { %11569 = vmatpush1.bf16.msra.mxu1 %v13708_v44  ;;  %v8213_v44 = vld [vmem:[%s16618_s24 + $0x410] sm:$0xff]  ;;  %v13532_v53 = vcombine.low %v8085_v38, %v8089_v40 }
0x11e7   : > { %v11277_v57 = vpop.f32.mrf.mxu1  ;;  %11570 = vmatprep.subr.bf16.mxu1 %v13701_v60  ;;  %v13533_v60 = vcombine.high %v8085_v38, %v8089_v40  ;;  %v13661_v3 = vcombine.high %v8213_v44, %v8217_v43  ;;  %v8209_v63 = vld [vmem:[%s16618_s24 + $0x3f0] sm:$0xff] }
0x11e8   : > { %11530 = vmatpush1.bf16.msra.mxu0 %v13572_v7  ;;  %v13660_v7 = vcombine.low %v8213_v44, %v8217_v43  ;;  %v13653_v24 = vcombine.high %v8205_v61, %v8209_v63  ;;  %v8201_v57 = vld [vmem:[%s16618_s24 + $0x3b0] sm:$0xff]  ;;  %v13652_v55 = vcombine.low %v8205_v61, %v8209_v63 }
0x11e9   : > { %11531 = vmatprep.subr.bf16.mxu0 %v13565_v36  ;;  %v8197_v36 = vld [vmem:[%s16618_s24 + $0x390] sm:$0xff] }
0x11ea   : > { %11571 = vmatpush1.bf16.msra.mxu1 %v13700_v1  ;;  %v13781_v1 = vcombine.high %v8333_v25, %v8337_v47  ;;  %v8329_v54 = vld [vmem:[%s16618_s24 + $0x7b0] sm:$0xff]  ;;  %v13645_v19 = vcombine.high %v8197_v36, %v8201_v57  ;;  %v13644_v18 = vcombine.low %v8197_v36, %v8201_v57 }
0x11eb   : > { %11572 = vmatprep.subr.bf16.mxu1 %v13693_v50  ;;  %v8325_v50 = vld [vmem:[%s16618_s24 + $0x790] sm:$0xff] }
0x11ec   : > { %11532 = vmatpush1.bf16.msra.mxu0 %v13564_v14  ;;  %v13773_v14 = vcombine.high %v8325_v50, %v8329_v54  ;;  %v8321_v16 = vld [vmem:[%s16618_s24 + $0x770] sm:$0xff]  ;;  %v13772_v23 = vcombine.low %v8325_v50, %v8329_v54 }
0x11ed   : > { %11533 = vmatprep.subr.bf16.mxu0 %v13557_v45  ;;  %v8193_v45 = vld [vmem:[%s16618_s24 + $0x370] sm:$0xff] }
0x11ee   : > { %11573 = vmatpush1.bf16.msra.mxu1 %v13692_v8  ;;  %v8189_v8 = vld [vmem:[%s16618_s24 + $0x350] sm:$0xff] }
0x11ef   : > { %11574 = vmatprep.subr.bf16.mxu1 %v13685_v4  ;;  %v8317_v4 = vld [vmem:[%s16618_s24 + $0x750] sm:$0xff]  ;;  %v13637_v20 = vcombine.high %v8189_v8, %v8193_v45  ;;  %v13636_v48 = vcombine.low %v8189_v8, %v8193_v45 }
0x11f0   : > { %11534 = vmatpush1.bf16.msra.mxu0 %v13556_v27  ;;  %v13765_v27 = vcombine.high %v8317_v4, %v8321_v16  ;;  %v8313_v31 = vld [vmem:[%s16618_s24 + $0x730] sm:$0xff]  ;;  %v13764_v15 = vcombine.low %v8317_v4, %v8321_v16 }
0x11f1   : > { %11535 = vmatprep.subr.bf16.mxu0 %v13549_v29  ;;  %v8185_v29 = vld [vmem:[%s16618_s24 + $0x330] sm:$0xff] }
0x11f2   : > { %11575 = vmatpush1.bf16.msra.mxu1 %v13684_v28  ;;  %v8181_v28 = vld [vmem:[%s16618_s24 + $0x310] sm:$0xff] }
0x11f3   : > { %11576 = vmatprep.subr.bf16.mxu1 %v13677_v30  ;;  %v8309_v30 = vld [vmem:[%s16618_s24 + $0x710] sm:$0xff]  ;;  %v13629_v33 = vcombine.high %v8181_v28, %v8185_v29  ;;  %v13628_v40 = vcombine.low %v8181_v28, %v8185_v29 }
0x11f4   : > { %11536 = vmatpush1.bf16.msra.mxu0 %v13548_v34  ;;  %v13757_v34 = vcombine.high %v8309_v30, %v8313_v31  ;;  %v8305_v38 = vld [vmem:[%s16618_s24 + $0x6f0] sm:$0xff]  ;;  %v13756_v44 = vcombine.low %v8309_v30, %v8313_v31 }
0x11f5   : > { %11537 = vmatprep.subr.bf16.mxu0 %v13541_v37  ;;  %v8177_v37 = vld [vmem:[%s16618_s24 + $0x2f0] sm:$0xff] }
0x11f6   : > { %11577 = vmatpush1.bf16.msra.mxu1 %v13676_v35  ;;  %v8173_v35 = vld [vmem:[%s16618_s24 + $0x2d0] sm:$0xff] }
0x11f7   : > { %11578 = vmatprep.subr.bf16.mxu1 %v13669_v6  ;;  %v8301_v6 = vld [vmem:[%s16618_s24 + $0x6d0] sm:$0xff]  ;;  %v13621_v43 = vcombine.high %v8173_v35, %v8177_v37  ;;  %v13620_v63 = vcombine.low %v8173_v35, %v8177_v37 }
0x11f8   : > { %11538 = vmatpush1.bf16.msra.mxu0 %v13540_v46  ;;  %v13749_v46 = vcombine.high %v8301_v6, %v8305_v38  ;;  %v8297_v61 = vld [vmem:[%s16618_s24 + $0x6b0] sm:$0xff]  ;;  %v13748_v25 = vcombine.low %v8301_v6, %v8305_v38 }
0x11f9   : > { %11539 = vmatprep.subr.bf16.mxu0 %v13533_v60  ;;  %v8169_v60 = vld [vmem:[%s16618_s24 + $0x2b0] sm:$0xff] }
0x11fa   : > { %11579 = vmatpush1.bf16.msra.mxu1 %v13668_v26  ;;  %v8165_v26 = vld [vmem:[%s16618_s24 + $0x290] sm:$0xff] }
0x11fb   : > { %11580 = vmatprep.subr.bf16.mxu1 %v13661_v3  ;;  %v8293_v3 = vld [vmem:[%s16618_s24 + $0x690] sm:$0xff]  ;;  %v13613_v47 = vcombine.high %v8165_v26, %v8169_v60  ;;  %v13612_v57 = vcombine.low %v8165_v26, %v8169_v60 }
0x11fc   : > { %11540 = vmatpush1.bf16.msra.mxu0 %v13532_v53  ;;  %v13741_v53 = vcombine.high %v8293_v3, %v8297_v61  ;;  %v8289_v36 = vld [vmem:[%s16618_s24 + $0x670] sm:$0xff]  ;;  %v13740_v50 = vcombine.low %v8293_v3, %v8297_v61 }
0x11fd   : > { %11541 = vmatprep.subr.bf16.mxu0 %v13653_v24  ;;  %v8161_v24 = vld [vmem:[%s16618_s24 + $0x270] sm:$0xff] }
0x11fe   : > { %11581 = vmatpush1.bf16.msra.mxu1 %v13660_v7  ;;  %v8157_v7 = vld [vmem:[%s16618_s24 + $0x250] sm:$0xff] }
0x11ff   : > { %11582 = vmatprep.subr.bf16.mxu1 %v13781_v1  ;;  %v8285_v1 = vld [vmem:[%s16618_s24 + $0x650] sm:$0xff]  ;;  %v13605_v54 = vcombine.high %v8157_v7, %v8161_v24  ;;  %v13604_v45 = vcombine.low %v8157_v7, %v8161_v24 }
0x1200   : > { %11542 = vmatpush2.bf16.msra.mxu0 %v13652_v55  ;;  %v13733_v55 = vcombine.high %v8285_v1, %v8289_v36  ;;  %v8281_v8 = vld [vmem:[%s16618_s24 + $0x630] sm:$0xff]  ;;  %v13732_v4 = vcombine.low %v8285_v1, %v8289_v36 }
0x1201   : > { %11543 = vmatprep.subr.bf16.mxu0 %v13645_v19  ;;  %v8153_v19 = vld [vmem:[%s16618_s24 + $0x230] sm:$0xff] }
0x1202   : > { %11583 = vmatpush2.bf16.msra.mxu1 %v13780_v2  ;;  %v8149_v2 = vld [vmem:[%s16618_s24 + $0x210] sm:$0xff] }
0x1203   : > { %11584 = vmatprep.subr.bf16.mxu1 %v13773_v14  ;;  %v8277_v14 = vld [vmem:[%s16618_s24 + $0x610] sm:$0xff]  ;;  %v13597_v16 = vcombine.high %v8149_v2, %v8153_v19  ;;  %v13596_v29 = vcombine.low %v8149_v2, %v8153_v19 }
0x1204   : > { %11544 = vmatpush2.bf16.msra.mxu0 %v13644_v18  ;;  %v13725_v18 = vcombine.high %v8277_v14, %v8281_v8  ;;  %v8529_v28 = vld [vmem:[%s16618_s24 + $0xdf0] sm:$0xff]  ;;  %v13724_v30 = vcombine.low %v8277_v14, %v8281_v8 }
0x1205   : > { %11545 = vmatprep.subr.bf16.mxu0 %v13637_v20  ;;  %v8401_v20 = vld [vmem:[%s16618_s24 + $0x9f0] sm:$0xff] }
0x1206   : > { %11585 = vmatpush2.bf16.msra.mxu1 %v13772_v23  ;;  %v8397_v23 = vld [vmem:[%s16618_s24 + $0x9d0] sm:$0xff] }
0x1207   : > { %11586 = vmatprep.subr.bf16.mxu1 %v13765_v27  ;;  %v8525_v27 = vld [vmem:[%s16618_s24 + $0xdd0] sm:$0xff]  ;;  %v13845_v31 = vcombine.high %v8397_v23, %v8401_v20  ;;  %v13844_v37 = vcombine.low %v8397_v23, %v8401_v20 }
0x1208   : > { %11546 = vmatpush2.bf16.msra.mxu0 %v13636_v48  ;;  %v13973_v48 = vcombine.high %v8525_v27, %v8529_v28  ;;  %v8521_v35 = vld [vmem:[%s16618_s24 + $0xdb0] sm:$0xff]  ;;  %v13972_v6 = vcombine.low %v8525_v27, %v8529_v28 }
0x1209   : > { %11547 = vmatprep.subr.bf16.mxu0 %v13629_v33  ;;  %v8393_v33 = vld [vmem:[%s16618_s24 + $0x9b0] sm:$0xff] }
0x120a   : > { %11587 = vmatpush2.bf16.msra.mxu1 %v13764_v15  ;;  %v8389_v15 = vld [vmem:[%s16618_s24 + $0x990] sm:$0xff] }
0x120b   : > { %11588 = vmatprep.subr.bf16.mxu1 %v13757_v34  ;;  %v8517_v34 = vld [vmem:[%s16618_s24 + $0xd90] sm:$0xff]  ;;  %v13837_v38 = vcombine.high %v8389_v15, %v8393_v33 }
0x120c   : > { %11548 = vmatpush2.bf16.msra.mxu0 %v13628_v40  ;;  %v13965_v40 = vcombine.high %v8517_v34, %v8521_v35  ;;  %v8509_v26 = vld [vmem:[%s16618_s24 + $0xd50] sm:$0xff] }
0x120d   : > { %11549 = vmatprep.subr.bf16.mxu0 %v13621_v43  ;;  %v8385_v43 = vld [vmem:[%s16618_s24 + $0x970] sm:$0xff] }
0x120e   : > { %11589 = vmatpush2.bf16.msra.mxu1 %v13756_v44  ;;  %v8381_v44 = vld [vmem:[%s16618_s24 + $0x950] sm:$0xff] }
0x120f   : > { %11590 = vmatprep.subr.bf16.mxu1 %v13749_v46  ;;  %v8513_v60 = vld [vmem:[%s16618_s24 + $0xd70] sm:$0xff] }
0x1210   : > { %11550 = vmatpush2.bf16.msra.mxu0 %v13620_v63  ;;  %v13836_v63 = vcombine.low %v8389_v15, %v8393_v33  ;;  %v8373_v36 = vld [vmem:[%s16618_s24 + $0x910] sm:$0xff]  ;;  %v13956_v8 = vcombine.low %v8509_v26, %v8513_v60 }
0x1211   : > { %11551 = vmatprep.subr.bf16.mxu0 %v13613_v47  ;;  %v13964_v47 = vcombine.low %v8517_v34, %v8521_v35  ;;  %v8365_v23 = vld [vmem:[%s16618_s24 + $0x8d0] sm:$0xff] }
0x1212   : > { %11591 = vmatpush2.bf16.msra.mxu1 %v13748_v25  ;;  %v8369_v20 = vld [vmem:[%s16618_s24 + $0x8f0] sm:$0xff] }
0x1213   : > { %11592 = vmatprep.subr.bf16.mxu1 %v13741_v53  ;;  %v13829_v53 = vcombine.high %v8381_v44, %v8385_v43  ;;  %v8493_v27 = vld [vmem:[%s16618_s24 + $0xcd0] sm:$0xff] }
0x1214   : > { %11552 = vmatpush2.bf16.msra.mxu0 %v13612_v57  ;;  %v8377_v57 = vld [vmem:[%s16618_s24 + $0x930] sm:$0xff] }
0x1215   : > { %11553 = vmatprep.subr.bf16.mxu0 %v13605_v54  ;;  %v8501_v54 = vld [vmem:[%s16618_s24 + $0xd10] sm:$0xff] }
0x1216   : > { %11593 = vmatpush2.bf16.msra.mxu1 %v13740_v50  ;;  %v8497_v28 = vld [vmem:[%s16618_s24 + $0xcf0] sm:$0xff] }
0x1217   : > { %11594 = vmatprep.subr.bf16.mxu1 %v13733_v55  ;;  %v8505_v55 = vld [vmem:[%s16618_s24 + $0xd30] sm:$0xff] }
0x1218   : > { %11554 = vmatpush2.bf16.msra.mxu0 %v13604_v45  ;;  %v13821_v45 = vcombine.high %v8373_v36, %v8377_v57  ;;  %v8357_v15 = vld [vmem:[%s16618_s24 + $0x890] sm:$0xff] }
0x1219   : > { %11555 = vmatprep.subr.bf16.mxu0 %v13597_v16  ;;  %v8361_v33 = vld [vmem:[%s16618_s24 + $0x8b0] sm:$0xff] }
0x121a   : > { %11595 = vmatpush2.bf16.msra.mxu1 %v13732_v4  ;;  %v8485_v34 = vld [vmem:[%s16618_s24 + $0xc90] sm:$0xff] }
0x121b   : > { %11596 = vmatprep.subr.bf16.mxu1 %v13725_v18  ;;  %v13949_v18 = vcombine.high %v8501_v54, %v8505_v55  ;;  %v8489_v35 = vld [vmem:[%s16618_s24 + $0xcb0] sm:$0xff] }
0x121c   : > { %11556 = vmatpush2.bf16.msra.mxu0 %v13596_v29  ;;  %v13820_v29 = vcombine.low %v8373_v36, %v8377_v57 }
0x121d   : > { %11607 = vmatprep.subr.bf16.mxu0 %v13845_v31  ;;  %v13813_v31 = vcombine.high %v8365_v23, %v8369_v20 }
0x121e   : > { %11597 = vmatpush2.bf16.msra.mxu1 %v13724_v30  ;;  %v13948_v30 = vcombine.low %v8501_v54, %v8505_v55  ;;  %v8465_v54 = vld [vmem:[%s16618_s24 + $0xbf0] sm:$0xff] }
0x121f   : > { %11648 = vmatprep.subr.bf16.mxu1 %v13973_v48  ;;  %v11313_v46 = vpop.f32.mrf.mxu0  ;;  %11558 = vmatmul.mubr.bf16.vlgmr.msra.gmra.mxu0 %v18653_v0  ;;  %v13941_v48 = vcombine.high %v8493_v27, %v8497_v28  ;;  %v8589_v55 = vld [vmem:[%s16618_s24 + $0xfd0] sm:$0xff] }
0x1220   : > { %v11314_v3 = vadd.f32 %v11313_v46, %v18895_v56  ;;  %11608 = vmatpush1.bf16.msra.mxu0 %v13844_v37  ;;  %v13957_v56 = vcombine.high %v8509_v26, %v8513_v60  ;;  %11639 = vmatprep.mubr.bf16.mxu0 %v18664_v59  ;;  %v13812_v37 = vcombine.low %v8365_v23, %v8369_v20  ;;  %v8477_v46 = vld [vmem:[%s16618_s24 + $0xc50] sm:$0xff] }
0x1221   : > { %v11354_v61 = vpop.f32.mrf.mxu1  ;;  %11599 = vmatmul.mubr.bf16.vlgmr.msra.gmra.mxu1 %v18660_v62  ;;  %v11315_v25 = vpop.f32.mrf.mxu0  ;;  %11609 = vmatprep.subr.bf16.mxu0 %v13837_v38  ;;  %v13805_v38 = vcombine.high %v8357_v15, %v8361_v33  ;;  %v8481_v26 = vld [vmem:[%s16618_s24 + $0xc70] sm:$0xff]  ;;  %v13804_v60 = vcombine.low %v8357_v15, %v8361_v33 }
0x1222   : > { %11649 = vmatpush1.bf16.msra.mxu1 %v13972_v6  ;;  %v18968_v7 = vadd.f32 %v11354_v61, %v11314_v3  ;;  %v11316_v24 = vadd.f32 %v11315_v25, %v18903_v51  ;;  %11680 = vmatprep.mubr.bf16.mxu1 %v18669_v9  ;;  %v13828_v51 = vcombine.low %v8381_v44, %v8385_v43  ;;  %v8349_v44 = vld [vmem:[%s16618_s24 + $0x850] sm:$0xff] }
0x1223   : > { %v11356_v1 = vpop.f32.mrf.mxu1  ;;  %11650 = vmatprep.subr.bf16.mxu1 %v13965_v40  ;;  %v11317_v50 = vpop.f32.mrf.mxu0  ;;  %v13940_v6 = vcombine.low %v8493_v27, %v8497_v28  ;;  %v13933_v40 = vcombine.high %v8485_v34, %v8489_v35  ;;  %v8353_v43 = vld [vmem:[%s16618_s24 + $0x870] sm:$0xff]  ;;  %v13932_v3 = vcombine.low %v8485_v34, %v8489_v35 }
0x1224   : > { %v18977_v2 = vadd.f32 %v11356_v1, %v11316_v24  ;;  %11610 = vmatpush1.bf16.msra.mxu0 %v13836_v63  ;;  %v13797_v61 = vcombine.high %v8349_v44, %v8353_v43  ;;  %v13925_v63 = vcombine.high %v8477_v46, %v8481_v26  ;;  %v8341_v25 = vld [vmem:[%s16618_s24 + $0x810] sm:$0xff]  ;;  %v13796_v1 = vcombine.low %v8349_v44, %v8353_v43 }
0x1225   : > { %v11358_v19 = vpop.f32.mrf.mxu1  ;;  %v11318_v14 = vpop.f32.mrf.mxu0  ;;  %11611 = vmatprep.subr.bf16.mxu0 %v13829_v53  ;;  %v8469_v53 = vld [vmem:[%s16618_s24 + $0xc10] sm:$0xff] }
0x1226   : > { %11651 = vmatpush1.bf16.msra.mxu1 %v13964_v47  ;;  %v11861_v4 = vcombine.low %v18968_v7, %v18977_v2  ;;  %v8345_v47 = vld [vmem:[%s16618_s24 + $0x830] sm:$0xff]  ;;  %v8358_v7 = vld [vmem:[%s16618_s24 + $0x898] sm:$0xff] }
0x1227   : > { %v11359_v16 = vpop.f32.mrf.mxu1  ;;  %11652 = vmatprep.subr.bf16.mxu1 %v13957_v56  ;;  %v8473_v24 = vld [vmem:[%s16618_s24 + $0xc30] sm:$0xff]  ;;  %v13924_v56 = vcombine.low %v8477_v46, %v8481_v26  ;;  %v13789_v36 = vcombine.high %v8341_v25, %v8345_v47  ;;  %v8362_v2 = vld [vmem:[%s16618_s24 + $0x8b8] sm:$0xff] }
0x1228   : > { %11612 = vmatpush1.bf16.msra.mxu0 %v13828_v51  ;;  %v13917_v57 = vcombine.high %v8469_v53, %v8473_v24  ;;  %v8461_v50 = vld [vmem:[%s16618_s24 + $0xbd0] sm:$0xff]  ;;  %v13788_v51 = vcombine.low %v8341_v25, %v8345_v47  ;;  %v13916_v14 = vcombine.low %v8469_v53, %v8473_v24 }
0x1229   : > { %11613 = vmatprep.subr.bf16.mxu0 %v13821_v45  ;;  %v8593_v19 = vld [vmem:[%s16618_s24 + $0xff0] sm:$0xff]  ;;  %v13908_v27 = vcombine.low %v8461_v50, %v8465_v54 }
0x122a   : > { %11653 = vmatpush1.bf16.msra.mxu1 %v13956_v8  ;;  %v13909_v8 = vcombine.high %v8461_v50, %v8465_v54  ;;  %v14037_v45 = vcombine.high %v8589_v55, %v8593_v19  ;;  %v8453_v16 = vld [vmem:[%s16618_s24 + $0xb90] sm:$0xff]  ;;  %v14036_v28 = vcombine.low %v8589_v55, %v8593_v19 }
0x122b   : > { %11654 = vmatprep.subr.bf16.mxu1 %v13949_v18  ;;  %v8457_v18 = vld [vmem:[%s16618_s24 + $0xbb0] sm:$0xff] }
0x122c   : > { %11614 = vmatpush1.bf16.msra.mxu0 %v13820_v29  ;;  %v8581_v23 = vld [vmem:[%s16618_s24 + $0xf90] sm:$0xff]  ;;  %v13901_v29 = vcombine.high %v8453_v16, %v8457_v18  ;;  %v13900_v34 = vcombine.low %v8453_v16, %v8457_v18 }
0x122d   : > { %11615 = vmatprep.subr.bf16.mxu0 %v13813_v31  ;;  %v8585_v20 = vld [vmem:[%s16618_s24 + $0xfb0] sm:$0xff] }
0x122e   : > { %11655 = vmatpush1.bf16.msra.mxu1 %v13948_v30  ;;  %v14029_v30 = vcombine.high %v8581_v23, %v8585_v20  ;;  %v8445_v31 = vld [vmem:[%s16618_s24 + $0xb50] sm:$0xff]  ;;  %v14028_v35 = vcombine.low %v8581_v23, %v8585_v20 }
0x122f   : > { %11656 = vmatprep.subr.bf16.mxu1 %v13941_v48  ;;  %v8449_v48 = vld [vmem:[%s16618_s24 + $0xb70] sm:$0xff] }
0x1230   : > { %11616 = vmatpush1.bf16.msra.mxu0 %v13812_v37  ;;  %v8573_v15 = vld [vmem:[%s16618_s24 + $0xf50] sm:$0xff]  ;;  %v13893_v37 = vcombine.high %v8445_v31, %v8449_v48  ;;  %v13892_v46 = vcombine.low %v8445_v31, %v8449_v48 }
0x1231   : > { %11617 = vmatprep.subr.bf16.mxu0 %v13805_v38  ;;  %v8577_v33 = vld [vmem:[%s16618_s24 + $0xf70] sm:$0xff] }
0x1232   : > { %11657 = vmatpush1.bf16.msra.mxu1 %v13940_v6  ;;  %v14021_v6 = vcombine.high %v8573_v15, %v8577_v33  ;;  %v8437_v38 = vld [vmem:[%s16618_s24 + $0xb10] sm:$0xff]  ;;  %v14020_v26 = vcombine.low %v8573_v15, %v8577_v33 }
0x1233   : > { %11658 = vmatprep.subr.bf16.mxu1 %v13933_v40  ;;  %v8441_v40 = vld [vmem:[%s16618_s24 + $0xb30] sm:$0xff] }
0x1234   : > { %11618 = vmatpush1.bf16.msra.mxu0 %v13804_v60  ;;  %v8565_v44 = vld [vmem:[%s16618_s24 + $0xf10] sm:$0xff]  ;;  %v13885_v60 = vcombine.high %v8437_v38, %v8441_v40  ;;  %v13884_v53 = vcombine.low %v8437_v38, %v8441_v40  ;;  %v8270_v38 = vld [vmem:[%s16618_s24 + $0x5d8] sm:$0xff] }
0x1235   : > { %11619 = vmatprep.subr.bf16.mxu0 %v13797_v61  ;;  %v8569_v43 = vld [vmem:[%s16618_s24 + $0xf30] sm:$0xff]  ;;  %v8274_v40 = vld [vmem:[%s16618_s24 + $0x5f8] sm:$0xff] }
0x1236   : > { %11659 = vmatpush1.bf16.msra.mxu1 %v13932_v3  ;;  %v14013_v3 = vcombine.high %v8565_v44, %v8569_v43  ;;  %v8429_v61 = vld [vmem:[%s16618_s24 + $0xad0] sm:$0xff]  ;;  %v14012_v24 = vcombine.low %v8565_v44, %v8569_v43 }
0x1237   : > { %11660 = vmatprep.subr.bf16.mxu1 %v13925_v63  ;;  %v8433_v63 = vld [vmem:[%s16618_s24 + $0xaf0] sm:$0xff] }
0x1238   : > { %11620 = vmatpush1.bf16.msra.mxu0 %v13796_v1  ;;  %v8557_v25 = vld [vmem:[%s16618_s24 + $0xed0] sm:$0xff]  ;;  %v13877_v1 = vcombine.high %v8429_v61, %v8433_v63  ;;  %v13876_v55 = vcombine.low %v8429_v61, %v8433_v63  ;;  %v8262_v61 = vld [vmem:[%s16618_s24 + $0x598] sm:$0xff] }
0x1239   : > { %11621 = vmatprep.subr.bf16.mxu0 %v13789_v36  ;;  %v8561_v47 = vld [vmem:[%s16618_s24 + $0xef0] sm:$0xff]  ;;  %v8266_v63 = vld [vmem:[%s16618_s24 + $0x5b8] sm:$0xff] }
0x123a   : > { %11661 = vmatpush1.bf16.msra.mxu1 %v13924_v56  ;;  %v14005_v56 = vcombine.high %v8557_v25, %v8561_v47  ;;  %v8421_v36 = vld [vmem:[%s16618_s24 + $0xa90] sm:$0xff]  ;;  %v14004_v19 = vcombine.low %v8557_v25, %v8561_v47  ;;  %v11168_v25 = vrot.slane %v18879_v5, %v18636_v42 }
0x123b   : > { %11662 = vmatprep.subr.bf16.mxu1 %v13917_v57  ;;  %v8425_v57 = vld [vmem:[%s16618_s24 + $0xab0] sm:$0xff] }
0x123c   : > { %11622 = vmatpush1.bf16.msra.mxu0 %v13788_v51  ;;  %v8549_v50 = vld [vmem:[%s16618_s24 + $0xe90] sm:$0xff]  ;;  %v13869_v51 = vcombine.high %v8421_v36, %v8425_v57  ;;  %v13868_v23 = vcombine.low %v8421_v36, %v8425_v57  ;;  %v8126_v36 = vld [vmem:[%s16618_s24 + $0x158] sm:$0xff] }
0x123d   : > { %11623 = vmatprep.subr.bf16.mxu0 %v13909_v8  ;;  %v8553_v54 = vld [vmem:[%s16618_s24 + $0xeb0] sm:$0xff]  ;;  %v8130_v57 = vld [vmem:[%s16618_s24 + $0x178] sm:$0xff] }
0x123e   : > { %11663 = vmatpush1.bf16.msra.mxu1 %v13916_v14  ;;  %v13997_v14 = vcombine.high %v8549_v50, %v8553_v54  ;;  %v8413_v8 = vld [vmem:[%s16618_s24 + $0xa50] sm:$0xff]  ;;  %v13996_v20 = vcombine.low %v8549_v50, %v8553_v54  ;;  %v8254_v54 = vld [vmem:[%s16618_s24 + $0x558] sm:$0xff] }
0x123f   : > { %11664 = vmatprep.subr.bf16.mxu1 %v14037_v45  ;;  %v8417_v45 = vld [vmem:[%s16618_s24 + $0xa70] sm:$0xff] }
0x1240   : > { %11624 = vmatpush2.bf16.msra.mxu0 %v13908_v27  ;;  %v8541_v16 = vld [vmem:[%s16618_s24 + $0xe50] sm:$0xff]  ;;  %v13861_v27 = vcombine.high %v8413_v8, %v8417_v45  ;;  %v13860_v15 = vcombine.low %v8413_v8, %v8417_v45  ;;  %v13710_v8 = vcombine.low %v8262_v61, %v8266_v63  ;;  %v13575_v45 = vcombine.high %v8126_v36, %v8130_v57 }
0x1241   : > { %11625 = vmatprep.subr.bf16.mxu0 %v13901_v29  ;;  %v8545_v18 = vld [vmem:[%s16618_s24 + $0xe70] sm:$0xff] }
0x1242   : > { %11665 = vmatpush2.bf16.msra.mxu1 %v14036_v28  ;;  %v13989_v28 = vcombine.high %v8541_v16, %v8545_v18  ;;  %v8405_v29 = vld [vmem:[%s16618_s24 + $0xa10] sm:$0xff]  ;;  %v13988_v33 = vcombine.low %v8541_v16, %v8545_v18 }
0x1243   : > { %11666 = vmatprep.subr.bf16.mxu1 %v14029_v30  ;;  %v8409_v30 = vld [vmem:[%s16618_s24 + $0xa30] sm:$0xff] }
0x1244   : > { %11626 = vmatpush2.bf16.msra.mxu0 %v13900_v34  ;;  %v8533_v31 = vld [vmem:[%s16618_s24 + $0xe10] sm:$0xff]  ;;  %v13853_v34 = vcombine.high %v8405_v29, %v8409_v30  ;;  %v13852_v44 = vcombine.low %v8405_v29, %v8409_v30  ;;  %v8246_v30 = vld [vmem:[%s16618_s24 + $0x518] sm:$0xff] }
0x1245   : > { %11627 = vmatprep.subr.bf16.mxu0 %v13893_v37  ;;  %v8537_v48 = vld [vmem:[%s16618_s24 + $0xe30] sm:$0xff]  ;;  %v8142_v37 = vld [vmem:[%s16618_s24 + $0x1d8] sm:$0xff] }
0x1246   : > { %11667 = vmatpush2.bf16.msra.mxu1 %v14028_v35  ;;  %v13981_v35 = vcombine.high %v8533_v31, %v8537_v48  ;;  %v13980_v43 = vcombine.low %v8533_v31, %v8537_v48  ;;  %v8250_v31 = vld [vmem:[%s16618_s24 + $0x538] sm:$0xff] }
0x1247   : > { %11668 = vmatprep.subr.bf16.mxu1 %v14021_v6  ;;  %v8146_v6 = vld [vmem:[%s16618_s24 + $0x1f8] sm:$0xff] }
0x1248   : > { %11628 = vmatpush2.bf16.msra.mxu0 %v13892_v46  ;;  %v13591_v46 = vcombine.high %v8142_v37, %v8146_v6  ;;  %v13590_v47 = vcombine.low %v8142_v37, %v8146_v6  ;;  %v13695_v6 = vcombine.high %v8246_v30, %v8250_v31 }
0x1249   : > { %11629 = vmatprep.subr.bf16.mxu0 %v13885_v60  ;;  %v8134_v60 = vld [vmem:[%s16618_s24 + $0x198] sm:$0xff] }
0x124a   : > { %11669 = vmatpush2.bf16.msra.mxu1 %v14020_v26  ;;  %v13719_v26 = vcombine.high %v8270_v38, %v8274_v40 }
0x124b   : > { %11670 = vmatprep.subr.bf16.mxu1 %v14013_v3  ;;  %v8138_v3 = vld [vmem:[%s16618_s24 + $0x1b8] sm:$0xff] }
0x124c   : > { %11630 = vmatpush2.bf16.msra.mxu0 %v13884_v53  ;;  %v13718_v53 = vcombine.low %v8270_v38, %v8274_v40  ;;  %v8110_v38 = vld [vmem:[%s16618_s24 + $0xd8] sm:$0xff] }
0x124d   : > { %11631 = vmatprep.subr.bf16.mxu0 %v13877_v1  ;;  %v11172_v1 = vrot.slane %v18879_v5, %v18580_v11  ;;  %v8238_v40 = vld [vmem:[%s16618_s24 + $0x4d8] sm:$0xff] }
0x124e   : > { %11671 = vmatpush2.bf16.msra.mxu1 %v14012_v24  ;;  %v13583_v24 = vcombine.high %v8134_v60, %v8138_v3 }
0x124f   : > { %11672 = vmatprep.subr.bf16.mxu1 %v14005_v56  ;;  %v13711_v56 = vcombine.high %v8262_v61, %v8266_v63  ;;  %v8106_v61 = vld [vmem:[%s16618_s24 + $0xb8] sm:$0xff] }
0x1250   : > { %11632 = vmatpush2.bf16.msra.mxu0 %v13876_v55  ;;  %v8258_v55 = vld [vmem:[%s16618_s24 + $0x578] sm:$0xff] }
0x1251   : > { %11633 = vmatprep.subr.bf16.mxu0 %v13869_v51  ;;  %v8230_v63 = vld [vmem:[%s16618_s24 + $0x498] sm:$0xff] }
0x1252   : > { %11673 = vmatpush2.bf16.msra.mxu1 %v14004_v19 }
0x1253   : > { %11674 = vmatprep.subr.bf16.mxu1 %v13997_v14  ;;  %v13582_v14 = vcombine.low %v8134_v60, %v8138_v3  ;;  %v8102_v3 = vld [vmem:[%s16618_s24 + $0x98] sm:$0xff] }
0x1254   : > { %11634 = vmatpush2.bf16.msra.mxu0 %v13868_v23 }
0x1255   : > { %11635 = vmatprep.subr.bf16.mxu0 %v13861_v27  ;;  %v8118_v27 = vld [vmem:[%s16618_s24 + $0x118] sm:$0xff] }
0x1256   : > { %11675 = vmatpush2.bf16.msra.mxu1 %v13996_v20  ;;  %v13703_v20 = vcombine.high %v8254_v54, %v8258_v55 }
0x1257   : > { %11676 = vmatprep.subr.bf16.mxu1 %v13989_v28  ;;  %v8122_v28 = vld [vmem:[%s16618_s24 + $0x138] sm:$0xff] }
0x1258   : > { %11636 = vmatpush2.bf16.msra.mxu0 %v13860_v15  ;;  %v13567_v37 = vcombine.high %v8118_v27, %v8122_v28 }
0x1259   : > { %11637 = vmatprep.subr.bf16.mxu0 %v13853_v34 }
0x125a   : > { %11677 = vmatpush2.bf16.msra.mxu1 %v13988_v33  ;;  %v13574_v33 = vcombine.low %v8126_v36, %v8130_v57  ;;  %v8098_v36 = vld [vmem:[%s16618_s24 + $0x78] sm:$0xff] }
0x125b   : > { %11678 = vmatprep.subr.bf16.mxu1 %v13981_v35  ;;  %v13702_v35 = vcombine.low %v8254_v54, %v8258_v55  ;;  %v8222_v57 = vld [vmem:[%s16618_s24 + $0x458] sm:$0xff]  ;;  %v13550_v54 = vcombine.low %v8102_v3, %v8106_v61 }
0x125c   : > { %11638 = vmatpush2.bf16.msra.mxu0 %v13852_v44  ;;  %v8242_v44 = vld [vmem:[%s16618_s24 + $0x4f8] sm:$0xff] }
0x125d   : > { %11689 = vmatprep.subr.bf16.mxu0 %v13591_v46  ;;  %v13694_v46 = vcombine.low %v8246_v30, %v8250_v31  ;;  %v13687_v60 = vcombine.high %v8238_v40, %v8242_v44  ;;  %v8334_v30 = vld [vmem:[%s16618_s24 + $0x7d8] sm:$0xff] }
0x125e   : > { %11679 = vmatpush2.bf16.msra.mxu1 %v13980_v43  ;;  %v13566_v43 = vcombine.low %v8118_v27, %v8122_v28  ;;  %v8206_v28 = vld [vmem:[%s16618_s24 + $0x3d8] sm:$0xff] }
0x125f   : > { %11730 = vmatprep.subr.bf16.mxu1 %v13719_v26  ;;  %v11395_v50 = vpop.f32.mrf.mxu0  ;;  %11640 = vmatmul.mubr.bf16.vlgmr.msra.gmra.mxu0 %v18740_v49  ;;  %v8338_v31 = vld [vmem:[%s16618_s24 + $0x7f8] sm:$0xff] }
0x1260   : > { %v11396_v19 = vadd.f32 %v11395_v50, %v11168_v25  ;;  %11690 = vmatpush1.bf16.msra.mxu0 %v13590_v47  ;;  %11721 = vmatprep.mubr.bf16.mxu0 %v18594_v32  ;;  %v8234_v25 = vld [vmem:[%s16618_s24 + $0x4b8] sm:$0xff] }
0x1261   : > { %v11436_v51 = vpop.f32.mrf.mxu1  ;;  %11681 = vmatmul.mubr.bf16.vlgmr.msra.gmra.mxu1 %v18744_v52  ;;  %v11397_v5 = vpop.f32.mrf.mxu0  ;;  %11691 = vmatprep.subr.bf16.mxu0 %v13583_v24  ;;  %v13551_v24 = vcombine.high %v8102_v3, %v8106_v61  ;;  %v8226_v50 = vld [vmem:[%s16618_s24 + $0x478] sm:$0xff]  ;;  %v13678_v55 = vcombine.low %v8230_v63, %v8234_v25 }
0x1262   : > { %11731 = vmatpush1.bf16.msra.mxu1 %v13718_v53  ;;  %v19047_v16 = vadd.f32 %v11436_v51, %v11396_v19  ;;  %v11398_v18 = vadd.f32 %v11397_v5, %v11172_v1  ;;  %11762 = vmatprep.mubr.bf16.mxu1 %v18596_v21  ;;  %v8114_v21 = vld [vmem:[%s16618_s24 + $0xf8] sm:$0xff]  ;;  %v13686_v53 = vcombine.low %v8238_v40, %v8242_v44 }
0x1263   : > { %v11438_v23 = vpop.f32.mrf.mxu1  ;;  %11732 = vmatprep.subr.bf16.mxu1 %v13711_v56  ;;  %v11399_v29 = vpop.f32.mrf.mxu0  ;;  %v13559_v26 = vcombine.high %v8110_v38, %v8114_v21  ;;  %v13558_v47 = vcombine.low %v8110_v38, %v8114_v21  ;;  %v13679_v1 = vcombine.high %v8230_v63, %v8234_v25  ;;  %v8094_v56 = vld [vmem:[%s16618_s24 + $0x58] sm:$0xff]  ;;  %v13671_v51 = vcombine.high %v8222_v57, %v8226_v50 }
0x1264   : > { %v19055_v48 = vadd.f32 %v11438_v23, %v11398_v18  ;;  %11692 = vmatpush1.bf16.msra.mxu0 %v13582_v14  ;;  %v13543_v19 = vcombine.high %v8094_v56, %v8098_v36  ;;  %v8086_v14 = vld [vmem:[%s16618_s24 + $0x18] sm:$0xff]  ;;  %v13542_v18 = vcombine.low %v8094_v56, %v8098_v36  ;;  %v13670_v23 = vcombine.low %v8222_v57, %v8226_v50 }
0x1265   : > { %v11440_v15 = vpop.f32.mrf.mxu1  ;;  %v11400_v34 = vpop.f32.mrf.mxu0  ;;  %11693 = vmatprep.subr.bf16.mxu0 %v13575_v45  ;;  %v8090_v5 = vld [vmem:[%s16618_s24 + $0x38] sm:$0xff]  ;;  %v13782_v40 = vcombine.low %v8334_v30, %v8338_v31 }
0x1266   : > { %11733 = vmatpush1.bf16.msra.mxu1 %v13710_v8  ;;  %v8214_v8 = vld [vmem:[%s16618_s24 + $0x418] sm:$0xff]  ;;  %v13534_v15 = vcombine.low %v8086_v14, %v8090_v5 }
0x1267   : > { %v11441_v32 = vpop.f32.mrf.mxu1  ;;  %11734 = vmatprep.subr.bf16.mxu1 %v13703_v20  ;;  %v8218_v45 = vld [vmem:[%s16618_s24 + $0x438] sm:$0xff]  ;;  %v13535_v20 = vcombine.high %v8086_v14, %v8090_v5 }
0x1268   : > { %11694 = vmatpush1.bf16.msra.mxu0 %v13574_v33  ;;  %v13663_v27 = vcombine.high %v8214_v8, %v8218_v45  ;;  %v8210_v29 = vld [vmem:[%s16618_s24 + $0x3f8] sm:$0xff]  ;;  %v13662_v33 = vcombine.low %v8214_v8, %v8218_v45 }
0x1269   : > { %11695 = vmatprep.subr.bf16.mxu0 %v13567_v37  ;;  %v13655_v34 = vcombine.high %v8206_v28, %v8210_v29  ;;  %v8198_v37 = vld [vmem:[%s16618_s24 + $0x398] sm:$0xff]  ;;  %v13654_v21 = vcombine.low %v8206_v28, %v8210_v29 }
0x126a   : > { %11735 = vmatpush1.bf16.msra.mxu1 %v13702_v35  ;;  %v13783_v35 = vcombine.high %v8334_v30, %v8338_v31  ;;  %v8202_v32 = vld [vmem:[%s16618_s24 + $0x3b8] sm:$0xff] }
0x126b   : > { %11736 = vmatprep.subr.bf16.mxu1 %v13695_v6  ;;  %v8326_v6 = vld [vmem:[%s16618_s24 + $0x798] sm:$0xff]  ;;  %v13647_v44 = vcombine.high %v8198_v37, %v8202_v32  ;;  %v13646_v61 = vcombine.low %v8198_v37, %v8202_v32 }
0x126c   : > { %11696 = vmatpush1.bf16.msra.mxu0 %v13566_v43  ;;  %v8330_v38 = vld [vmem:[%s16618_s24 + $0x7b8] sm:$0xff] }
0x126d   : > { %11697 = vmatprep.subr.bf16.mxu0 %v13559_v26  ;;  %v13775_v43 = vcombine.high %v8326_v6, %v8330_v38  ;;  %v8194_v26 = vld [vmem:[%s16618_s24 + $0x378] sm:$0xff]  ;;  %v13774_v63 = vcombine.low %v8326_v6, %v8330_v38 }
0x126e   : > { %11737 = vmatpush1.bf16.msra.mxu1 %v13694_v46  ;;  %v8190_v46 = vld [vmem:[%s16618_s24 + $0x358] sm:$0xff] }
0x126f   : > { %11738 = vmatprep.subr.bf16.mxu1 %v13687_v60  ;;  %v8318_v60 = vld [vmem:[%s16618_s24 + $0x758] sm:$0xff]  ;;  %v13639_v25 = vcombine.high %v8190_v46, %v8194_v26  ;;  %v13638_v36 = vcombine.low %v8190_v46, %v8194_v26 }
0x1270   : > { %11698 = vmatpush1.bf16.msra.mxu0 %v13558_v47  ;;  %v8322_v3 = vld [vmem:[%s16618_s24 + $0x778] sm:$0xff] }
0x1271   : > { %11699 = vmatprep.subr.bf16.mxu0 %v13551_v24  ;;  %v13767_v47 = vcombine.high %v8318_v60, %v8322_v3  ;;  %v8186_v24 = vld [vmem:[%s16618_s24 + $0x338] sm:$0xff]  ;;  %v13766_v57 = vcombine.low %v8318_v60, %v8322_v3 }
0x1272   : > { %11739 = vmatpush1.bf16.msra.mxu1 %v13686_v53  ;;  %v8182_v53 = vld [vmem:[%s16618_s24 + $0x318] sm:$0xff] }
0x1273   : > { %11740 = vmatprep.subr.bf16.mxu1 %v13679_v1  ;;  %v8310_v1 = vld [vmem:[%s16618_s24 + $0x718] sm:$0xff]  ;;  %v13631_v50 = vcombine.high %v8182_v53, %v8186_v24  ;;  %v13630_v5 = vcombine.low %v8182_v53, %v8186_v24 }
0x1274   : > { %11700 = vmatpush1.bf16.msra.mxu0 %v13550_v54  ;;  %v8314_v56 = vld [vmem:[%s16618_s24 + $0x738] sm:$0xff] }
0x1275   : > { %11701 = vmatprep.subr.bf16.mxu0 %v13543_v19  ;;  %v13759_v54 = vcombine.high %v8310_v1, %v8314_v56  ;;  %v8178_v19 = vld [vmem:[%s16618_s24 + $0x2f8] sm:$0xff]  ;;  %v13758_v8 = vcombine.low %v8310_v1, %v8314_v56 }
0x1276   : > { %11741 = vmatpush1.bf16.msra.mxu1 %v13678_v55  ;;  %v8174_v55 = vld [vmem:[%s16618_s24 + $0x2d8] sm:$0xff] }
0x1277   : > { %11742 = vmatprep.subr.bf16.mxu1 %v13671_v51  ;;  %v8302_v51 = vld [vmem:[%s16618_s24 + $0x6d8] sm:$0xff]  ;;  %v13623_v45 = vcombine.high %v8174_v55, %v8178_v19  ;;  %v13622_v29 = vcombine.low %v8174_v55, %v8178_v19  ;;  %v15325_v19 = vmov 1966171168  }
0x1278   : > { %11702 = vmatpush1.bf16.msra.mxu0 %v13542_v18  ;;  %v8306_v14 = vld [vmem:[%s16618_s24 + $0x6f8] sm:$0xff] }
0x1279   : > { %11703 = vmatprep.subr.bf16.mxu0 %v13535_v20  ;;  %v13751_v18 = vcombine.high %v8302_v51, %v8306_v14  ;;  %v8170_v20 = vld [vmem:[%s16618_s24 + $0x2b8] sm:$0xff]  ;;  %v13750_v30 = vcombine.low %v8302_v51, %v8306_v14  ;;  %v11866_v51 = vunpack.c.l.s4 %v15325_v19 }
0x127a   : > { %11743 = vmatpush1.bf16.msra.mxu1 %v13670_v23  ;;  %v8166_v23 = vld [vmem:[%s16618_s24 + $0x298] sm:$0xff] }
0x127b   : > { %11744 = vmatprep.subr.bf16.mxu1 %v13663_v27  ;;  %v8294_v27 = vld [vmem:[%s16618_s24 + $0x698] sm:$0xff]  ;;  %v13615_v31 = vcombine.high %v8166_v23, %v8170_v20  ;;  %v13614_v32 = vcombine.low %v8166_v23, %v8170_v20 }
0x127c   : > { %11704 = vmatpush1.bf16.msra.mxu0 %v13534_v15  ;;  %v8298_v28 = vld [vmem:[%s16618_s24 + $0x6b8] sm:$0xff] }
0x127d   : > { %11705 = vmatprep.subr.bf16.mxu0 %v13655_v34  ;;  %v13743_v15 = vcombine.high %v8294_v27, %v8298_v28  ;;  %v8162_v34 = vld [vmem:[%s16618_s24 + $0x278] sm:$0xff]  ;;  %v13742_v6 = vcombine.low %v8294_v27, %v8298_v28 }
0x127e   : > { %11745 = vmatpush1.bf16.msra.mxu1 %v13662_v33  ;;  %v8158_v33 = vld [vmem:[%s16618_s24 + $0x258] sm:$0xff] }
0x127f   : > { %11746 = vmatprep.subr.bf16.mxu1 %v13783_v35  ;;  %v8286_v35 = vld [vmem:[%s16618_s24 + $0x658] sm:$0xff]  ;;  %v13607_v38 = vcombine.high %v8158_v33, %v8162_v34  ;;  %v13606_v26 = vcombine.low %v8158_v33, %v8162_v34 }
0x1280   : > { %11706 = vmatpush2.bf16.msra.mxu0 %v13654_v21  ;;  %v8290_v37 = vld [vmem:[%s16618_s24 + $0x678] sm:$0xff] }
0x1281   : > { %11707 = vmatprep.subr.bf16.mxu0 %v13647_v44  ;;  %v13735_v21 = vcombine.high %v8286_v35, %v8290_v37  ;;  %v8154_v44 = vld [vmem:[%s16618_s24 + $0x238] sm:$0xff]  ;;  %v13734_v60 = vcombine.low %v8286_v35, %v8290_v37 }
0x1282   : > { %11747 = vmatpush2.bf16.msra.mxu1 %v13782_v40  ;;  %v8150_v40 = vld [vmem:[%s16618_s24 + $0x218] sm:$0xff] }
0x1283   : > { %11748 = vmatprep.subr.bf16.mxu1 %v13775_v43  ;;  %v8278_v43 = vld [vmem:[%s16618_s24 + $0x618] sm:$0xff]  ;;  %v13599_v3 = vcombine.high %v8150_v40, %v8154_v44  ;;  %v13598_v24 = vcombine.low %v8150_v40, %v8154_v44 }
0x1284   : > { %11708 = vmatpush2.bf16.msra.mxu0 %v13646_v61  ;;  %v8282_v46 = vld [vmem:[%s16618_s24 + $0x638] sm:$0xff] }
0x1285   : > { %11709 = vmatprep.subr.bf16.mxu0 %v13639_v25  ;;  %v13727_v61 = vcombine.high %v8278_v43, %v8282_v46  ;;  %v8402_v25 = vld [vmem:[%s16618_s24 + $0x9f8] sm:$0xff]  ;;  %v13726_v1 = vcombine.low %v8278_v43, %v8282_v46 }
0x1286   : > { %11749 = vmatpush2.bf16.msra.mxu1 %v13774_v63  ;;  %v8398_v63 = vld [vmem:[%s16618_s24 + $0x9d8] sm:$0xff] }
0x1287   : > { %11750 = vmatprep.subr.bf16.mxu1 %v13767_v47  ;;  %v8526_v47 = vld [vmem:[%s16618_s24 + $0xdd8] sm:$0xff]  ;;  %v13847_v56 = vcombine.high %v8398_v63, %v8402_v25  ;;  %v13846_v14 = vcombine.low %v8398_v63, %v8402_v25 }
0x1288   : > { %11710 = vmatpush2.bf16.msra.mxu0 %v13638_v36  ;;  %v8530_v53 = vld [vmem:[%s16618_s24 + $0xdf8] sm:$0xff] }
0x1289   : > { %11711 = vmatprep.subr.bf16.mxu0 %v13631_v50  ;;  %v13975_v36 = vcombine.high %v8526_v47, %v8530_v53  ;;  %v8394_v50 = vld [vmem:[%s16618_s24 + $0x9b8] sm:$0xff] }
0x128a   : > { %11751 = vmatpush2.bf16.msra.mxu1 %v13766_v57  ;;  %v8390_v57 = vld [vmem:[%s16618_s24 + $0x998] sm:$0xff] }
0x128b   : > { %11752 = vmatprep.subr.bf16.mxu1 %v13759_v54  ;;  %v8518_v54 = vld [vmem:[%s16618_s24 + $0xd98] sm:$0xff] }
0x128c   : > { %11712 = vmatpush2.bf16.msra.mxu0 %v13630_v5  ;;  %v8522_v55 = vld [vmem:[%s16618_s24 + $0xdb8] sm:$0xff]  ;;  %v13974_v5 = vcombine.low %v8526_v47, %v8530_v53 }
0x128d   : > { %11713 = vmatprep.subr.bf16.mxu0 %v13623_v45  ;;  %v13967_v45 = vcombine.high %v8518_v54, %v8522_v55  ;;  %v8386_v23 = vld [vmem:[%s16618_s24 + $0x978] sm:$0xff]  ;;  %v13966_v34 = vcombine.low %v8518_v54, %v8522_v55 }
0x128e   : > { %11753 = vmatpush2.bf16.msra.mxu1 %v13758_v8  ;;  %v13839_v8 = vcombine.high %v8390_v57, %v8394_v50  ;;  %v8510_v27 = vld [vmem:[%s16618_s24 + $0xd58] sm:$0xff] }
0x128f   : > { %11754 = vmatprep.subr.bf16.mxu1 %v13751_v18  ;;  %v8382_v18 = vld [vmem:[%s16618_s24 + $0x958] sm:$0xff] }
0x1290   : > { %11714 = vmatpush2.bf16.msra.mxu0 %v13622_v29  ;;  %v8514_v28 = vld [vmem:[%s16618_s24 + $0xd78] sm:$0xff]  ;;  %v11867_v29 = vunpack.c.0.s8 %v11866_v51  ;;  %v13831_v35 = vcombine.high %v8382_v18, %v8386_v23  ;;  %v13830_v46 = vcombine.low %v8382_v18, %v8386_v23 }
0x1291   : > { %11715 = vmatprep.subr.bf16.mxu0 %v13615_v31  ;;  %v8506_v40 = vld [vmem:[%s16618_s24 + $0xd38] sm:$0xff] }
0x1292   : > { %11755 = vmatpush2.bf16.msra.mxu1 %v13750_v30  ;;  %v19128_v44 = vsub.s32 %v11867_v29, %v18570_v13  ;;  %v8370_v25 = vld [vmem:[%s16618_s24 + $0x8f8] sm:$0xff] }
0x1293   : > { %11756 = vmatprep.subr.bf16.mxu1 %v13743_v15  ;;  %v13838_v15 = vcombine.low %v8390_v57, %v8394_v50  ;;  %v8494_v47 = vld [vmem:[%s16618_s24 + $0xcd8] sm:$0xff] }
0x1294   : > { %11716 = vmatpush2.bf16.msra.mxu0 %v13614_v32  ;;  %v8498_v53 = vld [vmem:[%s16618_s24 + $0xcf8] sm:$0xff] }
0x1295   : > { %11717 = vmatprep.subr.bf16.mxu0 %v13607_v38  ;;  %v8378_v38 = vld [vmem:[%s16618_s24 + $0x938] sm:$0xff]  ;;  %v13943_v54 = vcombine.high %v8494_v47, %v8498_v53  ;;  %v13942_v51 = vcombine.low %v8494_v47, %v8498_v53 }
0x1296   : > { %11757 = vmatpush2.bf16.msra.mxu1 %v13742_v6  ;;  %v13959_v6 = vcombine.high %v8510_v27, %v8514_v28  ;;  %v8490_v55 = vld [vmem:[%s16618_s24 + $0xcb8] sm:$0xff] }
0x1297   : > { %11758 = vmatprep.subr.bf16.mxu1 %v13735_v21  ;;  %v8502_v21 = vld [vmem:[%s16618_s24 + $0xd18] sm:$0xff] }
0x1298   : > { %11718 = vmatpush2.bf16.msra.mxu0 %v13606_v26  ;;  %v13951_v63 = vcombine.high %v8502_v21, %v8506_v40  ;;  %v8478_v18 = vld [vmem:[%s16618_s24 + $0xc58] sm:$0xff] }
0x1299   : > { %11719 = vmatprep.subr.bf16.mxu0 %v13599_v3  ;;  %v8482_v23 = vld [vmem:[%s16618_s24 + $0xc78] sm:$0xff] }
0x129a   : > { %11759 = vmatpush2.bf16.msra.mxu1 %v13734_v60  ;;  %v13927_v29 = vcombine.high %v8478_v18, %v8482_v23  ;;  %v8574_v47 = vld [vmem:[%s16618_s24 + $0xf58] sm:$0xff] }
0x129b   : > { %11760 = vmatprep.subr.bf16.mxu1 %v13727_v61  ;;  %v8578_v53 = vld [vmem:[%s16618_s24 + $0xf78] sm:$0xff] }
0x129c   : > { %11720 = vmatpush2.bf16.msra.mxu0 %v13598_v24  ;;  %v19138_v24 = vrot.slane %v11861_v4, %v19128_v44  ;;  %v8486_v4 = vld [vmem:[%s16618_s24 + $0xc98] sm:$0xff] }
0x129d   : > { %11771 = vmatprep.subr.bf16.mxu0 %v13847_v56 }
0x129e   : > { %11761 = vmatpush2.bf16.msra.mxu1 %v13726_v1 }
0x129f   : > { %11812 = vmatprep.subr.bf16.mxu1 %v13975_v36  ;;  %v11477_v20 = vpop.f32.mrf.mxu0  ;;  %11722 = vmatmul.mubr.bf16.vlgmr.msra.gmra.mxu0 %v18653_v0  ;;  %v13950_v36 = vcombine.low %v8502_v21, %v8506_v40 }
0x12a0   : > { %v11478_v30 = vadd.f32 %v11477_v20, %v19047_v16  ;;  %11772 = vmatpush1.bf16.msra.mxu0 %v13846_v14  ;;  %v8374_v16 = vld [vmem:[%s16618_s24 + $0x918] sm:$0xff]  ;;  %11803 = vmatprep.mubr.bf16.mxu0 %v18664_v59  ;;  %v13958_v59 = vcombine.low %v8510_v27, %v8514_v28  ;;  %v13807_v14 = vcombine.high %v8358_v7, %v8362_v2 }
0x12a1   : > { %v11518_v31 = vpop.f32.mrf.mxu1  ;;  %11763 = vmatmul.mubr.bf16.vlgmr.msra.gmra.mxu1 %v18660_v62  ;;  %v11479_v33 = vpop.f32.mrf.mxu0  ;;  %11773 = vmatprep.subr.bf16.mxu0 %v13839_v8  ;;  %v13823_v60 = vcombine.high %v8374_v16, %v8378_v38  ;;  %v13822_v56 = vcombine.low %v8374_v16, %v8378_v38  ;;  %v8350_v8 = vld [vmem:[%s16618_s24 + $0x858] sm:$0xff]  ;;  %v13806_v20 = vcombine.low %v8358_v7, %v8362_v2 }
0x12a2   : > { %11813 = vmatpush1.bf16.msra.mxu1 %v13974_v5  ;;  %v11519_v0 = vadd.f32 %v11518_v31, %v11478_v30  ;;  %v11480_v37 = vadd.f32 %v11479_v33, %v19055_v48  ;;  %11844 = vmatprep.mubr.bf16.mxu1 %v18669_v9  ;;  %v8366_v9 = vld [vmem:[%s16618_s24 + $0x8d8] sm:$0xff]  ;;  %v13935_v5 = vcombine.high %v8486_v4, %v8490_v55 }
0x12a3   : > { %v11520_v32 = vpop.f32.mrf.mxu1  ;;  %11814 = vmatprep.subr.bf16.mxu1 %v13967_v45  ;;  %v11481_v62 = vpop.f32.mrf.mxu0  ;;  %v13815_v57 = vcombine.high %v8366_v9, %v8370_v25  ;;  %v13814_v19 = vcombine.low %v8366_v9, %v8370_v25  ;;  %v8354_v45 = vld [vmem:[%s16618_s24 + $0x878] sm:$0xff]  ;;  %v13934_v27 = vcombine.low %v8486_v4, %v8490_v55 }
0x12a4   : > { %v11521_v43 = vadd.f32 %v11520_v32, %v11480_v37  ;;  %11774 = vmatpush1.bf16.msra.mxu0 %v13838_v15  ;;  %v13799_v28 = vcombine.high %v8350_v8, %v8354_v45  ;;  %v8342_v30 = vld [vmem:[%s16618_s24 + $0x818] sm:$0xff] }
0x12a5   : > { %v11522_v48 = vpop.f32.mrf.mxu1  ;;  %v11482_v26 = vpop.f32.mrf.mxu0  ;;  %11775 = vmatprep.subr.bf16.mxu0 %v13831_v35  ;;  %v8346_v31 = vld [vmem:[%s16618_s24 + $0x838] sm:$0xff]  ;;  %v13926_v35 = vcombine.low %v8478_v18, %v8482_v23 }
0x12a6   : > { %11815 = vmatpush1.bf16.msra.mxu1 %v13966_v34  ;;  %v11862_v3 = vcombine.low %v11519_v0, %v11521_v43  ;;  %v8470_v15 = vld [vmem:[%s16618_s24 + $0xc18] sm:$0xff]  ;;  %v13798_v34 = vcombine.low %v8350_v8, %v8354_v45  ;;  %v13791_v0 = vcombine.high %v8342_v30, %v8346_v31  ;;  %v13790_v62 = vcombine.low %v8342_v30, %v8346_v31 }
0x12a7   : > { %v11523_v61 = vpop.f32.mrf.mxu1  ;;  %11816 = vmatprep.subr.bf16.mxu1 %v13959_v6  ;;  %v8474_v33 = vld [vmem:[%s16618_s24 + $0xc38] sm:$0xff] }
0x12a8   : > { %v19141_v1 = vrot.slane %v11862_v3, %v19128_v44  ;;  %11776 = vmatpush1.bf16.msra.mxu0 %v13830_v46  ;;  %v13919_v37 = vcombine.high %v8470_v15, %v8474_v33  ;;  %v8462_v32 = vld [vmem:[%s16618_s24 + $0xbd8] sm:$0xff]  ;;  %v13918_v21 = vcombine.low %v8470_v15, %v8474_v33 }
0x12a9   : > { %11777 = vmatprep.subr.bf16.mxu0 %v13823_v60  ;;  %v8466_v6 = vld [vmem:[%s16618_s24 + $0xbf8] sm:$0xff] }
0x12aa   : > { %11817 = vmatpush1.bf16.msra.mxu1 %v13958_v59  ;;  %v11893_v50 = vcombine.low %v19138_v24, %v19141_v1  ;;  %v8590_v16 = vld [vmem:[%s16618_s24 + $0xfd8] sm:$0xff]  ;;  %v13911_v40 = vcombine.high %v8462_v32, %v8466_v6  ;;  %v13910_v60 = vcombine.low %v8462_v32, %v8466_v6 }
0x12ab   : > { %11818 = vmatprep.subr.bf16.mxu1 %v13951_v63  ;;  %v8594_v38 = vld [vmem:[%s16618_s24 + $0xff8] sm:$0xff] }
0x12ac   : > { %11778 = vmatpush1.bf16.msra.mxu0 %v13822_v56  ;;  %v14039_v43 = vcombine.high %v8590_v16, %v8594_v38  ;;  %v8454_v48 = vld [vmem:[%s16618_s24 + $0xb98] sm:$0xff]  ;;  %v14038_v3 = vcombine.low %v8590_v16, %v8594_v38 }
0x12ad   : > { %11779 = vmatprep.subr.bf16.mxu0 %v13815_v57  ;;  %v8458_v46 = vld [vmem:[%s16618_s24 + $0xbb8] sm:$0xff] }
0x12ae   : > { %11819 = vmatpush1.bf16.msra.mxu1 %v13950_v36  ;;  %v8582_v26 = vld [vmem:[%s16618_s24 + $0xf98] sm:$0xff]  ;;  %v13903_v61 = vcombine.high %v8454_v48, %v8458_v46  ;;  %v13902_v56 = vcombine.low %v8454_v48, %v8458_v46 }
0x12af   : > { %11820 = vmatprep.subr.bf16.mxu1 %v13943_v54  ;;  %v8586_v59 = vld [vmem:[%s16618_s24 + $0xfb8] sm:$0xff]  ;;  %v14023_v54 = vcombine.high %v8574_v47, %v8578_v53 }
0x12b0   : > { %11780 = vmatpush1.bf16.msra.mxu0 %v13814_v19  ;;  %v14031_v63 = vcombine.high %v8582_v26, %v8586_v59  ;;  %v8446_v9 = vld [vmem:[%s16618_s24 + $0xb58] sm:$0xff]  ;;  %v14030_v36 = vcombine.low %v8582_v26, %v8586_v59 }
0x12b1   : > { %11781 = vmatprep.subr.bf16.mxu0 %v13807_v14  ;;  %v8450_v25 = vld [vmem:[%s16618_s24 + $0xb78] sm:$0xff] }
0x12b2   : > { %11821 = vmatpush1.bf16.msra.mxu1 %v13942_v51  ;;  %v13895_v57 = vcombine.high %v8446_v9, %v8450_v25  ;;  %v8438_v7 = vld [vmem:[%s16618_s24 + $0xb18] sm:$0xff]  ;;  %v13894_v19 = vcombine.low %v8446_v9, %v8450_v25  ;;  %v14022_v51 = vcombine.low %v8574_v47, %v8578_v53 }
0x12b3   : > { %11822 = vmatprep.subr.bf16.mxu1 %v13935_v5  ;;  %v8442_v2 = vld [vmem:[%s16618_s24 + $0xb38] sm:$0xff] }
0x12b4   : > { %11782 = vmatpush1.bf16.msra.mxu0 %v13806_v20  ;;  %v8566_v4 = vld [vmem:[%s16618_s24 + $0xf18] sm:$0xff]  ;;  %v13887_v14 = vcombine.high %v8438_v7, %v8442_v2  ;;  %v13886_v20 = vcombine.low %v8438_v7, %v8442_v2 }
0x12b5   : > { %11783 = vmatprep.subr.bf16.mxu0 %v13799_v28  ;;  %v8570_v55 = vld [vmem:[%s16618_s24 + $0xf38] sm:$0xff] }
0x12b6   : > { %11823 = vmatpush1.bf16.msra.mxu1 %v13934_v27  ;;  %v14015_v5 = vcombine.high %v8566_v4, %v8570_v55  ;;  %v8430_v8 = vld [vmem:[%s16618_s24 + $0xad8] sm:$0xff]  ;;  %v14014_v27 = vcombine.low %v8566_v4, %v8570_v55 }
0x12b7   : > { %11824 = vmatprep.subr.bf16.mxu1 %v13927_v29  ;;  %v8434_v45 = vld [vmem:[%s16618_s24 + $0xaf8] sm:$0xff] }
0x12b8   : > { %11784 = vmatpush1.bf16.msra.mxu0 %v13798_v34  ;;  %v8558_v18 = vld [vmem:[%s16618_s24 + $0xed8] sm:$0xff]  ;;  %v13879_v28 = vcombine.high %v8430_v8, %v8434_v45  ;;  %v13878_v34 = vcombine.low %v8430_v8, %v8434_v45 }
0x12b9   : > { %11785 = vmatprep.subr.bf16.mxu0 %v13791_v0  ;;  %v8562_v23 = vld [vmem:[%s16618_s24 + $0xef8] sm:$0xff] }
0x12ba   : > { %11825 = vmatpush1.bf16.msra.mxu1 %v13926_v35  ;;  %v14007_v29 = vcombine.high %v8558_v18, %v8562_v23  ;;  %v8422_v30 = vld [vmem:[%s16618_s24 + $0xa98] sm:$0xff]  ;;  %v14006_v35 = vcombine.low %v8558_v18, %v8562_v23 }
0x12bb   : > { %11826 = vmatprep.subr.bf16.mxu1 %v13919_v37  ;;  %v8426_v31 = vld [vmem:[%s16618_s24 + $0xab8] sm:$0xff] }
0x12bc   : > { %11786 = vmatpush1.bf16.msra.mxu0 %v13790_v62  ;;  %v8550_v15 = vld [vmem:[%s16618_s24 + $0xe98] sm:$0xff]  ;;  %v13871_v0 = vcombine.high %v8422_v30, %v8426_v31  ;;  %v13870_v62 = vcombine.low %v8422_v30, %v8426_v31 }
0x12bd   : > { %11787 = vmatprep.subr.bf16.mxu0 %v13911_v40  ;;  %v8554_v33 = vld [vmem:[%s16618_s24 + $0xeb8] sm:$0xff] }
0x12be   : > { %11827 = vmatpush1.bf16.msra.mxu1 %v13918_v21  ;;  %v13999_v37 = vcombine.high %v8550_v15, %v8554_v33  ;;  %v8414_v32 = vld [vmem:[%s16618_s24 + $0xa58] sm:$0xff]  ;;  %v13998_v21 = vcombine.low %v8550_v15, %v8554_v33 }
0x12bf   : > { %11828 = vmatprep.subr.bf16.mxu1 %v14039_v43  ;;  %v8418_v6 = vld [vmem:[%s16618_s24 + $0xa78] sm:$0xff] }
0x12c0   : > { %11788 = vmatpush2.bf16.msra.mxu0 %v13910_v60  ;;  %v8542_v16 = vld [vmem:[%s16618_s24 + $0xe58] sm:$0xff]  ;;  %v13863_v40 = vcombine.high %v8414_v32, %v8418_v6  ;;  %v13862_v60 = vcombine.low %v8414_v32, %v8418_v6 }
0x12c1   : > { %11789 = vmatprep.subr.bf16.mxu0 %v13903_v61  ;;  %v8546_v38 = vld [vmem:[%s16618_s24 + $0xe78] sm:$0xff] }
0x12c2   : > { %11829 = vmatpush2.bf16.msra.mxu1 %v14038_v3  ;;  %v13991_v43 = vcombine.high %v8542_v16, %v8546_v38  ;;  %v8406_v48 = vld [vmem:[%s16618_s24 + $0xa18] sm:$0xff]  ;;  %v13990_v3 = vcombine.low %v8542_v16, %v8546_v38 }
0x12c3   : > { %11830 = vmatprep.subr.bf16.mxu1 %v14031_v63  ;;  %v8410_v46 = vld [vmem:[%s16618_s24 + $0xa38] sm:$0xff] }
0x12c4   : > { %11790 = vmatpush2.bf16.msra.mxu0 %v13902_v56  ;;  %v8534_v26 = vld [vmem:[%s16618_s24 + $0xe18] sm:$0xff]  ;;  %v13855_v61 = vcombine.high %v8406_v48, %v8410_v46  ;;  %v13854_v9 = vcombine.low %v8406_v48, %v8410_v46 }
0x12c5   : > { %11791 = vmatprep.subr.bf16.mxu0 %v13895_v57  ;;  %v8538_v59 = vld [vmem:[%s16618_s24 + $0xe38] sm:$0xff]  ;;  %s11918_s24 = scalar_lea.vmem (!%p14041_p11), [#allocation4], %s16596_s20 }
0x12c6   : > { %11831 = vmatpush2.bf16.msra.mxu1 %v14030_v36  ;;  %v13983_v63 = vcombine.high %v8534_v26, %v8538_v59  ;;  %v13982_v25 = vcombine.low %v8534_v26, %v8538_v59  ;;  %v15038_v47 = vld [vmem:[%s16616_s13] sm:$0xff]  ;;  %s11912_s13 = scalar_lea.vmem [#allocation3], %s16596_s20 }
0x12c7   : > { %11832 = vmatprep.subr.bf16.mxu1 %v14023_v54  ;;  %v11176_v53 = vrot.slane %v15038_v47, %v8053_v22  ;;  %v11180_v56 = vrot.slane %v15038_v47, %v8057_v58  ;;  %v11184_v16 = vrot.slane %v15038_v47, %v8061_v12  ;;  %v11188_v38 = vrot.slane %v15038_v47, %v8065_v17 }
0x12c8   : > { %11792 = vmatpush2.bf16.msra.mxu0 %v13894_v19 }
0x12c9   : > { %11793 = vmatprep.subr.bf16.mxu0 %v13887_v14 }
0x12ca   : > { %11833 = vmatpush2.bf16.msra.mxu1 %v14022_v51 }
0x12cb   : > { %11834 = vmatprep.subr.bf16.mxu1 %v14015_v5 }
0x12cc   : > { %11794 = vmatpush2.bf16.msra.mxu0 %v13886_v20 }
0x12cd   : > { %11795 = vmatprep.subr.bf16.mxu0 %v13879_v28 }
0x12ce   : > { %11835 = vmatpush2.bf16.msra.mxu1 %v14014_v27 }
0x12cf   : > { %11836 = vmatprep.subr.bf16.mxu1 %v14007_v29 }
0x12d0   : > { %11796 = vmatpush2.bf16.msra.mxu0 %v13878_v34 }
0x12d1   : > { %11797 = vmatprep.subr.bf16.mxu0 %v13871_v0 }
0x12d2   : > { %11837 = vmatpush2.bf16.msra.mxu1 %v14006_v35 }
0x12d3   : > { %11838 = vmatprep.subr.bf16.mxu1 %v13999_v37 }
0x12d4   : > { %11798 = vmatpush2.bf16.msra.mxu0 %v13870_v62 }
0x12d5   : > { %11799 = vmatprep.subr.bf16.mxu0 %v13863_v40 }
0x12d6   : > { %11839 = vmatpush2.bf16.msra.mxu1 %v13998_v21 }
0x12d7   : > { %11840 = vmatprep.subr.bf16.mxu1 %v13991_v43 }
0x12d8   : > { %11800 = vmatpush2.bf16.msra.mxu0 %v13862_v60 }
0x12d9   : > { %11801 = vmatprep.subr.bf16.mxu0 %v13855_v61 }
0x12da   : > { %11841 = vmatpush2.bf16.msra.mxu1 %v13990_v3 }
0x12db   : > { %11842 = vmatprep.subr.bf16.mxu1 %v13983_v63 }
0x12dc   : > { %11802 = vmatpush2.bf16.msra.mxu0 %v13854_v9 }
0x12de   : > { %11843 = vmatpush2.bf16.msra.mxu1 %v13982_v25 }
0x12df   : > { %v11559_v36 = vpop.f32.mrf.mxu0  ;;  %11804 = vmatmul.mubr.bf16.vlgmr.msra.gmra.mxu0 %v18740_v49 }
0x12e0   : > { %v11560_v57 = vadd.f32 %v11559_v36, %v11176_v53  ;;  %v11901_v36 = vrot.slane %v11893_v50, %v19128_v44 }
0x12e1   : > { %v11600_v54 = vpop.f32.mrf.mxu1  ;;  %11845 = vmatmul.mubr.bf16.vlgmr.msra.gmra.mxu1 %v18744_v52  ;;  %v11561_v7 = vpop.f32.mrf.mxu0 }
0x12e2   : > { %v11601_v2 = vadd.f32 %v11600_v54, %v11560_v57  ;;  %v11562_v4 = vadd.f32 %v11561_v7, %v11180_v56 }
0x12e3   : > { %v11602_v55 = vpop.f32.mrf.mxu1  ;;  %v11563_v19 = vpop.f32.mrf.mxu0 }
0x12e4   : > { %v11603_v51 = vadd.f32 %v11602_v55, %v11562_v4 }
0x12e5   : > { %v11604_v14 = vpop.f32.mrf.mxu1  ;;  %v11564_v5 = vpop.f32.mrf.mxu0 }
0x12e7   : > { %v11605_v22 = vpop.f32.mrf.mxu1 }
0x131f   : > { %v11641_v8 = vpop.f32.mrf.mxu0 }
0x1320   : > { %v11642_v45 = vadd.f32 %v11641_v8, %v11601_v2 }
0x1321   : > { %v11682_v18 = vpop.f32.mrf.mxu1  ;;  %v11643_v58 = vpop.f32.mrf.mxu0 }
0x1322   : > { %v11683_v23 = vadd.f32 %v11682_v18, %v11642_v45  ;;  %v11644_v20 = vadd.f32 %v11643_v58, %v11603_v51 }
0x1323   : > { %v11684_v49 = vpop.f32.mrf.mxu1  ;;  %v11645_v27 = vpop.f32.mrf.mxu0 }
0x1324   : > { %v11685_v28 = vadd.f32 %v11684_v49, %v11644_v20 }
0x1325   : > { %v11686_v29 = vpop.f32.mrf.mxu1  ;;  %v11646_v52 = vpop.f32.mrf.mxu0 }
0x1326   : > { %v11863_v30 = vcombine.low %v11683_v23, %v11685_v28 }
0x1327   : > { %v11687_v31 = vpop.f32.mrf.mxu1 }
0x1328   : > { %v11885_v13 = vrot.slane %v11863_v30, %v19128_v44 }
0x135f   : > { %v11723_v15 = vpop.f32.mrf.mxu0 }
0x1360   : > { %v11724_v62 = vadd.f32 %v11723_v15, %v11184_v16 }
0x1361   : > { %v11764_v33 = vpop.f32.mrf.mxu1  ;;  %v11725_v34 = vpop.f32.mrf.mxu0 }
0x1362   : > { %v11726_v21 = vadd.f32 %v11725_v34, %v11188_v38  ;;  %v11765_v40 = vadd.f32 %v11764_v33, %v11724_v62 }
0x1363   : > { %v11766_v35 = vpop.f32.mrf.mxu1  ;;  %v11727_v0 = vpop.f32.mrf.mxu0 }
0x1364   : > { %v11767_v48 = vadd.f32 %v11766_v35, %v11726_v21 }
0x1365   : > { %v11768_v37 = vpop.f32.mrf.mxu1  ;;  %v11728_v32 = vpop.f32.mrf.mxu0 }
0x1367   : > { %v11769_v6 = vpop.f32.mrf.mxu1 }
0x139f   : > { %v11805_v43 = vpop.f32.mrf.mxu0 }
0x13a0   : > { %v11806_v46 = vadd.f32 %v11805_v43, %v11765_v40 }
0x13a1   : > { %v11846_v26 = vpop.f32.mrf.mxu1  ;;  %v11807_v59 = vpop.f32.mrf.mxu0 }
0x13a2   : > { %v11808_v60 = vadd.f32 %v11807_v59, %v11767_v48  ;;  %v11847_v63 = vadd.f32 %v11846_v26, %v11806_v46 }
0x13a3   : > { %v11848_v3 = vpop.f32.mrf.mxu1  ;;  %v11809_v61 = vpop.f32.mrf.mxu0 }
0x13a4   : > { %v11849_v9 = vadd.f32 %v11848_v3, %v11808_v60 }
0x13a5   : > { %v11850_v25 = vpop.f32.mrf.mxu1  ;;  %v11810_v53 = vpop.f32.mrf.mxu0 }
0x13a6   : > { %v11864_v12 = vcombine.low %v11847_v63, %v11849_v9 }
0x13a7   : > { %v11851_v56 = vpop.f32.mrf.mxu1 }
0x13a8   : > { %v11892_v17 = vrot.slane %v11864_v12, %v19128_v44 }
0x13aa   : > { %v11894_v47 = vcombine.low %v11885_v13, %v11892_v17 }
0x13ac   : > { %v11908_v57 = vrot.slane %v11894_v47, %v19128_v44  ;;  %11916 = sbr.rel (%p14041_p11) target bundleno = 5051 (0x13bb), region = 139 }
0x13ae   : > { %v11909_v54 = vcombine.low %v11901_v36, %v11908_v57 }
0x13b0   : > { %11913 = vst [vmem:[%s11912_s13] sm:$0xff] %v11909_v54 }
0x13b1   : > { %v11919_v2 = vld [vmem:[%s11918_s24] sm:$0xff] }
0x13b7   : > { %v11917_v7 = vld [vmem:[%s11912_s13] sm:$0xff] }
0x13b8   : > { %v11920_v4 = vadd.f32 %v11919_v2, %v11917_v7 }
0x13ba   : > { %11921 = vst [vmem:[%s11912_s13] sm:$0xff] %v11920_v4 }
0x13bb PF: > { %p11922_p13 = scmp.eq.s32.totalorder %s15301_s1, 1  ;;  %p14042_p0 = scmp.ne.s32.totalorder %s15301_s1, 1 }
0x13bc   : > { %s19645_s20 = scalar_lea.vmem (!%p14042_p0), [#allocation8], %s16592_s19  ;;  %s19646_s7 = scalar_lea.vmem (!%p14042_p0), [#allocation6], %s16592_s19 }
0x13bd   : > { %11925 = sbr.rel (%p14042_p0) target bundleno = 5102 (0x13ee), region = 143 }
0x13c2   : > { %v11926_v24 = vld [vmem:[#allocation3] sm:$0xff]  ;;  %v11928_v1 = vld [vmem:[#allocation3 + $0x8] sm:$0xff]  ;;  %v11948_v23 = vld [vmem:[%s16610_s16] sm:$0xf]  ;;  %vm11956_vm10 = vcmp.lt.s32.totalorder %v8035_v41, 512 }
0x13c3   : > { %v11929_v50 = vmul.f32 0.5, %v11926_v24  ;;  %v11934_v55 = vrot.slane %v11926_v24, 4  ;;  %v11942_v51 = vrot.slane %v11928_v1, 4 }
0x13c5   : > { %15039 = vtanh.f32 %v11929_v50  ;;  %v11936_v19 = vmul.f32 0.5, %v11934_v55  ;;  %v11944_v14 = vmul.f32 0.5, %v11942_v51 }
0x13c6   : > { %15041 = vtanh.f32 %v11928_v1 }
0x13c7   : > { %15043 = vtanh.f32 %v11936_v19 }
0x13c8   : > { %15045 = vtanh.f32 %v11944_v14 }
0x13d2   : > { %v15040_v5 = vpop.eup %15039 }
0x13d3   : > { %v15042_v22 = vpop.eup %15041  ;;  %v11931_v8 = vmul.f32 0.5, %v15040_v5 }
0x13d4   : > { %v15044_v45 = vpop.eup %15043 }
0x13d5   : > { %v11932_v18 = vadd.f32 0.5, %v11931_v8  ;;  %v11938_v58 = vmul.f32 0.5, %v15044_v45  ;;  %v15046_v29 = vpop.eup %15045 }
0x13d6   : > { %v11946_v52 = vmul.f32 0.5, %v15046_v29 }
0x13d7   : > { %v11939_v20 = vadd.f32 0.5, %v11938_v58  ;;  %v11950_v49 = vmul.f32 %v15042_v22, %v11932_v18 }
0x13d8   : > { %v11947_v30 = vadd.f32 0.5, %v11946_v52 }
0x13d9   : > { %v11949_v27 = vmul.f32 %v11948_v23, %v11939_v20 }
0x13db   : > { %v11951_v28 = vadd.f32 %v11950_v49, %v11949_v27 }
0x13dd   : > { %15047 = vtanh.f32 %v11951_v28  ;;  %11958 = vst.msk [vmem:[%s19645_s20] sm:$0xf] %vm11956_vm10, %v11951_v28 }
0x13ea   : > { %v15048_v31 = vpop.eup %15047 }
0x13eb   : > { %v11953_v15 = vmul.f32 %v15048_v31, %v11947_v30 }
0x13ed   : > { %11959 = vst.msk [vmem:[%s19646_s7] sm:$0xf] %vm11956_vm10, %v11953_v15  ;;  %11960 = vst.msk [vmem:[#allocation2 + $0x4] sm:$0xf] %vm11956_vm10, %v11953_v15 }
0x13ee PF: > { %p11961_p1 = scmp.eq.s32.totalorder %s15305_s26, 2 }
0x13f0   : > { %p11962_p2 = pnand %p11961_p1, %p11922_p13 }
0x13f1   : > { %s19647_s25 = sld [smem:[#allocation42_spill]] (!%p11962_p2) }
0x13f2   : > { %11965 = sbr.rel (%p11962_p2) target bundleno = 5699 (0x1643), region = 147  ;;  %s19649_s5 = sld [smem:[#allocation43_spill]] (!%p11962_p2) }
0x13f7   : > { %s19648_s12 = smov %s19647_s25  ;;  %v15049_v33 = vld [vmem:[%s19647_s25 + $0x74] ss:$8 sps:$4 sm:$0xff]   ;;  %v11966_v18 = vld [vmem:[#allocation2 + $0x4] sm:$0xf]  ;;  %vm12470_vm11 = vcmask 1040384   ;;  %vm12510_vm12 = vcmp.lt.s32.totalorder %v8035_v41, 256 }
0x13f8   : > { %v15051_v34 = vld [vmem:[%s19648_s12 + $0x174] ss:$8 sps:$4 sm:$0xff]   ;;  %12388 = vmatprep.subr.bf16.mxu0 %v15049_v33  ;;  %v15053_v35 = vld [vmem:[%s19648_s12 + $0x70] ss:$8 sps:$4 sm:$0xff]   ;;  %v15055_v37 = vld [vmem:[%s19648_s12 + $0x64] ss:$8 sps:$4 sm:$0xff]   ;;  %v11975_v58 = vrot.slane %v11966_v18, %v18577_v10  ;;  %v11983_v23 = vrot.slane %v11966_v18, %v18580_v11 }
0x13f9   : > { %v15054_v0 = vld [vmem:[%s19648_s12 + $0x170] ss:$8 sps:$4 sm:$0xff]   ;;  %12429 = vmatprep.subr.bf16.mxu1 %v15051_v34  ;;  %12389 = vmatpush1.bf16.msra.mxu0 %v15053_v35  ;;  %v15057_v32 = vld [vmem:[%s19648_s12 + $0x164] ss:$8 sps:$4 sm:$0xff]   ;;  %v15059_v6 = vld [vmem:[%s19648_s12 + $0x60] ss:$8 sps:$4 sm:$0xff]  }
0x13fa   : > { %12430 = vmatpush1.bf16.msra.mxu1 %v15054_v0  ;;  %12390 = vmatprep.subr.bf16.mxu0 %v15055_v37  ;;  %v15060_v16 = vld [vmem:[%s19648_s12 + $0x160] ss:$8 sps:$4 sm:$0xff]   ;;  %v15061_v38 = vld [vmem:[%s19648_s12 + $0x54] ss:$8 sps:$4 sm:$0xff]   ;;  %v15065_v21 = vld [vmem:[%s19648_s12 + $0x50] ss:$8 sps:$4 sm:$0xff]   ;;  %v11989_v28 = vpack.c.bf16 %v11975_v58, %v11975_v58  ;;  %v11991_v29 = vpack.c.bf16 %v11983_v23, %v11983_v23 }
0x13fb   : > { %12431 = vmatprep.subr.bf16.mxu1 %v15057_v32  ;;  %v15063_v62 = vld [vmem:[%s19648_s12 + $0x154] ss:$8 sps:$4 sm:$0xff]   ;;  %v15066_v40 = vld [vmem:[%s19648_s12 + $0x150] ss:$8 sps:$4 sm:$0xff]   ;;  %v15067_v43 = vld [vmem:[%s19648_s12 + $0x44] ss:$8 sps:$4 sm:$0xff]  }
0x13fc   : > { %v15069_v48 = vld [vmem:[%s19648_s12 + $0x144] ss:$8 sps:$4 sm:$0xff]   ;;  %v15071_v46 = vld [vmem:[%s19648_s12 + $0x40] ss:$8 sps:$4 sm:$0xff]   ;;  %v15073_v59 = vld [vmem:[%s19648_s12 + $0x34] ss:$8 sps:$4 sm:$0xff]   ;;  %12420 = vmatprep.mubr.bf16.mxu0 %v11989_v28  ;;  %12461 = vmatprep.mubr.bf16.mxu1 %v11991_v29 }
0x13fd   : > { %12391 = vmatpush1.bf16.msra.mxu0 %v15059_v6  ;;  %v15072_v26 = vld [vmem:[%s19648_s12 + $0x140] ss:$8 sps:$4 sm:$0xff]   ;;  %v15075_v60 = vld [vmem:[%s19648_s12 + $0x134] ss:$8 sps:$4 sm:$0xff]   ;;  %v15077_v3 = vld [vmem:[%s19648_s12 + $0x30] ss:$8 sps:$4 sm:$0xff]  }
0x13fe   : > { %12432 = vmatpush1.bf16.msra.mxu1 %v15060_v16  ;;  %12392 = vmatprep.subr.bf16.mxu0 %v15061_v38  ;;  %v15078_v61 = vld [vmem:[%s19648_s12 + $0x130] ss:$8 sps:$4 sm:$0xff]   ;;  %v15079_v63 = vld [vmem:[%s19648_s12 + $0x24] ss:$8 sps:$4 sm:$0xff]   ;;  %v15083_v25 = vld [vmem:[%s19648_s12 + $0x20] ss:$8 sps:$4 sm:$0xff]   ;;  %v11971_v38 = vrot.slane %v11966_v18, %v18633_v39 }
0x13ff   : > { %12433 = vmatprep.subr.bf16.mxu1 %v15063_v62  ;;  %v15081_v9 = vld [vmem:[%s19648_s12 + $0x124] ss:$8 sps:$4 sm:$0xff]   ;;  %v15084_v53 = vld [vmem:[%s19648_s12 + $0x120] ss:$8 sps:$4 sm:$0xff]   ;;  %v15085_v12 = vld [vmem:[%s19648_s12 + $0x14] ss:$8 sps:$4 sm:$0xff]   ;;  %v11979_v62 = vrot.slane %v11966_v18, %v18636_v42 }
0x1400   : > { %v15087_v56 = vld [vmem:[%s19648_s12 + $0x114] ss:$8 sps:$4 sm:$0xff]   ;;  %v15089_v13 = vld [vmem:[%s19648_s12 + $0x10] ss:$8 sps:$4 sm:$0xff]   ;;  %v15091_v47 = vld [vmem:[%s19648_s12 + $0x4] ss:$8 sps:$4 sm:$0xff]  }
0x1401   : > { %12393 = vmatpush1.bf16.msra.mxu0 %v15065_v21  ;;  %v15090_v17 = vld [vmem:[%s19648_s12 + $0x110] ss:$8 sps:$4 sm:$0xff]   ;;  %v15093_v36 = vld [vmem:[%s19648_s12 + $0x104] ss:$8 sps:$4 sm:$0xff]   ;;  %v15095_v57 = vld [vmem:[%s19648_s12] ss:$8 sps:$4 sm:$0xff]  }
0x1402   : > { %12434 = vmatpush1.bf16.msra.mxu1 %v15066_v40  ;;  %12394 = vmatprep.subr.bf16.mxu0 %v15067_v43  ;;  %v15096_v54 = vld [vmem:[%s19648_s12 + $0x100] ss:$8 sps:$4 sm:$0xff]   ;;  %v15097_v7 = vld [vmem:[%s19648_s12 + $0xf4] ss:$8 sps:$4 sm:$0xff]   ;;  %v15101_v4 = vld [vmem:[%s19648_s12 + $0xf0] ss:$8 sps:$4 sm:$0xff]   ;;  %v11988_v43 = vpack.c.bf16 %v11971_v38, %v11971_v38 }
0x1403   : > { %12435 = vmatprep.subr.bf16.mxu1 %v15069_v48  ;;  %v15099_v2 = vld [vmem:[%s19648_s12 + $0x1f4] ss:$8 sps:$4 sm:$0xff]   ;;  %v15102_v24 = vld [vmem:[%s19648_s12 + $0x1f0] ss:$8 sps:$4 sm:$0xff]   ;;  %v15103_v1 = vld [vmem:[%s19648_s12 + $0xe4] ss:$8 sps:$4 sm:$0xff]   ;;  %v11990_v48 = vpack.c.bf16 %v11979_v62, %v11979_v62 }
0x1404   : > { %v15105_v50 = vld [vmem:[%s19648_s12 + $0x1e4] ss:$8 sps:$4 sm:$0xff]   ;;  %v15107_v55 = vld [vmem:[%s19648_s12 + $0xe0] ss:$8 sps:$4 sm:$0xff]   ;;  %v15109_v51 = vld [vmem:[%s19648_s12 + $0xd4] ss:$8 sps:$4 sm:$0xff]  }
0x1405   : > { %12395 = vmatpush1.bf16.msra.mxu0 %v15071_v46  ;;  %v15108_v19 = vld [vmem:[%s19648_s12 + $0x1e0] ss:$8 sps:$4 sm:$0xff]   ;;  %v15111_v14 = vld [vmem:[%s19648_s12 + $0x1d4] ss:$8 sps:$4 sm:$0xff]   ;;  %v15113_v5 = vld [vmem:[%s19648_s12 + $0xd0] ss:$8 sps:$4 sm:$0xff]  }
0x1406   : > { %12436 = vmatpush1.bf16.msra.mxu1 %v15072_v26  ;;  %12396 = vmatprep.subr.bf16.mxu0 %v15073_v59  ;;  %v15114_v22 = vld [vmem:[%s19648_s12 + $0x1d0] ss:$8 sps:$4 sm:$0xff]   ;;  %v15115_v8 = vld [vmem:[%s19648_s12 + $0xc4] ss:$8 sps:$4 sm:$0xff]   ;;  %v15119_v20 = vld [vmem:[%s19648_s12 + $0xc0] ss:$8 sps:$4 sm:$0xff]  }
0x1407   : > { %12437 = vmatprep.subr.bf16.mxu1 %v15075_v60  ;;  %v15117_v45 = vld [vmem:[%s19648_s12 + $0x1c4] ss:$8 sps:$4 sm:$0xff]   ;;  %v15120_v49 = vld [vmem:[%s19648_s12 + $0x1c0] ss:$8 sps:$4 sm:$0xff]   ;;  %v15121_v27 = vld [vmem:[%s19648_s12 + $0xb4] ss:$8 sps:$4 sm:$0xff]  }
0x1408   : > { %v15123_v11 = vld [vmem:[%s19648_s12 + $0x1b4] ss:$8 sps:$4 sm:$0xff]   ;;  %v15125_v52 = vld [vmem:[%s19648_s12 + $0xb0] ss:$8 sps:$4 sm:$0xff]   ;;  %v15127_v31 = vld [vmem:[%s19648_s12 + $0xa4] ss:$8 sps:$4 sm:$0xff]  }
0x1409   : > { %12397 = vmatpush1.bf16.msra.mxu0 %v15077_v3  ;;  %v15126_v30 = vld [vmem:[%s19648_s12 + $0x1b0] ss:$8 sps:$4 sm:$0xff]   ;;  %v15129_v15 = vld [vmem:[%s19648_s12 + $0x1a4] ss:$8 sps:$4 sm:$0xff]   ;;  %v15131_v33 = vld [vmem:[%s19648_s12 + $0xa0] ss:$8 sps:$4 sm:$0xff]  }
0x140a   : > { %12438 = vmatpush1.bf16.msra.mxu1 %v15078_v61  ;;  %12398 = vmatprep.subr.bf16.mxu0 %v15079_v63  ;;  %v15132_v34 = vld [vmem:[%s19648_s12 + $0x1a0] ss:$8 sps:$4 sm:$0xff]   ;;  %v15133_v35 = vld [vmem:[%s19648_s12 + $0x94] ss:$8 sps:$4 sm:$0xff]   ;;  %v15137_v37 = vld [vmem:[%s19648_s12 + $0x90] ss:$8 sps:$4 sm:$0xff]  }
0x140b   : > { %12439 = vmatprep.subr.bf16.mxu1 %v15081_v9  ;;  %v15135_v0 = vld [vmem:[%s19648_s12 + $0x194] ss:$8 sps:$4 sm:$0xff]   ;;  %v15138_v32 = vld [vmem:[%s19648_s12 + $0x190] ss:$8 sps:$4 sm:$0xff]   ;;  %v15139_v6 = vld [vmem:[%s19648_s12 + $0x84] ss:$8 sps:$4 sm:$0xff]  }
0x140c   : > { %v15141_v16 = vld [vmem:[%s19648_s12 + $0x184] ss:$8 sps:$4 sm:$0xff]   ;;  %v15143_v21 = vld [vmem:[%s19648_s12 + $0x80] ss:$8 sps:$4 sm:$0xff]  }
0x140d   : > { %12399 = vmatpush1.bf16.msra.mxu0 %v15083_v25  ;;  %v15144_v40 = vld [vmem:[%s19648_s12 + $0x180] ss:$8 sps:$4 sm:$0xff]  }
0x140e   : > { %12440 = vmatpush1.bf16.msra.mxu1 %v15084_v53  ;;  %12400 = vmatprep.subr.bf16.mxu0 %v15085_v12  ;;  %v12056_v42 = vld [vmem:[%s19649_s5] sm:$0x3] }
0x140f   : > { %12441 = vmatprep.subr.bf16.mxu1 %v15087_v56  ;;  %v12381_v46 = vrot.slane %v12056_v42, %v18633_v39  ;;  %v12385_v26 = vrot.slane %v12056_v42, %v18577_v10 }
0x1411   : > { %12401 = vmatpush1.bf16.msra.mxu0 %v15089_v13 }
0x1412   : > { %12442 = vmatpush1.bf16.msra.mxu1 %v15090_v17  ;;  %12402 = vmatprep.subr.bf16.mxu0 %v15091_v47 }
0x1413   : > { %12443 = vmatprep.subr.bf16.mxu1 %v15093_v36 }
0x1415   : > { %12403 = vmatpush1.bf16.msra.mxu0 %v15095_v57 }
0x1416   : > { %12444 = vmatpush1.bf16.msra.mxu1 %v15096_v54  ;;  %12404 = vmatprep.subr.bf16.mxu0 %v15097_v7 }
0x1417   : > { %12445 = vmatprep.subr.bf16.mxu1 %v15099_v2 }
0x1419   : > { %12405 = vmatpush2.bf16.msra.mxu0 %v15101_v4 }
0x141a   : > { %12446 = vmatpush2.bf16.msra.mxu1 %v15102_v24  ;;  %12406 = vmatprep.subr.bf16.mxu0 %v15103_v1 }
0x141b   : > { %12447 = vmatprep.subr.bf16.mxu1 %v15105_v50 }
0x141d   : > { %12407 = vmatpush2.bf16.msra.mxu0 %v15107_v55 }
0x141e   : > { %12448 = vmatpush2.bf16.msra.mxu1 %v15108_v19  ;;  %12408 = vmatprep.subr.bf16.mxu0 %v15109_v51 }
0x141f   : > { %12449 = vmatprep.subr.bf16.mxu1 %v15111_v14 }
0x1421   : > { %12409 = vmatpush2.bf16.msra.mxu0 %v15113_v5 }
0x1422   : > { %12450 = vmatpush2.bf16.msra.mxu1 %v15114_v22  ;;  %12410 = vmatprep.subr.bf16.mxu0 %v15115_v8 }
0x1423   : > { %12451 = vmatprep.subr.bf16.mxu1 %v15117_v45 }
0x1425   : > { %12411 = vmatpush2.bf16.msra.mxu0 %v15119_v20 }
0x1426   : > { %12452 = vmatpush2.bf16.msra.mxu1 %v15120_v49  ;;  %12412 = vmatprep.subr.bf16.mxu0 %v15121_v27 }
0x1427   : > { %12453 = vmatprep.subr.bf16.mxu1 %v15123_v11 }
0x1429   : > { %12413 = vmatpush2.bf16.msra.mxu0 %v15125_v52 }
0x142a   : > { %12454 = vmatpush2.bf16.msra.mxu1 %v15126_v30  ;;  %12414 = vmatprep.subr.bf16.mxu0 %v15127_v31 }
0x142b   : > { %12455 = vmatprep.subr.bf16.mxu1 %v15129_v15 }
0x142d   : > { %12415 = vmatpush2.bf16.msra.mxu0 %v15131_v33 }
0x142e   : > { %12456 = vmatpush2.bf16.msra.mxu1 %v15132_v34  ;;  %12416 = vmatprep.subr.bf16.mxu0 %v15133_v35 }
0x142f   : > { %12457 = vmatprep.subr.bf16.mxu1 %v15135_v0 }
0x1431   : > { %12417 = vmatpush2.bf16.msra.mxu0 %v15137_v37 }
0x1432   : > { %12458 = vmatpush2.bf16.msra.mxu1 %v15138_v32  ;;  %12418 = vmatprep.subr.bf16.mxu0 %v15139_v6 }
0x1433   : > { %12459 = vmatprep.subr.bf16.mxu1 %v15141_v16 }
0x1435   : > { %12419 = vmatpush2.bf16.msra.mxu0 %v15143_v21 }
0x1436   : > { %12460 = vmatpush2.bf16.msra.mxu1 %v15144_v40 }
0x1438   : > { %12421 = vmatmul.mubr.bf16.vlgmr.msra.gmra.mxu0 %v11988_v43 }
0x1439   : > { %12462 = vmatmul.mubr.bf16.vlgmr.msra.gmra.mxu1 %v11990_v48 }
0x14f8   : > { %v12422_v59 = vpop.f32.mrf.mxu0 }
0x14f9   : > { %v12463_v60 = vpop.f32.mrf.mxu1  ;;  %v12423_v3 = vadd.f32 %v12422_v59, %v12381_v46 }
0x14fa   : > { %v12424_v61 = vpop.f32.mrf.mxu0 }
0x14fb   : > { %v12465_v63 = vpop.f32.mrf.mxu1  ;;  %v12464_v9 = vadd.f32 %v12463_v60, %v12423_v3  ;;  %v12425_v25 = vadd.f32 %v12424_v61, %v12385_v26 }
0x14fc   : > { %v12426_v53 = vpop.f32.mrf.mxu0 }
0x14fd   : > { %v12467_v12 = vpop.f32.mrf.mxu1  ;;  %v12466_v56 = vadd.f32 %v12465_v63, %v12425_v25  ;;  %v12471_v47 = vsel %vm12470_vm11, %v12464_v9, -inf }
0x14fe   : > { %v12427_v13 = vpop.f32.mrf.mxu0 }
0x14ff   : > { %v12468_v17 = vpop.f32.mrf.mxu1  ;;  %v12472_v36 = vsel %vm12470_vm11, %v12466_v56, -inf }
0x1500   : > { %v12473_v39 = vmax.f32 %v12471_v47, %v12472_v36 }
0x1502   : > { %12474 = vmax.xlane.f32.xlu0 %v12473_v39 }
0x158b   : > { %v12475_v10 = vpop.xlane.xlu0 %12474 }
0x158c   : > { %v12476_v57 = vsub.f32 %v12464_v9, %v12475_v10  ;;  %v12477_v54 = vsub.f32 %v12466_v56, %v12475_v10 }
0x158e   : > { %v12478_v7 = vmul.f32 1.442695, %v12476_v57  ;;  %v12480_v2 = vmul.f32 1.442695, %v12477_v54 }
0x1590   : > { %15145 = vpow2.f32 %v12478_v7 }
0x1591   : > { %15147 = vpow2.f32 %v12480_v2 }
0x159d   : > { %v15146_v4 = vpop.eup %15145 }
0x159e   : > { %v15148_v24 = vpop.eup %15147  ;;  %v12482_v1 = vsel %vm12470_vm11, %v15146_v4, 0.0 }
0x159f   : > { %v12483_v50 = vsel %vm12470_vm11, %v15148_v24, 0.0 }
0x15a0   : > { %v12484_v55 = vadd.f32 %v12483_v50, %v12482_v1 }
0x15a2   : > { %12485 = vadd.xlane.f32.xlu0 %v12484_v55 }
0x162b   : > { %v12486_v19 = vpop.xlane.xlu0 %12485 }
0x162c   : > { %15149 = vrcp.f32 %v12486_v19 }
0x1639   : > { %v15150_v51 = vpop.eup %15149 }
0x163a   : > { %v12488_v14 = vmul.f32 %v15150_v51, %v15146_v4  ;;  %v12489_v5 = vmul.f32 %v15150_v51, %v15148_v24 }
0x163c   : > { %v12492_v22 = vcombine.low %v12488_v14, %v12489_v5 }
0x163e   : > { %v12499_v8 = vrot.slane %v12492_v22, %v19128_v44 }
0x1640   : > { %v12506_v45 = vrot.slane %v12499_v8, %v19128_v44 }
0x1642   : > { %12512 = vst.msk [vmem:[#allocation10] sm:$0x3] %vm12510_vm12, %v12506_v45 }
0x1643 PF: > { %s19650_s8 = sadd.s32 4294967295, %s15317_s27   ;;  %s14117_s10 = sshll.u32 %s15305_s26, 6 }
0x1644   : > { %s19431_s9 = sand.u32 1, %s19650_s8   ;;  %s19651_s1 = sld [smem:[#allocation45_spill]] }
0x1645   : > { %s19653_s6 = scalar_lea.vmem [#allocation8], %s16592_s19  ;;  %s19654_s16 = sld [smem:[#allocation44_spill]] }
0x1646   : > { %s12547_s24 = sshll.u32 %s19653_s6, 4  ;;  %s12519_s25 = scalar_lea.sflag [#allocation9], %s19431_s9  ;;  %s12548_s24 = int_to_ptr.vmem [resolvable:$true] %s12547_s24 }
0x1647   : > { %s15151_s5 = scalar_lea.vmem %s12548_s24, 64  ;;  %s15326_s26 = smov [#allocation8]  }
0x1648   : > { %p15152_p3 = scmp.ne.s32.totalorder %s12548_s24, %s15151_s5  ;;  %s15155_s8 = sshll.u32 %s15326_s26, 4  ;;  %s15156_s8 = int_to_ptr.vmem [resolvable:$false] %s15155_s8 }
0x1649   : > { %s15157_s11 = scalar_lea.vmem %s15156_s8, 128  ;;  %p15158_p8 = scmp.lt.s32.totalorder %s12548_s24, %s15156_s8 }
0x164a   : > { %s19652_s13 = smov %s19651_s1  ;;  %s19437_s2 = scalar_lea.hbm %s19651_s1, %s14117_s10 }
0x164b   : > { %s19444_s4 = scalar_lea.hbm %s19654_s16, %s14117_s10  ;;  %p15153_p4 = pnand %p15152_p3, %p15529_p7 }
0x164c   : > { %p15159_p9 = scmp.lt.s32.totalorder %s15157_s11, %s15151_s5 }
0x164d   : > { %p15154_p5 = pneg %p15153_p4 }
0x164e   : > { %p15160_p10 = por %p15159_p9, %p15158_p8 }
0x1650   : > { %p15161_p11 = pnand %p15160_p10, %p15154_p5 }
0x1652   : > { %15164 = shalt.err (!%p15161_p11)
}
0x1653   : > { %s15165_s10 = scalar_lea.hbm %s19437_s2, 64  ;;  %s15169_s1 = scalar_lea.hbm %s19652_s13, 192 }
0x1654   : > { %p15166_p13 = scmp.ne.s32.totalorder %s19437_s2, %s15165_s10  ;;  %p15170_p2 = scmp.lt.s32.totalorder %s19437_s2, %s19652_s13 }
0x1655   : > { %p15171_p3 = scmp.lt.s32.totalorder %s15169_s1, %s15165_s10 }
0x1656   : > { %p15167_p0 = pnand %p15166_p13, %p15529_p7 }
0x1657   : > { %p15172_p4 = por %p15171_p3, %p15170_p2 }
0x1658   : > { %p15168_p1 = pneg %p15167_p0 }
0x165a   : > { %p15173_p5 = pnand %p15172_p4, %p15168_p1 }
0x165c   : > { %15176 = shalt.err (!%p15173_p5)
}
0x165d   : > { %14749 = dma.vmem_to_hbm [thread:$0]  (%p15529_p7), %s12548_s24, 64, %s19437_s2, %s12519_s25  }
0x165e   : > { %s19655_s7 = scalar_lea.vmem [#allocation6], %s16592_s19  ;;  %s19656_s26 = sand.u32 1, %s15285_s30  }
0x165f   : > { %s12533_s5 = sshll.u32 %s19655_s7, 4  ;;  %s12514_s8 = scalar_lea.sflag [#allocation7], %s19656_s26  ;;  %s12534_s5 = int_to_ptr.vmem [resolvable:$true] %s12533_s5 }
0x1660   : > { %s15177_s11 = scalar_lea.vmem %s12534_s5, 64  ;;  %s15327_s10 = smov [#allocation6]  }
0x1661   : > { %p15178_p8 = scmp.ne.s32.totalorder %s12534_s5, %s15177_s11  ;;  %s15181_s9 = sshll.u32 %s15327_s10, 4  ;;  %s15182_s9 = int_to_ptr.vmem [resolvable:$false] %s15181_s9 }
0x1662   : > { %s15183_s3 = scalar_lea.vmem %s15182_s9, 128  ;;  %p15184_p11 = scmp.lt.s32.totalorder %s12534_s5, %s15182_s9 }
0x1663   : > { %p15179_p9 = pnand %p15178_p8, %p15529_p7  ;;  %p15185_p13 = scmp.lt.s32.totalorder %s15183_s3, %s15177_s11 }
0x1665   : > { %p15180_p10 = pneg %p15179_p9  ;;  %p15186_p0 = por %p15185_p13, %p15184_p11 }
0x1667   : > { %p15187_p1 = pnand %p15186_p0, %p15180_p10 }
0x1669   : > { %15190 = shalt.err (!%p15187_p1)
}
0x166a   : > { %s15191_s19 = scalar_lea.hbm %s19444_s4, 64  ;;  %s15195_s25 = scalar_lea.hbm %s19654_s16, 192 }
0x166b   : > { %p15192_p2 = scmp.ne.s32.totalorder %s19444_s4, %s15191_s19  ;;  %p15196_p5 = scmp.lt.s32.totalorder %s19444_s4, %s19654_s16 }
0x166c   : > { %p15197_p8 = scmp.lt.s32.totalorder %s15195_s25, %s15191_s19 }
0x166d   : > { %p15193_p3 = pnand %p15192_p2, %p15529_p7 }
0x166e   : > { %p15198_p9 = por %p15197_p8, %p15196_p5 }
0x166f   : > { %p15194_p4 = pneg %p15193_p3 }
0x1671   : > { %p15199_p10 = pnand %p15198_p9, %p15194_p4 }
0x1673   : > { %15202 = shalt.err (!%p15199_p10)
}
0x1674   : > { %14748 = dma.vmem_to_hbm [thread:$0]  (%p15529_p7), %s12534_s5, 64, %s19444_s4, %s12514_s8  }
0x1675   : > { %s15328_s7 = smov [#allocation10]  }
0x1676   : > { %s12558_s26 = sshll.u32 %s15328_s7, 4  ;;  %s12559_s26 = int_to_ptr.vmem [resolvable:$true] %s12558_s26 }
0x1677   : > { %s15203_s11 = scalar_lea.vmem %s12559_s26, 32  ;;  %p15210_p1 = scmp.lt.s32.totalorder %s12559_s26, %s12559_s26 }
0x1678   : > { %p15204_p11 = scmp.ne.s32.totalorder %s12559_s26, %s15203_s11  ;;  %p15211_p2 = scmp.lt.s32.totalorder %s15203_s11, %s15203_s11 }
0x167a   : > { %p15205_p13 = pnand %p15204_p11, %p15521_p6  ;;  %p15212_p3 = por %p15211_p2, %p15210_p1 }
0x167c   : > { %p15206_p0 = pneg %p15205_p13 }
0x167e   : > { %p15213_p12 = pnand %p15212_p3, %p15206_p0 }
0x1680   : > { %15216 = shalt.err (!%p15213_p12)
}
0x1681   : > { %s19658_s9 = sld [smem:[#allocation46_spill]] }
0x1687   : > { %14751 = dma.vmem_to_hbm [thread:$0]  (%p15521_p6), %s12559_s26, 32, %s19658_s9, [#allocation9]  }
0x1688   : > { %15268 = dma.done.wait (%p15521_p6), [#allocation9], 32  }
0x1689   : > { %15270 = vsyncadd (%p15521_p6), [#allocation9], 4294967264 }
0x168a PF: > { %s19659_s4 = sld [smem:[#allocation14_spill]]  ;;  %p14765_p7 = scmp.ge.s32.totalorder %s15317_s27, 2 }
0x168b   : > { %s19660_s5 = sld [smem:[#allocation22_spill]] }
0x1690   : > { %s12574_s8 = sand.u32 1, %s19659_s4  }
0x1691   : > { %p19661_p4 = scmp.ne.s32.totalorder %s19660_s5, 0  ;;  %s12575_s3 = scalar_lea.sflag [#allocation7], %s12574_s8 }
0x1693   : > { %p14757_p12 = pnand %p14765_p7, %p19661_p4 }
0x1695   : > { %p14758_p5 = pneg %p14757_p12 }
0x1697   : > { %15272 = dma.done.wait (%p14758_p5), %s12575_s3, 64  }
0x1698   : > { %15274 = vsyncadd (%p14758_p5), %s12575_s3, 4294967232  ;;  %s19662_s19 = sadd.s32 4294967294, %s15317_s27  }
0x1699   : > { %s12583_s2 = sand.u32 1, %s19662_s19  }
0x169a   : > { %s12584_s24 = scalar_lea.sflag [#allocation9], %s12583_s2 }
0x169b   : > { %15276 = dma.done.wait (%p14758_p5), %s12584_s24, 64  }
0x169c   : > { %15278 = vsyncadd (%p14758_p5), %s12584_s24, 4294967232  ;;  %s40_s27 = sadd.s32 1, %s15317_s27   ;;  %s19663_s25 = sld [smem:[#allocation15_spill]] }
0x169d   : > { %p37_p6 = scmp.ge.s32.totalorder %s40_s27, 8   ;;  %s19664_s24 = sld [smem:[#allocation23_spill]] }
0x169e   : > { %s19665_s1 = sld [smem:[#allocation16_spill]]  ;;  %s19671_s4 = smov %s15285_s30 }
0x169f   : > { %s19666_s5 = sld [smem:[#allocation24_spill]] }
0x16a0   : > { %s19667_s6 = sld [smem:[#allocation17_spill]] }
0x16a1   : > { %s19668_s26 = sld [smem:[#allocation18_spill]] }
0x16a2   : > { %s19669_s2 = sld [smem:[#allocation19_spill]]  ;;  %s19672_s30 = smov %s19663_s25 }
0x16a3   : > { %s19670_s20 = sld [smem:[#allocation21_spill]] }
0x16a4   : > { %s19673_s25 = smov %s19665_s1 }
0x16a5   :  { %39 = sbr.rel (!%p37_p6) target bundleno = 31 (0x1f), region = 257 }
0x16a6   : > { %s19674_s1 = smov %s19667_s6 }
0x16a9   : > { %s19675_s6 = smov %s19670_s20 }
0x16aa   :  { %12589 = vsyncpa [#allocation7], 1 }
0x16ab   :  { %12591 = vsyncpa [#allocation7 + $0x1], 1 }
0x16ac   :  { %12592 = vsyncpa [#allocation9], 1 }
0x16ad   :  { %12594 = vsyncpa [#allocation9 + $0x1], 1 }

</bundles_post_ra>
